<compile_context>
chip_gen: v6e
topology: v6e:2x2x1
jax: 0.10.0
libtpu: 0.0.40
codegen_flags: <defaults>
</compile_context>

<pallas_src>
import numpy as np
import jax
import jax.numpy as jnp
from jax.experimental import pallas as pl
from jax.experimental.pallas import tpu as pltpu


# ---------------------------------------------------------------------------
# Kernel: grid = (B, E // tE).  Edge update + partial aggregations every step;
# node and global updates only at the last E tile of each batch element.
# ---------------------------------------------------------------------------
def gn_block_kernel(xe_ref, node_ref, glob_ref, recvT_ref,
                    w1e_x_ref, w1e_g_ref, b1e_ref, w2e_ref, b2e_ref,
                    w1n_a_ref, w1n_x_ref, w1n_g_ref, b1n_ref, w2n_ref, b2n_ref,
                    w1u_e_ref, w1u_n_ref, w1u_g_ref, b1u_ref, w2u_ref, b2u_ref,
                    out_e_ref, out_n_ref, out_u_ref,
                    acc_en_ref, acc_eu_ref):
    f32 = jnp.float32
    cdt = w1e_x_ref.dtype          # MXU operand dtype (bf16 by default)
    ke = pl.program_id(1)
    last_ke = pl.num_programs(1) - 1

    @pl.when(ke == 0)
    def _():
        acc_en_ref[...] = jnp.zeros_like(acc_en_ref)
        acc_eu_ref[...] = jnp.zeros_like(acc_eu_ref)

    glob_row = glob_ref[0]                                         # (1, Fu)

    # ---- Edge update on this E tile (global folded into the bias row) ------
    xe = xe_ref[0]                                                 # (tE, Fe+2Fn)
    bias_e = b1e_ref[...] + jnp.dot(glob_row, w1e_g_ref[...],
                                    preferred_element_type=f32)    # (1, He)
    h_e = jnp.dot(xe, w1e_x_ref[...], preferred_element_type=f32) + bias_e
    h_e = jnp.maximum(h_e, 0.0)                                    # f32 on VPU
    out_e = (jnp.dot(h_e.astype(cdt), w2e_ref[...], preferred_element_type=f32)
             + b2e_ref[...])                                       # (tE, De) f32
    out_e_ref[0] = out_e.astype(out_e_ref.dtype)

    # ---- Partial e->u sum and e->n scatter-sum (incidence matmul on MXU) ---
    acc_eu_ref[...] += jnp.sum(out_e, axis=0, keepdims=True)       # (1, De)
    acc_en_ref[...] += jnp.dot(recvT_ref[...], out_e.astype(cdt),
                               preferred_element_type=f32)         # (N, De)

    # ---- Node + global updates once all E tiles are aggregated -------------
    @pl.when(ke == last_ke)
    def _():
        agg_en = acc_en_ref[...]                                   # (N, De) f32
        bias_n = b1n_ref[...] + jnp.dot(glob_row, w1n_g_ref[...],
                                        preferred_element_type=f32)  # (1, Hn)
        h_n = (jnp.dot(agg_en.astype(cdt), w1n_a_ref[...],
                       preferred_element_type=f32)
               + jnp.dot(node_ref[0], w1n_x_ref[...],
                         preferred_element_type=f32)
               + bias_n)
        h_n = jnp.maximum(h_n, 0.0)
        out_n = (jnp.dot(h_n.astype(cdt), w2n_ref[...],
                         preferred_element_type=f32)
                 + b2n_ref[...])                                   # (N, Dn) f32
        out_n_ref[0] = out_n.astype(out_n_ref.dtype)

        agg_nu = jnp.sum(out_n, axis=0, keepdims=True)             # (1, Dn) f32
        agg_eu = acc_eu_ref[...]                                   # (1, De) f32
        h_u = (jnp.dot(agg_eu.astype(cdt), w1u_e_ref[...],
                       preferred_element_type=f32)
               + jnp.dot(agg_nu.astype(cdt), w1u_n_ref[...],
                         preferred_element_type=f32)
               + jnp.dot(glob_row, w1u_g_ref[...],
                         preferred_element_type=f32)
               + b1u_ref[...])                                     # (1, Hu)
        h_u = jnp.maximum(h_u, 0.0)
        out_u_ref[0] = (jnp.dot(h_u.astype(cdt), w2u_ref[...],
                                preferred_element_type=f32)
                        + b2u_ref[...]).astype(out_u_ref.dtype)    # (1, Du)


# ---------------------------------------------------------------------------
# Helpers
# ---------------------------------------------------------------------------
def _vmem_capacity_bytes():
    """Generation-aware VMEM capacity; conservative (v7x-safe) fallback."""
    try:
        info = pltpu.get_tpu_info()
        for attr in ("vmem_capacity_bytes", "vmem_size_bytes", "vmem_bytes"):
            v = getattr(info, attr, None)
            if v:
                return int(v)
    except Exception:
        pass
    return 64 * 2**20


def _pick_edge_tile(E, requested=None):
    # recvT block is (N, tE): tE sits on the lane axis -> must be a multiple
    # of 128 or equal to E; bf16 sublane packing of the xe/out_e tiles is then
    # automatically satisfied (128 % 16 == 0).
    if requested is not None and E % requested == 0 and (
            requested % 128 == 0 or requested == E):
        return requested
    for t in (512, 384, 256, 128):
        if E % t == 0:
            return t
    return E


# ---------------------------------------------------------------------------
# Wrapper
# ---------------------------------------------------------------------------
def graphnet_block_forward(edge_feats, node_feats, global_feats,
                           senders, receivers, params,
                           matmul_dtype=jnp.bfloat16, tile_e=None):
    """GraphNetBlock forward (sum aggregation, no residual/norm/dropout)."""
    f32 = jnp.float32
    cdt = matmul_dtype
    B, E, Fe = edge_feats.shape
    _, N, Fn = node_feats.shape
    Fu = global_feats.shape[-1]
    w1e, b1e, w2e, b2e = params["edges"]
    w1n, b1n, w2n, b2n = params["nodes"]
    w1u, b1u, w2u, b2u = params["globals"]
    He, Hn, Hu = w1e.shape[1], w1n.shape[1], w1u.shape[1]
    De, Dn, Du = w2e.shape[1], w2n.shape[1], w2u.shape[1]
    Kx = Fe + 2 * Fn
    assert w1e.shape[0] == Kx + Fu
    assert w1n.shape[0] == De + Fn + Fu
    assert w1u.shape[0] == De + Dn + Fu

    tE = _pick_edge_tile(E, tile_e)
    KE = E // tE
    cast = lambda a: a.astype(cdt)

    # ---- Host-side layout plumbing (bf16 from the start, no f32 temps) -----
    # TODO(synk): for very large E, replace this XLA row gather with an
    # in-kernel scalar-prefetch / per-row DMA gather.
    node_c = cast(node_feats)                                  # (B, N, Fn)
    sender_f = jnp.take(node_c, senders, axis=1)               # (B, E, Fn)
    receiver_f = jnp.take(node_c, receivers, axis=1)           # (B, E, Fn)
    xe = jnp.concatenate([cast(edge_feats), sender_f, receiver_f], -1)  # (B,E,Kx)
    glob3 = cast(global_feats).reshape(B, 1, Fu)               # (B, 1, Fu)
    # Scatter incidence (transposed receiver one-hot); 0/1 exact in bf16.
    recvT = jax.nn.one_hot(receivers, N, dtype=cdt).T          # (N, E)

    # Pre-split first-layer weights (no unaligned sublane slicing in-kernel).
    w1e_x, w1e_g = w1e[:Kx], w1e[Kx:]
    w1n_a, w1n_x, w1n_g = w1n[:De], w1n[De:De + Fn], w1n[De + Fn:]
    w1u_e, w1u_n, w1u_g = w1u[:De], w1u[De:De + Dn], w1u[De + Dn:]
    const_args = (cast(w1e_x), cast(w1e_g), b1e, cast(w2e), b2e,
                  cast(w1n_a), cast(w1n_x), cast(w1n_g), b1n, cast(w2n), b2n,
                  cast(w1u_e), cast(w1u_n), cast(w1u_g), b1u, cast(w2u), b2u)

    def dsize(shape, dt):
        return int(np.prod(shape)) * np.dtype(dt).itemsize

    def run(single_buffer_consts):
        def const_spec(a):
            idx = lambda b, ke: (0,) * a.ndim
            if single_buffer_consts:
                # Grid-constant blocks: single-buffer to halve their VMEM use.
                return pl.BlockSpec(a.shape, idx, pipeline_mode=pl.Buffered(1))
            return pl.BlockSpec(a.shape, idx)

        in_specs = [
            pl.BlockSpec((1, tE, Kx), lambda b, ke: (b, ke, 0)),   # xe tile
            pl.BlockSpec((1, N, Fn), lambda b, ke: (b, 0, 0)),     # node feats
            pl.BlockSpec((1, 1, Fu), lambda b, ke: (b, 0, 0)),     # global row
            pl.BlockSpec((N, tE), lambda b, ke: (0, ke)),          # recvT tile
        ] + [const_spec(a) for a in const_args]

        out_specs = [
            pl.BlockSpec((1, tE, De), lambda b, ke: (b, ke, 0)),
            pl.BlockSpec((1, N, Dn), lambda b, ke: (b, 0, 0)),
            pl.BlockSpec((1, 1, Du), lambda b, ke: (b, 0, 0)),
        ]
        out_shape = (
            jax.ShapeDtypeStruct((B, E, De), f32),
            jax.ShapeDtypeStruct((B, N, Dn), f32),
            jax.ShapeDtypeStruct((B, 1, Du), f32),
        )

        # ---- VMEM budget: streamed blocks (double-buffered) + constants +
        #      scratch + in-kernel intermediates, capped per chip generation.
        streamed = 2 * (dsize((tE, Kx), cdt) + dsize((N, tE), cdt)
                        + dsize((N, Fn), cdt) + dsize((1, Fu), cdt)
                        + dsize((tE, De), f32) + dsize((N, Dn), f32)
                        + dsize((1, Du), f32))
        consts = (1 if single_buffer_consts else 2) * sum(
            int(a.size) * a.dtype.itemsize for a in const_args)
        scratch = dsize((N, De), f32) + dsize((1, De), f32)
        interm = (dsize((tE, He), f32) + dsize((tE, He), cdt)
                  + dsize((tE, De), cdt) + dsize((N, De), cdt)
                  + dsize((N, Hn), f32) + dsize((N, Hn), cdt)
                  + dsize((N, Dn), f32))
        vmem_need = streamed + consts + scratch + interm
        cap = _vmem_capacity_bytes()
        vmem_limit = int(min(max(int(1.5 * vmem_need), 32 * 2**20),
                             int(0.85 * cap)))

        outs = pl.pallas_call(
            gn_block_kernel,
            grid=(B, KE),
            in_specs=in_specs,
            out_specs=out_specs,
            out_shape=out_shape,
            scratch_shapes=[pltpu.VMEM((N, De), f32),   # e->n accumulator
                            pltpu.VMEM((1, De), f32)],  # e->u accumulator
            compiler_params=pltpu.CompilerParams(
                dimension_semantics=("parallel", "arbitrary"),
                vmem_limit_bytes=vmem_limit),
        )(xe, node_c, glob3, recvT, *const_args)
        jax.block_until_ready(outs)
        return outs

    if hasattr(pl, "Buffered"):
        try:
            out_e, out_n, out_u = run(True)
        except Exception:
            out_e, out_n, out_u = run(False)   # fallback: default buffering
    else:
        out_e, out_n, out_u = run(False)

    return {"edges": out_e, "nodes": out_n, "globals": out_u.reshape(B, Du)}


# ---------------------------------------------------------------------------
# Pure-JAX reference (mirrors the PyTorch forward).  With
# operand_dtype=bfloat16 it also mirrors the kernel's mixed precision
# (bf16 MXU operands, f32 accumulation) so a tight check is possible.
# ---------------------------------------------------------------------------
def graphnet_block_reference(edge, node, glob, senders, receivers, params,
                             operand_dtype=jnp.float32):
    c = lambda a: a.astype(operand_dtype)

    def mlp(x, p):
        w1, b1, w2, b2 = p
        h = jnp.dot(c(x), c(w1), preferred_element_type=jnp.float32) + b1
        h = jnp.maximum(h, 0.0)
        return jnp.dot(c(h), c(w2), preferred_element_type=jnp.float32) + b2

    B, E, _ = edge.shape
    N, Fu = node.shape[1], glob.shape[-1]
    sender_f = node[:, senders, :]
    receiver_f = node[:, receivers, :]
    glob_e = jnp.broadcast_to(glob[:, None, :], (B, E, Fu))
    out_e = mlp(jnp.concatenate([edge, sender_f, receiver_f, glob_e], -1),
                params["edges"])
    # e->n scatter-sum (the kernel feeds operand-rounded out_e to this matmul).
    out_e_r = c(out_e).astype(jnp.float32)
    agg_en = jax.vmap(lambda oe: jax.ops.segment_sum(oe, receivers,
                                                     num_segments=N))(out_e_r)
    glob_n = jnp.broadcast_to(glob[:, None, :], (B, N, Fu))
    out_n = mlp(jnp.concatenate([agg_en, node, glob_n], -1), params["nodes"])
    agg_eu = out_e.sum(axis=1)
    agg_nu = out_n.sum(axis=1)
    out_u = mlp(jnp.concatenate([agg_eu, agg_nu, glob], -1), params["globals"])
    return {"edges": out_e, "nodes": out_n, "globals": out_u}


# ---------------------------------------------------------------------------
# Deterministic parameter init (MLP: in -> hidden=(in+out)//2 -> out).
# Note: the module's hidden-size rule gives He=320 here, i.e. a 256+64 MXU
# N-pass residue on v6e/v7x (128+128+64 on v5e) -- a model-config choice, not
# something the kernel can change.
# ---------------------------------------------------------------------------
def make_mlp_params(key, d_in, d_out):
    d_h = (d_in + d_out) // 2
    k1, k2, k3, k4 = jax.random.split(key, 4)
    w1 = jax.random.normal(k1, (d_in, d_h), jnp.float32) / jnp.sqrt(d_in)
    b1 = 0.01 * jax.random.normal(k2, (1, d_h), jnp.float32)
    w2 = jax.random.normal(k3, (d_h, d_out), jnp.float32) / jnp.sqrt(d_h)
    b2 = 0.01 * jax.random.normal(k4, (1, d_out), jnp.float32)
    return w1, b1, w2, b2


if __name__ == "__main__":
    # Small but tile-friendly shapes: 128-wide feature dims keep output stores
    # full-lane; E=256 with tile_e=128 exercises the multi-E-tile reduction.
    B, N, E = 2, 16, 256
    Fe = Fn = Fu = 128
    De = Dn = Du = 128

    senders = jnp.asarray(np.arange(E) % N, dtype=jnp.int32)
    receivers = jnp.asarray((3 * np.arange(E) + 1) % N, dtype=jnp.int32)

    key = jax.random.PRNGKey(0)
    k_e, k_n, k_g, k_pe, k_pn, k_pu = jax.random.split(key, 6)
    edge_feats = jax.random.normal(k_e, (B, E, Fe), jnp.float32)
    node_feats = jax.random.normal(k_n, (B, N, Fn), jnp.float32)
    global_feats = jax.random.normal(k_g, (B, Fu), jnp.float32)

    params = {
        "edges":   make_mlp_params(k_pe, 2 * Fn + Fe + Fu, De),
        "nodes":   make_mlp_params(k_pn, Fn + De + Fu, Dn),
        "globals": make_mlp_params(k_pu, Dn + De + Fu, Du),
    }

    out = graphnet_block_forward(edge_feats, node_feats, global_feats,
                                 senders, receivers, params,
                                 matmul_dtype=jnp.bfloat16, tile_e=128)
    jax.block_until_ready(out)

    # 1) Tight check vs a reference mirroring the kernel's mixed precision.
    ref_mx = graphnet_block_reference(edge_feats, node_feats, global_feats,
                                      senders, receivers, params,
                                      operand_dtype=jnp.bfloat16)
    for k in ("edges", "nodes", "globals"):
        np.testing.assert_allclose(np.asarray(out[k]), np.asarray(ref_mx[k]),
                                   rtol=1e-2, atol=1e-2)

    # 2) Loose check vs the full-f32 reference (PyTorch semantics); the only
    #    difference is bf16 rounding of the MXU operands.
    ref_f32 = graphnet_block_reference(edge_feats, node_feats, global_feats,
                                       senders, receivers, params)
    for k in ("edges", "nodes", "globals"):
        a, b = np.asarray(out[k]), np.asarray(ref_f32[k])
        rel = np.linalg.norm(a - b) / max(np.linalg.norm(b), 1e-6)
        assert rel < 2.5e-2, (k, float(rel))

    print("KERNEL_OK")
</pallas_src>

<mosaic_0001>
module attributes {stable_mosaic.version = 11 : i64} {
  func.func @gn_block_kernel(%arg0: i32, %arg1: i32, %arg2: memref<1x128x384xbf16, #tpu.memory_space<vmem>>, %arg3: memref<1x16x128xbf16, #tpu.memory_space<vmem>>, %arg4: memref<1x1x128xbf16, #tpu.memory_space<vmem>>, %arg5: memref<16x128xbf16, #tpu.memory_space<vmem>>, %arg6: memref<384x320xbf16, #tpu.memory_space<vmem>>, %arg7: memref<128x320xbf16, #tpu.memory_space<vmem>>, %arg8: memref<1x320xf32, #tpu.memory_space<vmem>>, %arg9: memref<320x128xbf16, #tpu.memory_space<vmem>>, %arg10: memref<1x128xf32, #tpu.memory_space<vmem>>, %arg11: memref<128x256xbf16, #tpu.memory_space<vmem>>, %arg12: memref<128x256xbf16, #tpu.memory_space<vmem>>, %arg13: memref<128x256xbf16, #tpu.memory_space<vmem>>, %arg14: memref<1x256xf32, #tpu.memory_space<vmem>>, %arg15: memref<256x128xbf16, #tpu.memory_space<vmem>>, %arg16: memref<1x128xf32, #tpu.memory_space<vmem>>, %arg17: memref<128x256xbf16, #tpu.memory_space<vmem>>, %arg18: memref<128x256xbf16, #tpu.memory_space<vmem>>, %arg19: memref<128x256xbf16, #tpu.memory_space<vmem>>, %arg20: memref<1x256xf32, #tpu.memory_space<vmem>>, %arg21: memref<256x128xbf16, #tpu.memory_space<vmem>>, %arg22: memref<1x128xf32, #tpu.memory_space<vmem>>, %arg23: memref<1x128x128xf32, #tpu.memory_space<vmem>>, %arg24: memref<1x16x128xf32, #tpu.memory_space<vmem>>, %arg25: memref<1x1x128xf32, #tpu.memory_space<vmem>>, %arg26: memref<16x128xf32, #tpu.memory_space<vmem>>, %arg27: memref<1x128xf32, #tpu.memory_space<vmem>>) attributes {dimension_semantics = [#tpu.dimension_semantics<parallel>, #tpu.dimension_semantics<arbitrary>], iteration_bounds = array<i64: 2, 2>, scalar_prefetch = 0 : i64, scratch_operands = 2 : i64, tpu.core_type = #tpu.core_type<tc>, window_params = [{transform_indices = @transform_0, window_bounds = array<i64: 1, 128, 384>}, {transform_indices = @transform_1, window_bounds = array<i64: 1, 16, 128>}, {transform_indices = @transform_2, window_bounds = array<i64: 1, 1, 128>}, {transform_indices = @transform_3, window_bounds = array<i64: 16, 128>}, {pipeline_mode = #tpu.pipeline_mode<synchronous>, transform_indices = @transform_4, window_bounds = array<i64: 384, 320>}, {pipeline_mode = #tpu.pipeline_mode<synchronous>, transform_indices = @transform_5, window_bounds = array<i64: 128, 320>}, {pipeline_mode = #tpu.pipeline_mode<synchronous>, transform_indices = @transform_6, window_bounds = array<i64: 1, 320>}, {pipeline_mode = #tpu.pipeline_mode<synchronous>, transform_indices = @transform_7, window_bounds = array<i64: 320, 128>}, {pipeline_mode = #tpu.pipeline_mode<synchronous>, transform_indices = @transform_8, window_bounds = array<i64: 1, 128>}, {pipeline_mode = #tpu.pipeline_mode<synchronous>, transform_indices = @transform_9, window_bounds = array<i64: 128, 256>}, {pipeline_mode = #tpu.pipeline_mode<synchronous>, transform_indices = @transform_10, window_bounds = array<i64: 128, 256>}, {pipeline_mode = #tpu.pipeline_mode<synchronous>, transform_indices = @transform_11, window_bounds = array<i64: 128, 256>}, {pipeline_mode = #tpu.pipeline_mode<synchronous>, transform_indices = @transform_12, window_bounds = array<i64: 1, 256>}, {pipeline_mode = #tpu.pipeline_mode<synchronous>, transform_indices = @transform_13, window_bounds = array<i64: 256, 128>}, {pipeline_mode = #tpu.pipeline_mode<synchronous>, transform_indices = @transform_14, window_bounds = array<i64: 1, 128>}, {pipeline_mode = #tpu.pipeline_mode<synchronous>, transform_indices = @transform_15, window_bounds = array<i64: 128, 256>}, {pipeline_mode = #tpu.pipeline_mode<synchronous>, transform_indices = @transform_16, window_bounds = array<i64: 128, 256>}, {pipeline_mode = #tpu.pipeline_mode<synchronous>, transform_indices = @transform_17, window_bounds = array<i64: 128, 256>}, {pipeline_mode = #tpu.pipeline_mode<synchronous>, transform_indices = @transform_18, window_bounds = array<i64: 1, 256>}, {pipeline_mode = #tpu.pipeline_mode<synchronous>, transform_indices = @transform_19, window_bounds = array<i64: 256, 128>}, {pipeline_mode = #tpu.pipeline_mode<synchronous>, transform_indices = @transform_20, window_bounds = array<i64: 1, 128>}, {transform_indices = @transform_21, window_bounds = array<i64: 1, 128, 128>}, {transform_indices = @transform_22, window_bounds = array<i64: 1, 16, 128>}, {transform_indices = @transform_23, window_bounds = array<i64: 1, 1, 128>}]} {
    %c0_i32 = arith.constant 0 : i32
    %0 = arith.cmpi eq, %arg1, %c0_i32 : i32
    %1 = arith.extui %0 : i1 to i32
    %c0_i32_0 = arith.constant 0 : i32
    %2 = arith.cmpi ne, %1, %c0_i32_0 : i32
    scf.if %2 {
      %cst_35 = arith.constant 0.000000e+00 : f32
      %40 = vector.broadcast %cst_35 : f32 to vector<16x128xf32>
      %c0_36 = arith.constant 0 : index
      %c0_37 = arith.constant 0 : index
      %41 = vector.load %arg26[%c0_36, %c0_37] : memref<16x128xf32, #tpu.memory_space<vmem>>, vector<16x128xf32>
      tpu.vector_store %arg26[%c0_36, %c0_37], %40 {strides = array<i32>} : memref<16x128xf32, #tpu.memory_space<vmem>>, vector<16x128xf32>,
      %cst_38 = arith.constant 0.000000e+00 : f32
      %42 = vector.broadcast %cst_38 : f32 to vector<1x128xf32>
      %c0_39 = arith.constant 0 : index
      %c0_40 = arith.constant 0 : index
      %43 = vector.load %arg27[%c0_39, %c0_40] : memref<1x128xf32, #tpu.memory_space<vmem>>, vector<1x128xf32>
      tpu.vector_store %arg27[%c0_39, %c0_40], %42 {strides = array<i32>} : memref<1x128xf32, #tpu.memory_space<vmem>>, vector<1x128xf32>,
    } else {
    }
    %c0 = arith.constant 0 : index
    %c0_1 = arith.constant 0 : index
    %c0_2 = arith.constant 0 : index
    %3 = vector.load %arg4[%c0, %c0_1, %c0_2] : memref<1x1x128xbf16, #tpu.memory_space<vmem>>, vector<1x1x128xbf16>
    %4 = vector.shape_cast %3 : vector<1x1x128xbf16> to vector<1x128xbf16>
    %c0_3 = arith.constant 0 : index
    %c0_4 = arith.constant 0 : index
    %c0_5 = arith.constant 0 : index
    %5 = vector.load %arg2[%c0_3, %c0_4, %c0_5] : memref<1x128x384xbf16, #tpu.memory_space<vmem>>, vector<1x128x384xbf16>
    %6 = vector.shape_cast %5 : vector<1x128x384xbf16> to vector<128x384xbf16>
    %c0_6 = arith.constant 0 : index
    %c0_7 = arith.constant 0 : index
    %7 = vector.load %arg8[%c0_6, %c0_7] : memref<1x320xf32, #tpu.memory_space<vmem>>, vector<1x320xf32>
    %c0_8 = arith.constant 0 : index
    %c0_9 = arith.constant 0 : index
    %8 = vector.load %arg7[%c0_8, %c0_9] : memref<128x320xbf16, #tpu.memory_space<vmem>>, vector<128x320xbf16>
    %cst = arith.constant dense<0.000000e+00> : vector<1x320xf32>
    %9 = tpu.matmul %4, %8, %cst {dimension_numbers = #tpu.dot_dimension_numbers<[1], [0], [0], [1], [0, 0, 1, 1], [], []>} : vector<1x128xbf16>, vector<128x320xbf16>, vector<1x320xf32> -> vector<1x320xf32>
    %10 = arith.addf %7, %9 : vector<1x320xf32>
    %c0_10 = arith.constant 0 : index
    %c0_11 = arith.constant 0 : index
    %11 = vector.load %arg6[%c0_10, %c0_11] : memref<384x320xbf16, #tpu.memory_space<vmem>>, vector<384x320xbf16>
    %cst_12 = arith.constant dense<0.000000e+00> : vector<128x320xf32>
    %12 = tpu.matmul %6, %11, %cst_12 {dimension_numbers = #tpu.dot_dimension_numbers<[1], [0], [0], [1], [0, 0, 1, 1], [], []>} : vector<128x384xbf16>, vector<384x320xbf16>, vector<128x320xf32> -> vector<128x320xf32>
    %13 = vector.broadcast %10 : vector<1x320xf32> to vector<128x320xf32>
    %14 = arith.addf %12, %13 : vector<128x320xf32>
    %cst_13 = arith.constant 0.000000e+00 : f32
    %15 = vector.broadcast %cst_13 : f32 to vector<128x320xf32>
    %16 = arith.maximumf %14, %15 : vector<128x320xf32>
    %17 = arith.truncf %16 : vector<128x320xf32> to vector<128x320xbf16>
    %c0_14 = arith.constant 0 : index
    %c0_15 = arith.constant 0 : index
    %18 = vector.load %arg9[%c0_14, %c0_15] : memref<320x128xbf16, #tpu.memory_space<vmem>>, vector<320x128xbf16>
    %cst_16 = arith.constant dense<0.000000e+00> : vector<128x128xf32>
    %19 = tpu.matmul %17, %18, %cst_16 {dimension_numbers = #tpu.dot_dimension_numbers<[1], [0], [0], [1], [0, 0, 1, 1], [], []>} : vector<128x320xbf16>, vector<320x128xbf16>, vector<128x128xf32> -> vector<128x128xf32>
    %c0_17 = arith.constant 0 : index
    %c0_18 = arith.constant 0 : index
    %20 = vector.load %arg10[%c0_17, %c0_18] : memref<1x128xf32, #tpu.memory_space<vmem>>, vector<1x128xf32>
    %21 = vector.broadcast %20 : vector<1x128xf32> to vector<128x128xf32>
    %22 = arith.addf %19, %21 : vector<128x128xf32>
    %c0_19 = arith.constant 0 : index
    %c0_20 = arith.constant 0 : index
    %c0_21 = arith.constant 0 : index
    %23 = vector.load %arg23[%c0_19, %c0_20, %c0_21] : memref<1x128x128xf32, #tpu.memory_space<vmem>>, vector<1x128x128xf32>
    %24 = vector.shape_cast %23 : vector<1x128x128xf32> to vector<128x128xf32>
    %25 = vector.shape_cast %22 : vector<128x128xf32> to vector<1x128x128xf32>
    tpu.vector_store %arg23[%c0_19, %c0_20, %c0_21], %25 {strides = array<i32>} : memref<1x128x128xf32, #tpu.memory_space<vmem>>, vector<1x128x128xf32>,
    %c0_22 = arith.constant 0 : index
    %c0_23 = arith.constant 0 : index
    %26 = vector.load %arg27[%c0_22, %c0_23] : memref<1x128xf32, #tpu.memory_space<vmem>>, vector<1x128xf32>
    %cst_24 = arith.constant dense<0.000000e+00> : vector<128xf32>
    %27 = vector.multi_reduction <add>, %22, %cst_24 [0] : vector<128x128xf32> to vector<128xf32>
    %28 = vector.shape_cast %27 : vector<128xf32> to vector<1x128xf32>
    %29 = arith.addf %26, %28 : vector<1x128xf32>
    %c0_25 = arith.constant 0 : index
    %c0_26 = arith.constant 0 : index
    %30 = vector.load %arg27[%c0_25, %c0_26] : memref<1x128xf32, #tpu.memory_space<vmem>>, vector<1x128xf32>
    tpu.vector_store %arg27[%c0_25, %c0_26], %29 {strides = array<i32>} : memref<1x128xf32, #tpu.memory_space<vmem>>, vector<1x128xf32>,
    %c0_27 = arith.constant 0 : index
    %c0_28 = arith.constant 0 : index
    %31 = vector.load %arg26[%c0_27, %c0_28] : memref<16x128xf32, #tpu.memory_space<vmem>>, vector<16x128xf32>
    %c0_29 = arith.constant 0 : index
    %c0_30 = arith.constant 0 : index
    %32 = vector.load %arg5[%c0_29, %c0_30] : memref<16x128xbf16, #tpu.memory_space<vmem>>, vector<16x128xbf16>
    %33 = arith.truncf %22 : vector<128x128xf32> to vector<128x128xbf16>
    %cst_31 = arith.constant dense<0.000000e+00> : vector<16x128xf32>
    %34 = tpu.matmul %32, %33, %cst_31 {dimension_numbers = #tpu.dot_dimension_numbers<[1], [0], [0], [1], [0, 0, 1, 1], [], []>} : vector<16x128xbf16>, vector<128x128xbf16>, vector<16x128xf32> -> vector<16x128xf32>
    %35 = arith.addf %31, %34 : vector<16x128xf32>
    %c0_32 = arith.constant 0 : index
    %c0_33 = arith.constant 0 : index
    %36 = vector.load %arg26[%c0_32, %c0_33] : memref<16x128xf32, #tpu.memory_space<vmem>>, vector<16x128xf32>
    tpu.vector_store %arg26[%c0_32, %c0_33], %35 {strides = array<i32>} : memref<16x128xf32, #tpu.memory_space<vmem>>, vector<16x128xf32>,
    %c1_i32 = arith.constant 1 : i32
    %37 = arith.cmpi eq, %arg1, %c1_i32 : i32
    %38 = arith.extui %37 : i1 to i32
    %c0_i32_34 = arith.constant 0 : i32
    %39 = arith.cmpi ne, %38, %c0_i32_34 : i32
    scf.if %39 {
      %c0_35 = arith.constant 0 : index
      %c0_36 = arith.constant 0 : index
      %40 = vector.load %arg26[%c0_35, %c0_36] : memref<16x128xf32, #tpu.memory_space<vmem>>, vector<16x128xf32>
      %c0_37 = arith.constant 0 : index
      %c0_38 = arith.constant 0 : index
      %41 = vector.load %arg14[%c0_37, %c0_38] : memref<1x256xf32, #tpu.memory_space<vmem>>, vector<1x256xf32>
      %c0_39 = arith.constant 0 : index
      %c0_40 = arith.constant 0 : index
      %42 = vector.load %arg13[%c0_39, %c0_40] : memref<128x256xbf16, #tpu.memory_space<vmem>>, vector<128x256xbf16>
      %cst_41 = arith.constant dense<0.000000e+00> : vector<1x256xf32>
      %43 = tpu.matmul %4, %42, %cst_41 {dimension_numbers = #tpu.dot_dimension_numbers<[1], [0], [0], [1], [0, 0, 1, 1], [], []>} : vector<1x128xbf16>, vector<128x256xbf16>, vector<1x256xf32> -> vector<1x256xf32>
      %44 = arith.addf %41, %43 : vector<1x256xf32>
      %45 = arith.truncf %40 : vector<16x128xf32> to vector<16x128xbf16>
      %c0_42 = arith.constant 0 : index
      %c0_43 = arith.constant 0 : index
      %46 = vector.load %arg11[%c0_42, %c0_43] : memref<128x256xbf16, #tpu.memory_space<vmem>>, vector<128x256xbf16>
      %cst_44 = arith.constant dense<0.000000e+00> : vector<16x256xf32>
      %47 = tpu.matmul %45, %46, %cst_44 {dimension_numbers = #tpu.dot_dimension_numbers<[1], [0], [0], [1], [0, 0, 1, 1], [], []>} : vector<16x128xbf16>, vector<128x256xbf16>, vector<16x256xf32> -> vector<16x256xf32>
      %c0_45 = arith.constant 0 : index
      %c0_46 = arith.constant 0 : index
      %c0_47 = arith.constant 0 : index
      %48 = vector.load %arg3[%c0_45, %c0_46, %c0_47] : memref<1x16x128xbf16, #tpu.memory_space<vmem>>, vector<1x16x128xbf16>
      %49 = vector.shape_cast %48 : vector<1x16x128xbf16> to vector<16x128xbf16>
      %c0_48 = arith.constant 0 : index
      %c0_49 = arith.constant 0 : index
      %50 = vector.load %arg12[%c0_48, %c0_49] : memref<128x256xbf16, #tpu.memory_space<vmem>>, vector<128x256xbf16>
      %cst_50 = arith.constant dense<0.000000e+00> : vector<16x256xf32>
      %51 = tpu.matmul %49, %50, %cst_50 {dimension_numbers = #tpu.dot_dimension_numbers<[1], [0], [0], [1], [0, 0, 1, 1], [], []>} : vector<16x128xbf16>, vector<128x256xbf16>, vector<16x256xf32> -> vector<16x256xf32>
      %52 = arith.addf %47, %51 : vector<16x256xf32>
      %53 = vector.broadcast %44 : vector<1x256xf32> to vector<16x256xf32>
      %54 = arith.addf %52, %53 : vector<16x256xf32>
      %cst_51 = arith.constant 0.000000e+00 : f32
      %55 = vector.broadcast %cst_51 : f32 to vector<16x256xf32>
      %56 = arith.maximumf %54, %55 : vector<16x256xf32>
      %57 = arith.truncf %56 : vector<16x256xf32> to vector<16x256xbf16>
      %c0_52 = arith.constant 0 : index
      %c0_53 = arith.constant 0 : index
      %58 = vector.load %arg15[%c0_52, %c0_53] : memref<256x128xbf16, #tpu.memory_space<vmem>>, vector<256x128xbf16>
      %cst_54 = arith.constant dense<0.000000e+00> : vector<16x128xf32>
      %59 = tpu.matmul %57, %58, %cst_54 {dimension_numbers = #tpu.dot_dimension_numbers<[1], [0], [0], [1], [0, 0, 1, 1], [], []>} : vector<16x256xbf16>, vector<256x128xbf16>, vector<16x128xf32> -> vector<16x128xf32>
      %c0_55 = arith.constant 0 : index
      %c0_56 = arith.constant 0 : index
      %60 = vector.load %arg16[%c0_55, %c0_56] : memref<1x128xf32, #tpu.memory_space<vmem>>, vector<1x128xf32>
      %61 = vector.broadcast %60 : vector<1x128xf32> to vector<16x128xf32>
      %62 = arith.addf %59, %61 : vector<16x128xf32>
      %c0_57 = arith.constant 0 : index
      %c0_58 = arith.constant 0 : index
      %c0_59 = arith.constant 0 : index
      %63 = vector.load %arg24[%c0_57, %c0_58, %c0_59] : memref<1x16x128xf32, #tpu.memory_space<vmem>>, vector<1x16x128xf32>
      %64 = vector.shape_cast %63 : vector<1x16x128xf32> to vector<16x128xf32>
      %65 = vector.shape_cast %62 : vector<16x128xf32> to vector<1x16x128xf32>
      tpu.vector_store %arg24[%c0_57, %c0_58, %c0_59], %65 {strides = array<i32>} : memref<1x16x128xf32, #tpu.memory_space<vmem>>, vector<1x16x128xf32>,
      %cst_60 = arith.constant dense<0.000000e+00> : vector<128xf32>
      %66 = vector.multi_reduction <add>, %62, %cst_60 [0] : vector<16x128xf32> to vector<128xf32>
      %67 = vector.shape_cast %66 : vector<128xf32> to vector<1x128xf32>
      %c0_61 = arith.constant 0 : index
      %c0_62 = arith.constant 0 : index
      %68 = vector.load %arg27[%c0_61, %c0_62] : memref<1x128xf32, #tpu.memory_space<vmem>>, vector<1x128xf32>
      %69 = arith.truncf %68 : vector<1x128xf32> to vector<1x128xbf16>
      %c0_63 = arith.constant 0 : index
      %c0_64 = arith.constant 0 : index
      %70 = vector.load %arg17[%c0_63, %c0_64] : memref<128x256xbf16, #tpu.memory_space<vmem>>, vector<128x256xbf16>
      %cst_65 = arith.constant dense<0.000000e+00> : vector<1x256xf32>
      %71 = tpu.matmul %69, %70, %cst_65 {dimension_numbers = #tpu.dot_dimension_numbers<[1], [0], [0], [1], [0, 0, 1, 1], [], []>} : vector<1x128xbf16>, vector<128x256xbf16>, vector<1x256xf32> -> vector<1x256xf32>
      %72 = arith.truncf %67 : vector<1x128xf32> to vector<1x128xbf16>
      %c0_66 = arith.constant 0 : index
      %c0_67 = arith.constant 0 : index
      %73 = vector.load %arg18[%c0_66, %c0_67] : memref<128x256xbf16, #tpu.memory_space<vmem>>, vector<128x256xbf16>
      %cst_68 = arith.constant dense<0.000000e+00> : vector<1x256xf32>
      %74 = tpu.matmul %72, %73, %cst_68 {dimension_numbers = #tpu.dot_dimension_numbers<[1], [0], [0], [1], [0, 0, 1, 1], [], []>} : vector<1x128xbf16>, vector<128x256xbf16>, vector<1x256xf32> -> vector<1x256xf32>
      %75 = arith.addf %71, %74 : vector<1x256xf32>
      %c0_69 = arith.constant 0 : index
      %c0_70 = arith.constant 0 : index
      %76 = vector.load %arg19[%c0_69, %c0_70] : memref<128x256xbf16, #tpu.memory_space<vmem>>, vector<128x256xbf16>
      %cst_71 = arith.constant dense<0.000000e+00> : vector<1x256xf32>
      %77 = tpu.matmul %4, %76, %cst_71 {dimension_numbers = #tpu.dot_dimension_numbers<[1], [0], [0], [1], [0, 0, 1, 1], [], []>} : vector<1x128xbf16>, vector<128x256xbf16>, vector<1x256xf32> -> vector<1x256xf32>
      %78 = arith.addf %75, %77 : vector<1x256xf32>
      %c0_72 = arith.constant 0 : index
      %c0_73 = arith.constant 0 : index
      %79 = vector.load %arg20[%c0_72, %c0_73] : memref<1x256xf32, #tpu.memory_space<vmem>>, vector<1x256xf32>
      %80 = arith.addf %78, %79 : vector<1x256xf32>
      %cst_74 = arith.constant 0.000000e+00 : f32
      %81 = vector.broadcast %cst_74 : f32 to vector<1x256xf32>
      %82 = arith.maximumf %80, %81 : vector<1x256xf32>
      %83 = arith.truncf %82 : vector<1x256xf32> to vector<1x256xbf16>
      %c0_75 = arith.constant 0 : index
      %c0_76 = arith.constant 0 : index
      %84 = vector.load %arg21[%c0_75, %c0_76] : memref<256x128xbf16, #tpu.memory_space<vmem>>, vector<256x128xbf16>
      %cst_77 = arith.constant dense<0.000000e+00> : vector<1x128xf32>
      %85 = tpu.matmul %83, %84, %cst_77 {dimension_numbers = #tpu.dot_dimension_numbers<[1], [0], [0], [1], [0, 0, 1, 1], [], []>} : vector<1x256xbf16>, vector<256x128xbf16>, vector<1x128xf32> -> vector<1x128xf32>
      %c0_78 = arith.constant 0 : index
      %c0_79 = arith.constant 0 : index
      %86 = vector.load %arg22[%c0_78, %c0_79] : memref<1x128xf32, #tpu.memory_space<vmem>>, vector<1x128xf32>
      %87 = arith.addf %85, %86 : vector<1x128xf32>
      %c0_80 = arith.constant 0 : index
      %c0_81 = arith.constant 0 : index
      %c0_82 = arith.constant 0 : index
      %88 = vector.load %arg25[%c0_80, %c0_81, %c0_82] : memref<1x1x128xf32, #tpu.memory_space<vmem>>, vector<1x1x128xf32>
      %89 = vector.shape_cast %88 : vector<1x1x128xf32> to vector<1x128xf32>
      %90 = vector.shape_cast %87 : vector<1x128xf32> to vector<1x1x128xf32>
      tpu.vector_store %arg25[%c0_80, %c0_81, %c0_82], %90 {strides = array<i32>} : memref<1x1x128xf32, #tpu.memory_space<vmem>>, vector<1x1x128xf32>,
    } else {
    }
    return
  }
  func.func @transform_0(%arg0: i32, %arg1: i32) -> (i32, i32, i32) {
    %c0_i32 = arith.constant 0 : i32
    %c0_i32_0 = arith.constant 0 : i32
    return %arg0, %arg1, %c0_i32 : i32, i32, i32
  }
  func.func @transform_1(%arg0: i32, %arg1: i32) -> (i32, i32, i32) {
    %c0_i32 = arith.constant 0 : i32
    %c0_i32_0 = arith.constant 0 : i32
    %c0_i32_1 = arith.constant 0 : i32
    return %arg0, %c0_i32, %c0_i32_0 : i32, i32, i32
  }
  func.func @transform_2(%arg0: i32, %arg1: i32) -> (i32, i32, i32) {
    %c0_i32 = arith.constant 0 : i32
    %c0_i32_0 = arith.constant 0 : i32
    %c0_i32_1 = arith.constant 0 : i32
    return %arg0, %c0_i32, %c0_i32_0 : i32, i32, i32
  }
  func.func @transform_3(%arg0: i32, %arg1: i32) -> (i32, i32) {
    %c0_i32 = arith.constant 0 : i32
    %c0_i32_0 = arith.constant 0 : i32
    return %c0_i32, %arg1 : i32, i32
  }
  func.func @transform_4(%arg0: i32, %arg1: i32) -> (i32, i32) {
    %c0_i32 = arith.constant 0 : i32
    %c0_i32_0 = arith.constant 0 : i32
    %c0_i32_1 = arith.constant 0 : i32
    return %c0_i32, %c0_i32_0 : i32, i32
  }
  func.func @transform_5(%arg0: i32, %arg1: i32) -> (i32, i32) {
    %c0_i32 = arith.constant 0 : i32
    %c0_i32_0 = arith.constant 0 : i32
    %c0_i32_1 = arith.constant 0 : i32
    return %c0_i32, %c0_i32_0 : i32, i32
  }
  func.func @transform_6(%arg0: i32, %arg1: i32) -> (i32, i32) {
    %c0_i32 = arith.constant 0 : i32
    %c0_i32_0 = arith.constant 0 : i32
    %c0_i32_1 = arith.constant 0 : i32
    return %c0_i32, %c0_i32_0 : i32, i32
  }
  func.func @transform_7(%arg0: i32, %arg1: i32) -> (i32, i32) {
    %c0_i32 = arith.constant 0 : i32
    %c0_i32_0 = arith.constant 0 : i32
    %c0_i32_1 = arith.constant 0 : i32
    return %c0_i32, %c0_i32_0 : i32, i32
  }
  func.func @transform_8(%arg0: i32, %arg1: i32) -> (i32, i32) {
    %c0_i32 = arith.constant 0 : i32
    %c0_i32_0 = arith.constant 0 : i32
    %c0_i32_1 = arith.constant 0 : i32
    return %c0_i32, %c0_i32_0 : i32, i32
  }
  func.func @transform_9(%arg0: i32, %arg1: i32) -> (i32, i32) {
    %c0_i32 = arith.constant 0 : i32
    %c0_i32_0 = arith.constant 0 : i32
    %c0_i32_1 = arith.constant 0 : i32
    return %c0_i32, %c0_i32_0 : i32, i32
  }
  func.func @transform_10(%arg0: i32, %arg1: i32) -> (i32, i32) {
    %c0_i32 = arith.constant 0 : i32
    %c0_i32_0 = arith.constant 0 : i32
    %c0_i32_1 = arith.constant 0 : i32
    return %c0_i32, %c0_i32_0 : i32, i32
  }
  func.func @transform_11(%arg0: i32, %arg1: i32) -> (i32, i32) {
    %c0_i32 = arith.constant 0 : i32
    %c0_i32_0 = arith.constant 0 : i32
    %c0_i32_1 = arith.constant 0 : i32
    return %c0_i32, %c0_i32_0 : i32, i32
  }
  func.func @transform_12(%arg0: i32, %arg1: i32) -> (i32, i32) {
    %c0_i32 = arith.constant 0 : i32
    %c0_i32_0 = arith.constant 0 : i32
    %c0_i32_1 = arith.constant 0 : i32
    return %c0_i32, %c0_i32_0 : i32, i32
  }
  func.func @transform_13(%arg0: i32, %arg1: i32) -> (i32, i32) {
    %c0_i32 = arith.constant 0 : i32
    %c0_i32_0 = arith.constant 0 : i32
    %c0_i32_1 = arith.constant 0 : i32
    return %c0_i32, %c0_i32_0 : i32, i32
  }
  func.func @transform_14(%arg0: i32, %arg1: i32) -> (i32, i32) {
    %c0_i32 = arith.constant 0 : i32
    %c0_i32_0 = arith.constant 0 : i32
    %c0_i32_1 = arith.constant 0 : i32
    return %c0_i32, %c0_i32_0 : i32, i32
  }
  func.func @transform_15(%arg0: i32, %arg1: i32) -> (i32, i32) {
    %c0_i32 = arith.constant 0 : i32
    %c0_i32_0 = arith.constant 0 : i32
    %c0_i32_1 = arith.constant 0 : i32
    return %c0_i32, %c0_i32_0 : i32, i32
  }
  func.func @transform_16(%arg0: i32, %arg1: i32) -> (i32, i32) {
    %c0_i32 = arith.constant 0 : i32
    %c0_i32_0 = arith.constant 0 : i32
    %c0_i32_1 = arith.constant 0 : i32
    return %c0_i32, %c0_i32_0 : i32, i32
  }
  func.func @transform_17(%arg0: i32, %arg1: i32) -> (i32, i32) {
    %c0_i32 = arith.constant 0 : i32
    %c0_i32_0 = arith.constant 0 : i32
    %c0_i32_1 = arith.constant 0 : i32
    return %c0_i32, %c0_i32_0 : i32, i32
  }
  func.func @transform_18(%arg0: i32, %arg1: i32) -> (i32, i32) {
    %c0_i32 = arith.constant 0 : i32
    %c0_i32_0 = arith.constant 0 : i32
    %c0_i32_1 = arith.constant 0 : i32
    return %c0_i32, %c0_i32_0 : i32, i32
  }
  func.func @transform_19(%arg0: i32, %arg1: i32) -> (i32, i32) {
    %c0_i32 = arith.constant 0 : i32
    %c0_i32_0 = arith.constant 0 : i32
    %c0_i32_1 = arith.constant 0 : i32
    return %c0_i32, %c0_i32_0 : i32, i32
  }
  func.func @transform_20(%arg0: i32, %arg1: i32) -> (i32, i32) {
    %c0_i32 = arith.constant 0 : i32
    %c0_i32_0 = arith.constant 0 : i32
    %c0_i32_1 = arith.constant 0 : i32
    return %c0_i32, %c0_i32_0 : i32, i32
  }
  func.func @transform_21(%arg0: i32, %arg1: i32) -> (i32, i32, i32) {
    %c0_i32 = arith.constant 0 : i32
    %c0_i32_0 = arith.constant 0 : i32
    return %arg0, %arg1, %c0_i32 : i32, i32, i32
  }
  func.func @transform_22(%arg0: i32, %arg1: i32) -> (i32, i32, i32) {
    %c0_i32 = arith.constant 0 : i32
    %c0_i32_0 = arith.constant 0 : i32
    %c0_i32_1 = arith.constant 0 : i32
    return %arg0, %c0_i32, %c0_i32_0 : i32, i32, i32
  }
  func.func @transform_23(%arg0: i32, %arg1: i32) -> (i32, i32, i32) {
    %c0_i32 = arith.constant 0 : i32
    %c0_i32_0 = arith.constant 0 : i32
    %c0_i32_1 = arith.constant 0 : i32
    return %arg0, %c0_i32, %c0_i32_0 : i32, i32, i32
  }
}

module attributes {stable_mosaic.version = 11 : i64} {
  func.func @gn_block_kernel(%arg0: i32, %arg1: i32, %arg2: memref<1x128x384xbf16, #tpu.memory_space<vmem>>, %arg3: memref<1x16x128xbf16, #tpu.memory_space<vmem>>, %arg4: memref<1x1x128xbf16, #tpu.memory_space<vmem>>, %arg5: memref<16x128xbf16, #tpu.memory_space<vmem>>, %arg6: memref<384x320xbf16, #tpu.memory_space<vmem>>, %arg7: memref<128x320xbf16, #tpu.memory_space<vmem>>, %arg8: memref<1x320xf32, #tpu.memory_space<vmem>>, %arg9: memref<320x128xbf16, #tpu.memory_space<vmem>>, %arg10: memref<1x128xf32, #tpu.memory_space<vmem>>, %arg11: memref<128x256xbf16, #tpu.memory_space<vmem>>, %arg12: memref<128x256xbf16, #tpu.memory_space<vmem>>, %arg13: memref<128x256xbf16, #tpu.memory_space<vmem>>, %arg14: memref<1x256xf32, #tpu.memory_space<vmem>>, %arg15: memref<256x128xbf16, #tpu.memory_space<vmem>>, %arg16: memref<1x128xf32, #tpu.memory_space<vmem>>, %arg17: memref<128x256xbf16, #tpu.memory_space<vmem>>, %arg18: memref<128x256xbf16, #tpu.memory_space<vmem>>, %arg19: memref<128x256xbf16, #tpu.memory_space<vmem>>, %arg20: memref<1x256xf32, #tpu.memory_space<vmem>>, %arg21: memref<256x128xbf16, #tpu.memory_space<vmem>>, %arg22: memref<1x128xf32, #tpu.memory_space<vmem>>, %arg23: memref<1x128x128xf32, #tpu.memory_space<vmem>>, %arg24: memref<1x16x128xf32, #tpu.memory_space<vmem>>, %arg25: memref<1x1x128xf32, #tpu.memory_space<vmem>>, %arg26: memref<16x128xf32, #tpu.memory_space<vmem>>, %arg27: memref<1x128xf32, #tpu.memory_space<vmem>>) attributes {dimension_semantics = [#tpu.dimension_semantics<parallel>, #tpu.dimension_semantics<arbitrary>], iteration_bounds = array<i64: 2, 2>, scalar_prefetch = 0 : i64, scratch_operands = 2 : i64, tpu.core_type = #tpu.core_type<tc>, window_params = [{transform_indices = @transform_0, window_bounds = array<i64: 1, 128, 384>}, {transform_indices = @transform_1, window_bounds = array<i64: 1, 16, 128>}, {transform_indices = @transform_2, window_bounds = array<i64: 1, 1, 128>}, {transform_indices = @transform_3, window_bounds = array<i64: 16, 128>}, {pipeline_mode = #tpu.pipeline_mode<synchronous>, transform_indices = @transform_4, window_bounds = array<i64: 384, 320>}, {pipeline_mode = #tpu.pipeline_mode<synchronous>, transform_indices = @transform_5, window_bounds = array<i64: 128, 320>}, {pipeline_mode = #tpu.pipeline_mode<synchronous>, transform_indices = @transform_6, window_bounds = array<i64: 1, 320>}, {pipeline_mode = #tpu.pipeline_mode<synchronous>, transform_indices = @transform_7, window_bounds = array<i64: 320, 128>}, {pipeline_mode = #tpu.pipeline_mode<synchronous>, transform_indices = @transform_8, window_bounds = array<i64: 1, 128>}, {pipeline_mode = #tpu.pipeline_mode<synchronous>, transform_indices = @transform_9, window_bounds = array<i64: 128, 256>}, {pipeline_mode = #tpu.pipeline_mode<synchronous>, transform_indices = @transform_10, window_bounds = array<i64: 128, 256>}, {pipeline_mode = #tpu.pipeline_mode<synchronous>, transform_indices = @transform_11, window_bounds = array<i64: 128, 256>}, {pipeline_mode = #tpu.pipeline_mode<synchronous>, transform_indices = @transform_12, window_bounds = array<i64: 1, 256>}, {pipeline_mode = #tpu.pipeline_mode<synchronous>, transform_indices = @transform_13, window_bounds = array<i64: 256, 128>}, {pipeline_mode = #tpu.pipeline_mode<synchronous>, transform_indices = @transform_14, window_bounds = array<i64: 1, 128>}, {pipeline_mode = #tpu.pipeline_mode<synchronous>, transform_indices = @transform_15, window_bounds = array<i64: 128, 256>}, {pipeline_mode = #tpu.pipeline_mode<synchronous>, transform_indices = @transform_16, window_bounds = array<i64: 128, 256>}, {pipeline_mode = #tpu.pipeline_mode<synchronous>, transform_indices = @transform_17, window_bounds = array<i64: 128, 256>}, {pipeline_mode = #tpu.pipeline_mode<synchronous>, transform_indices = @transform_18, window_bounds = array<i64: 1, 256>}, {pipeline_mode = #tpu.pipeline_mode<synchronous>, transform_indices = @transform_19, window_bounds = array<i64: 256, 128>}, {pipeline_mode = #tpu.pipeline_mode<synchronous>, transform_indices = @transform_20, window_bounds = array<i64: 1, 128>}, {transform_indices = @transform_21, window_bounds = array<i64: 1, 128, 128>}, {transform_indices = @transform_22, window_bounds = array<i64: 1, 16, 128>}, {transform_indices = @transform_23, window_bounds = array<i64: 1, 1, 128>}]} {
    %c0_i32 = arith.constant 0 : i32
    %0 = arith.cmpi eq, %arg1, %c0_i32 : i32
    %1 = arith.extui %0 : i1 to i32
    %c0_i32_0 = arith.constant 0 : i32
    %2 = arith.cmpi ne, %1, %c0_i32_0 : i32
    scf.if %2 {
      %cst_35 = arith.constant 0.000000e+00 : f32
      %40 = vector.broadcast %cst_35 : f32 to vector<16x128xf32>
      %c0_36 = arith.constant 0 : index
      %c0_37 = arith.constant 0 : index
      %41 = vector.load %arg26[%c0_36, %c0_37] : memref<16x128xf32, #tpu.memory_space<vmem>>, vector<16x128xf32>
      tpu.vector_store %arg26[%c0_36, %c0_37], %40 {strides = array<i32>} : memref<16x128xf32, #tpu.memory_space<vmem>>, vector<16x128xf32>,
      %cst_38 = arith.constant 0.000000e+00 : f32
      %42 = vector.broadcast %cst_38 : f32 to vector<1x128xf32>
      %c0_39 = arith.constant 0 : index
      %c0_40 = arith.constant 0 : index
      %43 = vector.load %arg27[%c0_39, %c0_40] : memref<1x128xf32, #tpu.memory_space<vmem>>, vector<1x128xf32>
      tpu.vector_store %arg27[%c0_39, %c0_40], %42 {strides = array<i32>} : memref<1x128xf32, #tpu.memory_space<vmem>>, vector<1x128xf32>,
    } else {
    }
    %c0 = arith.constant 0 : index
    %c0_1 = arith.constant 0 : index
    %c0_2 = arith.constant 0 : index
    %3 = vector.load %arg4[%c0, %c0_1, %c0_2] : memref<1x1x128xbf16, #tpu.memory_space<vmem>>, vector<1x1x128xbf16>
    %4 = vector.shape_cast %3 : vector<1x1x128xbf16> to vector<1x128xbf16>
    %c0_3 = arith.constant 0 : index
    %c0_4 = arith.constant 0 : index
    %c0_5 = arith.constant 0 : index
    %5 = vector.load %arg2[%c0_3, %c0_4, %c0_5] : memref<1x128x384xbf16, #tpu.memory_space<vmem>>, vector<1x128x384xbf16>
    %6 = vector.shape_cast %5 : vector<1x128x384xbf16> to vector<128x384xbf16>
    %c0_6 = arith.constant 0 : index
    %c0_7 = arith.constant 0 : index
    %7 = vector.load %arg8[%c0_6, %c0_7] : memref<1x320xf32, #tpu.memory_space<vmem>>, vector<1x320xf32>
    %c0_8 = arith.constant 0 : index
    %c0_9 = arith.constant 0 : index
    %8 = vector.load %arg7[%c0_8, %c0_9] : memref<128x320xbf16, #tpu.memory_space<vmem>>, vector<128x320xbf16>
    %cst = arith.constant dense<0.000000e+00> : vector<1x320xf32>
    %9 = tpu.matmul %4, %8, %cst {dimension_numbers = #tpu.dot_dimension_numbers<[1], [0], [0], [1], [0, 0, 1, 1], [], []>} : vector<1x128xbf16>, vector<128x320xbf16>, vector<1x320xf32> -> vector<1x320xf32>
    %10 = arith.addf %7, %9 : vector<1x320xf32>
    %c0_10 = arith.constant 0 : index
    %c0_11 = arith.constant 0 : index
    %11 = vector.load %arg6[%c0_10, %c0_11] : memref<384x320xbf16, #tpu.memory_space<vmem>>, vector<384x320xbf16>
    %cst_12 = arith.constant dense<0.000000e+00> : vector<128x320xf32>
    %12 = tpu.matmul %6, %11, %cst_12 {dimension_numbers = #tpu.dot_dimension_numbers<[1], [0], [0], [1], [0, 0, 1, 1], [], []>} : vector<128x384xbf16>, vector<384x320xbf16>, vector<128x320xf32> -> vector<128x320xf32>
    %13 = vector.broadcast %10 : vector<1x320xf32> to vector<128x320xf32>
    %14 = arith.addf %12, %13 : vector<128x320xf32>
    %cst_13 = arith.constant 0.000000e+00 : f32
    %15 = vector.broadcast %cst_13 : f32 to vector<128x320xf32>
    %16 = arith.maximumf %14, %15 : vector<128x320xf32>
    %17 = arith.truncf %16 : vector<128x320xf32> to vector<128x320xbf16>
    %c0_14 = arith.constant 0 : index
    %c0_15 = arith.constant 0 : index
    %18 = vector.load %arg9[%c0_14, %c0_15] : memref<320x128xbf16, #tpu.memory_space<vmem>>, vector<320x128xbf16>
    %cst_16 = arith.constant dense<0.000000e+00> : vector<128x128xf32>
    %19 = tpu.matmul %17, %18, %cst_16 {dimension_numbers = #tpu.dot_dimension_numbers<[1], [0], [0], [1], [0, 0, 1, 1], [], []>} : vector<128x320xbf16>, vector<320x128xbf16>, vector<128x128xf32> -> vector<128x128xf32>
    %c0_17 = arith.constant 0 : index
    %c0_18 = arith.constant 0 : index
    %20 = vector.load %arg10[%c0_17, %c0_18] : memref<1x128xf32, #tpu.memory_space<vmem>>, vector<1x128xf32>
    %21 = vector.broadcast %20 : vector<1x128xf32> to vector<128x128xf32>
    %22 = arith.addf %19, %21 : vector<128x128xf32>
    %c0_19 = arith.constant 0 : index
    %c0_20 = arith.constant 0 : index
    %c0_21 = arith.constant 0 : index
    %23 = vector.load %arg23[%c0_19, %c0_20, %c0_21] : memref<1x128x128xf32, #tpu.memory_space<vmem>>, vector<1x128x128xf32>
    %24 = vector.shape_cast %23 : vector<1x128x128xf32> to vector<128x128xf32>
    %25 = vector.shape_cast %22 : vector<128x128xf32> to vector<1x128x128xf32>
    tpu.vector_store %arg23[%c0_19, %c0_20, %c0_21], %25 {strides = array<i32>} : memref<1x128x128xf32, #tpu.memory_space<vmem>>, vector<1x128x128xf32>,
    %c0_22 = arith.constant 0 : index
    %c0_23 = arith.constant 0 : index
    %26 = vector.load %arg27[%c0_22, %c0_23] : memref<1x128xf32, #tpu.memory_space<vmem>>, vector<1x128xf32>
    %cst_24 = arith.constant dense<0.000000e+00> : vector<128xf32>
    %27 = vector.multi_reduction <add>, %22, %cst_24 [0] : vector<128x128xf32> to vector<128xf32>
    %28 = vector.shape_cast %27 : vector<128xf32> to vector<1x128xf32>
    %29 = arith.addf %26, %28 : vector<1x128xf32>
    %c0_25 = arith.constant 0 : index
    %c0_26 = arith.constant 0 : index
    %30 = vector.load %arg27[%c0_25, %c0_26] : memref<1x128xf32, #tpu.memory_space<vmem>>, vector<1x128xf32>
    tpu.vector_store %arg27[%c0_25, %c0_26], %29 {strides = array<i32>} : memref<1x128xf32, #tpu.memory_space<vmem>>, vector<1x128xf32>,
    %c0_27 = arith.constant 0 : index
    %c0_28 = arith.constant 0 : index
    %31 = vector.load %arg26[%c0_27, %c0_28] : memref<16x128xf32, #tpu.memory_space<vmem>>, vector<16x128xf32>
    %c0_29 = arith.constant 0 : index
    %c0_30 = arith.constant 0 : index
    %32 = vector.load %arg5[%c0_29, %c0_30] : memref<16x128xbf16, #tpu.memory_space<vmem>>, vector<16x128xbf16>
    %33 = arith.truncf %22 : vector<128x128xf32> to vector<128x128xbf16>
    %cst_31 = arith.constant dense<0.000000e+00> : vector<16x128xf32>
    %34 = tpu.matmul %32, %33, %cst_31 {dimension_numbers = #tpu.dot_dimension_numbers<[1], [0], [0], [1], [0, 0, 1, 1], [], []>} : vector<16x128xbf16>, vector<128x128xbf16>, vector<16x128xf32> -> vector<16x128xf32>
    %35 = arith.addf %31, %34 : vector<16x128xf32>
    %c0_32 = arith.constant 0 : index
    %c0_33 = arith.constant 0 : index
    %36 = vector.load %arg26[%c0_32, %c0_33] : memref<16x128xf32, #tpu.memory_space<vmem>>, vector<16x128xf32>
    tpu.vector_store %arg26[%c0_32, %c0_33], %35 {strides = array<i32>} : memref<16x128xf32, #tpu.memory_space<vmem>>, vector<16x128xf32>,
    %c1_i32 = arith.constant 1 : i32
    %37 = arith.cmpi eq, %arg1, %c1_i32 : i32
    %38 = arith.extui %37 : i1 to i32
    %c0_i32_34 = arith.constant 0 : i32
    %39 = arith.cmpi ne, %38, %c0_i32_34 : i32
    scf.if %39 {
      %c0_35 = arith.constant 0 : index
      %c0_36 = arith.constant 0 : index
      %40 = vector.load %arg26[%c0_35, %c0_36] : memref<16x128xf32, #tpu.memory_space<vmem>>, vector<16x128xf32>
      %c0_37 = arith.constant 0 : index
      %c0_38 = arith.constant 0 : index
      %41 = vector.load %arg14[%c0_37, %c0_38] : memref<1x256xf32, #tpu.memory_space<vmem>>, vector<1x256xf32>
      %c0_39 = arith.constant 0 : index
      %c0_40 = arith.constant 0 : index
      %42 = vector.load %arg13[%c0_39, %c0_40] : memref<128x256xbf16, #tpu.memory_space<vmem>>, vector<128x256xbf16>
      %cst_41 = arith.constant dense<0.000000e+00> : vector<1x256xf32>
      %43 = tpu.matmul %4, %42, %cst_41 {dimension_numbers = #tpu.dot_dimension_numbers<[1], [0], [0], [1], [0, 0, 1, 1], [], []>} : vector<1x128xbf16>, vector<128x256xbf16>, vector<1x256xf32> -> vector<1x256xf32>
      %44 = arith.addf %41, %43 : vector<1x256xf32>
      %45 = arith.truncf %40 : vector<16x128xf32> to vector<16x128xbf16>
      %c0_42 = arith.constant 0 : index
      %c0_43 = arith.constant 0 : index
      %46 = vector.load %arg11[%c0_42, %c0_43] : memref<128x256xbf16, #tpu.memory_space<vmem>>, vector<128x256xbf16>
      %cst_44 = arith.constant dense<0.000000e+00> : vector<16x256xf32>
      %47 = tpu.matmul %45, %46, %cst_44 {dimension_numbers = #tpu.dot_dimension_numbers<[1], [0], [0], [1], [0, 0, 1, 1], [], []>} : vector<16x128xbf16>, vector<128x256xbf16>, vector<16x256xf32> -> vector<16x256xf32>
      %c0_45 = arith.constant 0 : index
      %c0_46 = arith.constant 0 : index
      %c0_47 = arith.constant 0 : index
      %48 = vector.load %arg3[%c0_45, %c0_46, %c0_47] : memref<1x16x128xbf16, #tpu.memory_space<vmem>>, vector<1x16x128xbf16>
      %49 = vector.shape_cast %48 : vector<1x16x128xbf16> to vector<16x128xbf16>
      %c0_48 = arith.constant 0 : index
      %c0_49 = arith.constant 0 : index
      %50 = vector.load %arg12[%c0_48, %c0_49] : memref<128x256xbf16, #tpu.memory_space<vmem>>, vector<128x256xbf16>
      %cst_50 = arith.constant dense<0.000000e+00> : vector<16x256xf32>
      %51 = tpu.matmul %49, %50, %cst_50 {dimension_numbers = #tpu.dot_dimension_numbers<[1], [0], [0], [1], [0, 0, 1, 1], [], []>} : vector<16x128xbf16>, vector<128x256xbf16>, vector<16x256xf32> -> vector<16x256xf32>
      %52 = arith.addf %47, %51 : vector<16x256xf32>
      %53 = vector.broadcast %44 : vector<1x256xf32> to vector<16x256xf32>
      %54 = arith.addf %52, %53 : vector<16x256xf32>
      %cst_51 = arith.constant 0.000000e+00 : f32
      %55 = vector.broadcast %cst_51 : f32 to vector<16x256xf32>
      %56 = arith.maximumf %54, %55 : vector<16x256xf32>
      %57 = arith.truncf %56 : vector<16x256xf32> to vector<16x256xbf16>
      %c0_52 = arith.constant 0 : index
      %c0_53 = arith.constant 0 : index
      %58 = vector.load %arg15[%c0_52, %c0_53] : memref<256x128xbf16, #tpu.memory_space<vmem>>, vector<256x128xbf16>
      %cst_54 = arith.constant dense<0.000000e+00> : vector<16x128xf32>
      %59 = tpu.matmul %57, %58, %cst_54 {dimension_numbers = #tpu.dot_dimension_numbers<[1], [0], [0], [1], [0, 0, 1, 1], [], []>} : vector<16x256xbf16>, vector<256x128xbf16>, vector<16x128xf32> -> vector<16x128xf32>
      %c0_55 = arith.constant 0 : index
      %c0_56 = arith.constant 0 : index
      %60 = vector.load %arg16[%c0_55, %c0_56] : memref<1x128xf32, #tpu.memory_space<vmem>>, vector<1x128xf32>
      %61 = vector.broadcast %60 : vector<1x128xf32> to vector<16x128xf32>
      %62 = arith.addf %59, %61 : vector<16x128xf32>
      %c0_57 = arith.constant 0 : index
      %c0_58 = arith.constant 0 : index
      %c0_59 = arith.constant 0 : index
      %63 = vector.load %arg24[%c0_57, %c0_58, %c0_59] : memref<1x16x128xf32, #tpu.memory_space<vmem>>, vector<1x16x128xf32>
      %64 = vector.shape_cast %63 : vector<1x16x128xf32> to vector<16x128xf32>
      %65 = vector.shape_cast %62 : vector<16x128xf32> to vector<1x16x128xf32>
      tpu.vector_store %arg24[%c0_57, %c0_58, %c0_59], %65 {strides = array<i32>} : memref<1x16x128xf32, #tpu.memory_space<vmem>>, vector<1x16x128xf32>,
      %cst_60 = arith.constant dense<0.000000e+00> : vector<128xf32>
      %66 = vector.multi_reduction <add>, %62, %cst_60 [0] : vector<16x128xf32> to vector<128xf32>
      %67 = vector.shape_cast %66 : vector<128xf32> to vector<1x128xf32>
      %c0_61 = arith.constant 0 : index
      %c0_62 = arith.constant 0 : index
      %68 = vector.load %arg27[%c0_61, %c0_62] : memref<1x128xf32, #tpu.memory_space<vmem>>, vector<1x128xf32>
      %69 = arith.truncf %68 : vector<1x128xf32> to vector<1x128xbf16>
      %c0_63 = arith.constant 0 : index
      %c0_64 = arith.constant 0 : index
      %70 = vector.load %arg17[%c0_63, %c0_64] : memref<128x256xbf16, #tpu.memory_space<vmem>>, vector<128x256xbf16>
      %cst_65 = arith.constant dense<0.000000e+00> : vector<1x256xf32>
      %71 = tpu.matmul %69, %70, %cst_65 {dimension_numbers = #tpu.dot_dimension_numbers<[1], [0], [0], [1], [0, 0, 1, 1], [], []>} : vector<1x128xbf16>, vector<128x256xbf16>, vector<1x256xf32> -> vector<1x256xf32>
      %72 = arith.truncf %67 : vector<1x128xf32> to vector<1x128xbf16>
      %c0_66 = arith.constant 0 : index
      %c0_67 = arith.constant 0 : index
      %73 = vector.load %arg18[%c0_66, %c0_67] : memref<128x256xbf16, #tpu.memory_space<vmem>>, vector<128x256xbf16>
      %cst_68 = arith.constant dense<0.000000e+00> : vector<1x256xf32>
      %74 = tpu.matmul %72, %73, %cst_68 {dimension_numbers = #tpu.dot_dimension_numbers<[1], [0], [0], [1], [0, 0, 1, 1], [], []>} : vector<1x128xbf16>, vector<128x256xbf16>, vector<1x256xf32> -> vector<1x256xf32>
      %75 = arith.addf %71, %74 : vector<1x256xf32>
      %c0_69 = arith.constant 0 : index
      %c0_70 = arith.constant 0 : index
      %76 = vector.load %arg19[%c0_69, %c0_70] : memref<128x256xbf16, #tpu.memory_space<vmem>>, vector<128x256xbf16>
      %cst_71 = arith.constant dense<0.000000e+00> : vector<1x256xf32>
      %77 = tpu.matmul %4, %76, %cst_71 {dimension_numbers = #tpu.dot_dimension_numbers<[1], [0], [0], [1], [0, 0, 1, 1], [], []>} : vector<1x128xbf16>, vector<128x256xbf16>, vector<1x256xf32> -> vector<1x256xf32>
      %78 = arith.addf %75, %77 : vector<1x256xf32>
      %c0_72 = arith.constant 0 : index
      %c0_73 = arith.constant 0 : index
      %79 = vector.load %arg20[%c0_72, %c0_73] : memref<1x256xf32, #tpu.memory_space<vmem>>, vector<1x256xf32>
      %80 = arith.addf %78, %79 : vector<1x256xf32>
      %cst_74 = arith.constant 0.000000e+00 : f32
      %81 = vector.broadcast %cst_74 : f32 to vector<1x256xf32>
      %82 = arith.maximumf %80, %81 : vector<1x256xf32>
      %83 = arith.truncf %82 : vector<1x256xf32> to vector<1x256xbf16>
      %c0_75 = arith.constant 0 : index
      %c0_76 = arith.constant 0 : index
      %84 = vector.load %arg21[%c0_75, %c0_76] : memref<256x128xbf16, #tpu.memory_space<vmem>>, vector<256x128xbf16>
      %cst_77 = arith.constant dense<0.000000e+00> : vector<1x128xf32>
      %85 = tpu.matmul %83, %84, %cst_77 {dimension_numbers = #tpu.dot_dimension_numbers<[1], [0], [0], [1], [0, 0, 1, 1], [], []>} : vector<1x256xbf16>, vector<256x128xbf16>, vector<1x128xf32> -> vector<1x128xf32>
      %c0_78 = arith.constant 0 : index
      %c0_79 = arith.constant 0 : index
      %86 = vector.load %arg22[%c0_78, %c0_79] : memref<1x128xf32, #tpu.memory_space<vmem>>, vector<1x128xf32>
      %87 = arith.addf %85, %86 : vector<1x128xf32>
      %c0_80 = arith.constant 0 : index
      %c0_81 = arith.constant 0 : index
      %c0_82 = arith.constant 0 : index
      %88 = vector.load %arg25[%c0_80, %c0_81, %c0_82] : memref<1x1x128xf32, #tpu.memory_space<vmem>>, vector<1x1x128xf32>
      %89 = vector.shape_cast %88 : vector<1x1x128xf32> to vector<1x128xf32>
      %90 = vector.shape_cast %87 : vector<1x128xf32> to vector<1x1x128xf32>
      tpu.vector_store %arg25[%c0_80, %c0_81, %c0_82], %90 {strides = array<i32>} : memref<1x1x128xf32, #tpu.memory_space<vmem>>, vector<1x1x128xf32>,
    } else {
    }
    return
  }
  func.func @transform_0(%arg0: i32, %arg1: i32) -> (i32, i32, i32) {
    %c0_i32 = arith.constant 0 : i32
    %c0_i32_0 = arith.constant 0 : i32
    return %arg0, %arg1, %c0_i32 : i32, i32, i32
  }
  func.func @transform_1(%arg0: i32, %arg1: i32) -> (i32, i32, i32) {
    %c0_i32 = arith.constant 0 : i32
    %c0_i32_0 = arith.constant 0 : i32
    %c0_i32_1 = arith.constant 0 : i32
    return %arg0, %c0_i32, %c0_i32_0 : i32, i32, i32
  }
  func.func @transform_2(%arg0: i32, %arg1: i32) -> (i32, i32, i32) {
    %c0_i32 = arith.constant 0 : i32
    %c0_i32_0 = arith.constant 0 : i32
    %c0_i32_1 = arith.constant 0 : i32
    return %arg0, %c0_i32, %c0_i32_0 : i32, i32, i32
  }
  func.func @transform_3(%arg0: i32, %arg1: i32) -> (i32, i32) {
    %c0_i32 = arith.constant 0 : i32
    %c0_i32_0 = arith.constant 0 : i32
    return %c0_i32, %arg1 : i32, i32
  }
  func.func @transform_4(%arg0: i32, %arg1: i32) -> (i32, i32) {
    %c0_i32 = arith.constant 0 : i32
    %c0_i32_0 = arith.constant 0 : i32
    %c0_i32_1 = arith.constant 0 : i32
    return %c0_i32, %c0_i32_0 : i32, i32
  }
  func.func @transform_5(%arg0: i32, %arg1: i32) -> (i32, i32) {
    %c0_i32 = arith.constant 0 : i32
    %c0_i32_0 = arith.constant 0 : i32
    %c0_i32_1 = arith.constant 0 : i32
    return %c0_i32, %c0_i32_0 : i32, i32
  }
  func.func @transform_6(%arg0: i32, %arg1: i32) -> (i32, i32) {
    %c0_i32 = arith.constant 0 : i32
    %c0_i32_0 = arith.constant 0 : i32
    %c0_i32_1 = arith.constant 0 : i32
    return %c0_i32, %c0_i32_0 : i32, i32
  }
  func.func @transform_7(%arg0: i32, %arg1: i32) -> (i32, i32) {
    %c0_i32 = arith.constant 0 : i32
    %c0_i32_0 = arith.constant 0 : i32
    %c0_i32_1 = arith.constant 0 : i32
    return %c0_i32, %c0_i32_0 : i32, i32
  }
  func.func @transform_8(%arg0: i32, %arg1: i32) -> (i32, i32) {
    %c0_i32 = arith.constant 0 : i32
    %c0_i32_0 = arith.constant 0 : i32
    %c0_i32_1 = arith.constant 0 : i32
    return %c0_i32, %c0_i32_0 : i32, i32
  }
  func.func @transform_9(%arg0: i32, %arg1: i32) -> (i32, i32) {
    %c0_i32 = arith.constant 0 : i32
    %c0_i32_0 = arith.constant 0 : i32
    %c0_i32_1 = arith.constant 0 : i32
    return %c0_i32, %c0_i32_0 : i32, i32
  }
  func.func @transform_10(%arg0: i32, %arg1: i32) -> (i32, i32) {
    %c0_i32 = arith.constant 0 : i32
    %c0_i32_0 = arith.constant 0 : i32
    %c0_i32_1 = arith.constant 0 : i32
    return %c0_i32, %c0_i32_0 : i32, i32
  }
  func.func @transform_11(%arg0: i32, %arg1: i32) -> (i32, i32) {
    %c0_i32 = arith.constant 0 : i32
    %c0_i32_0 = arith.constant 0 : i32
    %c0_i32_1 = arith.constant 0 : i32
    return %c0_i32, %c0_i32_0 : i32, i32
  }
  func.func @transform_12(%arg0: i32, %arg1: i32) -> (i32, i32) {
    %c0_i32 = arith.constant 0 : i32
    %c0_i32_0 = arith.constant 0 : i32
    %c0_i32_1 = arith.constant 0 : i32
    return %c0_i32, %c0_i32_0 : i32, i32
  }
  func.func @transform_13(%arg0: i32, %arg1: i32) -> (i32, i32) {
    %c0_i32 = arith.constant 0 : i32
    %c0_i32_0 = arith.constant 0 : i32
    %c0_i32_1 = arith.constant 0 : i32
    return %c0_i32, %c0_i32_0 : i32, i32
  }
  func.func @transform_14(%arg0: i32, %arg1: i32) -> (i32, i32) {
    %c0_i32 = arith.constant 0 : i32
    %c0_i32_0 = arith.constant 0 : i32
    %c0_i32_1 = arith.constant 0 : i32
    return %c0_i32, %c0_i32_0 : i32, i32
  }
  func.func @transform_15(%arg0: i32, %arg1: i32) -> (i32, i32) {
    %c0_i32 = arith.constant 0 : i32
    %c0_i32_0 = arith.constant 0 : i32
    %c0_i32_1 = arith.constant 0 : i32
    return %c0_i32, %c0_i32_0 : i32, i32
  }
  func.func @transform_16(%arg0: i32, %arg1: i32) -> (i32, i32) {
    %c0_i32 = arith.constant 0 : i32
    %c0_i32_0 = arith.constant 0 : i32
    %c0_i32_1 = arith.constant 0 : i32
    return %c0_i32, %c0_i32_0 : i32, i32
  }
  func.func @transform_17(%arg0: i32, %arg1: i32) -> (i32, i32) {
    %c0_i32 = arith.constant 0 : i32
    %c0_i32_0 = arith.constant 0 : i32
    %c0_i32_1 = arith.constant 0 : i32
    return %c0_i32, %c0_i32_0 : i32, i32
  }
  func.func @transform_18(%arg0: i32, %arg1: i32) -> (i32, i32) {
    %c0_i32 = arith.constant 0 : i32
    %c0_i32_0 = arith.constant 0 : i32
    %c0_i32_1 = arith.constant 0 : i32
    return %c0_i32, %c0_i32_0 : i32, i32
  }
  func.func @transform_19(%arg0: i32, %arg1: i32) -> (i32, i32) {
    %c0_i32 = arith.constant 0 : i32
    %c0_i32_0 = arith.constant 0 : i32
    %c0_i32_1 = arith.constant 0 : i32
    return %c0_i32, %c0_i32_0 : i32, i32
  }
  func.func @transform_20(%arg0: i32, %arg1: i32) -> (i32, i32) {
    %c0_i32 = arith.constant 0 : i32
    %c0_i32_0 = arith.constant 0 : i32
    %c0_i32_1 = arith.constant 0 : i32
    return %c0_i32, %c0_i32_0 : i32, i32
  }
  func.func @transform_21(%arg0: i32, %arg1: i32) -> (i32, i32, i32) {
    %c0_i32 = arith.constant 0 : i32
    %c0_i32_0 = arith.constant 0 : i32
    return %arg0, %arg1, %c0_i32 : i32, i32, i32
  }
  func.func @transform_22(%arg0: i32, %arg1: i32) -> (i32, i32, i32) {
    %c0_i32 = arith.constant 0 : i32
    %c0_i32_0 = arith.constant 0 : i32
    %c0_i32_1 = arith.constant 0 : i32
    return %arg0, %c0_i32, %c0_i32_0 : i32, i32, i32
  }
  func.func @transform_23(%arg0: i32, %arg1: i32) -> (i32, i32, i32) {
    %c0_i32 = arith.constant 0 : i32
    %c0_i32_0 = arith.constant 0 : i32
    %c0_i32_1 = arith.constant 0 : i32
    return %arg0, %c0_i32, %c0_i32_0 : i32, i32, i32
  }
}

</mosaic_0001>

<bundles_post_ra>
// kernel: tpu_custom_call.1
= control target key start
LH: loop header
LB: loop body
LE: loop exit
PB: predicated region body
PF: predicated region fallthrough
CT: control target
= control target key end

     0   :  { %s7351_s0 = inlined_call_operand.vmem [shape: bf16[2,256,384], index: 0, kind: input, shape index: {}]   ;;  %s7352_s1 = inlined_call_operand.vmem [shape: bf16[2,16,128], index: 1, kind: input, shape index: {}]   ;;  %s7353_s2 = inlined_call_operand.vmem [shape: bf16[2,1,128], index: 2, kind: input, shape index: {}]   ;;  %s7354_s3 = inlined_call_operand.vmem [shape: bf16[16,256], index: 3, kind: input, shape index: {}]   ;;  %s7355_s4 = inlined_call_operand.vmem [shape: bf16[384,320], index: 4, kind: input, shape index: {}]   ;;  %s7356_s5 = inlined_call_operand.vmem [shape: bf16[128,320], index: 5, kind: input, shape index: {}]   ;;  %s7357_s6 = inlined_call_operand.vmem [shape: f32[1,320], index: 6, kind: input, shape index: {}]   ;;  %s7358_s7 = inlined_call_operand.vmem [shape: bf16[320,128], index: 7, kind: input, shape index: {}]   ;;  %s7359_s8 = inlined_call_operand.vmem [shape: f32[1,128], index: 8, kind: input, shape index: {}]   ;;  %s7360_s9 = inlined_call_operand.vmem [shape: bf16[128,256], index: 9, kind: input, shape index: {}]   ;;  %s7361_s10 = inlined_call_operand.vmem [shape: bf16[128,256], index: 10, kind: input, shape index: {}]   ;;  %s7362_s11 = inlined_call_operand.vmem [shape: bf16[128,256], index: 11, kind: input, shape index: {}]   ;;  %s7363_s12 = inlined_call_operand.vmem [shape: f32[1,256], index: 12, kind: input, shape index: {}]   ;;  %s7364_s13 = inlined_call_operand.hbm [shape: bf16[256,128], index: 13, kind: input, shape index: {}]   ;;  %s7365_s14 = inlined_call_operand.vmem [shape: f32[1,128], index: 14, kind: input, shape index: {}]   ;;  %s7366_s15 = inlined_call_operand.hbm [shape: bf16[128,256], index: 15, kind: input, shape index: {}]   ;;  %s7367_s16 = inlined_call_operand.hbm [shape: bf16[128,256], index: 16, kind: input, shape index: {}]   ;;  %s7368_s17 = inlined_call_operand.hbm [shape: bf16[128,256], index: 17, kind: input, shape index: {}]   ;;  %s7369_s18 = inlined_call_operand.vmem [shape: f32[1,256], index: 18, kind: input, shape index: {}]   ;;  %s7370_s19 = inlined_call_operand.hbm [shape: bf16[256,128], index: 19, kind: input, shape index: {}]   ;;  %s7371_s20 = inlined_call_operand.vmem [shape: f32[1,128], index: 20, kind: input, shape index: {}]   ;;  %s7372_s21 = inlined_call_operand.hbm [shape: f32[2,256,128], index: 21, kind: output, shape index: {0}]   ;;  %s7373_s22 = inlined_call_operand.hbm [shape: f32[2,16,128], index: 22, kind: output, shape index: {1}]   ;;  %s7374_s23 = inlined_call_operand.hbm [shape: f32[2,1,128], index: 23, kind: output, shape index: {2}]  }
   0x1   :  { %7406 = sst [smem:[#allocation40_spill]] %s7351_s0 }
   0x2   :  { %7407 = sst [smem:[#allocation41_spill]] %s7352_s1 }
   0x3   :  { %7408 = sst [smem:[#allocation42_spill]] %s7353_s2 }
   0x4   :  { %7409 = sst [smem:[#allocation43_spill]] %s7354_s3 }
   0x5   :  { %7410 = sst [smem:[#allocation44_spill]] %s7355_s4 }
   0x6   :  { %7411 = sst [smem:[#allocation45_spill]] %s7356_s5 }
   0x7   :  { %7412 = sst [smem:[#allocation46_spill]] %s7357_s6 }
   0x8   :  { %7413 = sst [smem:[#allocation47_spill]] %s7358_s7 }
   0x9   :  { %7414 = sst [smem:[#allocation48_spill]] %s7360_s9 }
   0xa   :  { %7415 = sst [smem:[#allocation49_spill]] %s7361_s10 }
   0xb   :  { %7416 = sst [smem:[#allocation50_spill]] %s7362_s11 }
   0xc   :  { %7417 = sst [smem:[#allocation51_spill]] %s7363_s12 }
   0xd   :  { %7418 = sst [smem:[#allocation52_spill]] %s7364_s13 }
   0xe   :  { %7419 = sst [smem:[#allocation53_spill]] %s7365_s14 }
   0xf   :  { %7420 = sst [smem:[#allocation54_spill]] %s7366_s15 }
  0x10   :  { %7421 = sst [smem:[#allocation55_spill]] %s7367_s16 }
  0x11   :  { %7422 = sst [smem:[#allocation56_spill]] %s7368_s17 }
  0x12   :  { %7423 = sst [smem:[#allocation57_spill]] %s7369_s18 }
  0x13   :  { %7424 = sst [smem:[#allocation58_spill]] %s7370_s19 }
  0x14   :  { %7425 = sst [smem:[#allocation59_spill]] %s7371_s20 }
  0x15   :  { %7426 = sst [smem:[#allocation60_spill]] %s7372_s21 }
  0x16   :  { %7427 = sst [smem:[#allocation61_spill]] %s7373_s22 }
  0x17   :  { %7428 = sst [smem:[#allocation62_spill]] %s7374_s23 }
  0x18   :  { %29 = vsyncpa [#allocation6], 0 }
  0x19   :  { %30 = vsyncpa [#allocation9], 0 }
  0x1a   :  { %31 = vsyncpa [#allocation12], 0 }
  0x1b   :  { %32 = vsyncpa [#allocation7], 0 }
  0x1c   :  { %34 = vsyncpa [#allocation7 + $0x1], 0 }
  0x1d   :  { %35 = vsyncpa [#allocation16], 0 }
  0x1e   :  { %37 = vsyncpa [#allocation16 + $0x1], 0  ;;  %s6043_s4 = smov 0   ;;  %s6045_s30 = smov 0  }
  0x1f   :  { %s6047_s24 = smov 0   ;;  %s6049_s25 = smov 0  }
  0x20   :  { %s6051_s5 = smov 0   ;;  %s6053_s1 = smov 0  }
  0x21   :  { %s6055_s26 = smov 0   ;;  %s6057_s2 = smov 0  }
  0x22   :  { %s6059_s6 = smov 0   ;;  %s6061_s27 = smov 0  }
  0x23   :  { %s6063_s7 = smov 0   ;;  %s6065_s28 = smov 0  }
  0x24   :  { %s6067_s29 = smov 0  }
  0x25 LB: > { %7429 = sst [smem:[#allocation23_spill]] %s5857_s30  ;;  %s6109_s3 = sadd.s32 4294967295, %s5901_s29   ;;  %s5901_s29 = sphi %s6067_s29, %s43_s29   ;;  %s5897_s28 = sphi %s6065_s28, %s7518_s28   ;;  %s5893_s7 = sphi %s6063_s7, %s7515_s7   ;;  %s5889_s27 = sphi %s6061_s27, %s7514_s27   ;;  %s5885_s6 = sphi %s6059_s6, %s7513_s6   ;;  %s5881_s2 = sphi %s6057_s2, %s7512_s2   ;;  %s5877_s26 = sphi %s6055_s26, %s7511_s26   ;;  %s5873_s1 = sphi %s6053_s1, %s7510_s1   ;;  %s5869_s5 = sphi %s6051_s5, %s7509_s5   ;;  %s5865_s25 = sphi %s6049_s25, %s7508_s25   ;;  %s5861_s24 = sphi %s6047_s24, %s7507_s24   ;;  %s5857_s30 = sphi %s6045_s30, %s7506_s30   ;;  %s5853_s4 = sphi %s6043_s4, %s7505_s4  }
  0x26   : > { %7430 = sst [smem:[#allocation24_spill]] %s5861_s24  ;;  %s52_s23 = sadd.s32 1, %s5893_s7 }
  0x27   : > { %7431 = sst [smem:[#allocation25_spill]] %s5865_s25  ;;  %s55_s21 = sadd.s32 1, %s5897_s28 }
  0x28   : > { %7432 = sst [smem:[#allocation26_spill]] %s5869_s5  ;;  %p53_p0 = scmp.ge.s32.totalorder %s52_s23, 2 }
  0x29   : > { %7433 = sst [smem:[#allocation27_spill]] %s5873_s1  ;;  %s142_s22 = sadd.s32 1, %s5881_s2 }
  0x2a   : > { %7434 = sst [smem:[#allocation28_spill]] %s5881_s2  ;;  %p149_p1 = scmp.ne.s32.totalorder %s5881_s2, %s5877_s26 }
  0x2b   : > { %7435 = sst [smem:[#allocation29_spill]] %s5893_s7  ;;  %p150_p2 = scmp.eq.s32.totalorder %s5901_s29, 0 }
  0x2c   : > { %7436 = sst [smem:[#allocation30_spill]] %s5897_s28  ;;  %s7520_s23 = smov (%p53_p0, %s52_s23), 0 }
  0x2d   : > { %7437 = sst [smem:[#allocation31_spill]] %s5901_s29  ;;  %s7522_s21 = smov (!%p53_p0, %s55_s21), %s5897_s28 }
  0x2e   : > { %7438 = sst [smem:[#allocation32_spill]] %s7520_s23  ;;  %s139_s20 = ssub.s32 %s5893_s7, %s7520_s23 }
  0x2f   : > { %p6123_p3 = por %p150_p2, %p149_p1  ;;  %p57_p4 = scmp.ge.s32.totalorder %s7522_s21, 2 }
  0x30   : > { %p140_p5 = scmp.eq.s32.totalorder %s139_s20, 0  ;;  %s527_s18 = sadd.s32 1, %s5873_s1 }
  0x31   : > { %p537_p6 = scmp.ne.s32.totalorder %s5873_s1, %s5869_s5  ;;  %s7524_s21 = smov (%p57_p4, %s7522_s21), 0 }
  0x32   : > { %7440 = sst [smem:[#allocation33_spill]] %s7524_s21  ;;  %s522_s14 = ssub.s32 %s5897_s28, %s7524_s21 }
  0x33   : > { %s6133_s23 = scalar_select %p140_p5, %s5881_s2, %s142_s22  }
  0x34   : > { %p538_p7 = scmp.eq.s32.totalorder %s6109_s3, 3  ;;  %s524_s12 = sor.u32 %s522_s14, %s139_s20 }
  0x35   : > { %7441 = sst [smem:[#allocation34_spill]] %s6133_s23  ;;  %p543_p8 = scmp.ne.s32.totalorder %s5869_s5, %s5865_s25 }
  0x36   : > { %p525_p9 = scmp.eq.s32.totalorder %s524_s12, 0  ;;  %p6142_p10 = por %p538_p7, %p537_p6 }
  0x37   : > { %s7444_s10 = sadd.s32 4294967294, %s5901_s29   ;;  %p551_p12 = scmp.eq.s32.totalorder %s522_s14, 0 }
  0x38   : > { %s7442_s9 = scalar_select %p6142_p10, 1, 0 }
  0x39   : > { %p544_p11 = scmp.eq.s32.totalorder %s7444_s10, 3  ;;  %s553_s21 = sadd.s32 1, %s5861_s24 }
  0x3a   : > { %7443 = sst [smem:[#allocation35_spill]] %s7442_s9  ;;  %p563_p0 = scmp.ne.s32.totalorder %s5861_s24, %s5857_s30 }
  0x3b   : > { %s6149_s11 = scalar_select %p525_p9, %s5873_s1, %s527_s18  }
  0x3c   : > { %p6151_p13 = por %p544_p11, %p543_p8  ;;  %p569_p1 = scmp.ne.s32.totalorder %s5857_s30, %s5853_s4 }
  0x3d   : > { %7445 = sst [smem:[#allocation36_spill]] %s6149_s11  ;;  %p4397_p2 = scmp.ge.s32.totalorder %s5901_s29, 1 }
  0x3e   : > { %s7446_s22 = scalar_select %p6151_p13, 1, 0 }
  0x3f   : > { %s6157_s20 = scalar_select %p551_p12, %s5861_s24, %s553_s21  }
  0x40   : > { %7447 = sst [smem:[#allocation37_spill]] %s7446_s22  ;;  %p603_p4 = scmp.lt.s32.totalorder %s5901_s29, 5 }
  0x41   : > { %7448 = sst [smem:[#allocation38_spill]] %s6157_s20  ;;  %p6167_p5 = por %p563_p0, %p538_p7 }
  0x42   : > { %p6171_p6 = por %p569_p1, %p544_p11  ;;  %p6175_p8 = pnand %p4397_p2, %p603_p4 }
  0x43   : > { %p7388_p9 = scmp.eq.s32.totalorder %s6109_s3, 0  ;;  %s5903_s18 = smov [#allocation8]  }
  0x44   : > { %s7450_s10 = scalar_select %p6171_p6, 1, 0 }
  0x45   : > { %p5055_p12 = pneg %p6175_p8  ;;  %s658_s21 = sshll.u32 %s5903_s18, 4  ;;  %s659_s21 = int_to_ptr.vmem [resolvable:$true] %s658_s21 }
  0x46   : > { %7451 = sst [smem:[#allocation39_spill]] %s7450_s10  ;;  %s5904_s28 = smov [#allocation11]  }
  0x47   : > { %p6184_p7 = pnand %p7388_p9, %p5055_p12  ;;  %s684_s23 = sshll.u32 %s5904_s28, 4  ;;  %s685_s23 = int_to_ptr.vmem [resolvable:$true] %s684_s23 }
  0x48   : > { %s5582_s1 = scalar_lea.vmem %s659_s21, 2048  ;;  %p5590_p4 = scmp.lt.s32.totalorder %s659_s21, %s659_s21 }
  0x49   : > { %p6190_p11 = pneg %p6184_p7  ;;  %p5583_p0 = scmp.ne.s32.totalorder %s659_s21, %s5582_s1 }
  0x4a   : > { %p5591_p6 = scmp.lt.s32.totalorder %s5582_s1, %s5582_s1 }
  0x4b   : > { %p5585_p1 = pnand %p5583_p0, %p6190_p11 }
  0x4c   : > { %p5592_p12 = por %p5591_p6, %p5590_p4 }
  0x4d   : > { %p5586_p2 = pneg %p5585_p1 }
  0x4f   : > { %p5593_p9 = pnand %p5592_p12, %p5586_p2 }
  0x51   : > { %5596 = shalt.err (!%p5593_p9)
}
  0x52   : > { %s7392_s18 = smov 128   ;;  %s7393_s28 = smov 8  }
  0x53   : > { %s7455_s15 = sld [smem:[#allocation54_spill]]  ;;  %s5608_s10 = scalar_lea.vmem %s685_s23, 2048 }
  0x54   : > { %p5609_p0 = scmp.ne.s32.totalorder %s685_s23, %s5608_s10  ;;  %p5616_p2 = scmp.lt.s32.totalorder %s685_s23, %s685_s23 }
  0x55   : > { %p5617_p9 = scmp.lt.s32.totalorder %s5608_s10, %s5608_s10 }
  0x56   : > { %p5611_p1 = pnand %p5609_p0, %p6190_p11 }
  0x57   : > { %p5618_p4 = por %p5617_p9, %p5616_p2 }
  0x58   : > { %p5612_p6 = pneg %p5611_p1 }
  0x59   : > { %5061 = dma.hbm_to_vmem [thread:$0]  (!%p6184_p7), %s7455_s15, 2048, %s659_s21, [#allocation9], %s7392_s18, %s7392_s18, %s7393_s28  }
  0x5a   : > { %p5619_p12 = pnand %p5618_p4, %p5612_p6 }
  0x5c   : > { %5622 = shalt.err (!%p5619_p12)
}
  0x5d   : > { %s7456_s17 = sld [smem:[#allocation56_spill]]  ;;  %s5907_s24 = smov [#allocation5]  }
  0x5e   : > { %s642_s20 = sshll.u32 %s5907_s24, 4  ;;  %s643_s20 = int_to_ptr.vmem [resolvable:$true] %s642_s20 }
  0x5f   : > { %s5634_s21 = scalar_lea.vmem %s643_s20, 2048  ;;  %p5642_p6 = scmp.lt.s32.totalorder %s643_s20, %s643_s20 }
  0x60   : > { %p5635_p0 = scmp.ne.s32.totalorder %s643_s20, %s5634_s21  ;;  %p5643_p9 = scmp.lt.s32.totalorder %s5634_s21, %s5634_s21 }
  0x62   : > { %p5637_p1 = pnand %p5635_p0, %p6190_p11  ;;  %p5644_p4 = por %p5643_p9, %p5642_p6 }
  0x63   : > { %5067 = dma.hbm_to_vmem [thread:$0]  (!%p6184_p7), %s7456_s17, 2048, %s685_s23, [#allocation12], %s7392_s18, %s7392_s18, %s7393_s28  }
  0x64   : > { %p5638_p2 = pneg %p5637_p1 }
  0x66   : > { %p5645_p12 = pnand %p5644_p4, %p5638_p2 }
  0x68   : > { %5648 = shalt.err (!%p5645_p12)
}
  0x69   : > { %s5908_s10 = smov 64   ;;  %s5909_s15 = smov 4  }
  0x6a   : > { %s7457_s13 = sld [smem:[#allocation52_spill]]  ;;  %s5910_s1 = smov [#allocation10]  }
  0x6b   : > { %s671_s24 = sshll.u32 %s5910_s1, 4  ;;  %s5911_s18 = smov [#allocation13]   ;;  %s672_s24 = int_to_ptr.vmem [resolvable:$true] %s671_s24 }
  0x6c   : > { %s700_s21 = sshll.u32 %s5911_s18, 4  ;;  %s5660_s28 = scalar_lea.vmem %s672_s24, 2048  ;;  %s701_s21 = int_to_ptr.vmem [resolvable:$true] %s700_s21 }
  0x6d   : > { %p5661_p0 = scmp.ne.s32.totalorder %s672_s24, %s5660_s28  ;;  %p5668_p6 = scmp.lt.s32.totalorder %s672_s24, %s672_s24 }
  0x6e   : > { %p5669_p9 = scmp.lt.s32.totalorder %s5660_s28, %s5660_s28 }
  0x6f   : > { %p5663_p1 = pnand %p5661_p0, %p6190_p11 }
  0x70   : > { %5058 = dma.hbm_to_vmem [thread:$0]  (!%p6184_p7), %s7457_s13, 2048, %s643_s20, [#allocation6], %s5908_s10, %s5908_s10, %s5909_s15  }
  0x71   : > { %p5664_p2 = pneg %p5663_p1  ;;  %p5670_p4 = por %p5669_p9, %p5668_p6 }
  0x73   : > { %p5671_p12 = pnand %p5670_p4, %p5664_p2 }
  0x75   : > { %5674 = shalt.err (!%p5671_p12)
}
  0x76   : > { %s7458_s17 = smov 8   ;;  %s7459_s23 = smov 128  }
  0x77   : > { %s7460_s16 = sld [smem:[#allocation55_spill]]  ;;  %s5686_s18 = scalar_lea.vmem %s701_s21, 2048 }
  0x78   : > { %p5687_p13 = scmp.ne.s32.totalorder %s701_s21, %s5686_s18  ;;  %p5694_p10 = scmp.lt.s32.totalorder %s701_s21, %s701_s21 }
  0x79   : > { %p5695_p6 = scmp.lt.s32.totalorder %s5686_s18, %s5686_s18 }
  0x7a   : > { %p5689_p0 = pnand %p5687_p13, %p6190_p11 }
  0x7b   : > { %p5696_p2 = por %p5695_p6, %p5694_p10 }
  0x7c   : > { %p5690_p1 = pneg %p5689_p0 }
  0x7d   : > { %5064 = dma.hbm_to_vmem [thread:$0]  (!%p6184_p7), %s7460_s16, 2048, %s672_s24, [#allocation9], %s7459_s23, %s7459_s23, %s7458_s17  }
  0x7e   : > { %p5697_p9 = pnand %p5696_p2, %p5690_p1 }
  0x80   : > { %5700 = shalt.err (!%p5697_p9)
}
  0x81   : > { %s7461_s19 = sld [smem:[#allocation58_spill]]  ;;  %p4403_p4 = scmp.ge.s32.totalorder %s5901_s29, 4 }
  0x83   : > { %713 = sbr.rel (%p4403_p4) target bundleno = 147 (0x93), region = 84 }
  0x87   : > { %5070 = dma.hbm_to_vmem [thread:$0]  (!%p6184_p7), %s7461_s19, 2048, %s701_s21, [#allocation12], %s5908_s10, %s5908_s10, %s5909_s15  }
  0x88   : > { %744 = sbr.rel (!%p6123_p3) target bundleno = 147 (0x93), region = 100  ;;  %s746_s11 = sand.u32 (%p6123_p3), 1, %s5881_s2  }
  0x89   : > { %s4405_s17 = sshll.u32 (%p6123_p3), %s5893_s7, 2  ;;  %s4404_s24 = sshll.u32 (%p6123_p3), %s746_s11, 3 }
  0x8a   : > { %s7462_s20 = sld [smem:[#allocation43_spill]] (%p6123_p3)  ;;  %s748_s18 = scalar_lea.vmem (%p6123_p3), [#allocation4], %s4404_s24 }
  0x90   : > { %s750_s22 = scalar_lea.vmem %s7462_s20, %s4405_s17 }
  0x91   : > { %v767_v0 = vld [vmem:[%s750_s22] sm:$0xf]  ;;  %v769_v1 = vld [vmem:[%s750_s22 + $0x8] sm:$0xf] }
  0x92   : > { %768 = vst [vmem:[%s748_s18] sm:$0xf] %v767_v0  ;;  %770 = vst [vmem:[%s748_s18 + $0x4] sm:$0xf] %v769_v1 }
  0x93 PF: > { %801 = sbr.rel (%p6175_p8) target bundleno = 2016 (0x7e0), region = 141  ;;  %s804_s15 = sand.u32 (!%p6175_p8), 1, %s5877_s26  }
  0x94   : > { %s6255_s0 = sshll.u32 (!%p6175_p8), %s804_s15, 3  ;;  %p7463_p3 = scmp.eq.s32.totalorder (!%p6175_p8), %s6109_s3, 0 }
  0x98   : > { %5832 = dma.done.wait (%p7463_p3), [#allocation6], 2048   ;;  %p7464_p10 = pmov %p7463_p3 }
  0x99   : > { %p7465_p13 = pmov %p7463_p3 }
  0x9a   : > { %5834 = vsyncadd (%p7464_p10), [#allocation6], 4294965248 }
  0x9b   : > { %5836 = dma.done.wait (%p7465_p13), [#allocation9], 4096   ;;  %p7466_p7 = pmov %p7463_p3 }
  0x9c   : > { %p7467_p8 = pmov %p7463_p3 }
  0x9d   : > { %5838 = vsyncadd (%p7466_p7), [#allocation9], 4294963200 }
  0x9e   : > { %5840 = dma.done.wait (%p7467_p8), [#allocation12], 4096   ;;  %p7468_p11 = pmov %p7463_p3 }
  0x9f   : > { %s7395_s26 = sand.u32 1, %s5869_s5   ;;  %s905_s14 = sand.u32 1, %s5857_s30  }
  0xa0   : > { %5842 = vsyncadd (%p7468_p11), [#allocation12], 4294963200  ;;  %s4413_s21 = sshll.u32 %s7395_s26, 7  ;;  %s4414_s28 = sshll.u32 %s905_s14, 4 }
  0xa1   : > { %s6275_s1 = sshll.u32 %s5885_s6, 4  ;;  %p915_p12 = scmp.lt.s32.totalorder %s5889_s27, 1 }
  0xa2   : > { %p917_p0 = scmp.lt.s32.totalorder %s6275_s1, 31  ;;  %s7469_s18 = sld [smem:[#allocation41_spill]] }
  0xa3   : > { %s6280_s11 = scalar_select %p915_p12, %s5889_s27, 1 }
  0xa4   : > { %s918_s17 = scalar_select %p917_p0, %s6275_s1, 31 }
  0xa5   : > { %s5028_s24 = smul.u32 96, %s6280_s11  ;;  %s4711_s23 = sshll.u32 %s6280_s11, 3 }
  0xa6   : > { %s5027_s4 = smul.u32 3, %s918_s17  ;;  %s7470_s13 = sld [smem:[#allocation42_spill]] }
  0xa7   : > { %s7471_s25 = sld [smem:[#allocation40_spill]]  ;;  %s6299_s9 = scalar_lea.vmem [#allocation14], %s4413_s21 }
  0xa8   : > { %s6288_s15 = scalar_lea.vmem %s7469_s18, %s4711_s23  ;;  %s921_s19 = sadd.s32 %s5028_s24, %s5027_s4 }
  0xa9   : > { %s4416_s7 = sshll.u32 %s921_s19, 2  ;;  %s6301_s5 = scalar_lea.vmem [#allocation15], %s4414_s28 }
  0xaa   : > { %s6303_s17 = scalar_lea.vmem [#allocation17], %s905_s14  ;;  %p4419_p1 = scmp.ne.s32.totalorder %s5885_s6, 0 }
  0xac   : > { %s932_s16 = scalar_lea.vmem %s7470_s13, %s6280_s11  ;;  %938 = sbr.rel (%p4419_p1) target bundleno = 180 (0xb4), region = 169 }
  0xad   : > { %s6297_s29 = scalar_lea.vmem %s7471_s25, %s4416_s7 }
  0xb1   : > { %v5912_v2 = vmov 0.0  }
  0xb2   : > { %939 = vst [vmem:[#allocation2] sm:$0xff] %v5912_v2  ;;  %940 = vst [vmem:[#allocation2 + $0x8] sm:$0xff] %v5912_v2 }
  0xb3   : > { %941 = vst [vmem:[#allocation3] sm:$0x1] %v5912_v2 }
  0xb4 PF: > { %s7472_s10 = sld [smem:[#allocation45_spill]]  ;;  %v5913_v4 = vmov 0.0   ;;  %vm5914_vm0 = vmmov 0   ;;  %v5915_v8 = vmov 0   ;;  %v6400_v31 = vld [vmem:[%s932_s16] sm:$0x1] }
  0xb5   : > { %4931 = vmatprep.subr.bf16.mxu1 %v5913_v4  ;;  %4947 = vmatprep.mubr.msk.bf16.mxu1 %vm5914_vm0, %v5913_v4  ;;  %s7473_s30 = sld [smem:[#allocation44_spill]]  ;;  %v6496_v62 = vld [vmem:[%s6297_s29 + $0x8] ss:$12 sps:$4 sm:$0xff]   ;;  %vm2528_vm1 = vcmask 523264   ;;  %s7478_s26 = scalar_lea.vmem [#allocation4], %s6255_s0 }
  0xb6   : > { %1168 = vmatprep.mubr.bf16.mxu0 %v5915_v8  ;;  %s7476_s18 = sld [smem:[#allocation47_spill]]  ;;  %p4570_p6 = scmp.ne.s32.totalorder %s5885_s6, 1 }
  0xb7   : > { %s7477_s25 = sld [smem:[#allocation46_spill]] }
  0xb8   : > { %s7479_s24 = sld [smem:[#allocation50_spill]] (!%p4570_p6) }
  0xb9   : > { %s7483_s6 = sld [smem:[#allocation48_spill]] (!%p4570_p6) }
  0xba   : > { %v5213_v3 = vld [vmem:[%s7472_s10 + $0xac] ss:$12 sps:$4 sm:$0xff]   ;;  %v5215_v5 = vld [vmem:[%s7472_s10 + $0xb0] ss:$12 sps:$4 sm:$0xff]   ;;  %v5216_v6 = vld [vmem:[%s7472_s10 + $0xa8] ss:$12 sps:$4 sm:$0xff]  }
  0xbb   : > { %1136 = vmatprep.subr.bf16.mxu0 %v5213_v3  ;;  %4932 = vmatpush3.bf16.msra.mxu1 %v5215_v5  ;;  %v5217_v7 = vld [vmem:[%s7472_s10 + $0x94] ss:$12 sps:$4 sm:$0xff]   ;;  %v5219_v9 = vld [vmem:[%s7472_s10 + $0x98] ss:$12 sps:$4 sm:$0xff]   ;;  %v5220_v10 = vld [vmem:[%s7472_s10 + $0x90] ss:$12 sps:$4 sm:$0xff]   ;;  %s7474_s14 = smov %s7473_s30 }
  0xbc   : > { %1137 = vmatpush1.bf16.msra.mxu0 %v5216_v6  ;;  %4933 = vmatprep.subr.bf16.mxu1 %v5913_v4  ;;  %v5221_v11 = vld [vmem:[%s7472_s10 + $0x7c] ss:$12 sps:$4 sm:$0xff]   ;;  %v5223_v12 = vld [vmem:[%s7472_s10 + $0x80] ss:$12 sps:$4 sm:$0xff]   ;;  %v5224_v13 = vld [vmem:[%s7472_s10 + $0x78] ss:$12 sps:$4 sm:$0xff]  }
  0xbd   : > { %1138 = vmatprep.subr.bf16.mxu0 %v5217_v7  ;;  %v5225_v14 = vld [vmem:[%s7472_s10 + $0x64] ss:$12 sps:$4 sm:$0xff]   ;;  %v5227_v15 = vld [vmem:[%s7472_s10 + $0x68] ss:$12 sps:$4 sm:$0xff]   ;;  %v5228_v16 = vld [vmem:[%s7472_s10 + $0x60] ss:$12 sps:$4 sm:$0xff]  }
  0xbe   : > { %v5229_v17 = vld [vmem:[%s7472_s10 + $0x4c] ss:$12 sps:$4 sm:$0xff]   ;;  %v5231_v18 = vld [vmem:[%s7472_s10 + $0x50] ss:$12 sps:$4 sm:$0xff]   ;;  %v5232_v19 = vld [vmem:[%s7472_s10 + $0x48] ss:$12 sps:$4 sm:$0xff]   ;;  %s7480_s23 = smov (!%p4570_p6), %s7479_s24 }
  0xbf   : > { %4934 = vmatpush3.bf16.msra.mxu1 %v5219_v9  ;;  %v5233_v20 = vld [vmem:[%s7472_s10 + $0x34] ss:$12 sps:$4 sm:$0xff]   ;;  %v5235_v21 = vld [vmem:[%s7472_s10 + $0x38] ss:$12 sps:$4 sm:$0xff]   ;;  %v5236_v22 = vld [vmem:[%s7472_s10 + $0x30] ss:$12 sps:$4 sm:$0xff]   ;;  %s7484_s11 = smov (!%p4570_p6), %s7483_s6 }
  0xc0   : > { %1139 = vmatpush1.bf16.msra.mxu0 %v5220_v10  ;;  %4935 = vmatprep.subr.bf16.mxu1 %v5913_v4  ;;  %v5237_v23 = vld [vmem:[%s7472_s10 + $0x1c] ss:$12 sps:$4 sm:$0xff]   ;;  %v5239_v24 = vld [vmem:[%s7472_s10 + $0x20] ss:$12 sps:$4 sm:$0xff]   ;;  %v5240_v25 = vld [vmem:[%s7472_s10 + $0x18] ss:$12 sps:$4 sm:$0xff]  }
  0xc1   : > { %1140 = vmatprep.subr.bf16.mxu0 %v5221_v11  ;;  %v5241_v26 = vld [vmem:[%s7472_s10 + $0x4] ss:$12 sps:$4 sm:$0xff]   ;;  %v5243_v27 = vld [vmem:[%s7472_s10 + $0x8] ss:$12 sps:$4 sm:$0xff]   ;;  %v5244_v28 = vld [vmem:[%s7472_s10] ss:$12 sps:$4 sm:$0xff]  }
  0xc2   : > { %v5247_v29 = vld [vmem:[%s7473_s30 + $0x22c] ss:$12 sps:$4 sm:$0xff]   ;;  %v5245_v32 = vld [vmem:[%s7474_s14 + $0x228] ss:$12 sps:$4 sm:$0xff]   ;;  %v5251_v36 = vld [vmem:[%s7474_s14 + $0x210] ss:$12 sps:$4 sm:$0xff]  }
  0xc3   : > { %4936 = vmatpush3.bf16.msra.mxu1 %v5223_v12  ;;  %v5250_v30 = vld [vmem:[%s7474_s14 + $0xac] ss:$12 sps:$4 sm:$0xff]   ;;  %v5248_v33 = vld [vmem:[%s7474_s14 + $0xa8] ss:$12 sps:$4 sm:$0xff]   ;;  %v5254_v37 = vld [vmem:[%s7474_s14 + $0x90] ss:$12 sps:$4 sm:$0xff]  }
  0xc4   : > { %1141 = vmatpush1.bf16.msra.mxu0 %v5224_v13  ;;  %4937 = vmatprep.subr.bf16.mxu1 %v5913_v4  ;;  %v5253_v34 = vld [vmem:[%s7474_s14 + $0x214] ss:$12 sps:$4 sm:$0xff]   ;;  %v5259_v38 = vld [vmem:[%s7474_s14 + $0x1fc] ss:$12 sps:$4 sm:$0xff]   ;;  %v5257_v40 = vld [vmem:[%s7474_s14 + $0x1f8] ss:$12 sps:$4 sm:$0xff]  }
  0xc5   : > { %1142 = vmatprep.subr.bf16.mxu0 %v5225_v14  ;;  %v5256_v35 = vld [vmem:[%s7474_s14 + $0x94] ss:$12 sps:$4 sm:$0xff]   ;;  %v5262_v39 = vld [vmem:[%s7474_s14 + $0x7c] ss:$12 sps:$4 sm:$0xff]   ;;  %v5260_v41 = vld [vmem:[%s7474_s14 + $0x78] ss:$12 sps:$4 sm:$0xff]  }
  0xc6   : > { %v5265_v42 = vld [vmem:[%s7474_s14 + $0x1e4] ss:$12 sps:$4 sm:$0xff]   ;;  %v5263_v44 = vld [vmem:[%s7474_s14 + $0x1e0] ss:$12 sps:$4 sm:$0xff]   ;;  %v5269_v48 = vld [vmem:[%s7474_s14 + $0x1c8] ss:$12 sps:$4 sm:$0xff]  }
  0xc7   : > { %4938 = vmatpush3.bf16.msra.mxu1 %v5227_v15  ;;  %v5268_v43 = vld [vmem:[%s7474_s14 + $0x64] ss:$12 sps:$4 sm:$0xff]   ;;  %v5266_v45 = vld [vmem:[%s7474_s14 + $0x60] ss:$12 sps:$4 sm:$0xff]   ;;  %v5272_v49 = vld [vmem:[%s7474_s14 + $0x48] ss:$12 sps:$4 sm:$0xff]  }
  0xc8   : > { %1143 = vmatpush1.bf16.msra.mxu0 %v5228_v16  ;;  %4939 = vmatprep.subr.bf16.mxu1 %v5913_v4  ;;  %v5271_v46 = vld [vmem:[%s7474_s14 + $0x1cc] ss:$12 sps:$4 sm:$0xff]   ;;  %v5277_v50 = vld [vmem:[%s7474_s14 + $0x1b4] ss:$12 sps:$4 sm:$0xff]   ;;  %v5275_v52 = vld [vmem:[%s7474_s14 + $0x1b0] ss:$12 sps:$4 sm:$0xff]  }
  0xc9   : > { %1144 = vmatprep.subr.bf16.mxu0 %v5229_v17  ;;  %v5274_v47 = vld [vmem:[%s7474_s14 + $0x4c] ss:$12 sps:$4 sm:$0xff]   ;;  %v5280_v51 = vld [vmem:[%s7474_s14 + $0x34] ss:$12 sps:$4 sm:$0xff]   ;;  %v5278_v53 = vld [vmem:[%s7474_s14 + $0x30] ss:$12 sps:$4 sm:$0xff]  }
  0xca   : > { %v5283_v54 = vld [vmem:[%s7474_s14 + $0x19c] ss:$12 sps:$4 sm:$0xff]   ;;  %v5281_v56 = vld [vmem:[%s7474_s14 + $0x198] ss:$12 sps:$4 sm:$0xff]   ;;  %v5287_v60 = vld [vmem:[%s7474_s14 + $0x180] ss:$12 sps:$4 sm:$0xff]  }
  0xcb   : > { %4940 = vmatpush3.bf16.msra.mxu1 %v5231_v18  ;;  %v5286_v55 = vld [vmem:[%s7474_s14 + $0x1c] ss:$12 sps:$4 sm:$0xff]   ;;  %v5284_v57 = vld [vmem:[%s7474_s14 + $0x18] ss:$12 sps:$4 sm:$0xff]   ;;  %v5290_v61 = vld [vmem:[%s7474_s14] ss:$12 sps:$4 sm:$0xff]  }
  0xcc   : > { %1145 = vmatpush1.bf16.msra.mxu0 %v5232_v19  ;;  %4941 = vmatprep.subr.bf16.mxu1 %v5913_v4  ;;  %v5289_v58 = vld [vmem:[%s7474_s14 + $0x184] ss:$12 sps:$4 sm:$0xff]   ;;  %v5297_v0 = vld [vmem:[%s7474_s14 + $0x16c] ss:$12 sps:$4 sm:$0xff]   ;;  %v5295_v1 = vld [vmem:[%s7474_s14 + $0x168] ss:$12 sps:$4 sm:$0xff]  }
  0xcd   : > { %1146 = vmatprep.subr.bf16.mxu0 %v5233_v20  ;;  %v5292_v59 = vld [vmem:[%s7474_s14 + $0x4] ss:$12 sps:$4 sm:$0xff]   ;;  %v5301_v6 = vld [vmem:[%s7474_s14 + $0x154] ss:$12 sps:$4 sm:$0xff]   ;;  %v5306_v11 = vld [vmem:[%s7474_s14 + $0x13c] ss:$12 sps:$4 sm:$0xff]  }
  0xce   : > { %v5294_v63 = vld [vmem:[%s7474_s14 + $0x170] ss:$12 sps:$4 sm:$0xff]   ;;  %v5303_v3 = vld [vmem:[%s7474_s14 + $0x158] ss:$12 sps:$4 sm:$0xff]   ;;  %v5312_v10 = vld [vmem:[%s7474_s14 + $0x140] ss:$12 sps:$4 sm:$0xff]  }
  0xcf   : > { %4942 = vmatpush3.bf16.msra.mxu1 %v5235_v21  ;;  %v5298_v2 = vld [vmem:[%s7474_s14 + $0xb0] ss:$12 sps:$4 sm:$0xff]   ;;  %v5307_v9 = vld [vmem:[%s7474_s14 + $0x98] ss:$12 sps:$4 sm:$0xff]   ;;  %v6535_v12 = vld [vmem:[%s6297_s29 + $0x20] ss:$12 sps:$4 sm:$0xff]  }
  0xd0   : > { %1147 = vmatpush1.bf16.msra.mxu0 %v5236_v22  ;;  %4943 = vmatprep.subr.bf16.mxu1 %v5913_v4  ;;  %v6514_v5 = vld [vmem:[%s6297_s29 + $0x4] ss:$12 sps:$4 sm:$0xff]   ;;  %v5316_v14 = vld [vmem:[%s7474_s14 + $0x80] ss:$12 sps:$4 sm:$0xff]   ;;  %v5321_v15 = vld [vmem:[%s7474_s14 + $0x128] ss:$12 sps:$4 sm:$0xff]  }
  0xd1   : > { %1148 = vmatprep.subr.bf16.mxu0 %v5237_v23  ;;  %v5299_v7 = vld [vmem:[%s7474_s14 + $0x150] ss:$12 sps:$4 sm:$0xff]   ;;  %v5304_v13 = vld [vmem:[%s7474_s14 + $0x138] ss:$12 sps:$4 sm:$0xff]   ;;  %v5308_v17 = vld [vmem:[%s7474_s14 + $0x120] ss:$12 sps:$4 sm:$0xff]  }
  0xd2   : > { %v5310_v16 = vld [vmem:[%s7474_s14 + $0x124] ss:$12 sps:$4 sm:$0xff]   ;;  %v5325_v18 = vld [vmem:[%s7474_s14 + $0x68] ss:$12 sps:$4 sm:$0xff]   ;;  %v5315_v21 = vld [vmem:[%s7474_s14 + $0x10c] ss:$12 sps:$4 sm:$0xff]  }
  0xd3   : > { %4944 = vmatpush3.bf16.msra.mxu1 %v5239_v24  ;;  %v6558_v19 = vld [vmem:[%s6297_s29 + $0x38] ss:$12 sps:$4 sm:$0xff]   ;;  %v5333_v20 = vld [vmem:[%s7474_s14 + $0x110] ss:$12 sps:$4 sm:$0xff]   ;;  %v5313_v22 = vld [vmem:[%s7474_s14 + $0x108] ss:$12 sps:$4 sm:$0xff]  }
  0xd4   : > { %1149 = vmatpush1.bf16.msra.mxu0 %v5240_v25  ;;  %4945 = vmatprep.subr.bf16.mxu1 %v5913_v4  ;;  %v5334_v23 = vld [vmem:[%s7474_s14 + $0x50] ss:$12 sps:$4 sm:$0xff]   ;;  %v5339_v24 = vld [vmem:[%s7474_s14 + $0xf8] ss:$12 sps:$4 sm:$0xff]   ;;  %v5319_v25 = vld [vmem:[%s7474_s14 + $0xf4] ss:$12 sps:$4 sm:$0xff]  }
  0xd5   : > { %1150 = vmatprep.subr.bf16.mxu0 %v5241_v26  ;;  %v5317_v26 = vld [vmem:[%s7474_s14 + $0xf0] ss:$12 sps:$4 sm:$0xff]   ;;  %s7485_s28 = sld [smem:[#allocation51_spill]] (!%p4570_p6) }
  0xd6   : > { %s7486_s4 = sld [smem:[#allocation53_spill]] (!%p4570_p6) }
  0xd7   : > { %4946 = vmatpush3.bf16.msra.mxu1 %v5243_v27  ;;  %v5341_v27 = vld [vmem:[%s7474_s14 + $0x38] ss:$12 sps:$4 sm:$0xff]   ;;  %s7487_s22 = sld [smem:[#allocation57_spill]] (!%p4570_p6) }
  0xd8   : > { %1151 = vmatpush1.bf16.msra.mxu0 %v5244_v28  ;;  %1982 = vmatprep.subr.bf16.mxu1 %v5247_v29  ;;  %v5346_v28 = vld [vmem:[%s7474_s14 + $0xe0] ss:$12 sps:$4 sm:$0xff]   ;;  %v5324_v29 = vld [vmem:[%s7474_s14 + $0xdc] ss:$12 sps:$4 sm:$0xff]   ;;  %s7488_s13 = sld [smem:[#allocation59_spill]] (!%p4570_p6) }
  0xd9   : > { %1869 = vmatprep.subr.bf16.mxu0 %v5250_v30  ;;  %v6593_v30 = vld [vmem:[%s6297_s29 + $0x50] ss:$12 sps:$4 sm:$0xff]  }
  0xda   : > { %4948 = vmatmul.mubr.bf16.vlgmr.msra.gmra.mxu1 %v6400_v31 }
  0xdb   : > { %1169 = vmatmul.mubr.bf16.vlgmr.msra.gmra.mxu0 %v6400_v31  ;;  %1983 = vmatpush1.bf16.msra.mxu1 %v5245_v32  ;;  %v5322_v32 = vld [vmem:[%s7474_s14 + $0xd8] ss:$12 sps:$4 sm:$0xff]  }
  0xdc   : > { %1870 = vmatpush1.bf16.msra.mxu0 %v5248_v33  ;;  %1984 = vmatprep.subr.bf16.mxu1 %v5253_v34  ;;  %v5348_v33 = vld [vmem:[%s7474_s14 + $0x20] ss:$12 sps:$4 sm:$0xff]   ;;  %v5353_v34 = vld [vmem:[%s7474_s14 + $0xc8] ss:$12 sps:$4 sm:$0xff]  }
  0xdd   : > { %1871 = vmatprep.subr.bf16.mxu0 %v5256_v35  ;;  %2014 = vmatprep.mubr.bf16.mxu1 %v5915_v8  ;;  %v5328_v35 = vld [vmem:[%s7474_s14 + $0xc4] ss:$12 sps:$4 sm:$0xff]  }
  0xde   : > { %1901 = vmatprep.mubr.bf16.mxu0 %v6514_v5 }
  0xdf   : > { %1985 = vmatpush1.bf16.msra.mxu1 %v5251_v36  ;;  %v5355_v36 = vld [vmem:[%s7474_s14 + $0x8] ss:$12 sps:$4 sm:$0xff]  }
  0xe0   : > { %1872 = vmatpush1.bf16.msra.mxu0 %v5254_v37  ;;  %1986 = vmatprep.subr.bf16.mxu1 %v5259_v38  ;;  %v5326_v37 = vld [vmem:[%s7474_s14 + $0xc0] ss:$12 sps:$4 sm:$0xff]  }
  0xe1   : > { %1873 = vmatprep.subr.bf16.mxu0 %v5262_v39  ;;  %v5329_v38 = vld [vmem:[%s6297_s29] ss:$12 sps:$4 sm:$0xff]   ;;  %v6617_v39 = vld [vmem:[%s6297_s29 + $0x68] ss:$12 sps:$4 sm:$0xff]  }
  0xe3   : > { %1987 = vmatpush1.bf16.msra.mxu1 %v5257_v40  ;;  %v5335_v40 = vld [vmem:[%s7474_s14 + $0x230] ss:$12 sps:$4 sm:$0xff]  }
  0xe4   : > { %1874 = vmatpush1.bf16.msra.mxu0 %v5260_v41  ;;  %1988 = vmatprep.subr.bf16.mxu1 %v5265_v42  ;;  %v5336_v41 = vld [vmem:[%s6297_s29 + $0x1c] ss:$12 sps:$4 sm:$0xff]   ;;  %v5342_v42 = vld [vmem:[%s7474_s14 + $0x218] ss:$12 sps:$4 sm:$0xff]  }
  0xe5   : > { %1875 = vmatprep.subr.bf16.mxu0 %v5268_v43  ;;  %v6629_v43 = vld [vmem:[%s6297_s29 + $0x80] ss:$12 sps:$4 sm:$0xff]  }
  0xe7   : > { %1989 = vmatpush1.bf16.msra.mxu1 %v5263_v44  ;;  %v5349_v44 = vld [vmem:[%s7474_s14 + $0x200] ss:$12 sps:$4 sm:$0xff]  }
  0xe8   : > { %1876 = vmatpush1.bf16.msra.mxu0 %v5266_v45  ;;  %1990 = vmatprep.subr.bf16.mxu1 %v5271_v46  ;;  %v5340_v45 = vld [vmem:[%s6297_s29 + $0x18] ss:$12 sps:$4 sm:$0xff]   ;;  %v5343_v46 = vld [vmem:[%s6297_s29 + $0x34] ss:$12 sps:$4 sm:$0xff]  }
  0xe9   : > { %1877 = vmatprep.subr.bf16.mxu0 %v5274_v47  ;;  %v5356_v47 = vld [vmem:[%s7474_s14 + $0x1e8] ss:$12 sps:$4 sm:$0xff]  }
  0xeb   : > { %1991 = vmatpush1.bf16.msra.mxu1 %v5269_v48  ;;  %v5360_v48 = vld [vmem:[%s7474_s14 + $0x1d0] ss:$12 sps:$4 sm:$0xff]  }
  0xec   : > { %1878 = vmatpush1.bf16.msra.mxu0 %v5272_v49  ;;  %1992 = vmatprep.subr.bf16.mxu1 %v5277_v50  ;;  %v6645_v49 = vld [vmem:[%s6297_s29 + $0x98] ss:$12 sps:$4 sm:$0xff]   ;;  %v5347_v50 = vld [vmem:[%s6297_s29 + $0x30] ss:$12 sps:$4 sm:$0xff]  }
  0xed   : > { %1879 = vmatprep.subr.bf16.mxu0 %v5280_v51  ;;  %v5350_v51 = vld [vmem:[%s6297_s29 + $0x4c] ss:$12 sps:$4 sm:$0xff]  }
  0xef   : > { %1993 = vmatpush1.bf16.msra.mxu1 %v5275_v52  ;;  %v5364_v52 = vld [vmem:[%s7474_s14 + $0x1b8] ss:$12 sps:$4 sm:$0xff]  }
  0xf0   : > { %1880 = vmatpush1.bf16.msra.mxu0 %v5278_v53  ;;  %1994 = vmatprep.subr.bf16.mxu1 %v5283_v54  ;;  %v5368_v53 = vld [vmem:[%s7474_s14 + $0x1a0] ss:$12 sps:$4 sm:$0xff]   ;;  %v6658_v54 = vld [vmem:[%s6297_s29 + $0xb0] ss:$12 sps:$4 sm:$0xff]  }
  0xf1   : > { %1881 = vmatprep.subr.bf16.mxu0 %v5286_v55  ;;  %v5354_v55 = vld [vmem:[%s6297_s29 + $0x48] ss:$12 sps:$4 sm:$0xff]  }
  0xf3   : > { %1995 = vmatpush1.bf16.msra.mxu1 %v5281_v56  ;;  %v5357_v56 = vld [vmem:[%s6297_s29 + $0x64] ss:$12 sps:$4 sm:$0xff]  }
  0xf4   : > { %1882 = vmatpush1.bf16.msra.mxu0 %v5284_v57  ;;  %1996 = vmatprep.subr.bf16.mxu1 %v5289_v58  ;;  %v5359_v57 = vld [vmem:[%s6297_s29 + $0x60] ss:$12 sps:$4 sm:$0xff]   ;;  %v5361_v58 = vld [vmem:[%s6297_s29 + $0x7c] ss:$12 sps:$4 sm:$0xff]  }
  0xf5   : > { %1883 = vmatprep.subr.bf16.mxu0 %v5292_v59  ;;  %v5363_v59 = vld [vmem:[%s6297_s29 + $0x78] ss:$12 sps:$4 sm:$0xff]  }
  0xf7   : > { %1997 = vmatpush1.bf16.msra.mxu1 %v5287_v60  ;;  %v5365_v60 = vld [vmem:[%s6297_s29 + $0x94] ss:$12 sps:$4 sm:$0xff]  }
  0xf8   : > { %1884 = vmatpush1.bf16.msra.mxu0 %v5290_v61  ;;  %4722 = vmatprep.subr.bf16.mxu1 %v5294_v63  ;;  %v5367_v61 = vld [vmem:[%s6297_s29 + $0x90] ss:$12 sps:$4 sm:$0xff]   ;;  %v5369_v63 = vld [vmem:[%s6297_s29 + $0xac] ss:$12 sps:$4 sm:$0xff]  }
  0xf9   : > { %1885 = vmatprep.subr.bf16.mxu0 %v5297_v0  ;;  %v5373_v0 = vld [vmem:[%s7476_s18 + $0x78] sm:$0xff]  }
  0xfa   : > { %2015 = vmatmul.mubr.bf16.vlgmr.msra.gmra.mxu1 %v6496_v62 }
  0xfb   : > { %4723 = vmatpush3.bf16.msra.mxu1 %v5298_v2  ;;  %2024 = vmatprep.mubr.bf16.mxu1 %v5915_v8  ;;  %v5374_v2 = vld [vmem:[%s7476_s18 + $0x38] sm:$0xff]  }
  0xfc   : > { %1886 = vmatpush2.bf16.msra.mxu0 %v5295_v1  ;;  %4724 = vmatprep.subr.bf16.mxu1 %v5303_v3  ;;  %v5371_v1 = vld [vmem:[%s6297_s29 + $0xa8] ss:$12 sps:$4 sm:$0xff]  }
  0xfd   : > { %1887 = vmatprep.subr.bf16.mxu0 %v5301_v6  ;;  %v5375_v3 = vld [vmem:[%s7476_s18 + $0x70] sm:$0xff]   ;;  %v5378_v6 = vld [vmem:[%s7476_s18 + $0x28] sm:$0xff]  }
  0xff   : > { %4725 = vmatpush3.bf16.msra.mxu1 %v5307_v9  ;;  %v5380_v9 = vld [vmem:[%s7476_s18 + $0x20] sm:$0xff]  }
 0x100   : > { %1888 = vmatpush2.bf16.msra.mxu0 %v5299_v7  ;;  %4726 = vmatprep.subr.bf16.mxu1 %v5312_v10  ;;  %v5379_v7 = vld [vmem:[%s7476_s18 + $0x60] sm:$0xff]   ;;  %v5381_v10 = vld [vmem:[%s7476_s18 + $0x58] sm:$0xff]  }
 0x101   : > { %1889 = vmatprep.subr.bf16.mxu0 %v5306_v11  ;;  %v5382_v11 = vld [vmem:[%s7476_s18 + $0x18] sm:$0xff]  }
 0x102   : > { %2025 = vmatmul.mubr.bf16.gmra.mxu1 %v6535_v12 }
 0x103   : > { %2034 = vmatprep.mubr.bf16.mxu1 %v5915_v8  ;;  %4727 = vmatpush3.bf16.msra.mxu1 %v5316_v14  ;;  %v5385_v14 = vld [vmem:[%s7476_s18 + $0x48] sm:$0xff]  }
 0x104   : > { %1890 = vmatpush2.bf16.msra.mxu0 %v5304_v13  ;;  %4728 = vmatprep.subr.bf16.mxu1 %v5321_v15  ;;  %v5384_v13 = vld [vmem:[%s7476_s18 + $0x10] sm:$0xff]   ;;  %v5386_v15 = vld [vmem:[%s7476_s18 + $0x8] sm:$0xff]  }
 0x105   : > { %1891 = vmatprep.subr.bf16.mxu0 %v5310_v16  ;;  %v5389_v16 = vld [vmem:[%s7476_s18 + $0x98] sm:$0xff]  }
 0x107   : > { %4729 = vmatpush3.bf16.msra.mxu1 %v5325_v18  ;;  %v5388_v18 = vld [vmem:[%s7476_s18] sm:$0xff]  }
 0x108   : > { %1892 = vmatpush2.bf16.msra.mxu0 %v5308_v17  ;;  %4730 = vmatprep.subr.bf16.mxu1 %v5333_v20  ;;  %v5387_v17 = vld [vmem:[%s7476_s18 + $0x40] sm:$0xff]   ;;  %v5391_v20 = vld [vmem:[%s7476_s18 + $0x88] sm:$0xff]  }
 0x109   : > { %1893 = vmatprep.subr.bf16.mxu0 %v5315_v21 }
 0x10a   : > { %2035 = vmatmul.mubr.bf16.gmra.mxu1 %v6558_v19 }
 0x10b   : > { %2044 = vmatprep.mubr.bf16.mxu1 %v5915_v8  ;;  %4731 = vmatpush3.bf16.msra.mxu1 %v5334_v23 }
 0x10c   : > { %1894 = vmatpush2.bf16.msra.mxu0 %v5313_v22  ;;  %4732 = vmatprep.subr.bf16.mxu1 %v5339_v24 }
 0x10d   : > { %1895 = vmatprep.subr.bf16.mxu0 %v5319_v25 }
 0x10f   : > { %4733 = vmatpush3.bf16.msra.mxu1 %v5341_v27 }
 0x110   : > { %1896 = vmatpush2.bf16.msra.mxu0 %v5317_v26  ;;  %4734 = vmatprep.subr.bf16.mxu1 %v5346_v28  ;;  %v5392_v26 = vld [vmem:[%s7476_s18 + $0x80] sm:$0xff]  }
 0x111   : > { %1897 = vmatprep.subr.bf16.mxu0 %v5324_v29 }
 0x112   : > { %2045 = vmatmul.mubr.bf16.gmra.mxu1 %v6593_v30 }
 0x113   : > { %2054 = vmatprep.mubr.bf16.mxu1 %v5915_v8  ;;  %4735 = vmatpush3.bf16.msra.mxu1 %v5348_v33 }
 0x114   : > { %1898 = vmatpush2.bf16.msra.mxu0 %v5322_v32  ;;  %4736 = vmatprep.subr.bf16.mxu1 %v5353_v34 }
 0x115   : > { %1899 = vmatprep.subr.bf16.mxu0 %v5328_v35  ;;  %v5916_v35 = vmov 1966171168  }
 0x117   : > { %4737 = vmatpush3.bf16.msra.mxu1 %v5355_v36  ;;  %v1222_v36 = vunpack.c.l.s4 %v5916_v35 }
 0x118   : > { %1900 = vmatpush2.bf16.msra.mxu0 %v5326_v37  ;;  %4983 = vmatprep.subr.bf16.mxu1 %v5389_v16  ;;  %v1224_v37 = vlaneseq }
 0x119   : > { %4951 = vmatprep.subr.bf16.mxu0 %v5335_v40 }
 0x11a   : > { %2055 = vmatmul.mubr.bf16.gmra.mxu1 %v6617_v39 }
 0x11b   : > { %1902 = vmatmul.mubr.bf16.vlgmr.msra.gmra.mxu0 %v5329_v38  ;;  %2064 = vmatprep.mubr.bf16.mxu1 %v5915_v8 }
 0x11c   : > { %4952 = vmatpush3.bf16.msra.mxu0 %v5335_v40  ;;  %1911 = vmatprep.mubr.bf16.mxu0 %v5336_v41  ;;  %v1223_v40 = vunpack.c.0.s8 %v1222_v36 }
 0x11d   : > { %4953 = vmatprep.subr.bf16.mxu0 %v5342_v42 }
 0x120   : > { %4954 = vmatpush3.bf16.msra.mxu0 %v5342_v42 }
 0x121   : > { %4955 = vmatprep.subr.bf16.mxu0 %v5349_v44 }
 0x122   : > { %2065 = vmatmul.mubr.bf16.gmra.mxu1 %v6629_v43 }
 0x123   : > { %1912 = vmatmul.mubr.bf16.gmra.mxu0 %v5340_v45  ;;  %2074 = vmatprep.mubr.bf16.mxu1 %v5915_v8 }
 0x124   : > { %1921 = vmatprep.mubr.bf16.mxu0 %v5343_v46  ;;  %4956 = vmatpush3.bf16.msra.mxu0 %v5349_v44 }
 0x125   : > { %4957 = vmatprep.subr.bf16.mxu0 %v5356_v47 }
 0x128   : > { %4958 = vmatpush3.bf16.msra.mxu0 %v5356_v47 }
 0x129   : > { %4959 = vmatprep.subr.bf16.mxu0 %v5360_v48 }
 0x12a   : > { %2075 = vmatmul.mubr.bf16.gmra.mxu1 %v6645_v49 }
 0x12b   : > { %1922 = vmatmul.mubr.bf16.gmra.mxu0 %v5347_v50  ;;  %2084 = vmatprep.mubr.bf16.mxu1 %v5915_v8  ;;  %v5372_v8 = vld [vmem:[%s7474_s14 + $0x188] ss:$12 sps:$4 sm:$0xff]  }
 0x12c   : > { %1931 = vmatprep.mubr.bf16.mxu0 %v5350_v51  ;;  %4960 = vmatpush3.bf16.msra.mxu0 %v5360_v48 }
 0x12d   : > { %4961 = vmatprep.subr.bf16.mxu0 %v5364_v52 }
 0x130   : > { %4962 = vmatpush3.bf16.msra.mxu0 %v5364_v52 }
 0x131   : > { %4963 = vmatprep.subr.bf16.mxu0 %v5368_v53 }
 0x132   : > { %2085 = vmatmul.mubr.bf16.gmra.mxu1 %v6658_v54 }
 0x133   : > { %1932 = vmatmul.mubr.bf16.gmra.mxu0 %v5354_v55  ;;  %2127 = vmatprep.mubr.bf16.mxu1 %v6514_v5  ;;  %v5376_v5 = vld [vmem:[%s7476_s18 + $0x30] sm:$0xff]  }
 0x134   : > { %1941 = vmatprep.mubr.bf16.mxu0 %v5357_v56  ;;  %4964 = vmatpush3.bf16.msra.mxu0 %v5368_v53 }
 0x135   : > { %4965 = vmatprep.subr.bf16.mxu0 %v5372_v8 }
 0x138   : > { %4966 = vmatpush3.bf16.msra.mxu0 %v5372_v8 }
 0x139   : > { %4802 = vmatprep.subr.bf16.mxu0 %v5373_v0 }
 0x13a   : > { %2128 = vmatmul.mubr.bf16.vlgmr.msra.gmra.mxu1 %v5329_v38 }
 0x13b   : > { %1942 = vmatmul.mubr.bf16.gmra.mxu0 %v5359_v57  ;;  %2135 = vmatprep.mubr.bf16.mxu1 %v5336_v41  ;;  %v6745_v41 = vshrl.u32 %v1224_v37, 7 }
 0x13c   : > { %1951 = vmatprep.mubr.bf16.mxu0 %v5361_v58  ;;  %4984 = vmatpush3.bf16.msra.mxu1 %v5389_v16 }
 0x142   : > { %2136 = vmatmul.mubr.bf16.gmra.mxu1 %v5340_v45  ;;  %v6748_v45 = vsub.s32 %v1223_v40, %v6745_v41 }
 0x143   : > { %1952 = vmatmul.mubr.bf16.gmra.mxu0 %v5363_v59  ;;  %2143 = vmatprep.mubr.bf16.mxu1 %v5343_v46 }
 0x144   : > { %1961 = vmatprep.mubr.bf16.mxu0 %v5365_v60 }
 0x14a   : > { %2144 = vmatmul.mubr.bf16.gmra.mxu1 %v5347_v50 }
 0x14b   : > { %1962 = vmatmul.mubr.bf16.gmra.mxu0 %v5367_v61  ;;  %2151 = vmatprep.mubr.bf16.mxu1 %v5350_v51 }
 0x14c   : > { %1971 = vmatprep.mubr.bf16.mxu0 %v5369_v63 }
 0x152   : > { %2152 = vmatmul.mubr.bf16.gmra.mxu1 %v5354_v55 }
 0x153   : > { %1972 = vmatmul.mubr.bf16.gmra.mxu0 %v5371_v1  ;;  %2159 = vmatprep.mubr.bf16.mxu1 %v5357_v56  ;;  %v975_v56 = vld [vmem:[%s7477_s25] sm:$0x7] }
 0x154   : > { %4967 = vmatprep.mubr.bf16.mxu0 %v6496_v62  ;;  %v5377_v62 = vld [vmem:[%s7476_s18 + $0x68] sm:$0xff]  }
 0x15a   : > { %2160 = vmatmul.mubr.bf16.gmra.mxu1 %v5359_v57  ;;  %v6771_v57 = vsub.s32 1, %v6745_v41 }
 0x15b   : > { %4968 = vmatmul.mubr.bf16.vlgmr.msra.gmra.mxu0 %v6535_v12  ;;  %2167 = vmatprep.mubr.bf16.mxu1 %v5361_v58  ;;  %v5383_v12 = vld [vmem:[%s7476_s18 + $0x50] sm:$0xff]  }
 0x15c   : > { %4971 = vmatprep.mubr.bf16.mxu0 %v6558_v19  ;;  %4803 = vmatpush3.bf16.msra.mxu0 %v5374_v2  ;;  %v5390_v19 = vld [vmem:[%s7476_s18 + $0x90] sm:$0xff]  }
 0x15d   : > { %4804 = vmatprep.subr.bf16.mxu0 %v5375_v3  ;;  %4985 = vmatprep.subr.bf16.mxu1 %v5390_v19 }
 0x15e   : > { %4986 = vmatpush3.bf16.msra.mxu1 %v5390_v19 }
 0x15f   : > { %4987 = vmatprep.subr.bf16.mxu1 %v5391_v20 }
 0x160   : > { %4805 = vmatpush3.bf16.msra.mxu0 %v5376_v5 }
 0x161   : > { %4806 = vmatprep.subr.bf16.mxu0 %v5377_v62 }
 0x162   : > { %2168 = vmatmul.mubr.bf16.gmra.mxu1 %v5363_v59 }
 0x163   : > { %4972 = vmatmul.mubr.bf16.gmra.mxu0 %v6593_v30  ;;  %2175 = vmatprep.mubr.bf16.mxu1 %v5365_v60  ;;  %v6778_v60 = vsub.s32 0, %v6745_v41 }
 0x164   : > { %4975 = vmatprep.mubr.bf16.mxu0 %v6617_v39  ;;  %4807 = vmatpush3.bf16.msra.mxu0 %v5378_v6 }
 0x165   : > { %4808 = vmatprep.subr.bf16.mxu0 %v5379_v7  ;;  %4988 = vmatpush3.bf16.msra.mxu1 %v5391_v20 }
 0x166   : > { %4989 = vmatprep.subr.bf16.mxu1 %v5392_v26 }
 0x168   : > { %4809 = vmatpush3.bf16.msra.mxu0 %v5380_v9 }
 0x169   : > { %4810 = vmatprep.subr.bf16.mxu0 %v5381_v10  ;;  %4990 = vmatpush3.bf16.msra.mxu1 %v5392_v26 }
 0x16a   : > { %2176 = vmatmul.mubr.bf16.gmra.mxu1 %v5367_v61  ;;  %5007 = vmatprep.subr.bf16.mxu1 %v5913_v4 }
 0x16b   : > { %4976 = vmatmul.mubr.bf16.gmra.mxu0 %v6629_v43  ;;  %2183 = vmatprep.mubr.bf16.mxu1 %v5369_v63 }
 0x16c   : > { %4979 = vmatprep.mubr.bf16.mxu0 %v6645_v49  ;;  %4811 = vmatpush3.bf16.msra.mxu0 %v5382_v11 }
 0x16d   : > { %4812 = vmatprep.subr.bf16.mxu0 %v5383_v12 }
 0x170   : > { %4813 = vmatpush3.bf16.msra.mxu0 %v5384_v13 }
 0x171   : > { %4814 = vmatprep.subr.bf16.mxu0 %v5385_v14 }
 0x172   : > { %2184 = vmatmul.mubr.bf16.gmra.mxu1 %v5371_v1 }
 0x173   : > { %4980 = vmatmul.mubr.bf16.gmra.mxu0 %v6658_v54 }
 0x174   : > { %4815 = vmatpush3.bf16.msra.mxu0 %v5386_v15 }
 0x175   : > { %4816 = vmatprep.subr.bf16.mxu0 %v5387_v17 }
 0x178   : > { %4817 = vmatpush3.bf16.msra.mxu0 %v5388_v18 }
 0x19a   : > { %v1211_v21 = vpop.f32.mrf.mxu1 }
 0x19b   : > { %v1170_v22 = vpop.f32.mrf.mxu0  ;;  %v1234_v49 = vrot.slane %v1211_v21, %v6748_v45 }
 0x19c   : > { %v4949_v23 = vpop.f32.mrf.mxu1 }
 0x19d   : > { %v1172_v24 = vpop.f32.mrf.mxu0 }
 0x19e   : > { %v1214_v25 = vpop.f32.mrf.mxu1  ;;  %v1220_v43 = vcombine.low %v1170_v22, %v1172_v24 }
 0x19f   : > { %v1174_v27 = vpop.f32.mrf.mxu0 }
 0x1a0   : > { %v4950_v28 = vpop.f32.mrf.mxu1  ;;  %v1227_v47 = vrot.slane %v1220_v43, %v6748_v45 }
 0x1a1   : > { %v1175_v29 = vpop.f32.mrf.mxu0 }
 0x1a2   : > { %v1235_v51 = vcombine.low %v1227_v47, %v1234_v49 }
 0x1a4   : > { %v1242_v54 = vrot.slane %v1235_v51, %v6748_v45 }
 0x1a6   : > { %v6773_v58 = vadd.f32 %v1242_v54, %v975_v56 }
 0x1a8   : > { %v6784_v0 = vrot.slane %v6773_v58, %v6771_v57  ;;  %v6790_v2 = vrot.slane %v6773_v58, %v6778_v60 }
 0x1ba   : > { %v2016_v30 = vpop.f32.mrf.mxu1 }
 0x1bc   : > { %v2018_v32 = vpop.f32.mrf.mxu1 }
 0x1be   : > { %v2020_v33 = vpop.f32.mrf.mxu1 }
 0x1c0   : > { %v2022_v34 = vpop.f32.mrf.mxu1 }
 0x1c2   : > { %v6743_v38 = vpop.f32.mrf.mxu1 }
 0x1c4   : > { %v2028_v39 = vpop.f32.mrf.mxu1 }
 0x1c6   : > { %v2030_v42 = vpop.f32.mrf.mxu1 }
 0x1c8   : > { %v2032_v44 = vpop.f32.mrf.mxu1 }
 0x1ca   : > { %v6750_v46 = vpop.f32.mrf.mxu1 }
 0x1cc   : > { %v6753_v48 = vpop.f32.mrf.mxu1 }
 0x1ce   : > { %v6756_v50 = vpop.f32.mrf.mxu1 }
 0x1d0   : > { %v6758_v52 = vpop.f32.mrf.mxu1 }
 0x1d2   : > { %v6760_v53 = vpop.f32.mrf.mxu1 }
 0x1d4   : > { %v6763_v55 = vpop.f32.mrf.mxu1 }
 0x1d6   : > { %v6768_v8 = vpop.f32.mrf.mxu1 }
 0x1d8   : > { %v6775_v59 = vpop.f32.mrf.mxu1 }
 0x1da   : > { %v6780_v61 = vpop.f32.mrf.mxu1 }
 0x1db   : > { %v1903_v63 = vpop.f32.mrf.mxu0 }
 0x1dc   : > { %v6786_v1 = vpop.f32.mrf.mxu1  ;;  %v1904_v6 = vadd.f32 %v1903_v63, %v6790_v2 }
 0x1dd   : > { %v1905_v3 = vpop.f32.mrf.mxu0 }
 0x1de   : > { %v1906_v5 = vadd.f32 %v1905_v3, %v6784_v0  ;;  %v6793_v62 = vpop.f32.mrf.mxu1  ;;  %v2017_v16 = vadd.f32 %v2016_v30, %v1904_v6 }
 0x1df   : > { %v1907_v7 = vpop.f32.mrf.mxu0 }
 0x1e0   : > { %v1908_v9 = vadd.f32 %v1907_v7, %v6790_v2  ;;  %v6797_v10 = vpop.f32.mrf.mxu1  ;;  %v2019_v12 = vadd.f32 %v2018_v32, %v1906_v5  ;;  %v2289_v26 = vmax.f32 %v2017_v16, 0.0 }
 0x1e1   : > { %v1909_v11 = vpop.f32.mrf.mxu0 }
 0x1e2   : > { %v2021_v13 = vadd.f32 %v2020_v33, %v1908_v9  ;;  %v1910_v14 = vadd.f32 %v1909_v11, %v6784_v0  ;;  %v6800_v15 = vpop.f32.mrf.mxu1  ;;  %v2290_v22 = vmax.f32 %v2019_v12, 0.0 }
 0x1e3   : > { %v1913_v17 = vpop.f32.mrf.mxu0 }
 0x1e4   : > { %v2023_v18 = vadd.f32 %v2022_v34, %v1910_v14  ;;  %v6802_v19 = vpop.f32.mrf.mxu1  ;;  %v2292_v20 = vmax.f32 %v2021_v13, 0.0  ;;  %v1914_v27 = vadd.f32 %v1913_v17, %v6790_v2 }
 0x1e5   : > { %v1915_v21 = vpop.f32.mrf.mxu0 }
 0x1e6   : > { %v2293_v23 = vmax.f32 %v2023_v18, 0.0  ;;  %v1916_v24 = vadd.f32 %v1915_v21, %v6784_v0  ;;  %v6805_v25 = vpop.f32.mrf.mxu1  ;;  %v2337_v33 = vpack.c.bf16 %v2292_v20, %v2289_v26  ;;  %v2027_v43 = vadd.f32 %v6743_v38, %v1914_v27 }
 0x1e7   : > { %v1917_v28 = vpop.f32.mrf.mxu0 }
 0x1e8   : > { %v1918_v29 = vadd.f32 %v1917_v28, %v6790_v2  ;;  %v6809_v32 = vpop.f32.mrf.mxu1  ;;  %v2338_v30 = vpack.c.bf16 %v2293_v23, %v2290_v22  ;;  %v2029_v35 = vadd.f32 %v2028_v39, %v1916_v24 }
 0x1e9   : > { %v1919_v34 = vpop.f32.mrf.mxu0 }
 0x1ea   : > { %v2031_v36 = vadd.f32 %v2030_v42, %v1918_v29  ;;  %v1920_v37 = vadd.f32 %v1919_v34, %v6784_v0  ;;  %v6812_v40 = vpop.f32.mrf.mxu1  ;;  %2585 = vmatprep.mubr.bf16.mxu0 %v2338_v30  ;;  %v2296_v63 = vmax.f32 %v2029_v35, 0.0  ;;  %v2295_v42 = vmax.f32 %v2027_v43, 0.0 }
 0x1eb   : > { %v1923_v47 = vpop.f32.mrf.mxu0  ;;  %2586 = vmatmul.mubr.bf16.vlgmr.msra.gmra.mxu0 %v2337_v33 }
 0x1ec   : > { %v2033_v49 = vadd.f32 %v2032_v44, %v1920_v37  ;;  %v6815_v51 = vpop.f32.mrf.mxu1  ;;  %v2298_v54 = vmax.f32 %v2031_v36, 0.0  ;;  %v1924_v6 = vadd.f32 %v1923_v47, %v6790_v2 }
 0x1ed   : > { %v1925_v56 = vpop.f32.mrf.mxu0 }
 0x1ee   : > { %v2299_v3 = vmax.f32 %v2033_v49, 0.0  ;;  %v1926_v5 = vadd.f32 %v1925_v56, %v6784_v0  ;;  %v6818_v39 = vpop.f32.mrf.mxu1  ;;  %v2340_v12 = vpack.c.bf16 %v2298_v54, %v2295_v42  ;;  %v2037_v18 = vadd.f32 %v6750_v46, %v1924_v6 }
 0x1ef   : > { %v1927_v7 = vpop.f32.mrf.mxu0 }
 0x1f0   : > { %v1928_v9 = vadd.f32 %v1927_v7, %v6790_v2  ;;  %v6822_v38 = vpop.f32.mrf.mxu1  ;;  %v2341_v11 = vpack.c.bf16 %v2299_v3, %v2296_v63  ;;  %v2039_v13 = vadd.f32 %v6753_v48, %v1926_v5  ;;  %v2301_v28 = vmax.f32 %v2037_v18, 0.0 }
 0x1f1   : > { %v1929_v44 = vpop.f32.mrf.mxu0 }
 0x1f2   : > { %v2041_v14 = vadd.f32 %v6756_v50, %v1928_v9  ;;  %v1930_v16 = vadd.f32 %v1929_v44, %v6784_v0  ;;  %v6827_v17 = vpop.f32.mrf.mxu1  ;;  %2593 = vmatprep.mubr.bf16.mxu0 %v2341_v11  ;;  %v2302_v26 = vmax.f32 %v2039_v13, 0.0 }
 0x1f3   : > { %v1933_v20 = vpop.f32.mrf.mxu0  ;;  %2594 = vmatmul.mubr.bf16.gmra.mxu0 %v2340_v12 }
 0x1f4   : > { %v2043_v21 = vadd.f32 %v6758_v52, %v1930_v16  ;;  %v6831_v22 = vpop.f32.mrf.mxu1  ;;  %v2304_v23 = vmax.f32 %v2041_v14, 0.0  ;;  %v1934_v29 = vadd.f32 %v1933_v20, %v6790_v2 }
 0x1f5   : > { %v1935_v24 = vpop.f32.mrf.mxu0 }
 0x1f6   : > { %v2305_v27 = vmax.f32 %v2043_v21, 0.0  ;;  %v1936_v48 = vadd.f32 %v1935_v24, %v6784_v0  ;;  %v6834_v50 = vpop.f32.mrf.mxu1  ;;  %v2343_v35 = vpack.c.bf16 %v2304_v23, %v2301_v28  ;;  %v2047_v49 = vadd.f32 %v6760_v53, %v1934_v29 }
 0x1f7   : > { %v1937_v30 = vpop.f32.mrf.mxu0 }
 0x1f8   : > { %v1938_v46 = vadd.f32 %v1937_v30, %v6790_v2  ;;  %v6838_v33 = vpop.f32.mrf.mxu1  ;;  %v2344_v34 = vpack.c.bf16 %v2305_v27, %v2302_v26  ;;  %v2049_v36 = vadd.f32 %v6763_v55, %v1936_v48  ;;  %v2307_v7 = vmax.f32 %v2047_v49, 0.0 }
 0x1f9   : > { %v1939_v52 = vpop.f32.mrf.mxu0 }
 0x1fa   : > { %v2051_v37 = vadd.f32 %v6768_v8, %v1938_v46  ;;  %v1940_v43 = vadd.f32 %v1939_v52, %v6784_v0  ;;  %v6843_v47 = vpop.f32.mrf.mxu1  ;;  %2601 = vmatprep.mubr.bf16.mxu0 %v2344_v34  ;;  %v2308_v42 = vmax.f32 %v2049_v36, 0.0 }
 0x1fb   : > { %v1943_v54 = vpop.f32.mrf.mxu0  ;;  %2602 = vmatmul.mubr.bf16.gmra.mxu0 %v2343_v35 }
 0x1fc   : > { %v2053_v56 = vadd.f32 %v6775_v59, %v1940_v43  ;;  %v6847_v63 = vpop.f32.mrf.mxu1  ;;  %v2310_v3 = vmax.f32 %v2051_v37, 0.0  ;;  %v1944_v9 = vadd.f32 %v1943_v54, %v6790_v2 }
 0x1fd   : > { %v1945_v5 = vpop.f32.mrf.mxu0 }
 0x1fe   : > { %v2311_v6 = vmax.f32 %v2053_v56, 0.0  ;;  %v1946_v55 = vadd.f32 %v1945_v5, %v6784_v0  ;;  %v6850_v8 = vpop.f32.mrf.mxu1  ;;  %v2346_v13 = vpack.c.bf16 %v2310_v3, %v2307_v7  ;;  %v2057_v21 = vadd.f32 %v6780_v61, %v1944_v9 }
 0x1ff   : > { %v1947_v11 = vpop.f32.mrf.mxu0 }
 0x200   : > { %v1948_v53 = vadd.f32 %v1947_v11, %v6790_v2  ;;  %v6854_v44 = vpop.f32.mrf.mxu1  ;;  %v2347_v12 = vpack.c.bf16 %v2311_v6, %v2308_v42  ;;  %v2059_v14 = vadd.f32 %v6786_v1, %v1946_v55  ;;  %v2313_v30 = vmax.f32 %v2057_v21, 0.0 }
 0x201   : > { %v1949_v59 = vpop.f32.mrf.mxu0 }
 0x202   : > { %v2061_v16 = vadd.f32 %v6793_v62, %v1948_v53  ;;  %v1950_v18 = vadd.f32 %v1949_v59, %v6784_v0  ;;  %v6859_v20 = vpop.f32.mrf.mxu1  ;;  %2609 = vmatprep.mubr.bf16.mxu0 %v2347_v12  ;;  %v2314_v28 = vmax.f32 %v2059_v14, 0.0 }
 0x203   : > { %v1953_v23 = vpop.f32.mrf.mxu0  ;;  %2610 = vmatmul.mubr.bf16.gmra.mxu0 %v2346_v13 }
 0x204   : > { %v2063_v24 = vadd.f32 %v6797_v10, %v1950_v18  ;;  %v6863_v26 = vpop.f32.mrf.mxu1  ;;  %v2316_v27 = vmax.f32 %v2061_v16, 0.0  ;;  %v1954_v46 = vadd.f32 %v1953_v23, %v6790_v2 }
 0x205   : > { %v1955_v48 = vpop.f32.mrf.mxu0 }
 0x206   : > { %v2317_v29 = vmax.f32 %v2063_v24, 0.0  ;;  %v1956_v1 = vadd.f32 %v1955_v48, %v6784_v0  ;;  %v4747_v62 = vpop.f32.mrf.mxu1  ;;  %v2349_v37 = vpack.c.bf16 %v2316_v27, %v2313_v30  ;;  %v2067_v56 = vadd.f32 %v6800_v15, %v1954_v46 }
 0x207   : > { %v1957_v34 = vpop.f32.mrf.mxu0 }
 0x208   : > { %v1958_v52 = vadd.f32 %v1957_v34, %v6790_v2  ;;  %v4748_v61 = vpop.f32.mrf.mxu1  ;;  %v2350_v35 = vpack.c.bf16 %v2317_v29, %v2314_v28  ;;  %v2069_v10 = vadd.f32 %v6802_v19, %v1956_v1  ;;  %v2319_v11 = vmax.f32 %v2067_v56, 0.0 }
 0x209   : > { %v1959_v36 = vpop.f32.mrf.mxu0  ;;  %v4749_v56 = vadd.f32 %v4748_v61, %v4747_v62 }
 0x20a   : > { %v2071_v43 = vadd.f32 %v6805_v25, %v1958_v52  ;;  %v1960_v49 = vadd.f32 %v1959_v36, %v6784_v0  ;;  %v6871_v54 = vpop.f32.mrf.mxu1  ;;  %2617 = vmatprep.mubr.bf16.mxu0 %v2350_v35  ;;  %v2320_v7 = vmax.f32 %v2069_v10, 0.0  ;;  %v1352_v36 = vsub.s32 2, %v6745_v41 }
 0x20b   : > { %v1963_v3 = vpop.f32.mrf.mxu0  ;;  %2618 = vmatmul.mubr.bf16.gmra.mxu0 %v2349_v37  ;;  %v4746_v41 = vadd.f32 %v6863_v26, %v6859_v20 }
 0x20c   : > { %v2073_v5 = vadd.f32 %v6809_v32, %v1960_v49  ;;  %v6875_v42 = vpop.f32.mrf.mxu1  ;;  %v2322_v6 = vmax.f32 %v2071_v43, 0.0  ;;  %v1964_v53 = vadd.f32 %v1963_v3, %v6790_v2 }
 0x20d   : > { %v1965_v55 = vpop.f32.mrf.mxu0 }
 0x20e   : > { %v2323_v9 = vmax.f32 %v2073_v5, 0.0  ;;  %v1966_v19 = vadd.f32 %v1965_v55, %v6784_v0  ;;  %v6878_v25 = vpop.f32.mrf.mxu1  ;;  %v2352_v14 = vpack.c.bf16 %v2322_v6, %v2319_v11  ;;  %v2077_v24 = vadd.f32 %v6812_v40, %v1964_v53 }
 0x20f   : > { %v1967_v12 = vpop.f32.mrf.mxu0 }
 0x210   : > { %v1968_v15 = vadd.f32 %v1967_v12, %v6790_v2  ;;  %v6882_v59 = vpop.f32.mrf.mxu1  ;;  %v2353_v13 = vpack.c.bf16 %v2323_v9, %v2320_v7  ;;  %v2079_v16 = vadd.f32 %v6815_v51, %v1966_v19  ;;  %v2325_v52 = vmax.f32 %v2077_v24, 0.0 }
 0x211   : > { %v1969_v32 = vpop.f32.mrf.mxu0 }
 0x212   : > { %v2081_v18 = vadd.f32 %v6818_v39, %v1968_v15  ;;  %v1970_v21 = vadd.f32 %v1969_v32, %v6784_v0  ;;  %v4756_v23 = vpop.f32.mrf.mxu1  ;;  %2625 = vmatprep.mubr.bf16.mxu0 %v2353_v13  ;;  %v2326_v30 = vmax.f32 %v2079_v16, 0.0 }
 0x213   : > { %v1973_v27 = vpop.f32.mrf.mxu0  ;;  %2626 = vmatmul.mubr.bf16.gmra.mxu0 %v2352_v14  ;;  %v4752_v14 = vadd.f32 %v6875_v42, %v6871_v54 }
 0x214   : > { %v2083_v48 = vadd.f32 %v6822_v38, %v1970_v21  ;;  %v4757_v28 = vpop.f32.mrf.mxu1  ;;  %v2328_v29 = vmax.f32 %v2081_v18, 0.0  ;;  %v1974_v39 = vadd.f32 %v1973_v27, %v6790_v2  ;;  %v4740_v38 = vadd.f32 %v6847_v63, %v6843_v47 }
 0x215   : > { %v1975_v1 = vpop.f32.mrf.mxu0  ;;  %v6902_v47 = vrot.slane %v6773_v58, %v1352_v36  ;;  %v4743_v63 = vadd.f32 %v6854_v44, %v6850_v8  ;;  %v4758_v24 = vadd.f32 %v4757_v28, %v4756_v23 }
 0x216   : > { %v2329_v46 = vmax.f32 %v2083_v48, 0.0  ;;  %v1976_v34 = vadd.f32 %v1975_v1, %v6784_v0  ;;  %v4759_v51 = vpop.f32.mrf.mxu1  ;;  %v2355_v49 = vpack.c.bf16 %v2328_v29, %v2325_v52  ;;  %v4755_v29 = vadd.f32 %v6882_v59, %v6878_v25 }
 0x217   : > { %v1977_v35 = vpop.f32.mrf.mxu0  ;;  %v2130_v19 = vadd.f32 %v4740_v38, %v6902_v47  ;;  %v2138_v11 = vadd.f32 %v4746_v41, %v6902_v47  ;;  %v2133_v8 = vadd.f32 %v4743_v63, %v6902_v47  ;;  %v2146_v54 = vadd.f32 %v4752_v14, %v6902_v47 }
 0x218   : > { %v1978_v40 = vadd.f32 %v1977_v35, %v6790_v2  ;;  %v4760_v37 = vpop.f32.mrf.mxu1  ;;  %v2356_v10 = vpack.c.bf16 %v2329_v46, %v2326_v30  ;;  %v2089_v3 = vadd.f32 %v6831_v22, %v1976_v34  ;;  %v2087_v2 = vadd.f32 %v6827_v17, %v1974_v39 }
 0x219   : > { %v1979_v43 = vpop.f32.mrf.mxu0  ;;  %v2141_v17 = vadd.f32 %v4749_v56, %v6902_v47  ;;  %v4761_v16 = vadd.f32 %v4760_v37, %v4759_v51  ;;  %v2154_v23 = vadd.f32 %v4758_v24, %v6902_v47  ;;  %v2149_v25 = vadd.f32 %v4755_v29, %v6902_v47 }
 0x21a   : > { %v2091_v5 = vadd.f32 %v6834_v50, %v1978_v40  ;;  %v1980_v6 = vadd.f32 %v1979_v43, %v6784_v0  ;;  %v4762_v55 = vpop.f32.mrf.mxu1  ;;  %2633 = vmatprep.mubr.bf16.mxu0 %v2356_v10  ;;  %v2332_v61 = vmax.f32 %v2089_v3, 0.0  ;;  %v2331_v26 = vmax.f32 %v2087_v2, 0.0 }
 0x21b   : > { %v4969_v7 = vpop.f32.mrf.mxu0  ;;  %2634 = vmatmul.mubr.bf16.gmra.mxu0 %v2355_v49  ;;  %v2157_v51 = vadd.f32 %v4761_v16, %v6902_v47 }
 0x21c   : > { %v2093_v22 = vadd.f32 %v6838_v33, %v1980_v6  ;;  %v4763_v50 = vpop.f32.mrf.mxu1  ;;  %v2334_v62 = vmax.f32 %v2091_v5, 0.0  ;;  %v2235_v44 = vadd.f32 %v4969_v7, %v2138_v11 }
 0x21d   : > { %v2226_v0 = vpop.f32.mrf.mxu0  ;;  %v4764_v38 = vadd.f32 %v4763_v50, %v4762_v55 }
 0x21e   : > { %v2335_v9 = vmax.f32 %v2093_v22, 0.0  ;;  %v4765_v20 = vpop.f32.mrf.mxu1  ;;  %v2227_v53 = vadd.f32 %v2226_v0, %v2130_v19  ;;  %v2358_v32 = vpack.c.bf16 %v2334_v62, %v2331_v26  ;;  %v2297_v34 = vmax.f32 %v2235_v44, 0.0 }
 0x21f   : > { %v4970_v58 = vpop.f32.mrf.mxu0 }
 0x220   : > { %v2238_v12 = vadd.f32 %v4970_v58, %v2141_v17  ;;  %v4766_v15 = vpop.f32.mrf.mxu1  ;;  %v2359_v33 = vpack.c.bf16 %v2335_v9, %v2332_v61  ;;  %v2291_v1 = vmax.f32 %v2227_v53, 0.0  ;;  %v2162_v61 = vadd.f32 %v4764_v38, %v6902_v47 }
 0x221   : > { %v2229_v13 = vpop.f32.mrf.mxu0  ;;  %v4767_v41 = vadd.f32 %v4766_v15, %v4765_v20 }
 0x222   : > { %v2230_v18 = vadd.f32 %v2229_v13, %v2133_v8  ;;  %v4768_v21 = vpop.f32.mrf.mxu1  ;;  %2641 = vmatprep.mubr.bf16.mxu0 %v2359_v33  ;;  %v2300_v27 = vmax.f32 %v2238_v12, 0.0 }
 0x223   : > { %v4973_v48 = vpop.f32.mrf.mxu0  ;;  %2642 = vmatmul.mubr.bf16.gmra.mxu0 %v2358_v32  ;;  %v2165_v20 = vadd.f32 %v4767_v41, %v6902_v47 }
 0x224   : > { %v2294_v30 = vmax.f32 %v2230_v18, 0.0  ;;  %v4769_v46 = vpop.f32.mrf.mxu1  ;;  %v2342_v35 = vpack.c.bf16 %v2300_v27, %v2297_v34  ;;  %v2251_v59 = vadd.f32 %v4973_v48, %v2154_v23 }
 0x225   : > { %v2242_v52 = vpop.f32.mrf.mxu0  ;;  %v4770_v3 = vadd.f32 %v4769_v46, %v4768_v21 }
 0x226   : > { %v2339_v39 = vpack.c.bf16 %v2294_v30, %v2291_v1  ;;  %v4771_v42 = vpop.f32.mrf.mxu1  ;;  %v2243_v36 = vadd.f32 %v2242_v52, %v2146_v54  ;;  %v2309_v22 = vmax.f32 %v2251_v59, 0.0 }
 0x227   : > { %v4974_v28 = vpop.f32.mrf.mxu0  ;;  %v2170_v55 = vadd.f32 %v4770_v3, %v6902_v47 }
 0x228   : > { %v2254_v40 = vadd.f32 %v4974_v28, %v2157_v51  ;;  %v4772_v37 = vpop.f32.mrf.mxu1  ;;  %4991 = vmatprep.mubr.msk.bf16.mxu1 %vm2528_vm1, %v2339_v39  ;;  %v2303_v2 = vmax.f32 %v2243_v36, 0.0 }
 0x229   : > { %v2245_v10 = vpop.f32.mrf.mxu0  ;;  %4992 = vmatmul.mubr.msk.bf16.vlgmr.msra.gmra.mxu1 %vm2528_vm1, %v2342_v35  ;;  %v4773_v43 = vadd.f32 %v4772_v37, %v4771_v42 }
 0x22a   : > { %v2246_v49 = vadd.f32 %v2245_v10, %v2149_v25  ;;  %v4774_v56 = vpop.f32.mrf.mxu1  ;;  %v2312_v5 = vmax.f32 %v2254_v40, 0.0 }
 0x22b   : > { %v4977_v6 = vpop.f32.mrf.mxu0  ;;  %v2173_v19 = vadd.f32 %v4773_v43, %v6902_v47 }
 0x22c   : > { %v2306_v7 = vmax.f32 %v2246_v49, 0.0  ;;  %v4775_v63 = vpop.f32.mrf.mxu1  ;;  %v2348_v17 = vpack.c.bf16 %v2312_v5, %v2309_v22  ;;  %v2267_v53 = vadd.f32 %v4977_v6, %v2170_v55 }
 0x22d   : > { %v2258_v62 = vpop.f32.mrf.mxu0  ;;  %v4776_v15 = vadd.f32 %v4775_v63, %v4774_v56 }
 0x22e   : > { %v2345_v0 = vpack.c.bf16 %v2306_v7, %v2303_v2  ;;  %v4777_v9 = vpop.f32.mrf.mxu1  ;;  %v2259_v26 = vadd.f32 %v2258_v62, %v2162_v61  ;;  %v2321_v21 = vmax.f32 %v2267_v53, 0.0 }
 0x22f   : > { %v4978_v50 = vpop.f32.mrf.mxu0  ;;  %v2178_v29 = vadd.f32 %v4776_v15, %v6902_v47 }
 0x230   : > { %v2270_v11 = vadd.f32 %v4978_v50, %v2173_v19  ;;  %v4778_v58 = vpop.f32.mrf.mxu1  ;;  %4995 = vmatprep.mubr.msk.bf16.mxu1 %vm2528_vm1, %v2345_v0  ;;  %v2315_v32 = vmax.f32 %v2259_v26, 0.0 }
 0x231   : > { %v2261_v12 = vpop.f32.mrf.mxu0  ;;  %4996 = vmatmul.mubr.msk.bf16.gmra.mxu1 %vm2528_vm1, %v2348_v17  ;;  %v4779_v14 = vadd.f32 %v4778_v58, %v4777_v9 }
 0x232   : > { %v2262_v8 = vadd.f32 %v2261_v12, %v2165_v20  ;;  %v4780_v33 = vpop.f32.mrf.mxu1  ;;  %v2324_v44 = vmax.f32 %v2270_v11, 0.0 }
 0x233   : > { %v4981_v13 = vpop.f32.mrf.mxu0  ;;  %v2181_v54 = vadd.f32 %v4779_v14, %v6902_v47 }
 0x234   : > { %v2318_v16 = vmax.f32 %v2262_v8, 0.0  ;;  %v4781_v18 = vpop.f32.mrf.mxu1  ;;  %v2354_v30 = vpack.c.bf16 %v2324_v44, %v2321_v21 }
 0x235   : > { %v4782_v24 = vadd.f32 %v4781_v18, %v4780_v33  ;;  %v2274_v27 = vpop.f32.mrf.mxu0  ;;  %v6944_v33 = vld [vmem:[%s7359_s8] ss:$0 sm:$0xff] }
 0x236   : > { %v2351_v48 = vpack.c.bf16 %v2318_v16, %v2315_v32  ;;  %v4783_v1 = vpop.f32.mrf.mxu1  ;;  %v2275_v52 = vadd.f32 %v2274_v27, %v2178_v29 }
 0x237   : > { %v2186_v46 = vadd.f32 %v4782_v24, %v6902_v47  ;;  %v4982_v34 = vpop.f32.mrf.mxu0 }
 0x238   : > { %v4784_v39 = vpop.f32.mrf.mxu1  ;;  %4999 = vmatprep.mubr.msk.bf16.mxu1 %vm2528_vm1, %v2351_v48  ;;  %v2327_v36 = vmax.f32 %v2275_v52, 0.0 }
 0x239   : > { %v4785_v42 = vadd.f32 %v4784_v39, %v4783_v1  ;;  %v2277_v51 = vpop.f32.mrf.mxu0  ;;  %5000 = vmatmul.mubr.msk.bf16.gmra.mxu1 %vm2528_vm1, %v2354_v30  ;;  %v2283_v23 = vadd.f32 %v4981_v13, %v2186_v46 }
 0x23a   : > { %v2278_v35 = vadd.f32 %v2277_v51, %v2181_v54 }
 0x23b   : > { %v2189_v28 = vadd.f32 %v4785_v42, %v6902_v47  ;;  %v2333_v59 = vmax.f32 %v2283_v23, 0.0 }
 0x23c   : > { %v2330_v40 = vmax.f32 %v2278_v35, 0.0 }
 0x23d   : > { %v2286_v37 = vadd.f32 %v4982_v34, %v2189_v28 }
 0x23e   : > { %v2357_v25 = vpack.c.bf16 %v2330_v40, %v2327_v36 }
 0x23f   : > { %v2336_v10 = vmax.f32 %v2286_v37, 0.0 }
 0x240   : > { %5003 = vmatprep.mubr.msk.bf16.mxu1 %vm2528_vm1, %v2357_v25 }
 0x241   : > { %v2360_v38 = vpack.c.bf16 %v2336_v10, %v2333_v59 }
 0x243   : > { %5004 = vmatmul.mubr.msk.bf16.gmra.mxu1 %vm2528_vm1, %v2360_v38 }
 0x244   : > { %5023 = vmatprep.mubr.msk.bf16.mxu1 %vm5914_vm0, %v5913_v4 }
 0x2ab   : > { %v4818_v43 = vpop.f32.mrf.mxu0 }
 0x2ad   : > { %v4819_v49 = vpop.f32.mrf.mxu0 }
 0x2ae   : > { %v4820_v15 = vadd.f32 %v4819_v49, %v4818_v43 }
 0x2af   : > { %v4821_v56 = vpop.f32.mrf.mxu0 }
 0x2b0   : > { %v2588_v18 = vadd.f32 %v4820_v15, %v6944_v33 }
 0x2b1   : > { %v4822_v3 = vpop.f32.mrf.mxu0 }
 0x2b2   : > { %v4823_v14 = vadd.f32 %v4822_v3, %v4821_v56 }
 0x2b3   : > { %v4824_v5 = vpop.f32.mrf.mxu0 }
 0x2b4   : > { %v2591_v34 = vadd.f32 %v4823_v14, %v6944_v33 }
 0x2b5   : > { %v4825_v47 = vpop.f32.mrf.mxu0 }
 0x2b6   : > { %v4826_v12 = vadd.f32 %v4825_v47, %v4824_v5 }
 0x2b7   : > { %v4827_v6 = vpop.f32.mrf.mxu0 }
 0x2b8   : > { %v2596_v13 = vadd.f32 %v4826_v12, %v6944_v33 }
 0x2b9   : > { %v4828_v41 = vpop.f32.mrf.mxu0 }
 0x2ba   : > { %v4829_v44 = vadd.f32 %v4828_v41, %v4827_v6 }
 0x2bb   : > { %v4830_v2 = vpop.f32.mrf.mxu0 }
 0x2bc   : > { %v2599_v29 = vadd.f32 %v4829_v44, %v6944_v33 }
 0x2bd   : > { %v4831_v7 = vpop.f32.mrf.mxu0 }
 0x2be   : > { %v4832_v30 = vadd.f32 %v4831_v7, %v4830_v2 }
 0x2bf   : > { %v4833_v63 = vpop.f32.mrf.mxu0 }
 0x2c0   : > { %v2604_v40 = vadd.f32 %v4832_v30, %v6944_v33 }
 0x2c1   : > { %v4834_v22 = vpop.f32.mrf.mxu0 }
 0x2c2   : > { %v4835_v23 = vadd.f32 %v4834_v22, %v4833_v63 }
 0x2c3   : > { %v4836_v62 = vpop.f32.mrf.mxu0 }
 0x2c4   : > { %v2607_v47 = vadd.f32 %v4835_v23, %v6944_v33 }
 0x2c5   : > { %v4837_v0 = vpop.f32.mrf.mxu0 }
 0x2c6   : > { %v4838_v27 = vadd.f32 %v4837_v0, %v4836_v62 }
 0x2c7   : > { %v4839_v61 = vpop.f32.mrf.mxu0 }
 0x2c8   : > { %v2612_v51 = vadd.f32 %v4838_v27, %v6944_v33 }
 0x2c9   : > { %v4840_v9 = vpop.f32.mrf.mxu0 }
 0x2ca   : > { %v4841_v54 = vadd.f32 %v4840_v9, %v4839_v61 }
 0x2cb   : > { %v4842_v19 = vpop.f32.mrf.mxu0 }
 0x2cc   : > { %v2615_v43 = vadd.f32 %v4841_v54, %v6944_v33 }
 0x2cd   : > { %v4843_v17 = vpop.f32.mrf.mxu0 }
 0x2ce   : > { %v4844_v56 = vadd.f32 %v4843_v17, %v4842_v19 }
 0x2cf   : > { %v4845_v55 = vpop.f32.mrf.mxu0 }
 0x2d0   : > { %v2620_v19 = vadd.f32 %v4844_v56, %v6944_v33 }
 0x2d1   : > { %v4846_v50 = vpop.f32.mrf.mxu0 }
 0x2d2   : > { %v4847_v0 = vadd.f32 %v4846_v50, %v4845_v55 }
 0x2d3   : > { %v4848_v26 = vpop.f32.mrf.mxu0 }
 0x2d4   : > { %v2623_v44 = vadd.f32 %v4847_v0, %v6944_v33 }
 0x2d5   : > { %v4849_v11 = vpop.f32.mrf.mxu0 }
 0x2d6   : > { %v4850_v59 = vadd.f32 %v4849_v11, %v4848_v26 }
 0x2d7   : > { %v4851_v58 = vpop.f32.mrf.mxu0 }
 0x2d8   : > { %v2628_v22 = vadd.f32 %v4850_v59, %v6944_v33 }
 0x2d9   : > { %v4852_v20 = vpop.f32.mrf.mxu0 }
 0x2da   : > { %v4853_v2 = vadd.f32 %v4852_v20, %v4851_v58 }
 0x2db   : > { %v6937_v53 = vpop.f32.mrf.mxu0 }
 0x2dc   : > { %v2631_v20 = vadd.f32 %v4853_v2, %v6944_v33 }
 0x2dd   : > { %v6939_v8 = vpop.f32.mrf.mxu0 }
 0x2de   : > { %v4856_v14 = vadd.f32 %v6939_v8, %v6937_v53 }
 0x2df   : > { %v6950_v21 = vpop.f32.mrf.mxu0 }
 0x2e1   : > { %v4858_v52 = vpop.f32.mrf.mxu0 }
 0x2e3   : > { %v4860_v37 = vpop.f32.mrf.mxu0 }
 0x2e5   : > { %v4861_v6 = vpop.f32.mrf.mxu0 }
 0x2e6   : > { %v4862_v15 = vadd.f32 %v4861_v6, %v4860_v37 }
 0x2e7   : > { %v4863_v17 = vpop.f32.mrf.mxu0 }
 0x2e9   : > { %v4993_v32 = vpop.f32.mrf.mxu1 }
 0x2ea   : > { %v6947_v16 = vadd.f32 %v4993_v32, %v2596_v13  ;;  %v4864_v13 = vpop.f32.mrf.mxu0 }
 0x2eb   : > { %v2684_v24 = vpop.f32.mrf.mxu1  ;;  %v4865_v27 = vadd.f32 %v4864_v13, %v4863_v17  ;;  %v2787_v17 = vld [vmem:[#allocation2] sm:$0xff] }
 0x2ec   : > { %2749 = vst [vmem:[%s6299_s9 + $0x10] sm:$0xff] %v6947_v16  ;;  %v6954_v48 = vadd.f32 %v2684_v24, %v2588_v18 }
 0x2ed   : > { %v4994_v1 = vpop.f32.mrf.mxu1  ;;  %v2647_v23 = vadd.f32 %v4865_v27, %v6944_v33 }
 0x2ee   : > { %2747 = vst [vmem:[%s6299_s9] sm:$0xff] %v6954_v48  ;;  %v6959_v46 = vadd.f32 %v4994_v1, %v2599_v29  ;;  %v2644_v1 = vadd.f32 %v4862_v15, %v6944_v33 }
 0x2ef   : > { %v2687_v39 = vpop.f32.mrf.mxu1 }
 0x2f0   : > { %2750 = vst [vmem:[%s6299_s9 + $0x18] sm:$0xff] %v6959_v46  ;;  %v6964_v42 = vadd.f32 %v2687_v39, %v2591_v34  ;;  %v4859_v34 = vadd.f32 %v4858_v52, %v6950_v21 }
 0x2f1   : > { %v4997_v35 = vpop.f32.mrf.mxu1 }
 0x2f2   : > { %2748 = vst [vmem:[%s6299_s9 + $0x8] sm:$0xff] %v6964_v42  ;;  %v2764_v28 = vadd.f32 %v6964_v42, %v6954_v48  ;;  %v6971_v36 = vadd.f32 %v4997_v35, %v2612_v51  ;;  %v2636_v51 = vadd.f32 %v4856_v14, %v6944_v33  ;;  %v2639_v37 = vadd.f32 %v4859_v34, %v6944_v33 }
 0x2f3   : > { %v2700_v25 = vpop.f32.mrf.mxu1 }
 0x2f4   : > { %v2765_v10 = vadd.f32 %v2764_v28, %v6947_v16  ;;  %2753 = vst [vmem:[%s6299_s9 + $0x30] sm:$0xff] %v6971_v36  ;;  %v6977_v38 = vadd.f32 %v2700_v25, %v2604_v40 }
 0x2f5   : > { %v4998_v49 = vpop.f32.mrf.mxu1 }
 0x2f6   : > { %2751 = vst [vmem:[%s6299_s9 + $0x20] sm:$0xff] %v6977_v38  ;;  %v2766_v3 = vadd.f32 %v2765_v10, %v6959_v46  ;;  %v6983_v5 = vadd.f32 %v4998_v49, %v2615_v43 }
 0x2f7   : > { %v2703_v41 = vpop.f32.mrf.mxu1 }
 0x2f8   : > { %v2767_v7 = vadd.f32 %v2766_v3, %v6977_v38  ;;  %2754 = vst [vmem:[%s6299_s9 + $0x38] sm:$0xff] %v6983_v5  ;;  %v6989_v63 = vadd.f32 %v2703_v41, %v2607_v47 }
 0x2f9   : > { %v5001_v62 = vpop.f32.mrf.mxu1 }
 0x2fa   : > { %2752 = vst [vmem:[%s6299_s9 + $0x28] sm:$0xff] %v6989_v63  ;;  %v2768_v61 = vadd.f32 %v2767_v7, %v6989_v63  ;;  %v2725_v9 = vadd.f32 %v5001_v62, %v2628_v22  ;;  %v2794_v7 = vpack.c.bf16 %v6983_v5, %v6971_v36  ;;  %v2763_v62 = vld [vmem:[#allocation3] sm:$0x1] }
 0x2fb   : > { %v2716_v26 = vpop.f32.mrf.mxu1 }
 0x2fc   : > { %v2769_v11 = vadd.f32 %v2768_v61, %v6971_v36  ;;  %2757 = vst [vmem:[%s6299_s9 + $0x50] sm:$0xff] %v2725_v9  ;;  %v2717_v58 = vadd.f32 %v2716_v26, %v2620_v19  ;;  %v2793_v61 = vpack.c.bf16 %v6989_v63, %v6977_v38  ;;  %v2792_v19 = vpack.c.bf16 %v6959_v46, %v6947_v16 }
 0x2fd   : > { %v5002_v12 = vpop.f32.mrf.mxu1  ;;  %v2791_v36 = vpack.c.bf16 %v6964_v42, %v6954_v48 }
 0x2fe   : > { %2755 = vst [vmem:[%s6299_s9 + $0x40] sm:$0xff] %v2717_v58  ;;  %v2770_v55 = vadd.f32 %v2769_v11, %v6983_v5  ;;  %v2728_v50 = vadd.f32 %v5002_v12, %v2631_v20  ;;  %v5393_v5 = vld [vmem:[%s7478_s26] sm:$0xff]   ;;  %v2788_v11 = vld [vmem:[#allocation2 + $0x8] sm:$0xff]  ;;  %s7481_s26 = sld [smem:[#allocation49_spill]] (!%p4570_p6) }
 0x2ff   : > { %v2719_v32 = vpop.f32.mrf.mxu1 }
 0x300   : > { %v2771_v18 = vadd.f32 %v2770_v55, %v2717_v58  ;;  %2758 = vst [vmem:[%s6299_s9 + $0x58] sm:$0xff] %v2728_v50  ;;  %v2720_v24 = vadd.f32 %v2719_v32, %v2623_v44  ;;  %v2796_v3 = vpack.c.bf16 %v2728_v50, %v2725_v9 }
 0x302   : > { %2756 = vst [vmem:[%s6299_s9 + $0x48] sm:$0xff] %v2720_v24  ;;  %v2772_v29 = vadd.f32 %v2771_v18, %v2720_v24  ;;  %v2795_v33 = vpack.c.bf16 %v2720_v24, %v2717_v58 }
 0x303   : > { %v5005_v30 = vpop.f32.mrf.mxu1 }
 0x304   : > { %v2773_v39 = vadd.f32 %v2772_v29, %v2725_v9  ;;  %v2741_v54 = vadd.f32 %v5005_v30, %v2644_v1  ;;  %s7482_s21 = smov (!%p4570_p6), %s7481_s26 }
 0x305   : > { %v2732_v35 = vpop.f32.mrf.mxu1 }
 0x306   : > { %2761 = vst [vmem:[%s6299_s9 + $0x70] sm:$0xff] %v2741_v54  ;;  %v2733_v53 = vadd.f32 %v2732_v35, %v2636_v51  ;;  %v2774_v8 = vadd.f32 %v2773_v39, %v2728_v50 }
 0x307   : > { %v5006_v28 = vpop.f32.mrf.mxu1 }
 0x308   : > { %2759 = vst [vmem:[%s6299_s9 + $0x60] sm:$0xff] %v2733_v53  ;;  %v2744_v40 = vadd.f32 %v5006_v28, %v2647_v23  ;;  %v2775_v59 = vadd.f32 %v2774_v8, %v2733_v53 }
 0x309   : > { %v2735_v25 = vpop.f32.mrf.mxu1 }
 0x30a   : > { %2762 = vst [vmem:[%s6299_s9 + $0x78] sm:$0xff] %v2744_v40  ;;  %v2798_v21 = vpack.c.bf16 %v2744_v40, %v2741_v54  ;;  %v2736_v52 = vadd.f32 %v2735_v25, %v2639_v37 }
 0x30c   : > { %2760 = vst [vmem:[%s6299_s9 + $0x68] sm:$0xff] %v2736_v52  ;;  %v2776_v10 = vadd.f32 %v2775_v59, %v2736_v52  ;;  %5008 = vmatpush3.bf16.msra.mxu1 %v2798_v21  ;;  %v2797_v49 = vpack.c.bf16 %v2736_v52, %v2733_v53 }
 0x30d   : > { %5009 = vmatprep.subr.bf16.mxu1 %v5913_v4 }
 0x30e   : > { %v2777_v43 = vadd.f32 %v2776_v10, %v2741_v54 }
 0x310   : > { %v2778_v56 = vadd.f32 %v2777_v43, %v2744_v40  ;;  %5010 = vmatpush3.bf16.msra.mxu1 %v2797_v49 }
 0x311   : > { %5011 = vmatprep.subr.bf16.mxu1 %v5913_v4 }
 0x312   : > { %v2779_v47 = vrot.slane %v2778_v56, 4 }
 0x314   : > { %v2780_v6 = vadd.f32 %v2779_v47, %v2778_v56  ;;  %5012 = vmatpush3.bf16.msra.mxu1 %v2796_v3 }
 0x315   : > { %5013 = vmatprep.subr.bf16.mxu1 %v5913_v4 }
 0x316   : > { %v2781_v41 = vrot.slane %v2780_v6, 2 }
 0x318   : > { %v2782_v2 = vadd.f32 %v2781_v41, %v2780_v6  ;;  %5014 = vmatpush3.bf16.msra.mxu1 %v2795_v33 }
 0x319   : > { %5015 = vmatprep.subr.bf16.mxu1 %v5913_v4 }
 0x31a   : > { %v2783_v22 = vrot.slane %v2782_v2, 1 }
 0x31c   : > { %v2784_v0 = vadd.f32 %v2783_v22, %v2782_v2  ;;  %5016 = vmatpush3.bf16.msra.mxu1 %v2794_v7 }
 0x31d   : > { %5017 = vmatprep.subr.bf16.mxu1 %v5913_v4 }
 0x31e   : > { %v2785_v9 = vadd.f32 %v2784_v0, %v2763_v62 }
 0x320   : > { %2786 = vst [vmem:[#allocation3] sm:$0x1] %v2785_v9  ;;  %5018 = vmatpush3.bf16.msra.mxu1 %v2793_v61 }
 0x321   : > { %5019 = vmatprep.subr.bf16.mxu1 %v5913_v4 }
 0x324   : > { %5020 = vmatpush3.bf16.msra.mxu1 %v2792_v19 }
 0x325   : > { %5021 = vmatprep.subr.bf16.mxu1 %v5913_v4 }
 0x328   : > { %5022 = vmatpush3.bf16.msra.mxu1 %v2791_v36 }
 0x32b   : > { %5024 = vmatmul.mubr.bf16.vlgmr.msra.gmra.mxu1 %v5393_v5 }
 0x3eb   : > { %v2839_v38 = vpop.f32.mrf.mxu1 }
 0x3ec   : > { %v2846_v63 = vadd.f32 %v2839_v38, %v2787_v17 }
 0x3ed   : > { %v5025_v26 = vpop.f32.mrf.mxu1 }
 0x3ee   : > { %2848 = vst [vmem:[#allocation2] sm:$0xff] %v2846_v63  ;;  %2853 = sbr.rel (%p4570_p6) target bundleno = 1940 (0x794), region = 173 }
 0x3ef   : > { %v2842_v58 = vpop.f32.mrf.mxu1 }
 0x3f0   : > { %v2847_v20 = vadd.f32 %v2842_v58, %v2788_v11 }
 0x3f1   : > { %v5026_v12 = vpop.f32.mrf.mxu1 }
 0x3f2   : > { %2849 = vst [vmem:[#allocation2 + $0x8] sm:$0xff] %v2847_v20 }
 0x3f3   : > { %v5394_v4 = vld [vmem:[%s7479_s24 + $0x74] ss:$8 sps:$4 sm:$0xff]   ;;  %v5396_v16 = vld [vmem:[%s7480_s23 + $0x70] ss:$8 sps:$4 sm:$0xff]   ;;  %v5917_v48 = vmov 0   ;;  %v5463_v33 = vld [vmem:[%s6288_s15] sm:$0xff]  }
 0x3f4   : > { %2985 = vmatprep.mubr.bf16.mxu0 %v5917_v48  ;;  %3166 = vmatprep.mubr.bf16.mxu1 %v5917_v48  ;;  %v5397_v46 = vld [vmem:[%s7480_s23 + $0x64] ss:$8 sps:$4 sm:$0xff]   ;;  %v5399_v42 = vld [vmem:[%s7480_s23 + $0x60] ss:$8 sps:$4 sm:$0xff]   ;;  %v5400_v15 = vld [vmem:[%s7480_s23 + $0x54] ss:$8 sps:$4 sm:$0xff]  }
 0x3f5   : > { %2953 = vmatprep.subr.bf16.mxu0 %v5394_v4  ;;  %v5402_v55 = vld [vmem:[%s7480_s23 + $0x50] ss:$8 sps:$4 sm:$0xff]   ;;  %v5403_v50 = vld [vmem:[%s7480_s23 + $0x44] ss:$8 sps:$4 sm:$0xff]   ;;  %v5415_v44 = vld [vmem:[%s7481_s26 + $0x74] ss:$8 sps:$4 sm:$0xff]  }
 0x3f6   : > { %2954 = vmatpush1.bf16.msra.mxu0 %v5396_v16  ;;  %v5417_v13 = vld [vmem:[%s7482_s21 + $0x70] ss:$8 sps:$4 sm:$0xff]   ;;  %v5405_v32 = vld [vmem:[%s7480_s23 + $0x40] ss:$8 sps:$4 sm:$0xff]   ;;  %v5406_v14 = vld [vmem:[%s7480_s23 + $0x34] ss:$8 sps:$4 sm:$0xff]   ;;  %3134 = vmatprep.subr.bf16.mxu1 %v5415_v44 }
 0x3f7   : > { %2955 = vmatprep.subr.bf16.mxu0 %v5397_v46  ;;  %v5421_v18 = vld [vmem:[%s7482_s21 + $0x64] ss:$8 sps:$4 sm:$0xff]   ;;  %3135 = vmatpush1.bf16.msra.mxu1 %v5417_v13  ;;  %v5423_v24 = vld [vmem:[%s7482_s21 + $0x60] ss:$8 sps:$4 sm:$0xff]   ;;  %v5408_v27 = vld [vmem:[%s7480_s23 + $0x30] ss:$8 sps:$4 sm:$0xff]  }
 0x3f8   : > { %3136 = vmatprep.subr.bf16.mxu1 %v5421_v18  ;;  %v5427_v29 = vld [vmem:[%s7482_s21 + $0x54] ss:$8 sps:$4 sm:$0xff]   ;;  %v5409_v1 = vld [vmem:[%s7480_s23 + $0x24] ss:$8 sps:$4 sm:$0xff]   ;;  %v5429_v30 = vld [vmem:[%s7482_s21 + $0x50] ss:$8 sps:$4 sm:$0xff]  }
 0x3f9   : > { %v5433_v34 = vld [vmem:[%s7482_s21 + $0x44] ss:$8 sps:$4 sm:$0xff]   ;;  %v5411_v39 = vld [vmem:[%s7480_s23 + $0x20] ss:$8 sps:$4 sm:$0xff]   ;;  %v5412_v54 = vld [vmem:[%s7480_s23 + $0x14] ss:$8 sps:$4 sm:$0xff]  }
 0x3fa   : > { %2956 = vmatpush1.bf16.msra.mxu0 %v5399_v42  ;;  %v5435_v51 = vld [vmem:[%s7482_s21 + $0x40] ss:$8 sps:$4 sm:$0xff]   ;;  %v5439_v35 = vld [vmem:[%s7482_s21 + $0x34] ss:$8 sps:$4 sm:$0xff]   ;;  %v5414_v53 = vld [vmem:[%s7480_s23 + $0x10] ss:$8 sps:$4 sm:$0xff]  }
 0x3fb   : > { %2957 = vmatprep.subr.bf16.mxu0 %v5400_v15  ;;  %3137 = vmatpush1.bf16.msra.mxu1 %v5423_v24  ;;  %v5418_v8 = vld [vmem:[%s7480_s23 + $0x4] ss:$8 sps:$4 sm:$0xff]   ;;  %v5441_v23 = vld [vmem:[%s7482_s21 + $0x30] ss:$8 sps:$4 sm:$0xff]   ;;  %v5420_v40 = vld [vmem:[%s7480_s23] ss:$8 sps:$4 sm:$0xff]  }
 0x3fc   : > { %3138 = vmatprep.subr.bf16.mxu1 %v5427_v29  ;;  %v5445_v28 = vld [vmem:[%s7482_s21 + $0x24] ss:$8 sps:$4 sm:$0xff]   ;;  %v5426_v37 = vld [vmem:[%s7483_s6 + $0x74] ss:$8 sps:$4 sm:$0xff]   ;;  %v5447_v25 = vld [vmem:[%s7482_s21 + $0x20] ss:$8 sps:$4 sm:$0xff]  }
 0x3fd   : > { %v5451_v59 = vld [vmem:[%s7482_s21 + $0x14] ss:$8 sps:$4 sm:$0xff]   ;;  %v5424_v21 = vld [vmem:[%s7484_s11 + $0x70] ss:$8 sps:$4 sm:$0xff]   ;;  %v5432_v52 = vld [vmem:[%s7484_s11 + $0x64] ss:$8 sps:$4 sm:$0xff]  }
 0x3fe   : > { %2958 = vmatpush1.bf16.msra.mxu0 %v5402_v55  ;;  %v5430_v10 = vld [vmem:[%s7484_s11 + $0x60] ss:$8 sps:$4 sm:$0xff]   ;;  %v5453_v43 = vld [vmem:[%s7482_s21 + $0x10] ss:$8 sps:$4 sm:$0xff]   ;;  %v5457_v49 = vld [vmem:[%s7482_s21 + $0x4] ss:$8 sps:$4 sm:$0xff]  }
 0x3ff   : > { %2959 = vmatprep.subr.bf16.mxu0 %v5403_v50  ;;  %3139 = vmatpush1.bf16.msra.mxu1 %v5429_v30  ;;  %v5438_v56 = vld [vmem:[%s7484_s11 + $0x54] ss:$8 sps:$4 sm:$0xff]   ;;  %v5459_v3 = vld [vmem:[%s7482_s21] ss:$8 sps:$4 sm:$0xff]   ;;  %v5436_v47 = vld [vmem:[%s7484_s11 + $0x50] ss:$8 sps:$4 sm:$0xff]  }
 0x400   : > { %3140 = vmatprep.subr.bf16.mxu1 %v5433_v34  ;;  %v5444_v6 = vld [vmem:[%s7484_s11 + $0x44] ss:$8 sps:$4 sm:$0xff]   ;;  %v5442_v41 = vld [vmem:[%s7484_s11 + $0x40] ss:$8 sps:$4 sm:$0xff]   ;;  %v5450_v2 = vld [vmem:[%s7484_s11 + $0x34] ss:$8 sps:$4 sm:$0xff]  }
 0x401   : > { %v5448_v7 = vld [vmem:[%s7484_s11 + $0x30] ss:$8 sps:$4 sm:$0xff]   ;;  %v5456_v22 = vld [vmem:[%s7484_s11 + $0x24] ss:$8 sps:$4 sm:$0xff]   ;;  %v5454_v62 = vld [vmem:[%s7484_s11 + $0x20] ss:$8 sps:$4 sm:$0xff]  }
 0x402   : > { %2960 = vmatpush1.bf16.msra.mxu0 %v5405_v32  ;;  %v5462_v0 = vld [vmem:[%s7484_s11 + $0x14] ss:$8 sps:$4 sm:$0xff]   ;;  %v5460_v61 = vld [vmem:[%s7484_s11 + $0x10] ss:$8 sps:$4 sm:$0xff]   ;;  %v5466_v9 = vld [vmem:[%s7484_s11 + $0x4] ss:$8 sps:$4 sm:$0xff]  }
 0x403   : > { %2961 = vmatprep.subr.bf16.mxu0 %v5406_v14  ;;  %3141 = vmatpush1.bf16.msra.mxu1 %v5435_v51  ;;  %v5464_v19 = vld [vmem:[%s7484_s11] ss:$8 sps:$4 sm:$0xff]   ;;  %v5469_v26 = vld [vmem:[#allocation5 + $0x70] sm:$0xff]  }
 0x404   : > { %3142 = vmatprep.subr.bf16.mxu1 %v5439_v35  ;;  %v2854_v36 = vld [vmem:[#allocation2] sm:$0xff]  ;;  %v2855_v5 = vld [vmem:[#allocation2 + $0x8] sm:$0xff]  ;;  %v5470_v11 = vld [vmem:[#allocation5 + $0x30] sm:$0xff]  }
 0x405   : > { %v3013_v17 = vpack.c.bf16 %v2855_v5, %v2854_v36  ;;  %v5467_v38 = vld [vmem:[#allocation5 + $0x78] sm:$0xff]   ;;  %v5471_v58 = vld [vmem:[#allocation5 + $0x68] sm:$0xff]   ;;  %v5473_v12 = vld [vmem:[#allocation5 + $0x60] sm:$0xff]  }
 0x406   : > { %2962 = vmatpush1.bf16.msra.mxu0 %v5408_v27  ;;  %v5468_v63 = vld [vmem:[#allocation5 + $0x38] sm:$0xff]   ;;  %v5472_v20 = vld [vmem:[#allocation5 + $0x28] sm:$0xff]   ;;  %v5474_v4 = vld [vmem:[#allocation5 + $0x20] sm:$0xff]  }
 0x407   : > { %2963 = vmatprep.subr.bf16.mxu0 %v5409_v1  ;;  %3143 = vmatpush1.bf16.msra.mxu1 %v5441_v23  ;;  %v5475_v16 = vld [vmem:[#allocation5 + $0x58] sm:$0xff]   ;;  %v5477_v42 = vld [vmem:[#allocation5 + $0x50] sm:$0xff]   ;;  %v5479_v55 = vld [vmem:[#allocation5 + $0x48] sm:$0xff]  }
 0x408   : > { %3144 = vmatprep.subr.bf16.mxu1 %v5445_v28  ;;  %v5476_v46 = vld [vmem:[#allocation5 + $0x18] sm:$0xff]   ;;  %v5478_v15 = vld [vmem:[#allocation5 + $0x10] sm:$0xff]   ;;  %v5480_v50 = vld [vmem:[#allocation5 + $0x8] sm:$0xff]  }
 0x409   : > { %v5481_v44 = vld [vmem:[#allocation5 + $0x40] sm:$0xff]   ;;  %v5483_v32 = vld [vmem:[#allocation10 + $0x70] ss:$8 sps:$4 sm:$0xff]   ;;  %v5485_v14 = vld [vmem:[#allocation10 + $0x74] ss:$8 sps:$4 sm:$0xff]  }
 0x40a   : > { %2964 = vmatpush1.bf16.msra.mxu0 %v5411_v39  ;;  %v5482_v13 = vld [vmem:[#allocation5] sm:$0xff]   ;;  %v5488_v18 = vld [vmem:[#allocation8 + $0x74] ss:$8 sps:$4 sm:$0xff]   ;;  %v5495_v5 = vld [vmem:[#allocation10 + $0x50] ss:$8 sps:$4 sm:$0xff]  }
 0x40b   : > { %2965 = vmatprep.subr.bf16.mxu0 %v5412_v54  ;;  %3145 = vmatpush1.bf16.msra.mxu1 %v5447_v25  ;;  %v5491_v24 = vld [vmem:[#allocation10 + $0x64] ss:$8 sps:$4 sm:$0xff]   ;;  %v5489_v27 = vld [vmem:[#allocation10 + $0x60] ss:$8 sps:$4 sm:$0xff]   ;;  %v5497_v36 = vld [vmem:[#allocation10 + $0x54] ss:$8 sps:$4 sm:$0xff]  }
 0x40c   : > { %3146 = vmatprep.subr.bf16.mxu1 %v5451_v59 }
 0x40e   : > { %2966 = vmatpush1.bf16.msra.mxu0 %v5414_v53  ;;  %v2856_v53 = vld [vmem:[%s7485_s28] sm:$0x3] }
 0x40f   : > { %2967 = vmatprep.subr.bf16.mxu0 %v5418_v8  ;;  %3147 = vmatpush1.bf16.msra.mxu1 %v5453_v43 }
 0x410   : > { %3148 = vmatprep.subr.bf16.mxu1 %v5457_v49 }
 0x412   : > { %2968 = vmatpush1.bf16.msra.mxu0 %v5420_v40 }
 0x413   : > { %3257 = vmatprep.subr.bf16.mxu0 %v5426_v37  ;;  %3149 = vmatpush1.bf16.msra.mxu1 %v5459_v3 }
 0x414   : > { %4887 = vmatprep.subr.bf16.mxu1 %v5467_v38  ;;  %v5498_v38 = vld [vmem:[#allocation8 + $0x50] ss:$8 sps:$4 sm:$0xff]  }
 0x415   : > { %2986 = vmatmul.mubr.bf16.vlgmr.msra.gmra.mxu0 %v6400_v31 }
 0x416   : > { %3258 = vmatpush1.bf16.msra.mxu0 %v5424_v21  ;;  %3289 = vmatprep.mubr.bf16.mxu0 %v5917_v48 }
 0x417   : > { %3259 = vmatprep.subr.bf16.mxu0 %v5432_v52  ;;  %3167 = vmatmul.mubr.bf16.vlgmr.msra.gmra.mxu1 %v5463_v33 }
 0x418   : > { %4888 = vmatpush3.bf16.msra.mxu1 %v5468_v63  ;;  %v5503_v63 = vld [vmem:[#allocation10 + $0x44] ss:$8 sps:$4 sm:$0xff]  }
 0x419   : > { %4889 = vmatprep.subr.bf16.mxu1 %v5469_v26  ;;  %v5501_v26 = vld [vmem:[#allocation10 + $0x40] ss:$8 sps:$4 sm:$0xff]  }
 0x41a   : > { %3260 = vmatpush1.bf16.msra.mxu0 %v5430_v10 }
 0x41b   : > { %3261 = vmatprep.subr.bf16.mxu0 %v5438_v56 }
 0x41c   : > { %4890 = vmatpush3.bf16.msra.mxu1 %v5470_v11  ;;  %v5506_v11 = vld [vmem:[#allocation8 + $0x44] ss:$8 sps:$4 sm:$0xff]  }
 0x41d   : > { %4891 = vmatprep.subr.bf16.mxu1 %v5471_v58  ;;  %v5504_v58 = vld [vmem:[#allocation8 + $0x40] ss:$8 sps:$4 sm:$0xff]  }
 0x41e   : > { %3262 = vmatpush1.bf16.msra.mxu0 %v5436_v47 }
 0x41f   : > { %3263 = vmatprep.subr.bf16.mxu0 %v5444_v6 }
 0x420   : > { %4892 = vmatpush3.bf16.msra.mxu1 %v5472_v20  ;;  %v5509_v20 = vld [vmem:[#allocation10 + $0x34] ss:$8 sps:$4 sm:$0xff]  }
 0x421   : > { %4893 = vmatprep.subr.bf16.mxu1 %v5473_v12  ;;  %v5507_v12 = vld [vmem:[#allocation10 + $0x30] ss:$8 sps:$4 sm:$0xff]  }
 0x422   : > { %3264 = vmatpush1.bf16.msra.mxu0 %v5442_v41 }
 0x423   : > { %3265 = vmatprep.subr.bf16.mxu0 %v5450_v2 }
 0x424   : > { %4894 = vmatpush3.bf16.msra.mxu1 %v5474_v4  ;;  %v5512_v4 = vld [vmem:[#allocation8 + $0x34] ss:$8 sps:$4 sm:$0xff]  }
 0x425   : > { %4895 = vmatprep.subr.bf16.mxu1 %v5475_v16  ;;  %v5510_v16 = vld [vmem:[#allocation8 + $0x30] ss:$8 sps:$4 sm:$0xff]  }
 0x426   : > { %3266 = vmatpush1.bf16.msra.mxu0 %v5448_v7 }
 0x427   : > { %3267 = vmatprep.subr.bf16.mxu0 %v5456_v22 }
 0x428   : > { %4896 = vmatpush3.bf16.msra.mxu1 %v5476_v46  ;;  %v5515_v46 = vld [vmem:[#allocation10 + $0x24] ss:$8 sps:$4 sm:$0xff]  }
 0x429   : > { %4897 = vmatprep.subr.bf16.mxu1 %v5477_v42  ;;  %v5513_v42 = vld [vmem:[#allocation10 + $0x20] ss:$8 sps:$4 sm:$0xff]  }
 0x42a   : > { %3268 = vmatpush1.bf16.msra.mxu0 %v5454_v62 }
 0x42b   : > { %3269 = vmatprep.subr.bf16.mxu0 %v5462_v0  ;;  %v5486_v0 = vld [vmem:[#allocation8 + $0x70] ss:$8 sps:$4 sm:$0xff]  }
 0x42c   : > { %4898 = vmatpush3.bf16.msra.mxu1 %v5478_v15  ;;  %v5518_v15 = vld [vmem:[#allocation8 + $0x24] ss:$8 sps:$4 sm:$0xff]  }
 0x42d   : > { %4899 = vmatprep.subr.bf16.mxu1 %v5479_v55  ;;  %v5516_v55 = vld [vmem:[#allocation8 + $0x20] ss:$8 sps:$4 sm:$0xff]  }
 0x42e   : > { %3270 = vmatpush1.bf16.msra.mxu0 %v5460_v61 }
 0x42f   : > { %3271 = vmatprep.subr.bf16.mxu0 %v5466_v9  ;;  %v5494_v9 = vld [vmem:[#allocation8 + $0x64] ss:$8 sps:$4 sm:$0xff]  }
 0x430   : > { %4900 = vmatpush3.bf16.msra.mxu1 %v5480_v50  ;;  %v5521_v50 = vld [vmem:[#allocation10 + $0x14] ss:$8 sps:$4 sm:$0xff]  }
 0x431   : > { %4901 = vmatprep.subr.bf16.mxu1 %v5481_v44  ;;  %v5519_v44 = vld [vmem:[#allocation10 + $0x10] ss:$8 sps:$4 sm:$0xff]  }
 0x432   : > { %3272 = vmatpush1.bf16.msra.mxu0 %v5464_v19  ;;  %v5492_v19 = vld [vmem:[#allocation8 + $0x60] ss:$8 sps:$4 sm:$0xff]  }
 0x433   : > { %3621 = vmatprep.subr.bf16.mxu0 %v5485_v14  ;;  %v5525_v14 = vld [vmem:[#allocation10] ss:$8 sps:$4 sm:$0xff]  }
 0x434   : > { %4902 = vmatpush3.bf16.msra.mxu1 %v5482_v13  ;;  %v5524_v13 = vld [vmem:[#allocation8 + $0x14] ss:$8 sps:$4 sm:$0xff]  }
 0x435   : > { %3290 = vmatmul.mubr.bf16.vlgmr.msra.gmra.mxu0 %v3013_v17  ;;  %3742 = vmatprep.subr.bf16.mxu1 %v5488_v18  ;;  %v5500_v17 = vld [vmem:[#allocation8 + $0x54] ss:$8 sps:$4 sm:$0xff]   ;;  %v5527_v18 = vld [vmem:[#allocation10 + $0x4] ss:$8 sps:$4 sm:$0xff]  }
 0x436   : > { %3653 = vmatprep.mubr.bf16.mxu0 %v5917_v48  ;;  %3622 = vmatpush1.bf16.msra.mxu0 %v5483_v32  ;;  %v5522_v32 = vld [vmem:[#allocation8 + $0x10] ss:$8 sps:$4 sm:$0xff]  }
 0x437   : > { %3623 = vmatprep.subr.bf16.mxu0 %v5491_v24  ;;  %v5528_v24 = vld [vmem:[#allocation8] ss:$8 sps:$4 sm:$0xff]  }
 0x43a   : > { %3624 = vmatpush1.bf16.msra.mxu0 %v5489_v27  ;;  %v5530_v27 = vld [vmem:[#allocation8 + $0x4] ss:$8 sps:$4 sm:$0xff]  }
 0x43b   : > { %3625 = vmatprep.subr.bf16.mxu0 %v5497_v36 }
 0x43e   : > { %3626 = vmatpush1.bf16.msra.mxu0 %v5495_v5  ;;  %v5555_v5 = vld [vmem:[#allocation13 + $0x78] sm:$0xff]  }
 0x43f   : > { %3627 = vmatprep.subr.bf16.mxu0 %v5503_v63 }
 0x442   : > { %3628 = vmatpush1.bf16.msra.mxu0 %v5501_v26  ;;  %v5558_v26 = vld [vmem:[#allocation13 + $0x30] sm:$0xff]  }
 0x443   : > { %3629 = vmatprep.subr.bf16.mxu0 %v5509_v20  ;;  %v5561_v20 = vld [vmem:[#allocation13 + $0x60] sm:$0xff]  }
 0x446   : > { %3630 = vmatpush1.bf16.msra.mxu0 %v5507_v12  ;;  %v5562_v12 = vld [vmem:[#allocation13 + $0x20] sm:$0xff]  }
 0x447   : > { %3631 = vmatprep.subr.bf16.mxu0 %v5515_v46  ;;  %v5566_v46 = vld [vmem:[#allocation13 + $0x10] sm:$0xff]  }
 0x44a   : > { %3632 = vmatpush1.bf16.msra.mxu0 %v5513_v42  ;;  %v5567_v42 = vld [vmem:[#allocation13 + $0x48] sm:$0xff]  }
 0x44b   : > { %3633 = vmatprep.subr.bf16.mxu0 %v5521_v50  ;;  %v5570_v50 = vld [vmem:[#allocation13] sm:$0xff]  }
 0x44e   : > { %3634 = vmatpush1.bf16.msra.mxu0 %v5519_v44 }
 0x44f   : > { %3635 = vmatprep.subr.bf16.mxu0 %v5527_v18  ;;  %v3922_v18 = vld [vmem:[%s7487_s22] sm:$0x3] }
 0x452   : > { %3636 = vmatpush1.bf16.msra.mxu0 %v5525_v14 }
 0x4d5   : > { %v2987_v29 = vpop.f32.mrf.mxu0 }
 0x4d7   : > { %v2989_v1 = vpop.f32.mrf.mxu0  ;;  %v3168_v51 = vpop.f32.mrf.mxu1 }
 0x4d8   : > { %v2996_v39 = vcombine.low %v2987_v29, %v2989_v1  ;;  %v5533_v29 = vld [vmem:[#allocation11 + $0x74] ss:$8 sps:$4 sm:$0xff]   ;;  %v3506_v1 = vld [vmem:[#allocation3] sm:$0x1] }
 0x4d9   : > { %v2991_v30 = vpop.f32.mrf.mxu0  ;;  %v3170_v8 = vpop.f32.mrf.mxu1  ;;  %3879 = vmatprep.subr.bf16.mxu0 %v5533_v29 }
 0x4da   : > { %v3003_v54 = vrot.slane %v2996_v39, %v6748_v45  ;;  %v3507_v30 = vpack.c.bf16 %v3506_v1, %v3506_v1  ;;  %v4620_v39 = vld [vmem:[%s7486_s4] ss:$0 sm:$0xff] }
 0x4db   : > { %v2992_v34 = vpop.f32.mrf.mxu0  ;;  %v3172_v40 = vpop.f32.mrf.mxu1 }
 0x4dc   : > { %v3010_v35 = vrot.slane %v3003_v54, %v6748_v45 }
 0x4dd   : > { %v3174_v49 = vpop.f32.mrf.mxu1 }
 0x4de   : > { %v3012_v28 = vadd.f32 %v3010_v35, %v2856_v53 }
 0x4e0   : > { %v3304_v52 = vrot.slane %v3012_v28, %v6778_v60  ;;  %v3308_v10 = vrot.slane %v3012_v28, %v6771_v57 }
 0x4f5   : > { %v3291_v23 = vpop.f32.mrf.mxu0 }
 0x4f6   : > { %v3292_v59 = vadd.f32 %v3291_v23, %v3168_v51 }
 0x4f7   : > { %v3293_v37 = vpop.f32.mrf.mxu0 }
 0x4f8   : > { %v3294_v25 = vadd.f32 %v3293_v37, %v3170_v8  ;;  %v3311_v6 = vadd.f32 %v3304_v52, %v3292_v59 }
 0x4f9   : > { %v3295_v21 = vpop.f32.mrf.mxu0 }
 0x4fa   : > { %v3296_v43 = vadd.f32 %v3295_v21, %v3172_v40  ;;  %v3312_v45 = vadd.f32 %v3308_v10, %v3294_v25  ;;  %v3315_v22 = vmax.f32 %v3311_v6, 0.0  ;;  %v5542_v6 = vld [vmem:[#allocation11 + $0x44] ss:$8 sps:$4 sm:$0xff]  }
 0x4fb   : > { %v3297_v56 = vpop.f32.mrf.mxu0 }
 0x4fc   : > { %v3313_v3 = vadd.f32 %v3304_v52, %v3296_v43  ;;  %v3298_v47 = vadd.f32 %v3297_v56, %v3174_v49  ;;  %v3316_v2 = vmax.f32 %v3312_v45, 0.0  ;;  %v5531_v43 = vld [vmem:[#allocation11 + $0x70] ss:$8 sps:$4 sm:$0xff]   ;;  %v5536_v56 = vld [vmem:[#allocation11 + $0x64] ss:$8 sps:$4 sm:$0xff]  }
 0x4fd   : > { %v5534_v45 = vld [vmem:[#allocation11 + $0x60] ss:$8 sps:$4 sm:$0xff]  }
 0x4fe   : > { %v3314_v33 = vadd.f32 %v3308_v10, %v3298_v47  ;;  %v3317_v41 = vmax.f32 %v3313_v3, 0.0  ;;  %v5539_v3 = vld [vmem:[#allocation11 + $0x54] ss:$8 sps:$4 sm:$0xff]   ;;  %v5537_v47 = vld [vmem:[#allocation11 + $0x50] ss:$8 sps:$4 sm:$0xff]  }
 0x500   : > { %v3318_v7 = vmax.f32 %v3314_v33, 0.0  ;;  %v3319_v61 = vpack.c.bf16 %v3317_v41, %v3315_v22  ;;  %v5540_v33 = vld [vmem:[#allocation11 + $0x40] ss:$8 sps:$4 sm:$0xff]   ;;  %v5545_v41 = vld [vmem:[#allocation11 + $0x34] ss:$8 sps:$4 sm:$0xff]  }
 0x501   : > { %v5546_v22 = vld [vmem:[#allocation11 + $0x20] ss:$8 sps:$4 sm:$0xff]  }
 0x502   : > { %v3320_v62 = vpack.c.bf16 %v3318_v7, %v3316_v2  ;;  %v5543_v2 = vld [vmem:[#allocation11 + $0x30] ss:$8 sps:$4 sm:$0xff]   ;;  %v5548_v7 = vld [vmem:[#allocation11 + $0x24] ss:$8 sps:$4 sm:$0xff]  }
 0x504   : > { %3488 = vmatprep.mubr.bf16.mxu1 %v3320_v62  ;;  %v5551_v62 = vld [vmem:[#allocation11 + $0x14] ss:$8 sps:$4 sm:$0xff]  }
 0x505   : > { %3489 = vmatmul.mubr.bf16.vlgmr.msra.gmra.mxu1 %v3319_v61  ;;  %v5552_v61 = vld [vmem:[#allocation11] ss:$8 sps:$4 sm:$0xff]  }
 0x506   : > { %3743 = vmatpush1.bf16.msra.mxu1 %v5486_v0  ;;  %3774 = vmatprep.mubr.bf16.mxu1 %v5917_v48  ;;  %v5554_v0 = vld [vmem:[#allocation11 + $0x4] ss:$8 sps:$4 sm:$0xff]  }
 0x507   : > { %3744 = vmatprep.subr.bf16.mxu1 %v5494_v9 }
 0x50a   : > { %3745 = vmatpush1.bf16.msra.mxu1 %v5492_v19 }
 0x50b   : > { %3746 = vmatprep.subr.bf16.mxu1 %v5500_v17  ;;  %v5556_v17 = vld [vmem:[#allocation13 + $0x38] sm:$0xff]  }
 0x50e   : > { %3747 = vmatpush1.bf16.msra.mxu1 %v5498_v38  ;;  %v5557_v38 = vld [vmem:[#allocation13 + $0x70] sm:$0xff]  }
 0x50f   : > { %3748 = vmatprep.subr.bf16.mxu1 %v5506_v11  ;;  %v5559_v11 = vld [vmem:[#allocation13 + $0x68] sm:$0xff]  }
 0x512   : > { %3749 = vmatpush1.bf16.msra.mxu1 %v5504_v58  ;;  %v5560_v58 = vld [vmem:[#allocation13 + $0x28] sm:$0xff]  }
 0x513   : > { %3750 = vmatprep.subr.bf16.mxu1 %v5512_v4  ;;  %v5564_v4 = vld [vmem:[#allocation13 + $0x18] sm:$0xff]  }
 0x516   : > { %3751 = vmatpush1.bf16.msra.mxu1 %v5510_v16  ;;  %v5565_v16 = vld [vmem:[#allocation13 + $0x50] sm:$0xff]  }
 0x517   : > { %3752 = vmatprep.subr.bf16.mxu1 %v5518_v15  ;;  %v5568_v15 = vld [vmem:[#allocation13 + $0x8] sm:$0xff]  }
 0x51a   : > { %3753 = vmatpush1.bf16.msra.mxu1 %v5516_v55  ;;  %v5569_v55 = vld [vmem:[#allocation13 + $0x40] sm:$0xff]  }
 0x51b   : > { %3754 = vmatprep.subr.bf16.mxu1 %v5524_v13 }
 0x51e   : > { %3755 = vmatpush1.bf16.msra.mxu1 %v5522_v32 }
 0x51f   : > { %3756 = vmatprep.subr.bf16.mxu1 %v5530_v27  ;;  %v3927_v27 = vrot.slane %v3922_v18, %v6778_v60  ;;  %v3972_v60 = vld [vmem:[%s7488_s13] sm:$0x1] }
 0x522   : > { %3757 = vmatpush1.bf16.msra.mxu1 %v5528_v24 }
 0x523   : > { %4909 = vmatprep.subr.bf16.mxu1 %v5555_v5 }
 0x525   : > { %3775 = vmatmul.mubr.bf16.vlgmr.msra.gmra.mxu1 %v3507_v30 }
 0x526   : > { %4910 = vmatpush3.bf16.msra.mxu1 %v5556_v17 }
 0x527   : > { %4911 = vmatprep.subr.bf16.mxu1 %v5557_v38 }
 0x52a   : > { %4912 = vmatpush3.bf16.msra.mxu1 %v5558_v26 }
 0x52b   : > { %4913 = vmatprep.subr.bf16.mxu1 %v5559_v11 }
 0x52e   : > { %4914 = vmatpush3.bf16.msra.mxu1 %v5560_v58 }
 0x52f   : > { %4915 = vmatprep.subr.bf16.mxu1 %v5561_v20 }
 0x532   : > { %4916 = vmatpush3.bf16.msra.mxu1 %v5562_v12 }
 0x5c5   : > { %v4903_v34 = vpop.f32.mrf.mxu1 }
 0x5c7   : > { %v4904_v54 = vpop.f32.mrf.mxu1 }
 0x5c8   : > { %v4905_v51 = vadd.f32 %v4904_v54, %v4903_v34  ;;  %v3931_v34 = vrot.slane %v3922_v18, %v6771_v57 }
 0x5c9   : > { %v4906_v35 = vpop.f32.mrf.mxu1 }
 0x5ca   : > { %v3491_v53 = vadd.f32 %v4905_v51, %v4620_v39 }
 0x5cb   : > { %v4907_v8 = vpop.f32.mrf.mxu1 }
 0x5cc   : > { %3497 = vst [vmem:[%s6301_s5] sm:$0xff] %v3491_v53  ;;  %v4908_v23 = vadd.f32 %v4907_v8, %v4906_v35 }
 0x5ce   : > { %v3494_v28 = vadd.f32 %v4908_v23, %v4620_v39 }
 0x5d0   : > { %3498 = vst [vmem:[%s6301_s5 + $0x8] sm:$0xff] %v3494_v28  ;;  %v3499_v40 = vadd.f32 %v3494_v28, %v3491_v53 }
 0x5d2   : > { %v3500_v37 = vrot.slane %v3499_v40, 4 }
 0x5d4   : > { %v3501_v25 = vadd.f32 %v3500_v37, %v3499_v40 }
 0x5d6   : > { %v3502_v59 = vrot.slane %v3501_v25, 2 }
 0x5d8   : > { %v3503_v21 = vadd.f32 %v3502_v59, %v3501_v25 }
 0x5da   : > { %v3504_v52 = vrot.slane %v3503_v21, 1 }
 0x5dc   : > { %v3505_v10 = vadd.f32 %v3504_v52, %v3503_v21 }
 0x5de   : > { %v3524_v49 = vpack.c.bf16 %v3505_v10, %v3505_v10 }
 0x5e0   : > { %3654 = vmatmul.mubr.bf16.vlgmr.msra.gmra.mxu0 %v3524_v49 }
 0x5e1   : > { %3880 = vmatpush1.bf16.msra.mxu0 %v5531_v43  ;;  %3911 = vmatprep.mubr.bf16.mxu0 %v5917_v48  ;;  %v5549_v48 = vld [vmem:[#allocation11 + $0x10] ss:$8 sps:$4 sm:$0xff]  }
 0x5e2   : > { %3881 = vmatprep.subr.bf16.mxu0 %v5536_v56 }
 0x5e5   : > { %3882 = vmatpush1.bf16.msra.mxu0 %v5534_v45  ;;  %v3776_v9 = vpop.f32.mrf.mxu1 }
 0x5e6   : > { %3883 = vmatprep.subr.bf16.mxu0 %v5539_v3 }
 0x5e7   : > { %v3778_v19 = vpop.f32.mrf.mxu1 }
 0x5e9   : > { %3884 = vmatpush1.bf16.msra.mxu0 %v5537_v47  ;;  %v3780_v36 = vpop.f32.mrf.mxu1 }
 0x5ea   : > { %3885 = vmatprep.subr.bf16.mxu0 %v5542_v6 }
 0x5eb   : > { %v3781_v63 = vpop.f32.mrf.mxu1 }
 0x5ed   : > { %3886 = vmatpush1.bf16.msra.mxu0 %v5540_v33 }
 0x5ee   : > { %3887 = vmatprep.subr.bf16.mxu0 %v5545_v41 }
 0x5f1   : > { %3888 = vmatpush1.bf16.msra.mxu0 %v5543_v2 }
 0x5f2   : > { %3889 = vmatprep.subr.bf16.mxu0 %v5548_v7 }
 0x5f5   : > { %3890 = vmatpush1.bf16.msra.mxu0 %v5546_v22 }
 0x5f6   : > { %3891 = vmatprep.subr.bf16.mxu0 %v5551_v62 }
 0x5f9   : > { %3892 = vmatpush1.bf16.msra.mxu0 %v5549_v48 }
 0x5fa   : > { %3893 = vmatprep.subr.bf16.mxu0 %v5554_v0 }
 0x5fd   : > { %3894 = vmatpush1.bf16.msra.mxu0 %v5552_v61 }
 0x600   : > { %3912 = vmatmul.mubr.bf16.vlgmr.msra.gmra.mxu0 %v6400_v31  ;;  %v5563_v31 = vld [vmem:[#allocation13 + $0x58] sm:$0xff]  }
 0x601   : > { %4917 = vmatprep.subr.bf16.mxu1 %v5563_v31 }
 0x602   : > { %4918 = vmatpush3.bf16.msra.mxu1 %v5564_v4 }
 0x603   : > { %4919 = vmatprep.subr.bf16.mxu1 %v5565_v16 }
 0x606   : > { %4920 = vmatpush3.bf16.msra.mxu1 %v5566_v46 }
 0x607   : > { %4921 = vmatprep.subr.bf16.mxu1 %v5567_v42 }
 0x60a   : > { %4922 = vmatpush3.bf16.msra.mxu1 %v5568_v15 }
 0x60b   : > { %4923 = vmatprep.subr.bf16.mxu1 %v5569_v55 }
 0x60e   : > { %4924 = vmatpush3.bf16.msra.mxu1 %v5570_v50 }
 0x6a0   : > { %v3655_v44 = vpop.f32.mrf.mxu0 }
 0x6a1   : > { %v3777_v24 = vadd.f32 %v3776_v9, %v3655_v44 }
 0x6a2   : > { %v3657_v13 = vpop.f32.mrf.mxu0 }
 0x6a3   : > { %v3779_v1 = vadd.f32 %v3778_v19, %v3657_v13 }
 0x6a4   : > { %v3659_v32 = vpop.f32.mrf.mxu0 }
 0x6a6   : > { %v3660_v14 = vpop.f32.mrf.mxu0 }
 0x6c0   : > { %v3913_v29 = vpop.f32.mrf.mxu0 }
 0x6c1   : > { %v3920_v30 = vadd.f32 %v3913_v29, %v3777_v24 }
 0x6c2   : > { %v3915_v39 = vpop.f32.mrf.mxu0 }
 0x6c3   : > { %v3934_v54 = vadd.f32 %v3927_v27, %v3920_v30  ;;  %v3921_v51 = vadd.f32 %v3915_v39, %v3779_v1 }
 0x6c4   : > { %v3917_v35 = vpop.f32.mrf.mxu0 }
 0x6c5   : > { %v3935_v53 = vadd.f32 %v3931_v34, %v3921_v51  ;;  %v3936_v8 = vmax.f32 %v3934_v54, 0.0 }
 0x6c6   : > { %v3918_v23 = vpop.f32.mrf.mxu0 }
 0x6c7   : > { %v3937_v28 = vmax.f32 %v3935_v53, 0.0  ;;  %v3938_v37 = vpack.c.bf16 %v3936_v8, %v3936_v8 }
 0x6c9   : > { %v3939_v40 = vpack.c.bf16 %v3937_v28, %v3937_v28 }
 0x6cb   : > { %4101 = vmatprep.mubr.bf16.mxu1 %v3939_v40 }
 0x6cc   : > { %4102 = vmatmul.mubr.bf16.vlgmr.msra.gmra.mxu1 %v3938_v37 }
 0x78c   : > { %v4925_v25 = vpop.f32.mrf.mxu1 }
 0x78e   : > { %v4926_v59 = vpop.f32.mrf.mxu1 }
 0x78f   : > { %v4927_v57 = vadd.f32 %v4926_v59, %v4925_v25 }
 0x790   : > { %v4928_v21 = vpop.f32.mrf.mxu1 }
 0x791   : > { %v4104_v52 = vadd.f32 %v4927_v57, %v3972_v60 }
 0x792   : > { %v4929_v10 = vpop.f32.mrf.mxu1 }
 0x793   : > { %4109 = vst [vmem:[%s6303_s17] sm:$0x1] %v4104_v52 }
 0x794 PF: > { %s4115_s19 = sand.u32 1, %s6109_s3   ;;  %s4712_s29 = sshll.u32 %s5889_s27, 8 }
 0x795   : > { %s4151_s30 = sshll.u32 %s6301_s5, 4  ;;  %s7489_s7 = sld [smem:[#allocation61_spill]]  ;;  %s7215_s30 = int_to_ptr.vmem [resolvable:$true] %s4151_s30 }
 0x796   : > { %s7217_s28 = scalar_lea.sflag [#allocation16], %s4115_s19  ;;  %s5701_s24 = scalar_lea.vmem %s7215_s30, 256 }
 0x797   : > { %p5702_p2 = scmp.ne.s32.totalorder %s7215_s30, %s5701_s24  ;;  %s5918_s3 = smov [#allocation15]  }
 0x798   : > { %s5705_s4 = sshll.u32 %s5918_s3, 4  ;;  %s5706_s4 = int_to_ptr.vmem [resolvable:$false] %s5705_s4 }
 0x799   : > { %p5703_p9 = pnand %p5702_p2, %p6167_p5  ;;  %s5707_s5 = scalar_lea.vmem %s5706_s4, 512 }
 0x79a   : > { %p5708_p3 = scmp.lt.s32.totalorder %s7215_s30, %s5706_s4  ;;  %p5709_p10 = scmp.lt.s32.totalorder %s5707_s5, %s5701_s24 }
 0x79b   : > { %s7490_s0 = smov %s7489_s7  ;;  %s7213_s26 = scalar_lea.hbm %s7489_s7, %s4712_s29 }
 0x79c   : > { %p5704_p4 = pneg %p5703_p9  ;;  %p5710_p13 = por %p5709_p10, %p5708_p3 }
 0x79e   : > { %p5711_p7 = pnand %p5710_p13, %p5704_p4 }
 0x7a0   : > { %5714 = shalt.err (!%p5711_p7)
}
 0x7a1   : > { %s5715_s15 = scalar_lea.hbm %s7213_s26, 256  ;;  %s5719_s6 = scalar_lea.hbm %s7490_s0, 512 }
 0x7a2   : > { %p5716_p8 = scmp.ne.s32.totalorder %s7213_s26, %s5715_s15  ;;  %p5720_p0 = scmp.lt.s32.totalorder %s7213_s26, %s7490_s0 }
 0x7a3   : > { %p5721_p1 = scmp.lt.s32.totalorder %s5719_s6, %s5715_s15 }
 0x7a4   : > { %p5717_p11 = pnand %p5716_p8, %p6167_p5 }
 0x7a5   : > { %p5722_p6 = por %p5721_p1, %p5720_p0 }
 0x7a6   : > { %p5718_p12 = pneg %p5717_p11 }
 0x7a8   : > { %p5723_p2 = pnand %p5722_p6, %p5718_p12 }
 0x7aa   : > { %5726 = shalt.err (!%p5723_p2)
}
 0x7ab   : > { %s5919_s19 = smov 128   ;;  %s7491_s29 = sld [smem:[#allocation26_spill]] }
 0x7ac   : > { %s7492_s25 = sld [smem:[#allocation35_spill]]  ;;  %s5920_s2 = smov 8  }
 0x7ad   : > { %5050 = dma.vmem_to_hbm [thread:$0]  (%p6167_p5), %s7215_s30, 256, %s7213_s26, %s7217_s28, %s5919_s19, %s5919_s19, %s5920_s2  }
 0x7ae   : > { %s4704_s7 = sshll.u32 %s5889_s27, 5  ;;  %s4135_s3 = sshll.u32 %s6299_s9, 4  ;;  %s7246_s3 = int_to_ptr.vmem [resolvable:$true] %s4135_s3 }
 0x7af   : > { %s4132_s24 = sadd.s32 %s4704_s7, %s6275_s1  ;;  %s7493_s20 = sld [smem:[#allocation60_spill]] }
 0x7b0   : > { %s4705_s4 = sshll.u32 %s4132_s24, 7  ;;  %s4708_s6 = sshll.u32 %s5889_s27, 4 }
 0x7b1   : > { %s7494_s16 = sand.u32 1, %s7491_s29   ;;  %s5727_s0 = scalar_lea.vmem %s7246_s3, 2048 }
 0x7b2   : > { %s4111_s13 = scalar_lea.sflag [#allocation7], %s7494_s16  ;;  %p5728_p9 = scmp.ne.s32.totalorder %s7246_s3, %s5727_s0 }
 0x7b3   : > { %p7495_p4 = scmp.ne.s32.totalorder %s7492_s25, 0  ;;  %s5921_s9 = smov [#allocation14]  }
 0x7b4   : > { %s5731_s1 = sshll.u32 %s5921_s9, 4  ;;  %s5732_s1 = int_to_ptr.vmem [resolvable:$false] %s5731_s1 }
 0x7b5   : > { %s7251_s22 = scalar_lea.hbm %s7493_s20, %s4705_s4  ;;  %p5729_p3 = pnand %p5728_p9, %p7495_p4 }
 0x7b6   : > { %s5733_s30 = scalar_lea.vmem %s5732_s1, 4096  ;;  %p5734_p13 = scmp.lt.s32.totalorder %s7246_s3, %s5732_s1 }
 0x7b7   : > { %p5730_p10 = pneg %p5729_p3  ;;  %p5735_p7 = scmp.lt.s32.totalorder %s5733_s30, %s5727_s0 }
 0x7b9   : > { %p5736_p8 = por %p5735_p7, %p5734_p13 }
 0x7bb   : > { %p5737_p11 = pnand %p5736_p8, %p5730_p10 }
 0x7bd   : > { %5740 = shalt.err (!%p5737_p11)
}
 0x7be   : > { %s5741_s26 = scalar_lea.hbm %s7251_s22, 2048  ;;  %s5745_s24 = scalar_lea.hbm %s7493_s20, 8192 }
 0x7bf   : > { %p5742_p12 = scmp.ne.s32.totalorder %s7251_s22, %s5741_s26  ;;  %p5746_p6 = scmp.lt.s32.totalorder %s7251_s22, %s7493_s20 }
 0x7c0   : > { %p5747_p2 = scmp.lt.s32.totalorder %s5745_s24, %s5741_s26 }
 0x7c1   : > { %p5743_p0 = pnand %p5742_p12, %p7495_p4 }
 0x7c2   : > { %p5748_p9 = por %p5747_p2, %p5746_p6 }
 0x7c3   : > { %p5744_p1 = pneg %p5743_p0 }
 0x7c5   : > { %p5749_p3 = pnand %p5748_p9, %p5744_p1 }
 0x7c7   : > { %5752 = shalt.err (!%p5749_p3)
}
 0x7c8   : > { %5049 = dma.vmem_to_hbm [thread:$0]  (%p7495_p4), %s7246_s3, 2048, %s7251_s22, %s4111_s13, %s5919_s19, %s5919_s19, %s5920_s2  }
 0x7c9   : > { %s7496_s16 = sld [smem:[#allocation62_spill]]  ;;  %s4167_s1 = sshll.u32 %s6303_s17, 4  ;;  %s4168_s1 = int_to_ptr.vmem [resolvable:$true] %s4167_s1 }
 0x7ca   : > { %s5753_s30 = scalar_lea.vmem %s4168_s1, 16  ;;  %s5922_s25 = smov [#allocation17]  }
 0x7cb   : > { %p5754_p10 = scmp.ne.s32.totalorder %s4168_s1, %s5753_s30  ;;  %s5757_s26 = sshll.u32 %s5922_s25, 4  ;;  %s5758_s26 = int_to_ptr.vmem [resolvable:$false] %s5757_s26 }
 0x7cc   : > { %s5759_s29 = scalar_lea.vmem %s5758_s26, 32  ;;  %p5760_p8 = scmp.lt.s32.totalorder %s4168_s1, %s5758_s26 }
 0x7cd   : > { %p5755_p13 = pnand %p5754_p10, %p6167_p5  ;;  %p5761_p11 = scmp.lt.s32.totalorder %s5759_s29, %s5753_s30 }
 0x7cf   : > { %s4165_s9 = scalar_lea.hbm %s7496_s16, %s4708_s6  ;;  %p5756_p7 = pneg %p5755_p13 }
 0x7d0   : > { %p5762_p12 = por %p5761_p11, %p5760_p8 }
 0x7d2   : > { %p5763_p4 = pnand %p5762_p12, %p5756_p7 }
 0x7d4   : > { %5766 = shalt.err (!%p5763_p4)
}
 0x7d5   : > { %s5767_s27 = scalar_lea.hbm %s4165_s9, 16  ;;  %s5771_s2 = scalar_lea.hbm %s7496_s16, 32 }
 0x7d6   : > { %p5768_p0 = scmp.ne.s32.totalorder %s4165_s9, %s5767_s27  ;;  %p5772_p2 = scmp.lt.s32.totalorder %s4165_s9, %s7496_s16 }
 0x7d7   : > { %p5773_p9 = scmp.lt.s32.totalorder %s5771_s2, %s5767_s27 }
 0x7d8   : > { %p5769_p1 = pnand %p5768_p0, %p6167_p5 }
 0x7d9   : > { %p5774_p3 = por %p5773_p9, %p5772_p2 }
 0x7da   : > { %p5770_p6 = pneg %p5769_p1 }
 0x7dc   : > { %p5775_p10 = pnand %p5774_p3, %p5770_p6 }
 0x7de   : > { %5778 = shalt.err (!%p5775_p10)
}
 0x7df   : > { %5051 = dma.vmem_to_hbm [thread:$0]  (%p6167_p5), %s4168_s1, 16, %s4165_s9, %s7217_s28  }
 0x7e0 PF: > { %s7497_s6 = sld [smem:[#allocation31_spill]] }
 0x7e1   : > { %s7498_s13 = sld [smem:[#allocation25_spill]] }
 0x7e2   : > { %s7499_s7 = sld [smem:[#allocation37_spill]] }
 0x7e6   : > { %p5091_p13 = scmp.ge.s32.totalorder %s7497_s6, 2 }
 0x7e7   : > { %s4179_s24 = sand.u32 1, %s7498_s13  }
 0x7e8   : > { %p7500_p7 = scmp.ne.s32.totalorder %s7499_s7, 0  ;;  %s4180_s4 = scalar_lea.sflag [#allocation7], %s4179_s24 }
 0x7ea   : > { %p5072_p8 = pnand %p5091_p13, %p7500_p7 }
 0x7ec   : > { %p5073_p11 = pneg %p5072_p8 }
 0x7ee   : > { %5844 = dma.done.wait (%p5073_p11), %s4180_s4, 2048  }
 0x7ef   : > { %5846 = vsyncadd (%p5073_p11), %s4180_s4, 4294965248  ;;  %s7501_s5 = sadd.s32 4294967294, %s7497_s6   ;;  %s7502_s0 = sld [smem:[#allocation39_spill]] }
 0x7f0   : > { %s4188_s15 = sand.u32 1, %s7501_s5  }
 0x7f1   : > { %s4189_s12 = scalar_lea.sflag [#allocation16], %s4188_s15 }
 0x7f5   : > { %p7503_p12 = scmp.ne.s32.totalorder %s7502_s0, 0 }
 0x7f7   : > { %p5075_p4 = pnand %p5091_p13, %p7503_p12 }
 0x7f9   : > { %p5076_p0 = pneg %p5075_p4 }
 0x7fb   : > { %5848 = dma.done.wait (%p5076_p0), %s4189_s12, 272  }
 0x7fc   : > { %5850 = vsyncadd (%p5076_p0), %s4189_s12, 4294967024  ;;  %s43_s29 = sadd.s32 1, %s7497_s6   ;;  %s7505_s4 = sld [smem:[#allocation23_spill]] }
 0x7fd   : > { %p7307_p5 = scmp.ge.s32.totalorder %s43_s29, 6   ;;  %s7506_s30 = sld [smem:[#allocation24_spill]] }
 0x7fe   : > { %s7507_s24 = sld [smem:[#allocation38_spill]] }
 0x7ff   : > { %s7508_s25 = sld [smem:[#allocation26_spill]] }
 0x800   : > { %s7509_s5 = sld [smem:[#allocation27_spill]] }
 0x801   : > { %s7510_s1 = sld [smem:[#allocation36_spill]] }
 0x802   : > { %s7511_s26 = sld [smem:[#allocation28_spill]] }
 0x803   : > { %s7512_s2 = sld [smem:[#allocation34_spill]] }
 0x804   : > { %s7513_s6 = sld [smem:[#allocation29_spill]] }
 0x805   : > { %s7514_s27 = sld [smem:[#allocation30_spill]] }
 0x806   : > { %s7515_s7 = sld [smem:[#allocation32_spill]] }
 0x807   : > { %s7516_s9 = sld [smem:[#allocation33_spill]] }
 0x809   :  { %42 = sbr.rel (!%p7307_p5) target bundleno = 37 (0x25), region = 255 }
 0x80d   : > { %s7518_s28 = smov %s7516_s9 }
 0x80e   :  { %4202 = vsyncpa [#allocation6], 1 }
 0x80f   :  { %4204 = vsyncpa [#allocation6 + $0x1], 1 }
 0x810   :  { %4205 = vsyncpa [#allocation9], 1 }
 0x811   :  { %4206 = vsyncpa [#allocation12], 1 }
 0x812   :  { %4207 = vsyncpa [#allocation7], 1 }
 0x813   :  { %4209 = vsyncpa [#allocation7 + $0x1], 1 }
 0x814   :  { %4210 = vsyncpa [#allocation16], 1 }
 0x815   :  { %4212 = vsyncpa [#allocation16 + $0x1], 1 }

// kernel: tpu_custom_call.1
= control target key start
LH: loop header
LB: loop body
LE: loop exit
PB: predicated region body
PF: predicated region fallthrough
CT: control target
= control target key end

     0   :  { %s7351_s0 = inlined_call_operand.vmem [shape: bf16[2,256,384], index: 0, kind: input, shape index: {}]   ;;  %s7352_s1 = inlined_call_operand.vmem [shape: bf16[2,16,128], index: 1, kind: input, shape index: {}]   ;;  %s7353_s2 = inlined_call_operand.vmem [shape: bf16[2,1,128], index: 2, kind: input, shape index: {}]   ;;  %s7354_s3 = inlined_call_operand.vmem [shape: bf16[16,256], index: 3, kind: input, shape index: {}]   ;;  %s7355_s4 = inlined_call_operand.vmem [shape: bf16[384,320], index: 4, kind: input, shape index: {}]   ;;  %s7356_s5 = inlined_call_operand.vmem [shape: bf16[128,320], index: 5, kind: input, shape index: {}]   ;;  %s7357_s6 = inlined_call_operand.vmem [shape: f32[1,320], index: 6, kind: input, shape index: {}]   ;;  %s7358_s7 = inlined_call_operand.vmem [shape: bf16[320,128], index: 7, kind: input, shape index: {}]   ;;  %s7359_s8 = inlined_call_operand.vmem [shape: f32[1,128], index: 8, kind: input, shape index: {}]   ;;  %s7360_s9 = inlined_call_operand.vmem [shape: bf16[128,256], index: 9, kind: input, shape index: {}]   ;;  %s7361_s10 = inlined_call_operand.vmem [shape: bf16[128,256], index: 10, kind: input, shape index: {}]   ;;  %s7362_s11 = inlined_call_operand.vmem [shape: bf16[128,256], index: 11, kind: input, shape index: {}]   ;;  %s7363_s12 = inlined_call_operand.vmem [shape: f32[1,256], index: 12, kind: input, shape index: {}]   ;;  %s7364_s13 = inlined_call_operand.hbm [shape: bf16[256,128], index: 13, kind: input, shape index: {}]   ;;  %s7365_s14 = inlined_call_operand.vmem [shape: f32[1,128], index: 14, kind: input, shape index: {}]   ;;  %s7366_s15 = inlined_call_operand.hbm [shape: bf16[128,256], index: 15, kind: input, shape index: {}]   ;;  %s7367_s16 = inlined_call_operand.hbm [shape: bf16[128,256], index: 16, kind: input, shape index: {}]   ;;  %s7368_s17 = inlined_call_operand.hbm [shape: bf16[128,256], index: 17, kind: input, shape index: {}]   ;;  %s7369_s18 = inlined_call_operand.vmem [shape: f32[1,256], index: 18, kind: input, shape index: {}]   ;;  %s7370_s19 = inlined_call_operand.hbm [shape: bf16[256,128], index: 19, kind: input, shape index: {}]   ;;  %s7371_s20 = inlined_call_operand.vmem [shape: f32[1,128], index: 20, kind: input, shape index: {}]   ;;  %s7372_s21 = inlined_call_operand.hbm [shape: f32[2,256,128], index: 21, kind: output, shape index: {0}]   ;;  %s7373_s22 = inlined_call_operand.hbm [shape: f32[2,16,128], index: 22, kind: output, shape index: {1}]   ;;  %s7374_s23 = inlined_call_operand.hbm [shape: f32[2,1,128], index: 23, kind: output, shape index: {2}]  }
   0x1   :  { %7406 = sst [smem:[#allocation40_spill]] %s7351_s0 }
   0x2   :  { %7407 = sst [smem:[#allocation41_spill]] %s7352_s1 }
   0x3   :  { %7408 = sst [smem:[#allocation42_spill]] %s7353_s2 }
   0x4   :  { %7409 = sst [smem:[#allocation43_spill]] %s7354_s3 }
   0x5   :  { %7410 = sst [smem:[#allocation44_spill]] %s7355_s4 }
   0x6   :  { %7411 = sst [smem:[#allocation45_spill]] %s7356_s5 }
   0x7   :  { %7412 = sst [smem:[#allocation46_spill]] %s7357_s6 }
   0x8   :  { %7413 = sst [smem:[#allocation47_spill]] %s7358_s7 }
   0x9   :  { %7414 = sst [smem:[#allocation48_spill]] %s7360_s9 }
   0xa   :  { %7415 = sst [smem:[#allocation49_spill]] %s7361_s10 }
   0xb   :  { %7416 = sst [smem:[#allocation50_spill]] %s7362_s11 }
   0xc   :  { %7417 = sst [smem:[#allocation51_spill]] %s7363_s12 }
   0xd   :  { %7418 = sst [smem:[#allocation52_spill]] %s7364_s13 }
   0xe   :  { %7419 = sst [smem:[#allocation53_spill]] %s7365_s14 }
   0xf   :  { %7420 = sst [smem:[#allocation54_spill]] %s7366_s15 }
  0x10   :  { %7421 = sst [smem:[#allocation55_spill]] %s7367_s16 }
  0x11   :  { %7422 = sst [smem:[#allocation56_spill]] %s7368_s17 }
  0x12   :  { %7423 = sst [smem:[#allocation57_spill]] %s7369_s18 }
  0x13   :  { %7424 = sst [smem:[#allocation58_spill]] %s7370_s19 }
  0x14   :  { %7425 = sst [smem:[#allocation59_spill]] %s7371_s20 }
  0x15   :  { %7426 = sst [smem:[#allocation60_spill]] %s7372_s21 }
  0x16   :  { %7427 = sst [smem:[#allocation61_spill]] %s7373_s22 }
  0x17   :  { %7428 = sst [smem:[#allocation62_spill]] %s7374_s23 }
  0x18   :  { %29 = vsyncpa [#allocation6], 0 }
  0x19   :  { %30 = vsyncpa [#allocation9], 0 }
  0x1a   :  { %31 = vsyncpa [#allocation12], 0 }
  0x1b   :  { %32 = vsyncpa [#allocation7], 0 }
  0x1c   :  { %34 = vsyncpa [#allocation7 + $0x1], 0 }
  0x1d   :  { %35 = vsyncpa [#allocation16], 0 }
  0x1e   :  { %37 = vsyncpa [#allocation16 + $0x1], 0  ;;  %s6043_s4 = smov 0   ;;  %s6045_s30 = smov 0  }
  0x1f   :  { %s6047_s24 = smov 0   ;;  %s6049_s25 = smov 0  }
  0x20   :  { %s6051_s5 = smov 0   ;;  %s6053_s1 = smov 0  }
  0x21   :  { %s6055_s26 = smov 0   ;;  %s6057_s2 = smov 0  }
  0x22   :  { %s6059_s6 = smov 0   ;;  %s6061_s27 = smov 0  }
  0x23   :  { %s6063_s7 = smov 0   ;;  %s6065_s28 = smov 0  }
  0x24   :  { %s6067_s29 = smov 0  }
  0x25 LB: > { %7429 = sst [smem:[#allocation23_spill]] %s5857_s30  ;;  %s6109_s3 = sadd.s32 4294967295, %s5901_s29   ;;  %s5901_s29 = sphi %s6067_s29, %s43_s29   ;;  %s5897_s28 = sphi %s6065_s28, %s7518_s28   ;;  %s5893_s7 = sphi %s6063_s7, %s7515_s7   ;;  %s5889_s27 = sphi %s6061_s27, %s7514_s27   ;;  %s5885_s6 = sphi %s6059_s6, %s7513_s6   ;;  %s5881_s2 = sphi %s6057_s2, %s7512_s2   ;;  %s5877_s26 = sphi %s6055_s26, %s7511_s26   ;;  %s5873_s1 = sphi %s6053_s1, %s7510_s1   ;;  %s5869_s5 = sphi %s6051_s5, %s7509_s5   ;;  %s5865_s25 = sphi %s6049_s25, %s7508_s25   ;;  %s5861_s24 = sphi %s6047_s24, %s7507_s24   ;;  %s5857_s30 = sphi %s6045_s30, %s7506_s30   ;;  %s5853_s4 = sphi %s6043_s4, %s7505_s4  }
  0x26   : > { %7430 = sst [smem:[#allocation24_spill]] %s5861_s24  ;;  %s52_s23 = sadd.s32 1, %s5893_s7 }
  0x27   : > { %7431 = sst [smem:[#allocation25_spill]] %s5865_s25  ;;  %s55_s21 = sadd.s32 1, %s5897_s28 }
  0x28   : > { %7432 = sst [smem:[#allocation26_spill]] %s5869_s5  ;;  %p53_p0 = scmp.ge.s32.totalorder %s52_s23, 2 }
  0x29   : > { %7433 = sst [smem:[#allocation27_spill]] %s5873_s1  ;;  %s142_s22 = sadd.s32 1, %s5881_s2 }
  0x2a   : > { %7434 = sst [smem:[#allocation28_spill]] %s5881_s2  ;;  %p149_p1 = scmp.ne.s32.totalorder %s5881_s2, %s5877_s26 }
  0x2b   : > { %7435 = sst [smem:[#allocation29_spill]] %s5893_s7  ;;  %p150_p2 = scmp.eq.s32.totalorder %s5901_s29, 0 }
  0x2c   : > { %7436 = sst [smem:[#allocation30_spill]] %s5897_s28  ;;  %s7520_s23 = smov (%p53_p0, %s52_s23), 0 }
  0x2d   : > { %7437 = sst [smem:[#allocation31_spill]] %s5901_s29  ;;  %s7522_s21 = smov (!%p53_p0, %s55_s21), %s5897_s28 }
  0x2e   : > { %7438 = sst [smem:[#allocation32_spill]] %s7520_s23  ;;  %s139_s20 = ssub.s32 %s5893_s7, %s7520_s23 }
  0x2f   : > { %p6123_p3 = por %p150_p2, %p149_p1  ;;  %p57_p4 = scmp.ge.s32.totalorder %s7522_s21, 2 }
  0x30   : > { %p140_p5 = scmp.eq.s32.totalorder %s139_s20, 0  ;;  %s527_s18 = sadd.s32 1, %s5873_s1 }
  0x31   : > { %p537_p6 = scmp.ne.s32.totalorder %s5873_s1, %s5869_s5  ;;  %s7524_s21 = smov (%p57_p4, %s7522_s21), 0 }
  0x32   : > { %7440 = sst [smem:[#allocation33_spill]] %s7524_s21  ;;  %s522_s14 = ssub.s32 %s5897_s28, %s7524_s21 }
  0x33   : > { %s6133_s23 = scalar_select %p140_p5, %s5881_s2, %s142_s22  }
  0x34   : > { %p538_p7 = scmp.eq.s32.totalorder %s6109_s3, 3  ;;  %s524_s12 = sor.u32 %s522_s14, %s139_s20 }
  0x35   : > { %7441 = sst [smem:[#allocation34_spill]] %s6133_s23  ;;  %p543_p8 = scmp.ne.s32.totalorder %s5869_s5, %s5865_s25 }
  0x36   : > { %p525_p9 = scmp.eq.s32.totalorder %s524_s12, 0  ;;  %p6142_p10 = por %p538_p7, %p537_p6 }
  0x37   : > { %s7444_s10 = sadd.s32 4294967294, %s5901_s29   ;;  %p551_p12 = scmp.eq.s32.totalorder %s522_s14, 0 }
  0x38   : > { %s7442_s9 = scalar_select %p6142_p10, 1, 0 }
  0x39   : > { %p544_p11 = scmp.eq.s32.totalorder %s7444_s10, 3  ;;  %s553_s21 = sadd.s32 1, %s5861_s24 }
  0x3a   : > { %7443 = sst [smem:[#allocation35_spill]] %s7442_s9  ;;  %p563_p0 = scmp.ne.s32.totalorder %s5861_s24, %s5857_s30 }
  0x3b   : > { %s6149_s11 = scalar_select %p525_p9, %s5873_s1, %s527_s18  }
  0x3c   : > { %p6151_p13 = por %p544_p11, %p543_p8  ;;  %p569_p1 = scmp.ne.s32.totalorder %s5857_s30, %s5853_s4 }
  0x3d   : > { %7445 = sst [smem:[#allocation36_spill]] %s6149_s11  ;;  %p4397_p2 = scmp.ge.s32.totalorder %s5901_s29, 1 }
  0x3e   : > { %s7446_s22 = scalar_select %p6151_p13, 1, 0 }
  0x3f   : > { %s6157_s20 = scalar_select %p551_p12, %s5861_s24, %s553_s21  }
  0x40   : > { %7447 = sst [smem:[#allocation37_spill]] %s7446_s22  ;;  %p603_p4 = scmp.lt.s32.totalorder %s5901_s29, 5 }
  0x41   : > { %7448 = sst [smem:[#allocation38_spill]] %s6157_s20  ;;  %p6167_p5 = por %p563_p0, %p538_p7 }
  0x42   : > { %p6171_p6 = por %p569_p1, %p544_p11  ;;  %p6175_p8 = pnand %p4397_p2, %p603_p4 }
  0x43   : > { %p7388_p9 = scmp.eq.s32.totalorder %s6109_s3, 0  ;;  %s5903_s18 = smov [#allocation8]  }
  0x44   : > { %s7450_s10 = scalar_select %p6171_p6, 1, 0 }
  0x45   : > { %p5055_p12 = pneg %p6175_p8  ;;  %s658_s21 = sshll.u32 %s5903_s18, 4  ;;  %s659_s21 = int_to_ptr.vmem [resolvable:$true] %s658_s21 }
  0x46   : > { %7451 = sst [smem:[#allocation39_spill]] %s7450_s10  ;;  %s5904_s28 = smov [#allocation11]  }
  0x47   : > { %p6184_p7 = pnand %p7388_p9, %p5055_p12  ;;  %s684_s23 = sshll.u32 %s5904_s28, 4  ;;  %s685_s23 = int_to_ptr.vmem [resolvable:$true] %s684_s23 }
  0x48   : > { %s5582_s1 = scalar_lea.vmem %s659_s21, 2048  ;;  %p5590_p4 = scmp.lt.s32.totalorder %s659_s21, %s659_s21 }
  0x49   : > { %p6190_p11 = pneg %p6184_p7  ;;  %p5583_p0 = scmp.ne.s32.totalorder %s659_s21, %s5582_s1 }
  0x4a   : > { %p5591_p6 = scmp.lt.s32.totalorder %s5582_s1, %s5582_s1 }
  0x4b   : > { %p5585_p1 = pnand %p5583_p0, %p6190_p11 }
  0x4c   : > { %p5592_p12 = por %p5591_p6, %p5590_p4 }
  0x4d   : > { %p5586_p2 = pneg %p5585_p1 }
  0x4f   : > { %p5593_p9 = pnand %p5592_p12, %p5586_p2 }
  0x51   : > { %5596 = shalt.err (!%p5593_p9)
}
  0x52   : > { %s7392_s18 = smov 128   ;;  %s7393_s28 = smov 8  }
  0x53   : > { %s7455_s15 = sld [smem:[#allocation54_spill]]  ;;  %s5608_s10 = scalar_lea.vmem %s685_s23, 2048 }
  0x54   : > { %p5609_p0 = scmp.ne.s32.totalorder %s685_s23, %s5608_s10  ;;  %p5616_p2 = scmp.lt.s32.totalorder %s685_s23, %s685_s23 }
  0x55   : > { %p5617_p9 = scmp.lt.s32.totalorder %s5608_s10, %s5608_s10 }
  0x56   : > { %p5611_p1 = pnand %p5609_p0, %p6190_p11 }
  0x57   : > { %p5618_p4 = por %p5617_p9, %p5616_p2 }
  0x58   : > { %p5612_p6 = pneg %p5611_p1 }
  0x59   : > { %5061 = dma.hbm_to_vmem [thread:$0]  (!%p6184_p7), %s7455_s15, 2048, %s659_s21, [#allocation9], %s7392_s18, %s7392_s18, %s7393_s28  }
  0x5a   : > { %p5619_p12 = pnand %p5618_p4, %p5612_p6 }
  0x5c   : > { %5622 = shalt.err (!%p5619_p12)
}
  0x5d   : > { %s7456_s17 = sld [smem:[#allocation56_spill]]  ;;  %s5907_s24 = smov [#allocation5]  }
  0x5e   : > { %s642_s20 = sshll.u32 %s5907_s24, 4  ;;  %s643_s20 = int_to_ptr.vmem [resolvable:$true] %s642_s20 }
  0x5f   : > { %s5634_s21 = scalar_lea.vmem %s643_s20, 2048  ;;  %p5642_p6 = scmp.lt.s32.totalorder %s643_s20, %s643_s20 }
  0x60   : > { %p5635_p0 = scmp.ne.s32.totalorder %s643_s20, %s5634_s21  ;;  %p5643_p9 = scmp.lt.s32.totalorder %s5634_s21, %s5634_s21 }
  0x62   : > { %p5637_p1 = pnand %p5635_p0, %p6190_p11  ;;  %p5644_p4 = por %p5643_p9, %p5642_p6 }
  0x63   : > { %5067 = dma.hbm_to_vmem [thread:$0]  (!%p6184_p7), %s7456_s17, 2048, %s685_s23, [#allocation12], %s7392_s18, %s7392_s18, %s7393_s28  }
  0x64   : > { %p5638_p2 = pneg %p5637_p1 }
  0x66   : > { %p5645_p12 = pnand %p5644_p4, %p5638_p2 }
  0x68   : > { %5648 = shalt.err (!%p5645_p12)
}
  0x69   : > { %s5908_s10 = smov 64   ;;  %s5909_s15 = smov 4  }
  0x6a   : > { %s7457_s13 = sld [smem:[#allocation52_spill]]  ;;  %s5910_s1 = smov [#allocation10]  }
  0x6b   : > { %s671_s24 = sshll.u32 %s5910_s1, 4  ;;  %s5911_s18 = smov [#allocation13]   ;;  %s672_s24 = int_to_ptr.vmem [resolvable:$true] %s671_s24 }
  0x6c   : > { %s700_s21 = sshll.u32 %s5911_s18, 4  ;;  %s5660_s28 = scalar_lea.vmem %s672_s24, 2048  ;;  %s701_s21 = int_to_ptr.vmem [resolvable:$true] %s700_s21 }
  0x6d   : > { %p5661_p0 = scmp.ne.s32.totalorder %s672_s24, %s5660_s28  ;;  %p5668_p6 = scmp.lt.s32.totalorder %s672_s24, %s672_s24 }
  0x6e   : > { %p5669_p9 = scmp.lt.s32.totalorder %s5660_s28, %s5660_s28 }
  0x6f   : > { %p5663_p1 = pnand %p5661_p0, %p6190_p11 }
  0x70   : > { %5058 = dma.hbm_to_vmem [thread:$0]  (!%p6184_p7), %s7457_s13, 2048, %s643_s20, [#allocation6], %s5908_s10, %s5908_s10, %s5909_s15  }
  0x71   : > { %p5664_p2 = pneg %p5663_p1  ;;  %p5670_p4 = por %p5669_p9, %p5668_p6 }
  0x73   : > { %p5671_p12 = pnand %p5670_p4, %p5664_p2 }
  0x75   : > { %5674 = shalt.err (!%p5671_p12)
}
  0x76   : > { %s7458_s17 = smov 8   ;;  %s7459_s23 = smov 128  }
  0x77   : > { %s7460_s16 = sld [smem:[#allocation55_spill]]  ;;  %s5686_s18 = scalar_lea.vmem %s701_s21, 2048 }
  0x78   : > { %p5687_p13 = scmp.ne.s32.totalorder %s701_s21, %s5686_s18  ;;  %p5694_p10 = scmp.lt.s32.totalorder %s701_s21, %s701_s21 }
  0x79   : > { %p5695_p6 = scmp.lt.s32.totalorder %s5686_s18, %s5686_s18 }
  0x7a   : > { %p5689_p0 = pnand %p5687_p13, %p6190_p11 }
  0x7b   : > { %p5696_p2 = por %p5695_p6, %p5694_p10 }
  0x7c   : > { %p5690_p1 = pneg %p5689_p0 }
  0x7d   : > { %5064 = dma.hbm_to_vmem [thread:$0]  (!%p6184_p7), %s7460_s16, 2048, %s672_s24, [#allocation9], %s7459_s23, %s7459_s23, %s7458_s17  }
  0x7e   : > { %p5697_p9 = pnand %p5696_p2, %p5690_p1 }
  0x80   : > { %5700 = shalt.err (!%p5697_p9)
}
  0x81   : > { %s7461_s19 = sld [smem:[#allocation58_spill]]  ;;  %p4403_p4 = scmp.ge.s32.totalorder %s5901_s29, 4 }
  0x83   : > { %713 = sbr.rel (%p4403_p4) target bundleno = 147 (0x93), region = 84 }
  0x87   : > { %5070 = dma.hbm_to_vmem [thread:$0]  (!%p6184_p7), %s7461_s19, 2048, %s701_s21, [#allocation12], %s5908_s10, %s5908_s10, %s5909_s15  }
  0x88   : > { %744 = sbr.rel (!%p6123_p3) target bundleno = 147 (0x93), region = 100  ;;  %s746_s11 = sand.u32 (%p6123_p3), 1, %s5881_s2  }
  0x89   : > { %s4405_s17 = sshll.u32 (%p6123_p3), %s5893_s7, 2  ;;  %s4404_s24 = sshll.u32 (%p6123_p3), %s746_s11, 3 }
  0x8a   : > { %s7462_s20 = sld [smem:[#allocation43_spill]] (%p6123_p3)  ;;  %s748_s18 = scalar_lea.vmem (%p6123_p3), [#allocation4], %s4404_s24 }
  0x90   : > { %s750_s22 = scalar_lea.vmem %s7462_s20, %s4405_s17 }
  0x91   : > { %v767_v0 = vld [vmem:[%s750_s22] sm:$0xf]  ;;  %v769_v1 = vld [vmem:[%s750_s22 + $0x8] sm:$0xf] }
  0x92   : > { %768 = vst [vmem:[%s748_s18] sm:$0xf] %v767_v0  ;;  %770 = vst [vmem:[%s748_s18 + $0x4] sm:$0xf] %v769_v1 }
  0x93 PF: > { %801 = sbr.rel (%p6175_p8) target bundleno = 2016 (0x7e0), region = 141  ;;  %s804_s15 = sand.u32 (!%p6175_p8), 1, %s5877_s26  }
  0x94   : > { %s6255_s0 = sshll.u32 (!%p6175_p8), %s804_s15, 3  ;;  %p7463_p3 = scmp.eq.s32.totalorder (!%p6175_p8), %s6109_s3, 0 }
  0x98   : > { %5832 = dma.done.wait (%p7463_p3), [#allocation6], 2048   ;;  %p7464_p10 = pmov %p7463_p3 }
  0x99   : > { %p7465_p13 = pmov %p7463_p3 }
  0x9a   : > { %5834 = vsyncadd (%p7464_p10), [#allocation6], 4294965248 }
  0x9b   : > { %5836 = dma.done.wait (%p7465_p13), [#allocation9], 4096   ;;  %p7466_p7 = pmov %p7463_p3 }
  0x9c   : > { %p7467_p8 = pmov %p7463_p3 }
  0x9d   : > { %5838 = vsyncadd (%p7466_p7), [#allocation9], 4294963200 }
  0x9e   : > { %5840 = dma.done.wait (%p7467_p8), [#allocation12], 4096   ;;  %p7468_p11 = pmov %p7463_p3 }
  0x9f   : > { %s7395_s26 = sand.u32 1, %s5869_s5   ;;  %s905_s14 = sand.u32 1, %s5857_s30  }
  0xa0   : > { %5842 = vsyncadd (%p7468_p11), [#allocation12], 4294963200  ;;  %s4413_s21 = sshll.u32 %s7395_s26, 7  ;;  %s4414_s28 = sshll.u32 %s905_s14, 4 }
  0xa1   : > { %s6275_s1 = sshll.u32 %s5885_s6, 4  ;;  %p915_p12 = scmp.lt.s32.totalorder %s5889_s27, 1 }
  0xa2   : > { %p917_p0 = scmp.lt.s32.totalorder %s6275_s1, 31  ;;  %s7469_s18 = sld [smem:[#allocation41_spill]] }
  0xa3   : > { %s6280_s11 = scalar_select %p915_p12, %s5889_s27, 1 }
  0xa4   : > { %s918_s17 = scalar_select %p917_p0, %s6275_s1, 31 }
  0xa5   : > { %s5028_s24 = smul.u32 96, %s6280_s11  ;;  %s4711_s23 = sshll.u32 %s6280_s11, 3 }
  0xa6   : > { %s5027_s4 = smul.u32 3, %s918_s17  ;;  %s7470_s13 = sld [smem:[#allocation42_spill]] }
  0xa7   : > { %s7471_s25 = sld [smem:[#allocation40_spill]]  ;;  %s6299_s9 = scalar_lea.vmem [#allocation14], %s4413_s21 }
  0xa8   : > { %s6288_s15 = scalar_lea.vmem %s7469_s18, %s4711_s23  ;;  %s921_s19 = sadd.s32 %s5028_s24, %s5027_s4 }
  0xa9   : > { %s4416_s7 = sshll.u32 %s921_s19, 2  ;;  %s6301_s5 = scalar_lea.vmem [#allocation15], %s4414_s28 }
  0xaa   : > { %s6303_s17 = scalar_lea.vmem [#allocation17], %s905_s14  ;;  %p4419_p1 = scmp.ne.s32.totalorder %s5885_s6, 0 }
  0xac   : > { %s932_s16 = scalar_lea.vmem %s7470_s13, %s6280_s11  ;;  %938 = sbr.rel (%p4419_p1) target bundleno = 180 (0xb4), region = 169 }
  0xad   : > { %s6297_s29 = scalar_lea.vmem %s7471_s25, %s4416_s7 }
  0xb1   : > { %v5912_v2 = vmov 0.0  }
  0xb2   : > { %939 = vst [vmem:[#allocation2] sm:$0xff] %v5912_v2  ;;  %940 = vst [vmem:[#allocation2 + $0x8] sm:$0xff] %v5912_v2 }
  0xb3   : > { %941 = vst [vmem:[#allocation3] sm:$0x1] %v5912_v2 }
  0xb4 PF: > { %s7472_s10 = sld [smem:[#allocation45_spill]]  ;;  %v5913_v4 = vmov 0.0   ;;  %vm5914_vm0 = vmmov 0   ;;  %v5915_v8 = vmov 0   ;;  %v6400_v31 = vld [vmem:[%s932_s16] sm:$0x1] }
  0xb5   : > { %4931 = vmatprep.subr.bf16.mxu1 %v5913_v4  ;;  %4947 = vmatprep.mubr.msk.bf16.mxu1 %vm5914_vm0, %v5913_v4  ;;  %s7473_s30 = sld [smem:[#allocation44_spill]]  ;;  %v6496_v62 = vld [vmem:[%s6297_s29 + $0x8] ss:$12 sps:$4 sm:$0xff]   ;;  %vm2528_vm1 = vcmask 523264   ;;  %s7478_s26 = scalar_lea.vmem [#allocation4], %s6255_s0 }
  0xb6   : > { %1168 = vmatprep.mubr.bf16.mxu0 %v5915_v8  ;;  %s7476_s18 = sld [smem:[#allocation47_spill]]  ;;  %p4570_p6 = scmp.ne.s32.totalorder %s5885_s6, 1 }
  0xb7   : > { %s7477_s25 = sld [smem:[#allocation46_spill]] }
  0xb8   : > { %s7479_s24 = sld [smem:[#allocation50_spill]] (!%p4570_p6) }
  0xb9   : > { %s7483_s6 = sld [smem:[#allocation48_spill]] (!%p4570_p6) }
  0xba   : > { %v5213_v3 = vld [vmem:[%s7472_s10 + $0xac] ss:$12 sps:$4 sm:$0xff]   ;;  %v5215_v5 = vld [vmem:[%s7472_s10 + $0xb0] ss:$12 sps:$4 sm:$0xff]   ;;  %v5216_v6 = vld [vmem:[%s7472_s10 + $0xa8] ss:$12 sps:$4 sm:$0xff]  }
  0xbb   : > { %1136 = vmatprep.subr.bf16.mxu0 %v5213_v3  ;;  %4932 = vmatpush3.bf16.msra.mxu1 %v5215_v5  ;;  %v5217_v7 = vld [vmem:[%s7472_s10 + $0x94] ss:$12 sps:$4 sm:$0xff]   ;;  %v5219_v9 = vld [vmem:[%s7472_s10 + $0x98] ss:$12 sps:$4 sm:$0xff]   ;;  %v5220_v10 = vld [vmem:[%s7472_s10 + $0x90] ss:$12 sps:$4 sm:$0xff]   ;;  %s7474_s14 = smov %s7473_s30 }
  0xbc   : > { %1137 = vmatpush1.bf16.msra.mxu0 %v5216_v6  ;;  %4933 = vmatprep.subr.bf16.mxu1 %v5913_v4  ;;  %v5221_v11 = vld [vmem:[%s7472_s10 + $0x7c] ss:$12 sps:$4 sm:$0xff]   ;;  %v5223_v12 = vld [vmem:[%s7472_s10 + $0x80] ss:$12 sps:$4 sm:$0xff]   ;;  %v5224_v13 = vld [vmem:[%s7472_s10 + $0x78] ss:$12 sps:$4 sm:$0xff]  }
  0xbd   : > { %1138 = vmatprep.subr.bf16.mxu0 %v5217_v7  ;;  %v5225_v14 = vld [vmem:[%s7472_s10 + $0x64] ss:$12 sps:$4 sm:$0xff]   ;;  %v5227_v15 = vld [vmem:[%s7472_s10 + $0x68] ss:$12 sps:$4 sm:$0xff]   ;;  %v5228_v16 = vld [vmem:[%s7472_s10 + $0x60] ss:$12 sps:$4 sm:$0xff]  }
  0xbe   : > { %v5229_v17 = vld [vmem:[%s7472_s10 + $0x4c] ss:$12 sps:$4 sm:$0xff]   ;;  %v5231_v18 = vld [vmem:[%s7472_s10 + $0x50] ss:$12 sps:$4 sm:$0xff]   ;;  %v5232_v19 = vld [vmem:[%s7472_s10 + $0x48] ss:$12 sps:$4 sm:$0xff]   ;;  %s7480_s23 = smov (!%p4570_p6), %s7479_s24 }
  0xbf   : > { %4934 = vmatpush3.bf16.msra.mxu1 %v5219_v9  ;;  %v5233_v20 = vld [vmem:[%s7472_s10 + $0x34] ss:$12 sps:$4 sm:$0xff]   ;;  %v5235_v21 = vld [vmem:[%s7472_s10 + $0x38] ss:$12 sps:$4 sm:$0xff]   ;;  %v5236_v22 = vld [vmem:[%s7472_s10 + $0x30] ss:$12 sps:$4 sm:$0xff]   ;;  %s7484_s11 = smov (!%p4570_p6), %s7483_s6 }
  0xc0   : > { %1139 = vmatpush1.bf16.msra.mxu0 %v5220_v10  ;;  %4935 = vmatprep.subr.bf16.mxu1 %v5913_v4  ;;  %v5237_v23 = vld [vmem:[%s7472_s10 + $0x1c] ss:$12 sps:$4 sm:$0xff]   ;;  %v5239_v24 = vld [vmem:[%s7472_s10 + $0x20] ss:$12 sps:$4 sm:$0xff]   ;;  %v5240_v25 = vld [vmem:[%s7472_s10 + $0x18] ss:$12 sps:$4 sm:$0xff]  }
  0xc1   : > { %1140 = vmatprep.subr.bf16.mxu0 %v5221_v11  ;;  %v5241_v26 = vld [vmem:[%s7472_s10 + $0x4] ss:$12 sps:$4 sm:$0xff]   ;;  %v5243_v27 = vld [vmem:[%s7472_s10 + $0x8] ss:$12 sps:$4 sm:$0xff]   ;;  %v5244_v28 = vld [vmem:[%s7472_s10] ss:$12 sps:$4 sm:$0xff]  }
  0xc2   : > { %v5247_v29 = vld [vmem:[%s7473_s30 + $0x22c] ss:$12 sps:$4 sm:$0xff]   ;;  %v5245_v32 = vld [vmem:[%s7474_s14 + $0x228] ss:$12 sps:$4 sm:$0xff]   ;;  %v5251_v36 = vld [vmem:[%s7474_s14 + $0x210] ss:$12 sps:$4 sm:$0xff]  }
  0xc3   : > { %4936 = vmatpush3.bf16.msra.mxu1 %v5223_v12  ;;  %v5250_v30 = vld [vmem:[%s7474_s14 + $0xac] ss:$12 sps:$4 sm:$0xff]   ;;  %v5248_v33 = vld [vmem:[%s7474_s14 + $0xa8] ss:$12 sps:$4 sm:$0xff]   ;;  %v5254_v37 = vld [vmem:[%s7474_s14 + $0x90] ss:$12 sps:$4 sm:$0xff]  }
  0xc4   : > { %1141 = vmatpush1.bf16.msra.mxu0 %v5224_v13  ;;  %4937 = vmatprep.subr.bf16.mxu1 %v5913_v4  ;;  %v5253_v34 = vld [vmem:[%s7474_s14 + $0x214] ss:$12 sps:$4 sm:$0xff]   ;;  %v5259_v38 = vld [vmem:[%s7474_s14 + $0x1fc] ss:$12 sps:$4 sm:$0xff]   ;;  %v5257_v40 = vld [vmem:[%s7474_s14 + $0x1f8] ss:$12 sps:$4 sm:$0xff]  }
  0xc5   : > { %1142 = vmatprep.subr.bf16.mxu0 %v5225_v14  ;;  %v5256_v35 = vld [vmem:[%s7474_s14 + $0x94] ss:$12 sps:$4 sm:$0xff]   ;;  %v5262_v39 = vld [vmem:[%s7474_s14 + $0x7c] ss:$12 sps:$4 sm:$0xff]   ;;  %v5260_v41 = vld [vmem:[%s7474_s14 + $0x78] ss:$12 sps:$4 sm:$0xff]  }
  0xc6   : > { %v5265_v42 = vld [vmem:[%s7474_s14 + $0x1e4] ss:$12 sps:$4 sm:$0xff]   ;;  %v5263_v44 = vld [vmem:[%s7474_s14 + $0x1e0] ss:$12 sps:$4 sm:$0xff]   ;;  %v5269_v48 = vld [vmem:[%s7474_s14 + $0x1c8] ss:$12 sps:$4 sm:$0xff]  }
  0xc7   : > { %4938 = vmatpush3.bf16.msra.mxu1 %v5227_v15  ;;  %v5268_v43 = vld [vmem:[%s7474_s14 + $0x64] ss:$12 sps:$4 sm:$0xff]   ;;  %v5266_v45 = vld [vmem:[%s7474_s14 + $0x60] ss:$12 sps:$4 sm:$0xff]   ;;  %v5272_v49 = vld [vmem:[%s7474_s14 + $0x48] ss:$12 sps:$4 sm:$0xff]  }
  0xc8   : > { %1143 = vmatpush1.bf16.msra.mxu0 %v5228_v16  ;;  %4939 = vmatprep.subr.bf16.mxu1 %v5913_v4  ;;  %v5271_v46 = vld [vmem:[%s7474_s14 + $0x1cc] ss:$12 sps:$4 sm:$0xff]   ;;  %v5277_v50 = vld [vmem:[%s7474_s14 + $0x1b4] ss:$12 sps:$4 sm:$0xff]   ;;  %v5275_v52 = vld [vmem:[%s7474_s14 + $0x1b0] ss:$12 sps:$4 sm:$0xff]  }
  0xc9   : > { %1144 = vmatprep.subr.bf16.mxu0 %v5229_v17  ;;  %v5274_v47 = vld [vmem:[%s7474_s14 + $0x4c] ss:$12 sps:$4 sm:$0xff]   ;;  %v5280_v51 = vld [vmem:[%s7474_s14 + $0x34] ss:$12 sps:$4 sm:$0xff]   ;;  %v5278_v53 = vld [vmem:[%s7474_s14 + $0x30] ss:$12 sps:$4 sm:$0xff]  }
  0xca   : > { %v5283_v54 = vld [vmem:[%s7474_s14 + $0x19c] ss:$12 sps:$4 sm:$0xff]   ;;  %v5281_v56 = vld [vmem:[%s7474_s14 + $0x198] ss:$12 sps:$4 sm:$0xff]   ;;  %v5287_v60 = vld [vmem:[%s7474_s14 + $0x180] ss:$12 sps:$4 sm:$0xff]  }
  0xcb   : > { %4940 = vmatpush3.bf16.msra.mxu1 %v5231_v18  ;;  %v5286_v55 = vld [vmem:[%s7474_s14 + $0x1c] ss:$12 sps:$4 sm:$0xff]   ;;  %v5284_v57 = vld [vmem:[%s7474_s14 + $0x18] ss:$12 sps:$4 sm:$0xff]   ;;  %v5290_v61 = vld [vmem:[%s7474_s14] ss:$12 sps:$4 sm:$0xff]  }
  0xcc   : > { %1145 = vmatpush1.bf16.msra.mxu0 %v5232_v19  ;;  %4941 = vmatprep.subr.bf16.mxu1 %v5913_v4  ;;  %v5289_v58 = vld [vmem:[%s7474_s14 + $0x184] ss:$12 sps:$4 sm:$0xff]   ;;  %v5297_v0 = vld [vmem:[%s7474_s14 + $0x16c] ss:$12 sps:$4 sm:$0xff]   ;;  %v5295_v1 = vld [vmem:[%s7474_s14 + $0x168] ss:$12 sps:$4 sm:$0xff]  }
  0xcd   : > { %1146 = vmatprep.subr.bf16.mxu0 %v5233_v20  ;;  %v5292_v59 = vld [vmem:[%s7474_s14 + $0x4] ss:$12 sps:$4 sm:$0xff]   ;;  %v5301_v6 = vld [vmem:[%s7474_s14 + $0x154] ss:$12 sps:$4 sm:$0xff]   ;;  %v5306_v11 = vld [vmem:[%s7474_s14 + $0x13c] ss:$12 sps:$4 sm:$0xff]  }
  0xce   : > { %v5294_v63 = vld [vmem:[%s7474_s14 + $0x170] ss:$12 sps:$4 sm:$0xff]   ;;  %v5303_v3 = vld [vmem:[%s7474_s14 + $0x158] ss:$12 sps:$4 sm:$0xff]   ;;  %v5312_v10 = vld [vmem:[%s7474_s14 + $0x140] ss:$12 sps:$4 sm:$0xff]  }
  0xcf   : > { %4942 = vmatpush3.bf16.msra.mxu1 %v5235_v21  ;;  %v5298_v2 = vld [vmem:[%s7474_s14 + $0xb0] ss:$12 sps:$4 sm:$0xff]   ;;  %v5307_v9 = vld [vmem:[%s7474_s14 + $0x98] ss:$12 sps:$4 sm:$0xff]   ;;  %v6535_v12 = vld [vmem:[%s6297_s29 + $0x20] ss:$12 sps:$4 sm:$0xff]  }
  0xd0   : > { %1147 = vmatpush1.bf16.msra.mxu0 %v5236_v22  ;;  %4943 = vmatprep.subr.bf16.mxu1 %v5913_v4  ;;  %v6514_v5 = vld [vmem:[%s6297_s29 + $0x4] ss:$12 sps:$4 sm:$0xff]   ;;  %v5316_v14 = vld [vmem:[%s7474_s14 + $0x80] ss:$12 sps:$4 sm:$0xff]   ;;  %v5321_v15 = vld [vmem:[%s7474_s14 + $0x128] ss:$12 sps:$4 sm:$0xff]  }
  0xd1   : > { %1148 = vmatprep.subr.bf16.mxu0 %v5237_v23  ;;  %v5299_v7 = vld [vmem:[%s7474_s14 + $0x150] ss:$12 sps:$4 sm:$0xff]   ;;  %v5304_v13 = vld [vmem:[%s7474_s14 + $0x138] ss:$12 sps:$4 sm:$0xff]   ;;  %v5308_v17 = vld [vmem:[%s7474_s14 + $0x120] ss:$12 sps:$4 sm:$0xff]  }
  0xd2   : > { %v5310_v16 = vld [vmem:[%s7474_s14 + $0x124] ss:$12 sps:$4 sm:$0xff]   ;;  %v5325_v18 = vld [vmem:[%s7474_s14 + $0x68] ss:$12 sps:$4 sm:$0xff]   ;;  %v5315_v21 = vld [vmem:[%s7474_s14 + $0x10c] ss:$12 sps:$4 sm:$0xff]  }
  0xd3   : > { %4944 = vmatpush3.bf16.msra.mxu1 %v5239_v24  ;;  %v6558_v19 = vld [vmem:[%s6297_s29 + $0x38] ss:$12 sps:$4 sm:$0xff]   ;;  %v5333_v20 = vld [vmem:[%s7474_s14 + $0x110] ss:$12 sps:$4 sm:$0xff]   ;;  %v5313_v22 = vld [vmem:[%s7474_s14 + $0x108] ss:$12 sps:$4 sm:$0xff]  }
  0xd4   : > { %1149 = vmatpush1.bf16.msra.mxu0 %v5240_v25  ;;  %4945 = vmatprep.subr.bf16.mxu1 %v5913_v4  ;;  %v5334_v23 = vld [vmem:[%s7474_s14 + $0x50] ss:$12 sps:$4 sm:$0xff]   ;;  %v5339_v24 = vld [vmem:[%s7474_s14 + $0xf8] ss:$12 sps:$4 sm:$0xff]   ;;  %v5319_v25 = vld [vmem:[%s7474_s14 + $0xf4] ss:$12 sps:$4 sm:$0xff]  }
  0xd5   : > { %1150 = vmatprep.subr.bf16.mxu0 %v5241_v26  ;;  %v5317_v26 = vld [vmem:[%s7474_s14 + $0xf0] ss:$12 sps:$4 sm:$0xff]   ;;  %s7485_s28 = sld [smem:[#allocation51_spill]] (!%p4570_p6) }
  0xd6   : > { %s7486_s4 = sld [smem:[#allocation53_spill]] (!%p4570_p6) }
  0xd7   : > { %4946 = vmatpush3.bf16.msra.mxu1 %v5243_v27  ;;  %v5341_v27 = vld [vmem:[%s7474_s14 + $0x38] ss:$12 sps:$4 sm:$0xff]   ;;  %s7487_s22 = sld [smem:[#allocation57_spill]] (!%p4570_p6) }
  0xd8   : > { %1151 = vmatpush1.bf16.msra.mxu0 %v5244_v28  ;;  %1982 = vmatprep.subr.bf16.mxu1 %v5247_v29  ;;  %v5346_v28 = vld [vmem:[%s7474_s14 + $0xe0] ss:$12 sps:$4 sm:$0xff]   ;;  %v5324_v29 = vld [vmem:[%s7474_s14 + $0xdc] ss:$12 sps:$4 sm:$0xff]   ;;  %s7488_s13 = sld [smem:[#allocation59_spill]] (!%p4570_p6) }
  0xd9   : > { %1869 = vmatprep.subr.bf16.mxu0 %v5250_v30  ;;  %v6593_v30 = vld [vmem:[%s6297_s29 + $0x50] ss:$12 sps:$4 sm:$0xff]  }
  0xda   : > { %4948 = vmatmul.mubr.bf16.vlgmr.msra.gmra.mxu1 %v6400_v31 }
  0xdb   : > { %1169 = vmatmul.mubr.bf16.vlgmr.msra.gmra.mxu0 %v6400_v31  ;;  %1983 = vmatpush1.bf16.msra.mxu1 %v5245_v32  ;;  %v5322_v32 = vld [vmem:[%s7474_s14 + $0xd8] ss:$12 sps:$4 sm:$0xff]  }
  0xdc   : > { %1870 = vmatpush1.bf16.msra.mxu0 %v5248_v33  ;;  %1984 = vmatprep.subr.bf16.mxu1 %v5253_v34  ;;  %v5348_v33 = vld [vmem:[%s7474_s14 + $0x20] ss:$12 sps:$4 sm:$0xff]   ;;  %v5353_v34 = vld [vmem:[%s7474_s14 + $0xc8] ss:$12 sps:$4 sm:$0xff]  }
  0xdd   : > { %1871 = vmatprep.subr.bf16.mxu0 %v5256_v35  ;;  %2014 = vmatprep.mubr.bf16.mxu1 %v5915_v8  ;;  %v5328_v35 = vld [vmem:[%s7474_s14 + $0xc4] ss:$12 sps:$4 sm:$0xff]  }
  0xde   : > { %1901 = vmatprep.mubr.bf16.mxu0 %v6514_v5 }
  0xdf   : > { %1985 = vmatpush1.bf16.msra.mxu1 %v5251_v36  ;;  %v5355_v36 = vld [vmem:[%s7474_s14 + $0x8] ss:$12 sps:$4 sm:$0xff]  }
  0xe0   : > { %1872 = vmatpush1.bf16.msra.mxu0 %v5254_v37  ;;  %1986 = vmatprep.subr.bf16.mxu1 %v5259_v38  ;;  %v5326_v37 = vld [vmem:[%s7474_s14 + $0xc0] ss:$12 sps:$4 sm:$0xff]  }
  0xe1   : > { %1873 = vmatprep.subr.bf16.mxu0 %v5262_v39  ;;  %v5329_v38 = vld [vmem:[%s6297_s29] ss:$12 sps:$4 sm:$0xff]   ;;  %v6617_v39 = vld [vmem:[%s6297_s29 + $0x68] ss:$12 sps:$4 sm:$0xff]  }
  0xe3   : > { %1987 = vmatpush1.bf16.msra.mxu1 %v5257_v40  ;;  %v5335_v40 = vld [vmem:[%s7474_s14 + $0x230] ss:$12 sps:$4 sm:$0xff]  }
  0xe4   : > { %1874 = vmatpush1.bf16.msra.mxu0 %v5260_v41  ;;  %1988 = vmatprep.subr.bf16.mxu1 %v5265_v42  ;;  %v5336_v41 = vld [vmem:[%s6297_s29 + $0x1c] ss:$12 sps:$4 sm:$0xff]   ;;  %v5342_v42 = vld [vmem:[%s7474_s14 + $0x218] ss:$12 sps:$4 sm:$0xff]  }
  0xe5   : > { %1875 = vmatprep.subr.bf16.mxu0 %v5268_v43  ;;  %v6629_v43 = vld [vmem:[%s6297_s29 + $0x80] ss:$12 sps:$4 sm:$0xff]  }
  0xe7   : > { %1989 = vmatpush1.bf16.msra.mxu1 %v5263_v44  ;;  %v5349_v44 = vld [vmem:[%s7474_s14 + $0x200] ss:$12 sps:$4 sm:$0xff]  }
  0xe8   : > { %1876 = vmatpush1.bf16.msra.mxu0 %v5266_v45  ;;  %1990 = vmatprep.subr.bf16.mxu1 %v5271_v46  ;;  %v5340_v45 = vld [vmem:[%s6297_s29 + $0x18] ss:$12 sps:$4 sm:$0xff]   ;;  %v5343_v46 = vld [vmem:[%s6297_s29 + $0x34] ss:$12 sps:$4 sm:$0xff]  }
  0xe9   : > { %1877 = vmatprep.subr.bf16.mxu0 %v5274_v47  ;;  %v5356_v47 = vld [vmem:[%s7474_s14 + $0x1e8] ss:$12 sps:$4 sm:$0xff]  }
  0xeb   : > { %1991 = vmatpush1.bf16.msra.mxu1 %v5269_v48  ;;  %v5360_v48 = vld [vmem:[%s7474_s14 + $0x1d0] ss:$12 sps:$4 sm:$0xff]  }
  0xec   : > { %1878 = vmatpush1.bf16.msra.mxu0 %v5272_v49  ;;  %1992 = vmatprep.subr.bf16.mxu1 %v5277_v50  ;;  %v6645_v49 = vld [vmem:[%s6297_s29 + $0x98] ss:$12 sps:$4 sm:$0xff]   ;;  %v5347_v50 = vld [vmem:[%s6297_s29 + $0x30] ss:$12 sps:$4 sm:$0xff]  }
  0xed   : > { %1879 = vmatprep.subr.bf16.mxu0 %v5280_v51  ;;  %v5350_v51 = vld [vmem:[%s6297_s29 + $0x4c] ss:$12 sps:$4 sm:$0xff]  }
  0xef   : > { %1993 = vmatpush1.bf16.msra.mxu1 %v5275_v52  ;;  %v5364_v52 = vld [vmem:[%s7474_s14 + $0x1b8] ss:$12 sps:$4 sm:$0xff]  }
  0xf0   : > { %1880 = vmatpush1.bf16.msra.mxu0 %v5278_v53  ;;  %1994 = vmatprep.subr.bf16.mxu1 %v5283_v54  ;;  %v5368_v53 = vld [vmem:[%s7474_s14 + $0x1a0] ss:$12 sps:$4 sm:$0xff]   ;;  %v6658_v54 = vld [vmem:[%s6297_s29 + $0xb0] ss:$12 sps:$4 sm:$0xff]  }
  0xf1   : > { %1881 = vmatprep.subr.bf16.mxu0 %v5286_v55  ;;  %v5354_v55 = vld [vmem:[%s6297_s29 + $0x48] ss:$12 sps:$4 sm:$0xff]  }
  0xf3   : > { %1995 = vmatpush1.bf16.msra.mxu1 %v5281_v56  ;;  %v5357_v56 = vld [vmem:[%s6297_s29 + $0x64] ss:$12 sps:$4 sm:$0xff]  }
  0xf4   : > { %1882 = vmatpush1.bf16.msra.mxu0 %v5284_v57  ;;  %1996 = vmatprep.subr.bf16.mxu1 %v5289_v58  ;;  %v5359_v57 = vld [vmem:[%s6297_s29 + $0x60] ss:$12 sps:$4 sm:$0xff]   ;;  %v5361_v58 = vld [vmem:[%s6297_s29 + $0x7c] ss:$12 sps:$4 sm:$0xff]  }
  0xf5   : > { %1883 = vmatprep.subr.bf16.mxu0 %v5292_v59  ;;  %v5363_v59 = vld [vmem:[%s6297_s29 + $0x78] ss:$12 sps:$4 sm:$0xff]  }
  0xf7   : > { %1997 = vmatpush1.bf16.msra.mxu1 %v5287_v60  ;;  %v5365_v60 = vld [vmem:[%s6297_s29 + $0x94] ss:$12 sps:$4 sm:$0xff]  }
  0xf8   : > { %1884 = vmatpush1.bf16.msra.mxu0 %v5290_v61  ;;  %4722 = vmatprep.subr.bf16.mxu1 %v5294_v63  ;;  %v5367_v61 = vld [vmem:[%s6297_s29 + $0x90] ss:$12 sps:$4 sm:$0xff]   ;;  %v5369_v63 = vld [vmem:[%s6297_s29 + $0xac] ss:$12 sps:$4 sm:$0xff]  }
  0xf9   : > { %1885 = vmatprep.subr.bf16.mxu0 %v5297_v0  ;;  %v5373_v0 = vld [vmem:[%s7476_s18 + $0x78] sm:$0xff]  }
  0xfa   : > { %2015 = vmatmul.mubr.bf16.vlgmr.msra.gmra.mxu1 %v6496_v62 }
  0xfb   : > { %4723 = vmatpush3.bf16.msra.mxu1 %v5298_v2  ;;  %2024 = vmatprep.mubr.bf16.mxu1 %v5915_v8  ;;  %v5374_v2 = vld [vmem:[%s7476_s18 + $0x38] sm:$0xff]  }
  0xfc   : > { %1886 = vmatpush2.bf16.msra.mxu0 %v5295_v1  ;;  %4724 = vmatprep.subr.bf16.mxu1 %v5303_v3  ;;  %v5371_v1 = vld [vmem:[%s6297_s29 + $0xa8] ss:$12 sps:$4 sm:$0xff]  }
  0xfd   : > { %1887 = vmatprep.subr.bf16.mxu0 %v5301_v6  ;;  %v5375_v3 = vld [vmem:[%s7476_s18 + $0x70] sm:$0xff]   ;;  %v5378_v6 = vld [vmem:[%s7476_s18 + $0x28] sm:$0xff]  }
  0xff   : > { %4725 = vmatpush3.bf16.msra.mxu1 %v5307_v9  ;;  %v5380_v9 = vld [vmem:[%s7476_s18 + $0x20] sm:$0xff]  }
 0x100   : > { %1888 = vmatpush2.bf16.msra.mxu0 %v5299_v7  ;;  %4726 = vmatprep.subr.bf16.mxu1 %v5312_v10  ;;  %v5379_v7 = vld [vmem:[%s7476_s18 + $0x60] sm:$0xff]   ;;  %v5381_v10 = vld [vmem:[%s7476_s18 + $0x58] sm:$0xff]  }
 0x101   : > { %1889 = vmatprep.subr.bf16.mxu0 %v5306_v11  ;;  %v5382_v11 = vld [vmem:[%s7476_s18 + $0x18] sm:$0xff]  }
 0x102   : > { %2025 = vmatmul.mubr.bf16.gmra.mxu1 %v6535_v12 }
 0x103   : > { %2034 = vmatprep.mubr.bf16.mxu1 %v5915_v8  ;;  %4727 = vmatpush3.bf16.msra.mxu1 %v5316_v14  ;;  %v5385_v14 = vld [vmem:[%s7476_s18 + $0x48] sm:$0xff]  }
 0x104   : > { %1890 = vmatpush2.bf16.msra.mxu0 %v5304_v13  ;;  %4728 = vmatprep.subr.bf16.mxu1 %v5321_v15  ;;  %v5384_v13 = vld [vmem:[%s7476_s18 + $0x10] sm:$0xff]   ;;  %v5386_v15 = vld [vmem:[%s7476_s18 + $0x8] sm:$0xff]  }
 0x105   : > { %1891 = vmatprep.subr.bf16.mxu0 %v5310_v16  ;;  %v5389_v16 = vld [vmem:[%s7476_s18 + $0x98] sm:$0xff]  }
 0x107   : > { %4729 = vmatpush3.bf16.msra.mxu1 %v5325_v18  ;;  %v5388_v18 = vld [vmem:[%s7476_s18] sm:$0xff]  }
 0x108   : > { %1892 = vmatpush2.bf16.msra.mxu0 %v5308_v17  ;;  %4730 = vmatprep.subr.bf16.mxu1 %v5333_v20  ;;  %v5387_v17 = vld [vmem:[%s7476_s18 + $0x40] sm:$0xff]   ;;  %v5391_v20 = vld [vmem:[%s7476_s18 + $0x88] sm:$0xff]  }
 0x109   : > { %1893 = vmatprep.subr.bf16.mxu0 %v5315_v21 }
 0x10a   : > { %2035 = vmatmul.mubr.bf16.gmra.mxu1 %v6558_v19 }
 0x10b   : > { %2044 = vmatprep.mubr.bf16.mxu1 %v5915_v8  ;;  %4731 = vmatpush3.bf16.msra.mxu1 %v5334_v23 }
 0x10c   : > { %1894 = vmatpush2.bf16.msra.mxu0 %v5313_v22  ;;  %4732 = vmatprep.subr.bf16.mxu1 %v5339_v24 }
 0x10d   : > { %1895 = vmatprep.subr.bf16.mxu0 %v5319_v25 }
 0x10f   : > { %4733 = vmatpush3.bf16.msra.mxu1 %v5341_v27 }
 0x110   : > { %1896 = vmatpush2.bf16.msra.mxu0 %v5317_v26  ;;  %4734 = vmatprep.subr.bf16.mxu1 %v5346_v28  ;;  %v5392_v26 = vld [vmem:[%s7476_s18 + $0x80] sm:$0xff]  }
 0x111   : > { %1897 = vmatprep.subr.bf16.mxu0 %v5324_v29 }
 0x112   : > { %2045 = vmatmul.mubr.bf16.gmra.mxu1 %v6593_v30 }
 0x113   : > { %2054 = vmatprep.mubr.bf16.mxu1 %v5915_v8  ;;  %4735 = vmatpush3.bf16.msra.mxu1 %v5348_v33 }
 0x114   : > { %1898 = vmatpush2.bf16.msra.mxu0 %v5322_v32  ;;  %4736 = vmatprep.subr.bf16.mxu1 %v5353_v34 }
 0x115   : > { %1899 = vmatprep.subr.bf16.mxu0 %v5328_v35  ;;  %v5916_v35 = vmov 1966171168  }
 0x117   : > { %4737 = vmatpush3.bf16.msra.mxu1 %v5355_v36  ;;  %v1222_v36 = vunpack.c.l.s4 %v5916_v35 }
 0x118   : > { %1900 = vmatpush2.bf16.msra.mxu0 %v5326_v37  ;;  %4983 = vmatprep.subr.bf16.mxu1 %v5389_v16  ;;  %v1224_v37 = vlaneseq }
 0x119   : > { %4951 = vmatprep.subr.bf16.mxu0 %v5335_v40 }
 0x11a   : > { %2055 = vmatmul.mubr.bf16.gmra.mxu1 %v6617_v39 }
 0x11b   : > { %1902 = vmatmul.mubr.bf16.vlgmr.msra.gmra.mxu0 %v5329_v38  ;;  %2064 = vmatprep.mubr.bf16.mxu1 %v5915_v8 }
 0x11c   : > { %4952 = vmatpush3.bf16.msra.mxu0 %v5335_v40  ;;  %1911 = vmatprep.mubr.bf16.mxu0 %v5336_v41  ;;  %v1223_v40 = vunpack.c.0.s8 %v1222_v36 }
 0x11d   : > { %4953 = vmatprep.subr.bf16.mxu0 %v5342_v42 }
 0x120   : > { %4954 = vmatpush3.bf16.msra.mxu0 %v5342_v42 }
 0x121   : > { %4955 = vmatprep.subr.bf16.mxu0 %v5349_v44 }
 0x122   : > { %2065 = vmatmul.mubr.bf16.gmra.mxu1 %v6629_v43 }
 0x123   : > { %1912 = vmatmul.mubr.bf16.gmra.mxu0 %v5340_v45  ;;  %2074 = vmatprep.mubr.bf16.mxu1 %v5915_v8 }
 0x124   : > { %1921 = vmatprep.mubr.bf16.mxu0 %v5343_v46  ;;  %4956 = vmatpush3.bf16.msra.mxu0 %v5349_v44 }
 0x125   : > { %4957 = vmatprep.subr.bf16.mxu0 %v5356_v47 }
 0x128   : > { %4958 = vmatpush3.bf16.msra.mxu0 %v5356_v47 }
 0x129   : > { %4959 = vmatprep.subr.bf16.mxu0 %v5360_v48 }
 0x12a   : > { %2075 = vmatmul.mubr.bf16.gmra.mxu1 %v6645_v49 }
 0x12b   : > { %1922 = vmatmul.mubr.bf16.gmra.mxu0 %v5347_v50  ;;  %2084 = vmatprep.mubr.bf16.mxu1 %v5915_v8  ;;  %v5372_v8 = vld [vmem:[%s7474_s14 + $0x188] ss:$12 sps:$4 sm:$0xff]  }
 0x12c   : > { %1931 = vmatprep.mubr.bf16.mxu0 %v5350_v51  ;;  %4960 = vmatpush3.bf16.msra.mxu0 %v5360_v48 }
 0x12d   : > { %4961 = vmatprep.subr.bf16.mxu0 %v5364_v52 }
 0x130   : > { %4962 = vmatpush3.bf16.msra.mxu0 %v5364_v52 }
 0x131   : > { %4963 = vmatprep.subr.bf16.mxu0 %v5368_v53 }
 0x132   : > { %2085 = vmatmul.mubr.bf16.gmra.mxu1 %v6658_v54 }
 0x133   : > { %1932 = vmatmul.mubr.bf16.gmra.mxu0 %v5354_v55  ;;  %2127 = vmatprep.mubr.bf16.mxu1 %v6514_v5  ;;  %v5376_v5 = vld [vmem:[%s7476_s18 + $0x30] sm:$0xff]  }
 0x134   : > { %1941 = vmatprep.mubr.bf16.mxu0 %v5357_v56  ;;  %4964 = vmatpush3.bf16.msra.mxu0 %v5368_v53 }
 0x135   : > { %4965 = vmatprep.subr.bf16.mxu0 %v5372_v8 }
 0x138   : > { %4966 = vmatpush3.bf16.msra.mxu0 %v5372_v8 }
 0x139   : > { %4802 = vmatprep.subr.bf16.mxu0 %v5373_v0 }
 0x13a   : > { %2128 = vmatmul.mubr.bf16.vlgmr.msra.gmra.mxu1 %v5329_v38 }
 0x13b   : > { %1942 = vmatmul.mubr.bf16.gmra.mxu0 %v5359_v57  ;;  %2135 = vmatprep.mubr.bf16.mxu1 %v5336_v41  ;;  %v6745_v41 = vshrl.u32 %v1224_v37, 7 }
 0x13c   : > { %1951 = vmatprep.mubr.bf16.mxu0 %v5361_v58  ;;  %4984 = vmatpush3.bf16.msra.mxu1 %v5389_v16 }
 0x142   : > { %2136 = vmatmul.mubr.bf16.gmra.mxu1 %v5340_v45  ;;  %v6748_v45 = vsub.s32 %v1223_v40, %v6745_v41 }
 0x143   : > { %1952 = vmatmul.mubr.bf16.gmra.mxu0 %v5363_v59  ;;  %2143 = vmatprep.mubr.bf16.mxu1 %v5343_v46 }
 0x144   : > { %1961 = vmatprep.mubr.bf16.mxu0 %v5365_v60 }
 0x14a   : > { %2144 = vmatmul.mubr.bf16.gmra.mxu1 %v5347_v50 }
 0x14b   : > { %1962 = vmatmul.mubr.bf16.gmra.mxu0 %v5367_v61  ;;  %2151 = vmatprep.mubr.bf16.mxu1 %v5350_v51 }
 0x14c   : > { %1971 = vmatprep.mubr.bf16.mxu0 %v5369_v63 }
 0x152   : > { %2152 = vmatmul.mubr.bf16.gmra.mxu1 %v5354_v55 }
 0x153   : > { %1972 = vmatmul.mubr.bf16.gmra.mxu0 %v5371_v1  ;;  %2159 = vmatprep.mubr.bf16.mxu1 %v5357_v56  ;;  %v975_v56 = vld [vmem:[%s7477_s25] sm:$0x7] }
 0x154   : > { %4967 = vmatprep.mubr.bf16.mxu0 %v6496_v62  ;;  %v5377_v62 = vld [vmem:[%s7476_s18 + $0x68] sm:$0xff]  }
 0x15a   : > { %2160 = vmatmul.mubr.bf16.gmra.mxu1 %v5359_v57  ;;  %v6771_v57 = vsub.s32 1, %v6745_v41 }
 0x15b   : > { %4968 = vmatmul.mubr.bf16.vlgmr.msra.gmra.mxu0 %v6535_v12  ;;  %2167 = vmatprep.mubr.bf16.mxu1 %v5361_v58  ;;  %v5383_v12 = vld [vmem:[%s7476_s18 + $0x50] sm:$0xff]  }
 0x15c   : > { %4971 = vmatprep.mubr.bf16.mxu0 %v6558_v19  ;;  %4803 = vmatpush3.bf16.msra.mxu0 %v5374_v2  ;;  %v5390_v19 = vld [vmem:[%s7476_s18 + $0x90] sm:$0xff]  }
 0x15d   : > { %4804 = vmatprep.subr.bf16.mxu0 %v5375_v3  ;;  %4985 = vmatprep.subr.bf16.mxu1 %v5390_v19 }
 0x15e   : > { %4986 = vmatpush3.bf16.msra.mxu1 %v5390_v19 }
 0x15f   : > { %4987 = vmatprep.subr.bf16.mxu1 %v5391_v20 }
 0x160   : > { %4805 = vmatpush3.bf16.msra.mxu0 %v5376_v5 }
 0x161   : > { %4806 = vmatprep.subr.bf16.mxu0 %v5377_v62 }
 0x162   : > { %2168 = vmatmul.mubr.bf16.gmra.mxu1 %v5363_v59 }
 0x163   : > { %4972 = vmatmul.mubr.bf16.gmra.mxu0 %v6593_v30  ;;  %2175 = vmatprep.mubr.bf16.mxu1 %v5365_v60  ;;  %v6778_v60 = vsub.s32 0, %v6745_v41 }
 0x164   : > { %4975 = vmatprep.mubr.bf16.mxu0 %v6617_v39  ;;  %4807 = vmatpush3.bf16.msra.mxu0 %v5378_v6 }
 0x165   : > { %4808 = vmatprep.subr.bf16.mxu0 %v5379_v7  ;;  %4988 = vmatpush3.bf16.msra.mxu1 %v5391_v20 }
 0x166   : > { %4989 = vmatprep.subr.bf16.mxu1 %v5392_v26 }
 0x168   : > { %4809 = vmatpush3.bf16.msra.mxu0 %v5380_v9 }
 0x169   : > { %4810 = vmatprep.subr.bf16.mxu0 %v5381_v10  ;;  %4990 = vmatpush3.bf16.msra.mxu1 %v5392_v26 }
 0x16a   : > { %2176 = vmatmul.mubr.bf16.gmra.mxu1 %v5367_v61  ;;  %5007 = vmatprep.subr.bf16.mxu1 %v5913_v4 }
 0x16b   : > { %4976 = vmatmul.mubr.bf16.gmra.mxu0 %v6629_v43  ;;  %2183 = vmatprep.mubr.bf16.mxu1 %v5369_v63 }
 0x16c   : > { %4979 = vmatprep.mubr.bf16.mxu0 %v6645_v49  ;;  %4811 = vmatpush3.bf16.msra.mxu0 %v5382_v11 }
 0x16d   : > { %4812 = vmatprep.subr.bf16.mxu0 %v5383_v12 }
 0x170   : > { %4813 = vmatpush3.bf16.msra.mxu0 %v5384_v13 }
 0x171   : > { %4814 = vmatprep.subr.bf16.mxu0 %v5385_v14 }
 0x172   : > { %2184 = vmatmul.mubr.bf16.gmra.mxu1 %v5371_v1 }
 0x173   : > { %4980 = vmatmul.mubr.bf16.gmra.mxu0 %v6658_v54 }
 0x174   : > { %4815 = vmatpush3.bf16.msra.mxu0 %v5386_v15 }
 0x175   : > { %4816 = vmatprep.subr.bf16.mxu0 %v5387_v17 }
 0x178   : > { %4817 = vmatpush3.bf16.msra.mxu0 %v5388_v18 }
 0x19a   : > { %v1211_v21 = vpop.f32.mrf.mxu1 }
 0x19b   : > { %v1170_v22 = vpop.f32.mrf.mxu0  ;;  %v1234_v49 = vrot.slane %v1211_v21, %v6748_v45 }
 0x19c   : > { %v4949_v23 = vpop.f32.mrf.mxu1 }
 0x19d   : > { %v1172_v24 = vpop.f32.mrf.mxu0 }
 0x19e   : > { %v1214_v25 = vpop.f32.mrf.mxu1  ;;  %v1220_v43 = vcombine.low %v1170_v22, %v1172_v24 }
 0x19f   : > { %v1174_v27 = vpop.f32.mrf.mxu0 }
 0x1a0   : > { %v4950_v28 = vpop.f32.mrf.mxu1  ;;  %v1227_v47 = vrot.slane %v1220_v43, %v6748_v45 }
 0x1a1   : > { %v1175_v29 = vpop.f32.mrf.mxu0 }
 0x1a2   : > { %v1235_v51 = vcombine.low %v1227_v47, %v1234_v49 }
 0x1a4   : > { %v1242_v54 = vrot.slane %v1235_v51, %v6748_v45 }
 0x1a6   : > { %v6773_v58 = vadd.f32 %v1242_v54, %v975_v56 }
 0x1a8   : > { %v6784_v0 = vrot.slane %v6773_v58, %v6771_v57  ;;  %v6790_v2 = vrot.slane %v6773_v58, %v6778_v60 }
 0x1ba   : > { %v2016_v30 = vpop.f32.mrf.mxu1 }
 0x1bc   : > { %v2018_v32 = vpop.f32.mrf.mxu1 }
 0x1be   : > { %v2020_v33 = vpop.f32.mrf.mxu1 }
 0x1c0   : > { %v2022_v34 = vpop.f32.mrf.mxu1 }
 0x1c2   : > { %v6743_v38 = vpop.f32.mrf.mxu1 }
 0x1c4   : > { %v2028_v39 = vpop.f32.mrf.mxu1 }
 0x1c6   : > { %v2030_v42 = vpop.f32.mrf.mxu1 }
 0x1c8   : > { %v2032_v44 = vpop.f32.mrf.mxu1 }
 0x1ca   : > { %v6750_v46 = vpop.f32.mrf.mxu1 }
 0x1cc   : > { %v6753_v48 = vpop.f32.mrf.mxu1 }
 0x1ce   : > { %v6756_v50 = vpop.f32.mrf.mxu1 }
 0x1d0   : > { %v6758_v52 = vpop.f32.mrf.mxu1 }
 0x1d2   : > { %v6760_v53 = vpop.f32.mrf.mxu1 }
 0x1d4   : > { %v6763_v55 = vpop.f32.mrf.mxu1 }
 0x1d6   : > { %v6768_v8 = vpop.f32.mrf.mxu1 }
 0x1d8   : > { %v6775_v59 = vpop.f32.mrf.mxu1 }
 0x1da   : > { %v6780_v61 = vpop.f32.mrf.mxu1 }
 0x1db   : > { %v1903_v63 = vpop.f32.mrf.mxu0 }
 0x1dc   : > { %v6786_v1 = vpop.f32.mrf.mxu1  ;;  %v1904_v6 = vadd.f32 %v1903_v63, %v6790_v2 }
 0x1dd   : > { %v1905_v3 = vpop.f32.mrf.mxu0 }
 0x1de   : > { %v1906_v5 = vadd.f32 %v1905_v3, %v6784_v0  ;;  %v6793_v62 = vpop.f32.mrf.mxu1  ;;  %v2017_v16 = vadd.f32 %v2016_v30, %v1904_v6 }
 0x1df   : > { %v1907_v7 = vpop.f32.mrf.mxu0 }
 0x1e0   : > { %v1908_v9 = vadd.f32 %v1907_v7, %v6790_v2  ;;  %v6797_v10 = vpop.f32.mrf.mxu1  ;;  %v2019_v12 = vadd.f32 %v2018_v32, %v1906_v5  ;;  %v2289_v26 = vmax.f32 %v2017_v16, 0.0 }
 0x1e1   : > { %v1909_v11 = vpop.f32.mrf.mxu0 }
 0x1e2   : > { %v2021_v13 = vadd.f32 %v2020_v33, %v1908_v9  ;;  %v1910_v14 = vadd.f32 %v1909_v11, %v6784_v0  ;;  %v6800_v15 = vpop.f32.mrf.mxu1  ;;  %v2290_v22 = vmax.f32 %v2019_v12, 0.0 }
 0x1e3   : > { %v1913_v17 = vpop.f32.mrf.mxu0 }
 0x1e4   : > { %v2023_v18 = vadd.f32 %v2022_v34, %v1910_v14  ;;  %v6802_v19 = vpop.f32.mrf.mxu1  ;;  %v2292_v20 = vmax.f32 %v2021_v13, 0.0  ;;  %v1914_v27 = vadd.f32 %v1913_v17, %v6790_v2 }
 0x1e5   : > { %v1915_v21 = vpop.f32.mrf.mxu0 }
 0x1e6   : > { %v2293_v23 = vmax.f32 %v2023_v18, 0.0  ;;  %v1916_v24 = vadd.f32 %v1915_v21, %v6784_v0  ;;  %v6805_v25 = vpop.f32.mrf.mxu1  ;;  %v2337_v33 = vpack.c.bf16 %v2292_v20, %v2289_v26  ;;  %v2027_v43 = vadd.f32 %v6743_v38, %v1914_v27 }
 0x1e7   : > { %v1917_v28 = vpop.f32.mrf.mxu0 }
 0x1e8   : > { %v1918_v29 = vadd.f32 %v1917_v28, %v6790_v2  ;;  %v6809_v32 = vpop.f32.mrf.mxu1  ;;  %v2338_v30 = vpack.c.bf16 %v2293_v23, %v2290_v22  ;;  %v2029_v35 = vadd.f32 %v2028_v39, %v1916_v24 }
 0x1e9   : > { %v1919_v34 = vpop.f32.mrf.mxu0 }
 0x1ea   : > { %v2031_v36 = vadd.f32 %v2030_v42, %v1918_v29  ;;  %v1920_v37 = vadd.f32 %v1919_v34, %v6784_v0  ;;  %v6812_v40 = vpop.f32.mrf.mxu1  ;;  %2585 = vmatprep.mubr.bf16.mxu0 %v2338_v30  ;;  %v2296_v63 = vmax.f32 %v2029_v35, 0.0  ;;  %v2295_v42 = vmax.f32 %v2027_v43, 0.0 }
 0x1eb   : > { %v1923_v47 = vpop.f32.mrf.mxu0  ;;  %2586 = vmatmul.mubr.bf16.vlgmr.msra.gmra.mxu0 %v2337_v33 }
 0x1ec   : > { %v2033_v49 = vadd.f32 %v2032_v44, %v1920_v37  ;;  %v6815_v51 = vpop.f32.mrf.mxu1  ;;  %v2298_v54 = vmax.f32 %v2031_v36, 0.0  ;;  %v1924_v6 = vadd.f32 %v1923_v47, %v6790_v2 }
 0x1ed   : > { %v1925_v56 = vpop.f32.mrf.mxu0 }
 0x1ee   : > { %v2299_v3 = vmax.f32 %v2033_v49, 0.0  ;;  %v1926_v5 = vadd.f32 %v1925_v56, %v6784_v0  ;;  %v6818_v39 = vpop.f32.mrf.mxu1  ;;  %v2340_v12 = vpack.c.bf16 %v2298_v54, %v2295_v42  ;;  %v2037_v18 = vadd.f32 %v6750_v46, %v1924_v6 }
 0x1ef   : > { %v1927_v7 = vpop.f32.mrf.mxu0 }
 0x1f0   : > { %v1928_v9 = vadd.f32 %v1927_v7, %v6790_v2  ;;  %v6822_v38 = vpop.f32.mrf.mxu1  ;;  %v2341_v11 = vpack.c.bf16 %v2299_v3, %v2296_v63  ;;  %v2039_v13 = vadd.f32 %v6753_v48, %v1926_v5  ;;  %v2301_v28 = vmax.f32 %v2037_v18, 0.0 }
 0x1f1   : > { %v1929_v44 = vpop.f32.mrf.mxu0 }
 0x1f2   : > { %v2041_v14 = vadd.f32 %v6756_v50, %v1928_v9  ;;  %v1930_v16 = vadd.f32 %v1929_v44, %v6784_v0  ;;  %v6827_v17 = vpop.f32.mrf.mxu1  ;;  %2593 = vmatprep.mubr.bf16.mxu0 %v2341_v11  ;;  %v2302_v26 = vmax.f32 %v2039_v13, 0.0 }
 0x1f3   : > { %v1933_v20 = vpop.f32.mrf.mxu0  ;;  %2594 = vmatmul.mubr.bf16.gmra.mxu0 %v2340_v12 }
 0x1f4   : > { %v2043_v21 = vadd.f32 %v6758_v52, %v1930_v16  ;;  %v6831_v22 = vpop.f32.mrf.mxu1  ;;  %v2304_v23 = vmax.f32 %v2041_v14, 0.0  ;;  %v1934_v29 = vadd.f32 %v1933_v20, %v6790_v2 }
 0x1f5   : > { %v1935_v24 = vpop.f32.mrf.mxu0 }
 0x1f6   : > { %v2305_v27 = vmax.f32 %v2043_v21, 0.0  ;;  %v1936_v48 = vadd.f32 %v1935_v24, %v6784_v0  ;;  %v6834_v50 = vpop.f32.mrf.mxu1  ;;  %v2343_v35 = vpack.c.bf16 %v2304_v23, %v2301_v28  ;;  %v2047_v49 = vadd.f32 %v6760_v53, %v1934_v29 }
 0x1f7   : > { %v1937_v30 = vpop.f32.mrf.mxu0 }
 0x1f8   : > { %v1938_v46 = vadd.f32 %v1937_v30, %v6790_v2  ;;  %v6838_v33 = vpop.f32.mrf.mxu1  ;;  %v2344_v34 = vpack.c.bf16 %v2305_v27, %v2302_v26  ;;  %v2049_v36 = vadd.f32 %v6763_v55, %v1936_v48  ;;  %v2307_v7 = vmax.f32 %v2047_v49, 0.0 }
 0x1f9   : > { %v1939_v52 = vpop.f32.mrf.mxu0 }
 0x1fa   : > { %v2051_v37 = vadd.f32 %v6768_v8, %v1938_v46  ;;  %v1940_v43 = vadd.f32 %v1939_v52, %v6784_v0  ;;  %v6843_v47 = vpop.f32.mrf.mxu1  ;;  %2601 = vmatprep.mubr.bf16.mxu0 %v2344_v34  ;;  %v2308_v42 = vmax.f32 %v2049_v36, 0.0 }
 0x1fb   : > { %v1943_v54 = vpop.f32.mrf.mxu0  ;;  %2602 = vmatmul.mubr.bf16.gmra.mxu0 %v2343_v35 }
 0x1fc   : > { %v2053_v56 = vadd.f32 %v6775_v59, %v1940_v43  ;;  %v6847_v63 = vpop.f32.mrf.mxu1  ;;  %v2310_v3 = vmax.f32 %v2051_v37, 0.0  ;;  %v1944_v9 = vadd.f32 %v1943_v54, %v6790_v2 }
 0x1fd   : > { %v1945_v5 = vpop.f32.mrf.mxu0 }
 0x1fe   : > { %v2311_v6 = vmax.f32 %v2053_v56, 0.0  ;;  %v1946_v55 = vadd.f32 %v1945_v5, %v6784_v0  ;;  %v6850_v8 = vpop.f32.mrf.mxu1  ;;  %v2346_v13 = vpack.c.bf16 %v2310_v3, %v2307_v7  ;;  %v2057_v21 = vadd.f32 %v6780_v61, %v1944_v9 }
 0x1ff   : > { %v1947_v11 = vpop.f32.mrf.mxu0 }
 0x200   : > { %v1948_v53 = vadd.f32 %v1947_v11, %v6790_v2  ;;  %v6854_v44 = vpop.f32.mrf.mxu1  ;;  %v2347_v12 = vpack.c.bf16 %v2311_v6, %v2308_v42  ;;  %v2059_v14 = vadd.f32 %v6786_v1, %v1946_v55  ;;  %v2313_v30 = vmax.f32 %v2057_v21, 0.0 }
 0x201   : > { %v1949_v59 = vpop.f32.mrf.mxu0 }
 0x202   : > { %v2061_v16 = vadd.f32 %v6793_v62, %v1948_v53  ;;  %v1950_v18 = vadd.f32 %v1949_v59, %v6784_v0  ;;  %v6859_v20 = vpop.f32.mrf.mxu1  ;;  %2609 = vmatprep.mubr.bf16.mxu0 %v2347_v12  ;;  %v2314_v28 = vmax.f32 %v2059_v14, 0.0 }
 0x203   : > { %v1953_v23 = vpop.f32.mrf.mxu0  ;;  %2610 = vmatmul.mubr.bf16.gmra.mxu0 %v2346_v13 }
 0x204   : > { %v2063_v24 = vadd.f32 %v6797_v10, %v1950_v18  ;;  %v6863_v26 = vpop.f32.mrf.mxu1  ;;  %v2316_v27 = vmax.f32 %v2061_v16, 0.0  ;;  %v1954_v46 = vadd.f32 %v1953_v23, %v6790_v2 }
 0x205   : > { %v1955_v48 = vpop.f32.mrf.mxu0 }
 0x206   : > { %v2317_v29 = vmax.f32 %v2063_v24, 0.0  ;;  %v1956_v1 = vadd.f32 %v1955_v48, %v6784_v0  ;;  %v4747_v62 = vpop.f32.mrf.mxu1  ;;  %v2349_v37 = vpack.c.bf16 %v2316_v27, %v2313_v30  ;;  %v2067_v56 = vadd.f32 %v6800_v15, %v1954_v46 }
 0x207   : > { %v1957_v34 = vpop.f32.mrf.mxu0 }
 0x208   : > { %v1958_v52 = vadd.f32 %v1957_v34, %v6790_v2  ;;  %v4748_v61 = vpop.f32.mrf.mxu1  ;;  %v2350_v35 = vpack.c.bf16 %v2317_v29, %v2314_v28  ;;  %v2069_v10 = vadd.f32 %v6802_v19, %v1956_v1  ;;  %v2319_v11 = vmax.f32 %v2067_v56, 0.0 }
 0x209   : > { %v1959_v36 = vpop.f32.mrf.mxu0  ;;  %v4749_v56 = vadd.f32 %v4748_v61, %v4747_v62 }
 0x20a   : > { %v2071_v43 = vadd.f32 %v6805_v25, %v1958_v52  ;;  %v1960_v49 = vadd.f32 %v1959_v36, %v6784_v0  ;;  %v6871_v54 = vpop.f32.mrf.mxu1  ;;  %2617 = vmatprep.mubr.bf16.mxu0 %v2350_v35  ;;  %v2320_v7 = vmax.f32 %v2069_v10, 0.0  ;;  %v1352_v36 = vsub.s32 2, %v6745_v41 }
 0x20b   : > { %v1963_v3 = vpop.f32.mrf.mxu0  ;;  %2618 = vmatmul.mubr.bf16.gmra.mxu0 %v2349_v37  ;;  %v4746_v41 = vadd.f32 %v6863_v26, %v6859_v20 }
 0x20c   : > { %v2073_v5 = vadd.f32 %v6809_v32, %v1960_v49  ;;  %v6875_v42 = vpop.f32.mrf.mxu1  ;;  %v2322_v6 = vmax.f32 %v2071_v43, 0.0  ;;  %v1964_v53 = vadd.f32 %v1963_v3, %v6790_v2 }
 0x20d   : > { %v1965_v55 = vpop.f32.mrf.mxu0 }
 0x20e   : > { %v2323_v9 = vmax.f32 %v2073_v5, 0.0  ;;  %v1966_v19 = vadd.f32 %v1965_v55, %v6784_v0  ;;  %v6878_v25 = vpop.f32.mrf.mxu1  ;;  %v2352_v14 = vpack.c.bf16 %v2322_v6, %v2319_v11  ;;  %v2077_v24 = vadd.f32 %v6812_v40, %v1964_v53 }
 0x20f   : > { %v1967_v12 = vpop.f32.mrf.mxu0 }
 0x210   : > { %v1968_v15 = vadd.f32 %v1967_v12, %v6790_v2  ;;  %v6882_v59 = vpop.f32.mrf.mxu1  ;;  %v2353_v13 = vpack.c.bf16 %v2323_v9, %v2320_v7  ;;  %v2079_v16 = vadd.f32 %v6815_v51, %v1966_v19  ;;  %v2325_v52 = vmax.f32 %v2077_v24, 0.0 }
 0x211   : > { %v1969_v32 = vpop.f32.mrf.mxu0 }
 0x212   : > { %v2081_v18 = vadd.f32 %v6818_v39, %v1968_v15  ;;  %v1970_v21 = vadd.f32 %v1969_v32, %v6784_v0  ;;  %v4756_v23 = vpop.f32.mrf.mxu1  ;;  %2625 = vmatprep.mubr.bf16.mxu0 %v2353_v13  ;;  %v2326_v30 = vmax.f32 %v2079_v16, 0.0 }
 0x213   : > { %v1973_v27 = vpop.f32.mrf.mxu0  ;;  %2626 = vmatmul.mubr.bf16.gmra.mxu0 %v2352_v14  ;;  %v4752_v14 = vadd.f32 %v6875_v42, %v6871_v54 }
 0x214   : > { %v2083_v48 = vadd.f32 %v6822_v38, %v1970_v21  ;;  %v4757_v28 = vpop.f32.mrf.mxu1  ;;  %v2328_v29 = vmax.f32 %v2081_v18, 0.0  ;;  %v1974_v39 = vadd.f32 %v1973_v27, %v6790_v2  ;;  %v4740_v38 = vadd.f32 %v6847_v63, %v6843_v47 }
 0x215   : > { %v1975_v1 = vpop.f32.mrf.mxu0  ;;  %v6902_v47 = vrot.slane %v6773_v58, %v1352_v36  ;;  %v4743_v63 = vadd.f32 %v6854_v44, %v6850_v8  ;;  %v4758_v24 = vadd.f32 %v4757_v28, %v4756_v23 }
 0x216   : > { %v2329_v46 = vmax.f32 %v2083_v48, 0.0  ;;  %v1976_v34 = vadd.f32 %v1975_v1, %v6784_v0  ;;  %v4759_v51 = vpop.f32.mrf.mxu1  ;;  %v2355_v49 = vpack.c.bf16 %v2328_v29, %v2325_v52  ;;  %v4755_v29 = vadd.f32 %v6882_v59, %v6878_v25 }
 0x217   : > { %v1977_v35 = vpop.f32.mrf.mxu0  ;;  %v2130_v19 = vadd.f32 %v4740_v38, %v6902_v47  ;;  %v2138_v11 = vadd.f32 %v4746_v41, %v6902_v47  ;;  %v2133_v8 = vadd.f32 %v4743_v63, %v6902_v47  ;;  %v2146_v54 = vadd.f32 %v4752_v14, %v6902_v47 }
 0x218   : > { %v1978_v40 = vadd.f32 %v1977_v35, %v6790_v2  ;;  %v4760_v37 = vpop.f32.mrf.mxu1  ;;  %v2356_v10 = vpack.c.bf16 %v2329_v46, %v2326_v30  ;;  %v2089_v3 = vadd.f32 %v6831_v22, %v1976_v34  ;;  %v2087_v2 = vadd.f32 %v6827_v17, %v1974_v39 }
 0x219   : > { %v1979_v43 = vpop.f32.mrf.mxu0  ;;  %v2141_v17 = vadd.f32 %v4749_v56, %v6902_v47  ;;  %v4761_v16 = vadd.f32 %v4760_v37, %v4759_v51  ;;  %v2154_v23 = vadd.f32 %v4758_v24, %v6902_v47  ;;  %v2149_v25 = vadd.f32 %v4755_v29, %v6902_v47 }
 0x21a   : > { %v2091_v5 = vadd.f32 %v6834_v50, %v1978_v40  ;;  %v1980_v6 = vadd.f32 %v1979_v43, %v6784_v0  ;;  %v4762_v55 = vpop.f32.mrf.mxu1  ;;  %2633 = vmatprep.mubr.bf16.mxu0 %v2356_v10  ;;  %v2332_v61 = vmax.f32 %v2089_v3, 0.0  ;;  %v2331_v26 = vmax.f32 %v2087_v2, 0.0 }
 0x21b   : > { %v4969_v7 = vpop.f32.mrf.mxu0  ;;  %2634 = vmatmul.mubr.bf16.gmra.mxu0 %v2355_v49  ;;  %v2157_v51 = vadd.f32 %v4761_v16, %v6902_v47 }
 0x21c   : > { %v2093_v22 = vadd.f32 %v6838_v33, %v1980_v6  ;;  %v4763_v50 = vpop.f32.mrf.mxu1  ;;  %v2334_v62 = vmax.f32 %v2091_v5, 0.0  ;;  %v2235_v44 = vadd.f32 %v4969_v7, %v2138_v11 }
 0x21d   : > { %v2226_v0 = vpop.f32.mrf.mxu0  ;;  %v4764_v38 = vadd.f32 %v4763_v50, %v4762_v55 }
 0x21e   : > { %v2335_v9 = vmax.f32 %v2093_v22, 0.0  ;;  %v4765_v20 = vpop.f32.mrf.mxu1  ;;  %v2227_v53 = vadd.f32 %v2226_v0, %v2130_v19  ;;  %v2358_v32 = vpack.c.bf16 %v2334_v62, %v2331_v26  ;;  %v2297_v34 = vmax.f32 %v2235_v44, 0.0 }
 0x21f   : > { %v4970_v58 = vpop.f32.mrf.mxu0 }
 0x220   : > { %v2238_v12 = vadd.f32 %v4970_v58, %v2141_v17  ;;  %v4766_v15 = vpop.f32.mrf.mxu1  ;;  %v2359_v33 = vpack.c.bf16 %v2335_v9, %v2332_v61  ;;  %v2291_v1 = vmax.f32 %v2227_v53, 0.0  ;;  %v2162_v61 = vadd.f32 %v4764_v38, %v6902_v47 }
 0x221   : > { %v2229_v13 = vpop.f32.mrf.mxu0  ;;  %v4767_v41 = vadd.f32 %v4766_v15, %v4765_v20 }
 0x222   : > { %v2230_v18 = vadd.f32 %v2229_v13, %v2133_v8  ;;  %v4768_v21 = vpop.f32.mrf.mxu1  ;;  %2641 = vmatprep.mubr.bf16.mxu0 %v2359_v33  ;;  %v2300_v27 = vmax.f32 %v2238_v12, 0.0 }
 0x223   : > { %v4973_v48 = vpop.f32.mrf.mxu0  ;;  %2642 = vmatmul.mubr.bf16.gmra.mxu0 %v2358_v32  ;;  %v2165_v20 = vadd.f32 %v4767_v41, %v6902_v47 }
 0x224   : > { %v2294_v30 = vmax.f32 %v2230_v18, 0.0  ;;  %v4769_v46 = vpop.f32.mrf.mxu1  ;;  %v2342_v35 = vpack.c.bf16 %v2300_v27, %v2297_v34  ;;  %v2251_v59 = vadd.f32 %v4973_v48, %v2154_v23 }
 0x225   : > { %v2242_v52 = vpop.f32.mrf.mxu0  ;;  %v4770_v3 = vadd.f32 %v4769_v46, %v4768_v21 }
 0x226   : > { %v2339_v39 = vpack.c.bf16 %v2294_v30, %v2291_v1  ;;  %v4771_v42 = vpop.f32.mrf.mxu1  ;;  %v2243_v36 = vadd.f32 %v2242_v52, %v2146_v54  ;;  %v2309_v22 = vmax.f32 %v2251_v59, 0.0 }
 0x227   : > { %v4974_v28 = vpop.f32.mrf.mxu0  ;;  %v2170_v55 = vadd.f32 %v4770_v3, %v6902_v47 }
 0x228   : > { %v2254_v40 = vadd.f32 %v4974_v28, %v2157_v51  ;;  %v4772_v37 = vpop.f32.mrf.mxu1  ;;  %4991 = vmatprep.mubr.msk.bf16.mxu1 %vm2528_vm1, %v2339_v39  ;;  %v2303_v2 = vmax.f32 %v2243_v36, 0.0 }
 0x229   : > { %v2245_v10 = vpop.f32.mrf.mxu0  ;;  %4992 = vmatmul.mubr.msk.bf16.vlgmr.msra.gmra.mxu1 %vm2528_vm1, %v2342_v35  ;;  %v4773_v43 = vadd.f32 %v4772_v37, %v4771_v42 }
 0x22a   : > { %v2246_v49 = vadd.f32 %v2245_v10, %v2149_v25  ;;  %v4774_v56 = vpop.f32.mrf.mxu1  ;;  %v2312_v5 = vmax.f32 %v2254_v40, 0.0 }
 0x22b   : > { %v4977_v6 = vpop.f32.mrf.mxu0  ;;  %v2173_v19 = vadd.f32 %v4773_v43, %v6902_v47 }
 0x22c   : > { %v2306_v7 = vmax.f32 %v2246_v49, 0.0  ;;  %v4775_v63 = vpop.f32.mrf.mxu1  ;;  %v2348_v17 = vpack.c.bf16 %v2312_v5, %v2309_v22  ;;  %v2267_v53 = vadd.f32 %v4977_v6, %v2170_v55 }
 0x22d   : > { %v2258_v62 = vpop.f32.mrf.mxu0  ;;  %v4776_v15 = vadd.f32 %v4775_v63, %v4774_v56 }
 0x22e   : > { %v2345_v0 = vpack.c.bf16 %v2306_v7, %v2303_v2  ;;  %v4777_v9 = vpop.f32.mrf.mxu1  ;;  %v2259_v26 = vadd.f32 %v2258_v62, %v2162_v61  ;;  %v2321_v21 = vmax.f32 %v2267_v53, 0.0 }
 0x22f   : > { %v4978_v50 = vpop.f32.mrf.mxu0  ;;  %v2178_v29 = vadd.f32 %v4776_v15, %v6902_v47 }
 0x230   : > { %v2270_v11 = vadd.f32 %v4978_v50, %v2173_v19  ;;  %v4778_v58 = vpop.f32.mrf.mxu1  ;;  %4995 = vmatprep.mubr.msk.bf16.mxu1 %vm2528_vm1, %v2345_v0  ;;  %v2315_v32 = vmax.f32 %v2259_v26, 0.0 }
 0x231   : > { %v2261_v12 = vpop.f32.mrf.mxu0  ;;  %4996 = vmatmul.mubr.msk.bf16.gmra.mxu1 %vm2528_vm1, %v2348_v17  ;;  %v4779_v14 = vadd.f32 %v4778_v58, %v4777_v9 }
 0x232   : > { %v2262_v8 = vadd.f32 %v2261_v12, %v2165_v20  ;;  %v4780_v33 = vpop.f32.mrf.mxu1  ;;  %v2324_v44 = vmax.f32 %v2270_v11, 0.0 }
 0x233   : > { %v4981_v13 = vpop.f32.mrf.mxu0  ;;  %v2181_v54 = vadd.f32 %v4779_v14, %v6902_v47 }
 0x234   : > { %v2318_v16 = vmax.f32 %v2262_v8, 0.0  ;;  %v4781_v18 = vpop.f32.mrf.mxu1  ;;  %v2354_v30 = vpack.c.bf16 %v2324_v44, %v2321_v21 }
 0x235   : > { %v4782_v24 = vadd.f32 %v4781_v18, %v4780_v33  ;;  %v2274_v27 = vpop.f32.mrf.mxu0  ;;  %v6944_v33 = vld [vmem:[%s7359_s8] ss:$0 sm:$0xff] }
 0x236   : > { %v2351_v48 = vpack.c.bf16 %v2318_v16, %v2315_v32  ;;  %v4783_v1 = vpop.f32.mrf.mxu1  ;;  %v2275_v52 = vadd.f32 %v2274_v27, %v2178_v29 }
 0x237   : > { %v2186_v46 = vadd.f32 %v4782_v24, %v6902_v47  ;;  %v4982_v34 = vpop.f32.mrf.mxu0 }
 0x238   : > { %v4784_v39 = vpop.f32.mrf.mxu1  ;;  %4999 = vmatprep.mubr.msk.bf16.mxu1 %vm2528_vm1, %v2351_v48  ;;  %v2327_v36 = vmax.f32 %v2275_v52, 0.0 }
 0x239   : > { %v4785_v42 = vadd.f32 %v4784_v39, %v4783_v1  ;;  %v2277_v51 = vpop.f32.mrf.mxu0  ;;  %5000 = vmatmul.mubr.msk.bf16.gmra.mxu1 %vm2528_vm1, %v2354_v30  ;;  %v2283_v23 = vadd.f32 %v4981_v13, %v2186_v46 }
 0x23a   : > { %v2278_v35 = vadd.f32 %v2277_v51, %v2181_v54 }
 0x23b   : > { %v2189_v28 = vadd.f32 %v4785_v42, %v6902_v47  ;;  %v2333_v59 = vmax.f32 %v2283_v23, 0.0 }
 0x23c   : > { %v2330_v40 = vmax.f32 %v2278_v35, 0.0 }
 0x23d   : > { %v2286_v37 = vadd.f32 %v4982_v34, %v2189_v28 }
 0x23e   : > { %v2357_v25 = vpack.c.bf16 %v2330_v40, %v2327_v36 }
 0x23f   : > { %v2336_v10 = vmax.f32 %v2286_v37, 0.0 }
 0x240   : > { %5003 = vmatprep.mubr.msk.bf16.mxu1 %vm2528_vm1, %v2357_v25 }
 0x241   : > { %v2360_v38 = vpack.c.bf16 %v2336_v10, %v2333_v59 }
 0x243   : > { %5004 = vmatmul.mubr.msk.bf16.gmra.mxu1 %vm2528_vm1, %v2360_v38 }
 0x244   : > { %5023 = vmatprep.mubr.msk.bf16.mxu1 %vm5914_vm0, %v5913_v4 }
 0x2ab   : > { %v4818_v43 = vpop.f32.mrf.mxu0 }
 0x2ad   : > { %v4819_v49 = vpop.f32.mrf.mxu0 }
 0x2ae   : > { %v4820_v15 = vadd.f32 %v4819_v49, %v4818_v43 }
 0x2af   : > { %v4821_v56 = vpop.f32.mrf.mxu0 }
 0x2b0   : > { %v2588_v18 = vadd.f32 %v4820_v15, %v6944_v33 }
 0x2b1   : > { %v4822_v3 = vpop.f32.mrf.mxu0 }
 0x2b2   : > { %v4823_v14 = vadd.f32 %v4822_v3, %v4821_v56 }
 0x2b3   : > { %v4824_v5 = vpop.f32.mrf.mxu0 }
 0x2b4   : > { %v2591_v34 = vadd.f32 %v4823_v14, %v6944_v33 }
 0x2b5   : > { %v4825_v47 = vpop.f32.mrf.mxu0 }
 0x2b6   : > { %v4826_v12 = vadd.f32 %v4825_v47, %v4824_v5 }
 0x2b7   : > { %v4827_v6 = vpop.f32.mrf.mxu0 }
 0x2b8   : > { %v2596_v13 = vadd.f32 %v4826_v12, %v6944_v33 }
 0x2b9   : > { %v4828_v41 = vpop.f32.mrf.mxu0 }
 0x2ba   : > { %v4829_v44 = vadd.f32 %v4828_v41, %v4827_v6 }
 0x2bb   : > { %v4830_v2 = vpop.f32.mrf.mxu0 }
 0x2bc   : > { %v2599_v29 = vadd.f32 %v4829_v44, %v6944_v33 }
 0x2bd   : > { %v4831_v7 = vpop.f32.mrf.mxu0 }
 0x2be   : > { %v4832_v30 = vadd.f32 %v4831_v7, %v4830_v2 }
 0x2bf   : > { %v4833_v63 = vpop.f32.mrf.mxu0 }
 0x2c0   : > { %v2604_v40 = vadd.f32 %v4832_v30, %v6944_v33 }
 0x2c1   : > { %v4834_v22 = vpop.f32.mrf.mxu0 }
 0x2c2   : > { %v4835_v23 = vadd.f32 %v4834_v22, %v4833_v63 }
 0x2c3   : > { %v4836_v62 = vpop.f32.mrf.mxu0 }
 0x2c4   : > { %v2607_v47 = vadd.f32 %v4835_v23, %v6944_v33 }
 0x2c5   : > { %v4837_v0 = vpop.f32.mrf.mxu0 }
 0x2c6   : > { %v4838_v27 = vadd.f32 %v4837_v0, %v4836_v62 }
 0x2c7   : > { %v4839_v61 = vpop.f32.mrf.mxu0 }
 0x2c8   : > { %v2612_v51 = vadd.f32 %v4838_v27, %v6944_v33 }
 0x2c9   : > { %v4840_v9 = vpop.f32.mrf.mxu0 }
 0x2ca   : > { %v4841_v54 = vadd.f32 %v4840_v9, %v4839_v61 }
 0x2cb   : > { %v4842_v19 = vpop.f32.mrf.mxu0 }
 0x2cc   : > { %v2615_v43 = vadd.f32 %v4841_v54, %v6944_v33 }
 0x2cd   : > { %v4843_v17 = vpop.f32.mrf.mxu0 }
 0x2ce   : > { %v4844_v56 = vadd.f32 %v4843_v17, %v4842_v19 }
 0x2cf   : > { %v4845_v55 = vpop.f32.mrf.mxu0 }
 0x2d0   : > { %v2620_v19 = vadd.f32 %v4844_v56, %v6944_v33 }
 0x2d1   : > { %v4846_v50 = vpop.f32.mrf.mxu0 }
 0x2d2   : > { %v4847_v0 = vadd.f32 %v4846_v50, %v4845_v55 }
 0x2d3   : > { %v4848_v26 = vpop.f32.mrf.mxu0 }
 0x2d4   : > { %v2623_v44 = vadd.f32 %v4847_v0, %v6944_v33 }
 0x2d5   : > { %v4849_v11 = vpop.f32.mrf.mxu0 }
 0x2d6   : > { %v4850_v59 = vadd.f32 %v4849_v11, %v4848_v26 }
 0x2d7   : > { %v4851_v58 = vpop.f32.mrf.mxu0 }
 0x2d8   : > { %v2628_v22 = vadd.f32 %v4850_v59, %v6944_v33 }
 0x2d9   : > { %v4852_v20 = vpop.f32.mrf.mxu0 }
 0x2da   : > { %v4853_v2 = vadd.f32 %v4852_v20, %v4851_v58 }
 0x2db   : > { %v6937_v53 = vpop.f32.mrf.mxu0 }
 0x2dc   : > { %v2631_v20 = vadd.f32 %v4853_v2, %v6944_v33 }
 0x2dd   : > { %v6939_v8 = vpop.f32.mrf.mxu0 }
 0x2de   : > { %v4856_v14 = vadd.f32 %v6939_v8, %v6937_v53 }
 0x2df   : > { %v6950_v21 = vpop.f32.mrf.mxu0 }
 0x2e1   : > { %v4858_v52 = vpop.f32.mrf.mxu0 }
 0x2e3   : > { %v4860_v37 = vpop.f32.mrf.mxu0 }
 0x2e5   : > { %v4861_v6 = vpop.f32.mrf.mxu0 }
 0x2e6   : > { %v4862_v15 = vadd.f32 %v4861_v6, %v4860_v37 }
 0x2e7   : > { %v4863_v17 = vpop.f32.mrf.mxu0 }
 0x2e9   : > { %v4993_v32 = vpop.f32.mrf.mxu1 }
 0x2ea   : > { %v6947_v16 = vadd.f32 %v4993_v32, %v2596_v13  ;;  %v4864_v13 = vpop.f32.mrf.mxu0 }
 0x2eb   : > { %v2684_v24 = vpop.f32.mrf.mxu1  ;;  %v4865_v27 = vadd.f32 %v4864_v13, %v4863_v17  ;;  %v2787_v17 = vld [vmem:[#allocation2] sm:$0xff] }
 0x2ec   : > { %2749 = vst [vmem:[%s6299_s9 + $0x10] sm:$0xff] %v6947_v16  ;;  %v6954_v48 = vadd.f32 %v2684_v24, %v2588_v18 }
 0x2ed   : > { %v4994_v1 = vpop.f32.mrf.mxu1  ;;  %v2647_v23 = vadd.f32 %v4865_v27, %v6944_v33 }
 0x2ee   : > { %2747 = vst [vmem:[%s6299_s9] sm:$0xff] %v6954_v48  ;;  %v6959_v46 = vadd.f32 %v4994_v1, %v2599_v29  ;;  %v2644_v1 = vadd.f32 %v4862_v15, %v6944_v33 }
 0x2ef   : > { %v2687_v39 = vpop.f32.mrf.mxu1 }
 0x2f0   : > { %2750 = vst [vmem:[%s6299_s9 + $0x18] sm:$0xff] %v6959_v46  ;;  %v6964_v42 = vadd.f32 %v2687_v39, %v2591_v34  ;;  %v4859_v34 = vadd.f32 %v4858_v52, %v6950_v21 }
 0x2f1   : > { %v4997_v35 = vpop.f32.mrf.mxu1 }
 0x2f2   : > { %2748 = vst [vmem:[%s6299_s9 + $0x8] sm:$0xff] %v6964_v42  ;;  %v2764_v28 = vadd.f32 %v6964_v42, %v6954_v48  ;;  %v6971_v36 = vadd.f32 %v4997_v35, %v2612_v51  ;;  %v2636_v51 = vadd.f32 %v4856_v14, %v6944_v33  ;;  %v2639_v37 = vadd.f32 %v4859_v34, %v6944_v33 }
 0x2f3   : > { %v2700_v25 = vpop.f32.mrf.mxu1 }
 0x2f4   : > { %v2765_v10 = vadd.f32 %v2764_v28, %v6947_v16  ;;  %2753 = vst [vmem:[%s6299_s9 + $0x30] sm:$0xff] %v6971_v36  ;;  %v6977_v38 = vadd.f32 %v2700_v25, %v2604_v40 }
 0x2f5   : > { %v4998_v49 = vpop.f32.mrf.mxu1 }
 0x2f6   : > { %2751 = vst [vmem:[%s6299_s9 + $0x20] sm:$0xff] %v6977_v38  ;;  %v2766_v3 = vadd.f32 %v2765_v10, %v6959_v46  ;;  %v6983_v5 = vadd.f32 %v4998_v49, %v2615_v43 }
 0x2f7   : > { %v2703_v41 = vpop.f32.mrf.mxu1 }
 0x2f8   : > { %v2767_v7 = vadd.f32 %v2766_v3, %v6977_v38  ;;  %2754 = vst [vmem:[%s6299_s9 + $0x38] sm:$0xff] %v6983_v5  ;;  %v6989_v63 = vadd.f32 %v2703_v41, %v2607_v47 }
 0x2f9   : > { %v5001_v62 = vpop.f32.mrf.mxu1 }
 0x2fa   : > { %2752 = vst [vmem:[%s6299_s9 + $0x28] sm:$0xff] %v6989_v63  ;;  %v2768_v61 = vadd.f32 %v2767_v7, %v6989_v63  ;;  %v2725_v9 = vadd.f32 %v5001_v62, %v2628_v22  ;;  %v2794_v7 = vpack.c.bf16 %v6983_v5, %v6971_v36  ;;  %v2763_v62 = vld [vmem:[#allocation3] sm:$0x1] }
 0x2fb   : > { %v2716_v26 = vpop.f32.mrf.mxu1 }
 0x2fc   : > { %v2769_v11 = vadd.f32 %v2768_v61, %v6971_v36  ;;  %2757 = vst [vmem:[%s6299_s9 + $0x50] sm:$0xff] %v2725_v9  ;;  %v2717_v58 = vadd.f32 %v2716_v26, %v2620_v19  ;;  %v2793_v61 = vpack.c.bf16 %v6989_v63, %v6977_v38  ;;  %v2792_v19 = vpack.c.bf16 %v6959_v46, %v6947_v16 }
 0x2fd   : > { %v5002_v12 = vpop.f32.mrf.mxu1  ;;  %v2791_v36 = vpack.c.bf16 %v6964_v42, %v6954_v48 }
 0x2fe   : > { %2755 = vst [vmem:[%s6299_s9 + $0x40] sm:$0xff] %v2717_v58  ;;  %v2770_v55 = vadd.f32 %v2769_v11, %v6983_v5  ;;  %v2728_v50 = vadd.f32 %v5002_v12, %v2631_v20  ;;  %v5393_v5 = vld [vmem:[%s7478_s26] sm:$0xff]   ;;  %v2788_v11 = vld [vmem:[#allocation2 + $0x8] sm:$0xff]  ;;  %s7481_s26 = sld [smem:[#allocation49_spill]] (!%p4570_p6) }
 0x2ff   : > { %v2719_v32 = vpop.f32.mrf.mxu1 }
 0x300   : > { %v2771_v18 = vadd.f32 %v2770_v55, %v2717_v58  ;;  %2758 = vst [vmem:[%s6299_s9 + $0x58] sm:$0xff] %v2728_v50  ;;  %v2720_v24 = vadd.f32 %v2719_v32, %v2623_v44  ;;  %v2796_v3 = vpack.c.bf16 %v2728_v50, %v2725_v9 }
 0x302   : > { %2756 = vst [vmem:[%s6299_s9 + $0x48] sm:$0xff] %v2720_v24  ;;  %v2772_v29 = vadd.f32 %v2771_v18, %v2720_v24  ;;  %v2795_v33 = vpack.c.bf16 %v2720_v24, %v2717_v58 }
 0x303   : > { %v5005_v30 = vpop.f32.mrf.mxu1 }
 0x304   : > { %v2773_v39 = vadd.f32 %v2772_v29, %v2725_v9  ;;  %v2741_v54 = vadd.f32 %v5005_v30, %v2644_v1  ;;  %s7482_s21 = smov (!%p4570_p6), %s7481_s26 }
 0x305   : > { %v2732_v35 = vpop.f32.mrf.mxu1 }
 0x306   : > { %2761 = vst [vmem:[%s6299_s9 + $0x70] sm:$0xff] %v2741_v54  ;;  %v2733_v53 = vadd.f32 %v2732_v35, %v2636_v51  ;;  %v2774_v8 = vadd.f32 %v2773_v39, %v2728_v50 }
 0x307   : > { %v5006_v28 = vpop.f32.mrf.mxu1 }
 0x308   : > { %2759 = vst [vmem:[%s6299_s9 + $0x60] sm:$0xff] %v2733_v53  ;;  %v2744_v40 = vadd.f32 %v5006_v28, %v2647_v23  ;;  %v2775_v59 = vadd.f32 %v2774_v8, %v2733_v53 }
 0x309   : > { %v2735_v25 = vpop.f32.mrf.mxu1 }
 0x30a   : > { %2762 = vst [vmem:[%s6299_s9 + $0x78] sm:$0xff] %v2744_v40  ;;  %v2798_v21 = vpack.c.bf16 %v2744_v40, %v2741_v54  ;;  %v2736_v52 = vadd.f32 %v2735_v25, %v2639_v37 }
 0x30c   : > { %2760 = vst [vmem:[%s6299_s9 + $0x68] sm:$0xff] %v2736_v52  ;;  %v2776_v10 = vadd.f32 %v2775_v59, %v2736_v52  ;;  %5008 = vmatpush3.bf16.msra.mxu1 %v2798_v21  ;;  %v2797_v49 = vpack.c.bf16 %v2736_v52, %v2733_v53 }
 0x30d   : > { %5009 = vmatprep.subr.bf16.mxu1 %v5913_v4 }
 0x30e   : > { %v2777_v43 = vadd.f32 %v2776_v10, %v2741_v54 }
 0x310   : > { %v2778_v56 = vadd.f32 %v2777_v43, %v2744_v40  ;;  %5010 = vmatpush3.bf16.msra.mxu1 %v2797_v49 }
 0x311   : > { %5011 = vmatprep.subr.bf16.mxu1 %v5913_v4 }
 0x312   : > { %v2779_v47 = vrot.slane %v2778_v56, 4 }
 0x314   : > { %v2780_v6 = vadd.f32 %v2779_v47, %v2778_v56  ;;  %5012 = vmatpush3.bf16.msra.mxu1 %v2796_v3 }
 0x315   : > { %5013 = vmatprep.subr.bf16.mxu1 %v5913_v4 }
 0x316   : > { %v2781_v41 = vrot.slane %v2780_v6, 2 }
 0x318   : > { %v2782_v2 = vadd.f32 %v2781_v41, %v2780_v6  ;;  %5014 = vmatpush3.bf16.msra.mxu1 %v2795_v33 }
 0x319   : > { %5015 = vmatprep.subr.bf16.mxu1 %v5913_v4 }
 0x31a   : > { %v2783_v22 = vrot.slane %v2782_v2, 1 }
 0x31c   : > { %v2784_v0 = vadd.f32 %v2783_v22, %v2782_v2  ;;  %5016 = vmatpush3.bf16.msra.mxu1 %v2794_v7 }
 0x31d   : > { %5017 = vmatprep.subr.bf16.mxu1 %v5913_v4 }
 0x31e   : > { %v2785_v9 = vadd.f32 %v2784_v0, %v2763_v62 }
 0x320   : > { %2786 = vst [vmem:[#allocation3] sm:$0x1] %v2785_v9  ;;  %5018 = vmatpush3.bf16.msra.mxu1 %v2793_v61 }
 0x321   : > { %5019 = vmatprep.subr.bf16.mxu1 %v5913_v4 }
 0x324   : > { %5020 = vmatpush3.bf16.msra.mxu1 %v2792_v19 }
 0x325   : > { %5021 = vmatprep.subr.bf16.mxu1 %v5913_v4 }
 0x328   : > { %5022 = vmatpush3.bf16.msra.mxu1 %v2791_v36 }
 0x32b   : > { %5024 = vmatmul.mubr.bf16.vlgmr.msra.gmra.mxu1 %v5393_v5 }
 0x3eb   : > { %v2839_v38 = vpop.f32.mrf.mxu1 }
 0x3ec   : > { %v2846_v63 = vadd.f32 %v2839_v38, %v2787_v17 }
 0x3ed   : > { %v5025_v26 = vpop.f32.mrf.mxu1 }
 0x3ee   : > { %2848 = vst [vmem:[#allocation2] sm:$0xff] %v2846_v63  ;;  %2853 = sbr.rel (%p4570_p6) target bundleno = 1940 (0x794), region = 173 }
 0x3ef   : > { %v2842_v58 = vpop.f32.mrf.mxu1 }
 0x3f0   : > { %v2847_v20 = vadd.f32 %v2842_v58, %v2788_v11 }
 0x3f1   : > { %v5026_v12 = vpop.f32.mrf.mxu1 }
 0x3f2   : > { %2849 = vst [vmem:[#allocation2 + $0x8] sm:$0xff] %v2847_v20 }
 0x3f3   : > { %v5394_v4 = vld [vmem:[%s7479_s24 + $0x74] ss:$8 sps:$4 sm:$0xff]   ;;  %v5396_v16 = vld [vmem:[%s7480_s23 + $0x70] ss:$8 sps:$4 sm:$0xff]   ;;  %v5917_v48 = vmov 0   ;;  %v5463_v33 = vld [vmem:[%s6288_s15] sm:$0xff]  }
 0x3f4   : > { %2985 = vmatprep.mubr.bf16.mxu0 %v5917_v48  ;;  %3166 = vmatprep.mubr.bf16.mxu1 %v5917_v48  ;;  %v5397_v46 = vld [vmem:[%s7480_s23 + $0x64] ss:$8 sps:$4 sm:$0xff]   ;;  %v5399_v42 = vld [vmem:[%s7480_s23 + $0x60] ss:$8 sps:$4 sm:$0xff]   ;;  %v5400_v15 = vld [vmem:[%s7480_s23 + $0x54] ss:$8 sps:$4 sm:$0xff]  }
 0x3f5   : > { %2953 = vmatprep.subr.bf16.mxu0 %v5394_v4  ;;  %v5402_v55 = vld [vmem:[%s7480_s23 + $0x50] ss:$8 sps:$4 sm:$0xff]   ;;  %v5403_v50 = vld [vmem:[%s7480_s23 + $0x44] ss:$8 sps:$4 sm:$0xff]   ;;  %v5415_v44 = vld [vmem:[%s7481_s26 + $0x74] ss:$8 sps:$4 sm:$0xff]  }
 0x3f6   : > { %2954 = vmatpush1.bf16.msra.mxu0 %v5396_v16  ;;  %v5417_v13 = vld [vmem:[%s7482_s21 + $0x70] ss:$8 sps:$4 sm:$0xff]   ;;  %v5405_v32 = vld [vmem:[%s7480_s23 + $0x40] ss:$8 sps:$4 sm:$0xff]   ;;  %v5406_v14 = vld [vmem:[%s7480_s23 + $0x34] ss:$8 sps:$4 sm:$0xff]   ;;  %3134 = vmatprep.subr.bf16.mxu1 %v5415_v44 }
 0x3f7   : > { %2955 = vmatprep.subr.bf16.mxu0 %v5397_v46  ;;  %v5421_v18 = vld [vmem:[%s7482_s21 + $0x64] ss:$8 sps:$4 sm:$0xff]   ;;  %3135 = vmatpush1.bf16.msra.mxu1 %v5417_v13  ;;  %v5423_v24 = vld [vmem:[%s7482_s21 + $0x60] ss:$8 sps:$4 sm:$0xff]   ;;  %v5408_v27 = vld [vmem:[%s7480_s23 + $0x30] ss:$8 sps:$4 sm:$0xff]  }
 0x3f8   : > { %3136 = vmatprep.subr.bf16.mxu1 %v5421_v18  ;;  %v5427_v29 = vld [vmem:[%s7482_s21 + $0x54] ss:$8 sps:$4 sm:$0xff]   ;;  %v5409_v1 = vld [vmem:[%s7480_s23 + $0x24] ss:$8 sps:$4 sm:$0xff]   ;;  %v5429_v30 = vld [vmem:[%s7482_s21 + $0x50] ss:$8 sps:$4 sm:$0xff]  }
 0x3f9   : > { %v5433_v34 = vld [vmem:[%s7482_s21 + $0x44] ss:$8 sps:$4 sm:$0xff]   ;;  %v5411_v39 = vld [vmem:[%s7480_s23 + $0x20] ss:$8 sps:$4 sm:$0xff]   ;;  %v5412_v54 = vld [vmem:[%s7480_s23 + $0x14] ss:$8 sps:$4 sm:$0xff]  }
 0x3fa   : > { %2956 = vmatpush1.bf16.msra.mxu0 %v5399_v42  ;;  %v5435_v51 = vld [vmem:[%s7482_s21 + $0x40] ss:$8 sps:$4 sm:$0xff]   ;;  %v5439_v35 = vld [vmem:[%s7482_s21 + $0x34] ss:$8 sps:$4 sm:$0xff]   ;;  %v5414_v53 = vld [vmem:[%s7480_s23 + $0x10] ss:$8 sps:$4 sm:$0xff]  }
 0x3fb   : > { %2957 = vmatprep.subr.bf16.mxu0 %v5400_v15  ;;  %3137 = vmatpush1.bf16.msra.mxu1 %v5423_v24  ;;  %v5418_v8 = vld [vmem:[%s7480_s23 + $0x4] ss:$8 sps:$4 sm:$0xff]   ;;  %v5441_v23 = vld [vmem:[%s7482_s21 + $0x30] ss:$8 sps:$4 sm:$0xff]   ;;  %v5420_v40 = vld [vmem:[%s7480_s23] ss:$8 sps:$4 sm:$0xff]  }
 0x3fc   : > { %3138 = vmatprep.subr.bf16.mxu1 %v5427_v29  ;;  %v5445_v28 = vld [vmem:[%s7482_s21 + $0x24] ss:$8 sps:$4 sm:$0xff]   ;;  %v5426_v37 = vld [vmem:[%s7483_s6 + $0x74] ss:$8 sps:$4 sm:$0xff]   ;;  %v5447_v25 = vld [vmem:[%s7482_s21 + $0x20] ss:$8 sps:$4 sm:$0xff]  }
 0x3fd   : > { %v5451_v59 = vld [vmem:[%s7482_s21 + $0x14] ss:$8 sps:$4 sm:$0xff]   ;;  %v5424_v21 = vld [vmem:[%s7484_s11 + $0x70] ss:$8 sps:$4 sm:$0xff]   ;;  %v5432_v52 = vld [vmem:[%s7484_s11 + $0x64] ss:$8 sps:$4 sm:$0xff]  }
 0x3fe   : > { %2958 = vmatpush1.bf16.msra.mxu0 %v5402_v55  ;;  %v5430_v10 = vld [vmem:[%s7484_s11 + $0x60] ss:$8 sps:$4 sm:$0xff]   ;;  %v5453_v43 = vld [vmem:[%s7482_s21 + $0x10] ss:$8 sps:$4 sm:$0xff]   ;;  %v5457_v49 = vld [vmem:[%s7482_s21 + $0x4] ss:$8 sps:$4 sm:$0xff]  }
 0x3ff   : > { %2959 = vmatprep.subr.bf16.mxu0 %v5403_v50  ;;  %3139 = vmatpush1.bf16.msra.mxu1 %v5429_v30  ;;  %v5438_v56 = vld [vmem:[%s7484_s11 + $0x54] ss:$8 sps:$4 sm:$0xff]   ;;  %v5459_v3 = vld [vmem:[%s7482_s21] ss:$8 sps:$4 sm:$0xff]   ;;  %v5436_v47 = vld [vmem:[%s7484_s11 + $0x50] ss:$8 sps:$4 sm:$0xff]  }
 0x400   : > { %3140 = vmatprep.subr.bf16.mxu1 %v5433_v34  ;;  %v5444_v6 = vld [vmem:[%s7484_s11 + $0x44] ss:$8 sps:$4 sm:$0xff]   ;;  %v5442_v41 = vld [vmem:[%s7484_s11 + $0x40] ss:$8 sps:$4 sm:$0xff]   ;;  %v5450_v2 = vld [vmem:[%s7484_s11 + $0x34] ss:$8 sps:$4 sm:$0xff]  }
 0x401   : > { %v5448_v7 = vld [vmem:[%s7484_s11 + $0x30] ss:$8 sps:$4 sm:$0xff]   ;;  %v5456_v22 = vld [vmem:[%s7484_s11 + $0x24] ss:$8 sps:$4 sm:$0xff]   ;;  %v5454_v62 = vld [vmem:[%s7484_s11 + $0x20] ss:$8 sps:$4 sm:$0xff]  }
 0x402   : > { %2960 = vmatpush1.bf16.msra.mxu0 %v5405_v32  ;;  %v5462_v0 = vld [vmem:[%s7484_s11 + $0x14] ss:$8 sps:$4 sm:$0xff]   ;;  %v5460_v61 = vld [vmem:[%s7484_s11 + $0x10] ss:$8 sps:$4 sm:$0xff]   ;;  %v5466_v9 = vld [vmem:[%s7484_s11 + $0x4] ss:$8 sps:$4 sm:$0xff]  }
 0x403   : > { %2961 = vmatprep.subr.bf16.mxu0 %v5406_v14  ;;  %3141 = vmatpush1.bf16.msra.mxu1 %v5435_v51  ;;  %v5464_v19 = vld [vmem:[%s7484_s11] ss:$8 sps:$4 sm:$0xff]   ;;  %v5469_v26 = vld [vmem:[#allocation5 + $0x70] sm:$0xff]  }
 0x404   : > { %3142 = vmatprep.subr.bf16.mxu1 %v5439_v35  ;;  %v2854_v36 = vld [vmem:[#allocation2] sm:$0xff]  ;;  %v2855_v5 = vld [vmem:[#allocation2 + $0x8] sm:$0xff]  ;;  %v5470_v11 = vld [vmem:[#allocation5 + $0x30] sm:$0xff]  }
 0x405   : > { %v3013_v17 = vpack.c.bf16 %v2855_v5, %v2854_v36  ;;  %v5467_v38 = vld [vmem:[#allocation5 + $0x78] sm:$0xff]   ;;  %v5471_v58 = vld [vmem:[#allocation5 + $0x68] sm:$0xff]   ;;  %v5473_v12 = vld [vmem:[#allocation5 + $0x60] sm:$0xff]  }
 0x406   : > { %2962 = vmatpush1.bf16.msra.mxu0 %v5408_v27  ;;  %v5468_v63 = vld [vmem:[#allocation5 + $0x38] sm:$0xff]   ;;  %v5472_v20 = vld [vmem:[#allocation5 + $0x28] sm:$0xff]   ;;  %v5474_v4 = vld [vmem:[#allocation5 + $0x20] sm:$0xff]  }
 0x407   : > { %2963 = vmatprep.subr.bf16.mxu0 %v5409_v1  ;;  %3143 = vmatpush1.bf16.msra.mxu1 %v5441_v23  ;;  %v5475_v16 = vld [vmem:[#allocation5 + $0x58] sm:$0xff]   ;;  %v5477_v42 = vld [vmem:[#allocation5 + $0x50] sm:$0xff]   ;;  %v5479_v55 = vld [vmem:[#allocation5 + $0x48] sm:$0xff]  }
 0x408   : > { %3144 = vmatprep.subr.bf16.mxu1 %v5445_v28  ;;  %v5476_v46 = vld [vmem:[#allocation5 + $0x18] sm:$0xff]   ;;  %v5478_v15 = vld [vmem:[#allocation5 + $0x10] sm:$0xff]   ;;  %v5480_v50 = vld [vmem:[#allocation5 + $0x8] sm:$0xff]  }
 0x409   : > { %v5481_v44 = vld [vmem:[#allocation5 + $0x40] sm:$0xff]   ;;  %v5483_v32 = vld [vmem:[#allocation10 + $0x70] ss:$8 sps:$4 sm:$0xff]   ;;  %v5485_v14 = vld [vmem:[#allocation10 + $0x74] ss:$8 sps:$4 sm:$0xff]  }
 0x40a   : > { %2964 = vmatpush1.bf16.msra.mxu0 %v5411_v39  ;;  %v5482_v13 = vld [vmem:[#allocation5] sm:$0xff]   ;;  %v5488_v18 = vld [vmem:[#allocation8 + $0x74] ss:$8 sps:$4 sm:$0xff]   ;;  %v5495_v5 = vld [vmem:[#allocation10 + $0x50] ss:$8 sps:$4 sm:$0xff]  }
 0x40b   : > { %2965 = vmatprep.subr.bf16.mxu0 %v5412_v54  ;;  %3145 = vmatpush1.bf16.msra.mxu1 %v5447_v25  ;;  %v5491_v24 = vld [vmem:[#allocation10 + $0x64] ss:$8 sps:$4 sm:$0xff]   ;;  %v5489_v27 = vld [vmem:[#allocation10 + $0x60] ss:$8 sps:$4 sm:$0xff]   ;;  %v5497_v36 = vld [vmem:[#allocation10 + $0x54] ss:$8 sps:$4 sm:$0xff]  }
 0x40c   : > { %3146 = vmatprep.subr.bf16.mxu1 %v5451_v59 }
 0x40e   : > { %2966 = vmatpush1.bf16.msra.mxu0 %v5414_v53  ;;  %v2856_v53 = vld [vmem:[%s7485_s28] sm:$0x3] }
 0x40f   : > { %2967 = vmatprep.subr.bf16.mxu0 %v5418_v8  ;;  %3147 = vmatpush1.bf16.msra.mxu1 %v5453_v43 }
 0x410   : > { %3148 = vmatprep.subr.bf16.mxu1 %v5457_v49 }
 0x412   : > { %2968 = vmatpush1.bf16.msra.mxu0 %v5420_v40 }
 0x413   : > { %3257 = vmatprep.subr.bf16.mxu0 %v5426_v37  ;;  %3149 = vmatpush1.bf16.msra.mxu1 %v5459_v3 }
 0x414   : > { %4887 = vmatprep.subr.bf16.mxu1 %v5467_v38  ;;  %v5498_v38 = vld [vmem:[#allocation8 + $0x50] ss:$8 sps:$4 sm:$0xff]  }
 0x415   : > { %2986 = vmatmul.mubr.bf16.vlgmr.msra.gmra.mxu0 %v6400_v31 }
 0x416   : > { %3258 = vmatpush1.bf16.msra.mxu0 %v5424_v21  ;;  %3289 = vmatprep.mubr.bf16.mxu0 %v5917_v48 }
 0x417   : > { %3259 = vmatprep.subr.bf16.mxu0 %v5432_v52  ;;  %3167 = vmatmul.mubr.bf16.vlgmr.msra.gmra.mxu1 %v5463_v33 }
 0x418   : > { %4888 = vmatpush3.bf16.msra.mxu1 %v5468_v63  ;;  %v5503_v63 = vld [vmem:[#allocation10 + $0x44] ss:$8 sps:$4 sm:$0xff]  }
 0x419   : > { %4889 = vmatprep.subr.bf16.mxu1 %v5469_v26  ;;  %v5501_v26 = vld [vmem:[#allocation10 + $0x40] ss:$8 sps:$4 sm:$0xff]  }
 0x41a   : > { %3260 = vmatpush1.bf16.msra.mxu0 %v5430_v10 }
 0x41b   : > { %3261 = vmatprep.subr.bf16.mxu0 %v5438_v56 }
 0x41c   : > { %4890 = vmatpush3.bf16.msra.mxu1 %v5470_v11  ;;  %v5506_v11 = vld [vmem:[#allocation8 + $0x44] ss:$8 sps:$4 sm:$0xff]  }
 0x41d   : > { %4891 = vmatprep.subr.bf16.mxu1 %v5471_v58  ;;  %v5504_v58 = vld [vmem:[#allocation8 + $0x40] ss:$8 sps:$4 sm:$0xff]  }
 0x41e   : > { %3262 = vmatpush1.bf16.msra.mxu0 %v5436_v47 }
 0x41f   : > { %3263 = vmatprep.subr.bf16.mxu0 %v5444_v6 }
 0x420   : > { %4892 = vmatpush3.bf16.msra.mxu1 %v5472_v20  ;;  %v5509_v20 = vld [vmem:[#allocation10 + $0x34] ss:$8 sps:$4 sm:$0xff]  }
 0x421   : > { %4893 = vmatprep.subr.bf16.mxu1 %v5473_v12  ;;  %v5507_v12 = vld [vmem:[#allocation10 + $0x30] ss:$8 sps:$4 sm:$0xff]  }
 0x422   : > { %3264 = vmatpush1.bf16.msra.mxu0 %v5442_v41 }
 0x423   : > { %3265 = vmatprep.subr.bf16.mxu0 %v5450_v2 }
 0x424   : > { %4894 = vmatpush3.bf16.msra.mxu1 %v5474_v4  ;;  %v5512_v4 = vld [vmem:[#allocation8 + $0x34] ss:$8 sps:$4 sm:$0xff]  }
 0x425   : > { %4895 = vmatprep.subr.bf16.mxu1 %v5475_v16  ;;  %v5510_v16 = vld [vmem:[#allocation8 + $0x30] ss:$8 sps:$4 sm:$0xff]  }
 0x426   : > { %3266 = vmatpush1.bf16.msra.mxu0 %v5448_v7 }
 0x427   : > { %3267 = vmatprep.subr.bf16.mxu0 %v5456_v22 }
 0x428   : > { %4896 = vmatpush3.bf16.msra.mxu1 %v5476_v46  ;;  %v5515_v46 = vld [vmem:[#allocation10 + $0x24] ss:$8 sps:$4 sm:$0xff]  }
 0x429   : > { %4897 = vmatprep.subr.bf16.mxu1 %v5477_v42  ;;  %v5513_v42 = vld [vmem:[#allocation10 + $0x20] ss:$8 sps:$4 sm:$0xff]  }
 0x42a   : > { %3268 = vmatpush1.bf16.msra.mxu0 %v5454_v62 }
 0x42b   : > { %3269 = vmatprep.subr.bf16.mxu0 %v5462_v0  ;;  %v5486_v0 = vld [vmem:[#allocation8 + $0x70] ss:$8 sps:$4 sm:$0xff]  }
 0x42c   : > { %4898 = vmatpush3.bf16.msra.mxu1 %v5478_v15  ;;  %v5518_v15 = vld [vmem:[#allocation8 + $0x24] ss:$8 sps:$4 sm:$0xff]  }
 0x42d   : > { %4899 = vmatprep.subr.bf16.mxu1 %v5479_v55  ;;  %v5516_v55 = vld [vmem:[#allocation8 + $0x20] ss:$8 sps:$4 sm:$0xff]  }
 0x42e   : > { %3270 = vmatpush1.bf16.msra.mxu0 %v5460_v61 }
 0x42f   : > { %3271 = vmatprep.subr.bf16.mxu0 %v5466_v9  ;;  %v5494_v9 = vld [vmem:[#allocation8 + $0x64] ss:$8 sps:$4 sm:$0xff]  }
 0x430   : > { %4900 = vmatpush3.bf16.msra.mxu1 %v5480_v50  ;;  %v5521_v50 = vld [vmem:[#allocation10 + $0x14] ss:$8 sps:$4 sm:$0xff]  }
 0x431   : > { %4901 = vmatprep.subr.bf16.mxu1 %v5481_v44  ;;  %v5519_v44 = vld [vmem:[#allocation10 + $0x10] ss:$8 sps:$4 sm:$0xff]  }
 0x432   : > { %3272 = vmatpush1.bf16.msra.mxu0 %v5464_v19  ;;  %v5492_v19 = vld [vmem:[#allocation8 + $0x60] ss:$8 sps:$4 sm:$0xff]  }
 0x433   : > { %3621 = vmatprep.subr.bf16.mxu0 %v5485_v14  ;;  %v5525_v14 = vld [vmem:[#allocation10] ss:$8 sps:$4 sm:$0xff]  }
 0x434   : > { %4902 = vmatpush3.bf16.msra.mxu1 %v5482_v13  ;;  %v5524_v13 = vld [vmem:[#allocation8 + $0x14] ss:$8 sps:$4 sm:$0xff]  }
 0x435   : > { %3290 = vmatmul.mubr.bf16.vlgmr.msra.gmra.mxu0 %v3013_v17  ;;  %3742 = vmatprep.subr.bf16.mxu1 %v5488_v18  ;;  %v5500_v17 = vld [vmem:[#allocation8 + $0x54] ss:$8 sps:$4 sm:$0xff]   ;;  %v5527_v18 = vld [vmem:[#allocation10 + $0x4] ss:$8 sps:$4 sm:$0xff]  }
 0x436   : > { %3653 = vmatprep.mubr.bf16.mxu0 %v5917_v48  ;;  %3622 = vmatpush1.bf16.msra.mxu0 %v5483_v32  ;;  %v5522_v32 = vld [vmem:[#allocation8 + $0x10] ss:$8 sps:$4 sm:$0xff]  }
 0x437   : > { %3623 = vmatprep.subr.bf16.mxu0 %v5491_v24  ;;  %v5528_v24 = vld [vmem:[#allocation8] ss:$8 sps:$4 sm:$0xff]  }
 0x43a   : > { %3624 = vmatpush1.bf16.msra.mxu0 %v5489_v27  ;;  %v5530_v27 = vld [vmem:[#allocation8 + $0x4] ss:$8 sps:$4 sm:$0xff]  }
 0x43b   : > { %3625 = vmatprep.subr.bf16.mxu0 %v5497_v36 }
 0x43e   : > { %3626 = vmatpush1.bf16.msra.mxu0 %v5495_v5  ;;  %v5555_v5 = vld [vmem:[#allocation13 + $0x78] sm:$0xff]  }
 0x43f   : > { %3627 = vmatprep.subr.bf16.mxu0 %v5503_v63 }
 0x442   : > { %3628 = vmatpush1.bf16.msra.mxu0 %v5501_v26  ;;  %v5558_v26 = vld [vmem:[#allocation13 + $0x30] sm:$0xff]  }
 0x443   : > { %3629 = vmatprep.subr.bf16.mxu0 %v5509_v20  ;;  %v5561_v20 = vld [vmem:[#allocation13 + $0x60] sm:$0xff]  }
 0x446   : > { %3630 = vmatpush1.bf16.msra.mxu0 %v5507_v12  ;;  %v5562_v12 = vld [vmem:[#allocation13 + $0x20] sm:$0xff]  }
 0x447   : > { %3631 = vmatprep.subr.bf16.mxu0 %v5515_v46  ;;  %v5566_v46 = vld [vmem:[#allocation13 + $0x10] sm:$0xff]  }
 0x44a   : > { %3632 = vmatpush1.bf16.msra.mxu0 %v5513_v42  ;;  %v5567_v42 = vld [vmem:[#allocation13 + $0x48] sm:$0xff]  }
 0x44b   : > { %3633 = vmatprep.subr.bf16.mxu0 %v5521_v50  ;;  %v5570_v50 = vld [vmem:[#allocation13] sm:$0xff]  }
 0x44e   : > { %3634 = vmatpush1.bf16.msra.mxu0 %v5519_v44 }
 0x44f   : > { %3635 = vmatprep.subr.bf16.mxu0 %v5527_v18  ;;  %v3922_v18 = vld [vmem:[%s7487_s22] sm:$0x3] }
 0x452   : > { %3636 = vmatpush1.bf16.msra.mxu0 %v5525_v14 }
 0x4d5   : > { %v2987_v29 = vpop.f32.mrf.mxu0 }
 0x4d7   : > { %v2989_v1 = vpop.f32.mrf.mxu0  ;;  %v3168_v51 = vpop.f32.mrf.mxu1 }
 0x4d8   : > { %v2996_v39 = vcombine.low %v2987_v29, %v2989_v1  ;;  %v5533_v29 = vld [vmem:[#allocation11 + $0x74] ss:$8 sps:$4 sm:$0xff]   ;;  %v3506_v1 = vld [vmem:[#allocation3] sm:$0x1] }
 0x4d9   : > { %v2991_v30 = vpop.f32.mrf.mxu0  ;;  %v3170_v8 = vpop.f32.mrf.mxu1  ;;  %3879 = vmatprep.subr.bf16.mxu0 %v5533_v29 }
 0x4da   : > { %v3003_v54 = vrot.slane %v2996_v39, %v6748_v45  ;;  %v3507_v30 = vpack.c.bf16 %v3506_v1, %v3506_v1  ;;  %v4620_v39 = vld [vmem:[%s7486_s4] ss:$0 sm:$0xff] }
 0x4db   : > { %v2992_v34 = vpop.f32.mrf.mxu0  ;;  %v3172_v40 = vpop.f32.mrf.mxu1 }
 0x4dc   : > { %v3010_v35 = vrot.slane %v3003_v54, %v6748_v45 }
 0x4dd   : > { %v3174_v49 = vpop.f32.mrf.mxu1 }
 0x4de   : > { %v3012_v28 = vadd.f32 %v3010_v35, %v2856_v53 }
 0x4e0   : > { %v3304_v52 = vrot.slane %v3012_v28, %v6778_v60  ;;  %v3308_v10 = vrot.slane %v3012_v28, %v6771_v57 }
 0x4f5   : > { %v3291_v23 = vpop.f32.mrf.mxu0 }
 0x4f6   : > { %v3292_v59 = vadd.f32 %v3291_v23, %v3168_v51 }
 0x4f7   : > { %v3293_v37 = vpop.f32.mrf.mxu0 }
 0x4f8   : > { %v3294_v25 = vadd.f32 %v3293_v37, %v3170_v8  ;;  %v3311_v6 = vadd.f32 %v3304_v52, %v3292_v59 }
 0x4f9   : > { %v3295_v21 = vpop.f32.mrf.mxu0 }
 0x4fa   : > { %v3296_v43 = vadd.f32 %v3295_v21, %v3172_v40  ;;  %v3312_v45 = vadd.f32 %v3308_v10, %v3294_v25  ;;  %v3315_v22 = vmax.f32 %v3311_v6, 0.0  ;;  %v5542_v6 = vld [vmem:[#allocation11 + $0x44] ss:$8 sps:$4 sm:$0xff]  }
 0x4fb   : > { %v3297_v56 = vpop.f32.mrf.mxu0 }
 0x4fc   : > { %v3313_v3 = vadd.f32 %v3304_v52, %v3296_v43  ;;  %v3298_v47 = vadd.f32 %v3297_v56, %v3174_v49  ;;  %v3316_v2 = vmax.f32 %v3312_v45, 0.0  ;;  %v5531_v43 = vld [vmem:[#allocation11 + $0x70] ss:$8 sps:$4 sm:$0xff]   ;;  %v5536_v56 = vld [vmem:[#allocation11 + $0x64] ss:$8 sps:$4 sm:$0xff]  }
 0x4fd   : > { %v5534_v45 = vld [vmem:[#allocation11 + $0x60] ss:$8 sps:$4 sm:$0xff]  }
 0x4fe   : > { %v3314_v33 = vadd.f32 %v3308_v10, %v3298_v47  ;;  %v3317_v41 = vmax.f32 %v3313_v3, 0.0  ;;  %v5539_v3 = vld [vmem:[#allocation11 + $0x54] ss:$8 sps:$4 sm:$0xff]   ;;  %v5537_v47 = vld [vmem:[#allocation11 + $0x50] ss:$8 sps:$4 sm:$0xff]  }
 0x500   : > { %v3318_v7 = vmax.f32 %v3314_v33, 0.0  ;;  %v3319_v61 = vpack.c.bf16 %v3317_v41, %v3315_v22  ;;  %v5540_v33 = vld [vmem:[#allocation11 + $0x40] ss:$8 sps:$4 sm:$0xff]   ;;  %v5545_v41 = vld [vmem:[#allocation11 + $0x34] ss:$8 sps:$4 sm:$0xff]  }
 0x501   : > { %v5546_v22 = vld [vmem:[#allocation11 + $0x20] ss:$8 sps:$4 sm:$0xff]  }
 0x502   : > { %v3320_v62 = vpack.c.bf16 %v3318_v7, %v3316_v2  ;;  %v5543_v2 = vld [vmem:[#allocation11 + $0x30] ss:$8 sps:$4 sm:$0xff]   ;;  %v5548_v7 = vld [vmem:[#allocation11 + $0x24] ss:$8 sps:$4 sm:$0xff]  }
 0x504   : > { %3488 = vmatprep.mubr.bf16.mxu1 %v3320_v62  ;;  %v5551_v62 = vld [vmem:[#allocation11 + $0x14] ss:$8 sps:$4 sm:$0xff]  }
 0x505   : > { %3489 = vmatmul.mubr.bf16.vlgmr.msra.gmra.mxu1 %v3319_v61  ;;  %v5552_v61 = vld [vmem:[#allocation11] ss:$8 sps:$4 sm:$0xff]  }
 0x506   : > { %3743 = vmatpush1.bf16.msra.mxu1 %v5486_v0  ;;  %3774 = vmatprep.mubr.bf16.mxu1 %v5917_v48  ;;  %v5554_v0 = vld [vmem:[#allocation11 + $0x4] ss:$8 sps:$4 sm:$0xff]  }
 0x507   : > { %3744 = vmatprep.subr.bf16.mxu1 %v5494_v9 }
 0x50a   : > { %3745 = vmatpush1.bf16.msra.mxu1 %v5492_v19 }
 0x50b   : > { %3746 = vmatprep.subr.bf16.mxu1 %v5500_v17  ;;  %v5556_v17 = vld [vmem:[#allocation13 + $0x38] sm:$0xff]  }
 0x50e   : > { %3747 = vmatpush1.bf16.msra.mxu1 %v5498_v38  ;;  %v5557_v38 = vld [vmem:[#allocation13 + $0x70] sm:$0xff]  }
 0x50f   : > { %3748 = vmatprep.subr.bf16.mxu1 %v5506_v11  ;;  %v5559_v11 = vld [vmem:[#allocation13 + $0x68] sm:$0xff]  }
 0x512   : > { %3749 = vmatpush1.bf16.msra.mxu1 %v5504_v58  ;;  %v5560_v58 = vld [vmem:[#allocation13 + $0x28] sm:$0xff]  }
 0x513   : > { %3750 = vmatprep.subr.bf16.mxu1 %v5512_v4  ;;  %v5564_v4 = vld [vmem:[#allocation13 + $0x18] sm:$0xff]  }
 0x516   : > { %3751 = vmatpush1.bf16.msra.mxu1 %v5510_v16  ;;  %v5565_v16 = vld [vmem:[#allocation13 + $0x50] sm:$0xff]  }
 0x517   : > { %3752 = vmatprep.subr.bf16.mxu1 %v5518_v15  ;;  %v5568_v15 = vld [vmem:[#allocation13 + $0x8] sm:$0xff]  }
 0x51a   : > { %3753 = vmatpush1.bf16.msra.mxu1 %v5516_v55  ;;  %v5569_v55 = vld [vmem:[#allocation13 + $0x40] sm:$0xff]  }
 0x51b   : > { %3754 = vmatprep.subr.bf16.mxu1 %v5524_v13 }
 0x51e   : > { %3755 = vmatpush1.bf16.msra.mxu1 %v5522_v32 }
 0x51f   : > { %3756 = vmatprep.subr.bf16.mxu1 %v5530_v27  ;;  %v3927_v27 = vrot.slane %v3922_v18, %v6778_v60  ;;  %v3972_v60 = vld [vmem:[%s7488_s13] sm:$0x1] }
 0x522   : > { %3757 = vmatpush1.bf16.msra.mxu1 %v5528_v24 }
 0x523   : > { %4909 = vmatprep.subr.bf16.mxu1 %v5555_v5 }
 0x525   : > { %3775 = vmatmul.mubr.bf16.vlgmr.msra.gmra.mxu1 %v3507_v30 }
 0x526   : > { %4910 = vmatpush3.bf16.msra.mxu1 %v5556_v17 }
 0x527   : > { %4911 = vmatprep.subr.bf16.mxu1 %v5557_v38 }
 0x52a   : > { %4912 = vmatpush3.bf16.msra.mxu1 %v5558_v26 }
 0x52b   : > { %4913 = vmatprep.subr.bf16.mxu1 %v5559_v11 }
 0x52e   : > { %4914 = vmatpush3.bf16.msra.mxu1 %v5560_v58 }
 0x52f   : > { %4915 = vmatprep.subr.bf16.mxu1 %v5561_v20 }
 0x532   : > { %4916 = vmatpush3.bf16.msra.mxu1 %v5562_v12 }
 0x5c5   : > { %v4903_v34 = vpop.f32.mrf.mxu1 }
 0x5c7   : > { %v4904_v54 = vpop.f32.mrf.mxu1 }
 0x5c8   : > { %v4905_v51 = vadd.f32 %v4904_v54, %v4903_v34  ;;  %v3931_v34 = vrot.slane %v3922_v18, %v6771_v57 }
 0x5c9   : > { %v4906_v35 = vpop.f32.mrf.mxu1 }
 0x5ca   : > { %v3491_v53 = vadd.f32 %v4905_v51, %v4620_v39 }
 0x5cb   : > { %v4907_v8 = vpop.f32.mrf.mxu1 }
 0x5cc   : > { %3497 = vst [vmem:[%s6301_s5] sm:$0xff] %v3491_v53  ;;  %v4908_v23 = vadd.f32 %v4907_v8, %v4906_v35 }
 0x5ce   : > { %v3494_v28 = vadd.f32 %v4908_v23, %v4620_v39 }
 0x5d0   : > { %3498 = vst [vmem:[%s6301_s5 + $0x8] sm:$0xff] %v3494_v28  ;;  %v3499_v40 = vadd.f32 %v3494_v28, %v3491_v53 }
 0x5d2   : > { %v3500_v37 = vrot.slane %v3499_v40, 4 }
 0x5d4   : > { %v3501_v25 = vadd.f32 %v3500_v37, %v3499_v40 }
 0x5d6   : > { %v3502_v59 = vrot.slane %v3501_v25, 2 }
 0x5d8   : > { %v3503_v21 = vadd.f32 %v3502_v59, %v3501_v25 }
 0x5da   : > { %v3504_v52 = vrot.slane %v3503_v21, 1 }
 0x5dc   : > { %v3505_v10 = vadd.f32 %v3504_v52, %v3503_v21 }
 0x5de   : > { %v3524_v49 = vpack.c.bf16 %v3505_v10, %v3505_v10 }
 0x5e0   : > { %3654 = vmatmul.mubr.bf16.vlgmr.msra.gmra.mxu0 %v3524_v49 }
 0x5e1   : > { %3880 = vmatpush1.bf16.msra.mxu0 %v5531_v43  ;;  %3911 = vmatprep.mubr.bf16.mxu0 %v5917_v48  ;;  %v5549_v48 = vld [vmem:[#allocation11 + $0x10] ss:$8 sps:$4 sm:$0xff]  }
 0x5e2   : > { %3881 = vmatprep.subr.bf16.mxu0 %v5536_v56 }
 0x5e5   : > { %3882 = vmatpush1.bf16.msra.mxu0 %v5534_v45  ;;  %v3776_v9 = vpop.f32.mrf.mxu1 }
 0x5e6   : > { %3883 = vmatprep.subr.bf16.mxu0 %v5539_v3 }
 0x5e7   : > { %v3778_v19 = vpop.f32.mrf.mxu1 }
 0x5e9   : > { %3884 = vmatpush1.bf16.msra.mxu0 %v5537_v47  ;;  %v3780_v36 = vpop.f32.mrf.mxu1 }
 0x5ea   : > { %3885 = vmatprep.subr.bf16.mxu0 %v5542_v6 }
 0x5eb   : > { %v3781_v63 = vpop.f32.mrf.mxu1 }
 0x5ed   : > { %3886 = vmatpush1.bf16.msra.mxu0 %v5540_v33 }
 0x5ee   : > { %3887 = vmatprep.subr.bf16.mxu0 %v5545_v41 }
 0x5f1   : > { %3888 = vmatpush1.bf16.msra.mxu0 %v5543_v2 }
 0x5f2   : > { %3889 = vmatprep.subr.bf16.mxu0 %v5548_v7 }
 0x5f5   : > { %3890 = vmatpush1.bf16.msra.mxu0 %v5546_v22 }
 0x5f6   : > { %3891 = vmatprep.subr.bf16.mxu0 %v5551_v62 }
 0x5f9   : > { %3892 = vmatpush1.bf16.msra.mxu0 %v5549_v48 }
 0x5fa   : > { %3893 = vmatprep.subr.bf16.mxu0 %v5554_v0 }
 0x5fd   : > { %3894 = vmatpush1.bf16.msra.mxu0 %v5552_v61 }
 0x600   : > { %3912 = vmatmul.mubr.bf16.vlgmr.msra.gmra.mxu0 %v6400_v31  ;;  %v5563_v31 = vld [vmem:[#allocation13 + $0x58] sm:$0xff]  }
 0x601   : > { %4917 = vmatprep.subr.bf16.mxu1 %v5563_v31 }
 0x602   : > { %4918 = vmatpush3.bf16.msra.mxu1 %v5564_v4 }
 0x603   : > { %4919 = vmatprep.subr.bf16.mxu1 %v5565_v16 }
 0x606   : > { %4920 = vmatpush3.bf16.msra.mxu1 %v5566_v46 }
 0x607   : > { %4921 = vmatprep.subr.bf16.mxu1 %v5567_v42 }
 0x60a   : > { %4922 = vmatpush3.bf16.msra.mxu1 %v5568_v15 }
 0x60b   : > { %4923 = vmatprep.subr.bf16.mxu1 %v5569_v55 }
 0x60e   : > { %4924 = vmatpush3.bf16.msra.mxu1 %v5570_v50 }
 0x6a0   : > { %v3655_v44 = vpop.f32.mrf.mxu0 }
 0x6a1   : > { %v3777_v24 = vadd.f32 %v3776_v9, %v3655_v44 }
 0x6a2   : > { %v3657_v13 = vpop.f32.mrf.mxu0 }
 0x6a3   : > { %v3779_v1 = vadd.f32 %v3778_v19, %v3657_v13 }
 0x6a4   : > { %v3659_v32 = vpop.f32.mrf.mxu0 }
 0x6a6   : > { %v3660_v14 = vpop.f32.mrf.mxu0 }
 0x6c0   : > { %v3913_v29 = vpop.f32.mrf.mxu0 }
 0x6c1   : > { %v3920_v30 = vadd.f32 %v3913_v29, %v3777_v24 }
 0x6c2   : > { %v3915_v39 = vpop.f32.mrf.mxu0 }
 0x6c3   : > { %v3934_v54 = vadd.f32 %v3927_v27, %v3920_v30  ;;  %v3921_v51 = vadd.f32 %v3915_v39, %v3779_v1 }
 0x6c4   : > { %v3917_v35 = vpop.f32.mrf.mxu0 }
 0x6c5   : > { %v3935_v53 = vadd.f32 %v3931_v34, %v3921_v51  ;;  %v3936_v8 = vmax.f32 %v3934_v54, 0.0 }
 0x6c6   : > { %v3918_v23 = vpop.f32.mrf.mxu0 }
 0x6c7   : > { %v3937_v28 = vmax.f32 %v3935_v53, 0.0  ;;  %v3938_v37 = vpack.c.bf16 %v3936_v8, %v3936_v8 }
 0x6c9   : > { %v3939_v40 = vpack.c.bf16 %v3937_v28, %v3937_v28 }
 0x6cb   : > { %4101 = vmatprep.mubr.bf16.mxu1 %v3939_v40 }
 0x6cc   : > { %4102 = vmatmul.mubr.bf16.vlgmr.msra.gmra.mxu1 %v3938_v37 }
 0x78c   : > { %v4925_v25 = vpop.f32.mrf.mxu1 }
 0x78e   : > { %v4926_v59 = vpop.f32.mrf.mxu1 }
 0x78f   : > { %v4927_v57 = vadd.f32 %v4926_v59, %v4925_v25 }
 0x790   : > { %v4928_v21 = vpop.f32.mrf.mxu1 }
 0x791   : > { %v4104_v52 = vadd.f32 %v4927_v57, %v3972_v60 }
 0x792   : > { %v4929_v10 = vpop.f32.mrf.mxu1 }
 0x793   : > { %4109 = vst [vmem:[%s6303_s17] sm:$0x1] %v4104_v52 }
 0x794 PF: > { %s4115_s19 = sand.u32 1, %s6109_s3   ;;  %s4712_s29 = sshll.u32 %s5889_s27, 8 }
 0x795   : > { %s4151_s30 = sshll.u32 %s6301_s5, 4  ;;  %s7489_s7 = sld [smem:[#allocation61_spill]]  ;;  %s7215_s30 = int_to_ptr.vmem [resolvable:$true] %s4151_s30 }
 0x796   : > { %s7217_s28 = scalar_lea.sflag [#allocation16], %s4115_s19  ;;  %s5701_s24 = scalar_lea.vmem %s7215_s30, 256 }
 0x797   : > { %p5702_p2 = scmp.ne.s32.totalorder %s7215_s30, %s5701_s24  ;;  %s5918_s3 = smov [#allocation15]  }
 0x798   : > { %s5705_s4 = sshll.u32 %s5918_s3, 4  ;;  %s5706_s4 = int_to_ptr.vmem [resolvable:$false] %s5705_s4 }
 0x799   : > { %p5703_p9 = pnand %p5702_p2, %p6167_p5  ;;  %s5707_s5 = scalar_lea.vmem %s5706_s4, 512 }
 0x79a   : > { %p5708_p3 = scmp.lt.s32.totalorder %s7215_s30, %s5706_s4  ;;  %p5709_p10 = scmp.lt.s32.totalorder %s5707_s5, %s5701_s24 }
 0x79b   : > { %s7490_s0 = smov %s7489_s7  ;;  %s7213_s26 = scalar_lea.hbm %s7489_s7, %s4712_s29 }
 0x79c   : > { %p5704_p4 = pneg %p5703_p9  ;;  %p5710_p13 = por %p5709_p10, %p5708_p3 }
 0x79e   : > { %p5711_p7 = pnand %p5710_p13, %p5704_p4 }
 0x7a0   : > { %5714 = shalt.err (!%p5711_p7)
}
 0x7a1   : > { %s5715_s15 = scalar_lea.hbm %s7213_s26, 256  ;;  %s5719_s6 = scalar_lea.hbm %s7490_s0, 512 }
 0x7a2   : > { %p5716_p8 = scmp.ne.s32.totalorder %s7213_s26, %s5715_s15  ;;  %p5720_p0 = scmp.lt.s32.totalorder %s7213_s26, %s7490_s0 }
 0x7a3   : > { %p5721_p1 = scmp.lt.s32.totalorder %s5719_s6, %s5715_s15 }
 0x7a4   : > { %p5717_p11 = pnand %p5716_p8, %p6167_p5 }
 0x7a5   : > { %p5722_p6 = por %p5721_p1, %p5720_p0 }
 0x7a6   : > { %p5718_p12 = pneg %p5717_p11 }
 0x7a8   : > { %p5723_p2 = pnand %p5722_p6, %p5718_p12 }
 0x7aa   : > { %5726 = shalt.err (!%p5723_p2)
}
 0x7ab   : > { %s5919_s19 = smov 128   ;;  %s7491_s29 = sld [smem:[#allocation26_spill]] }
 0x7ac   : > { %s7492_s25 = sld [smem:[#allocation35_spill]]  ;;  %s5920_s2 = smov 8  }
 0x7ad   : > { %5050 = dma.vmem_to_hbm [thread:$0]  (%p6167_p5), %s7215_s30, 256, %s7213_s26, %s7217_s28, %s5919_s19, %s5919_s19, %s5920_s2  }
 0x7ae   : > { %s4704_s7 = sshll.u32 %s5889_s27, 5  ;;  %s4135_s3 = sshll.u32 %s6299_s9, 4  ;;  %s7246_s3 = int_to_ptr.vmem [resolvable:$true] %s4135_s3 }
 0x7af   : > { %s4132_s24 = sadd.s32 %s4704_s7, %s6275_s1  ;;  %s7493_s20 = sld [smem:[#allocation60_spill]] }
 0x7b0   : > { %s4705_s4 = sshll.u32 %s4132_s24, 7  ;;  %s4708_s6 = sshll.u32 %s5889_s27, 4 }
 0x7b1   : > { %s7494_s16 = sand.u32 1, %s7491_s29   ;;  %s5727_s0 = scalar_lea.vmem %s7246_s3, 2048 }
 0x7b2   : > { %s4111_s13 = scalar_lea.sflag [#allocation7], %s7494_s16  ;;  %p5728_p9 = scmp.ne.s32.totalorder %s7246_s3, %s5727_s0 }
 0x7b3   : > { %p7495_p4 = scmp.ne.s32.totalorder %s7492_s25, 0  ;;  %s5921_s9 = smov [#allocation14]  }
 0x7b4   : > { %s5731_s1 = sshll.u32 %s5921_s9, 4  ;;  %s5732_s1 = int_to_ptr.vmem [resolvable:$false] %s5731_s1 }
 0x7b5   : > { %s7251_s22 = scalar_lea.hbm %s7493_s20, %s4705_s4  ;;  %p5729_p3 = pnand %p5728_p9, %p7495_p4 }
 0x7b6   : > { %s5733_s30 = scalar_lea.vmem %s5732_s1, 4096  ;;  %p5734_p13 = scmp.lt.s32.totalorder %s7246_s3, %s5732_s1 }
 0x7b7   : > { %p5730_p10 = pneg %p5729_p3  ;;  %p5735_p7 = scmp.lt.s32.totalorder %s5733_s30, %s5727_s0 }
 0x7b9   : > { %p5736_p8 = por %p5735_p7, %p5734_p13 }
 0x7bb   : > { %p5737_p11 = pnand %p5736_p8, %p5730_p10 }
 0x7bd   : > { %5740 = shalt.err (!%p5737_p11)
}
 0x7be   : > { %s5741_s26 = scalar_lea.hbm %s7251_s22, 2048  ;;  %s5745_s24 = scalar_lea.hbm %s7493_s20, 8192 }
 0x7bf   : > { %p5742_p12 = scmp.ne.s32.totalorder %s7251_s22, %s5741_s26  ;;  %p5746_p6 = scmp.lt.s32.totalorder %s7251_s22, %s7493_s20 }
 0x7c0   : > { %p5747_p2 = scmp.lt.s32.totalorder %s5745_s24, %s5741_s26 }
 0x7c1   : > { %p5743_p0 = pnand %p5742_p12, %p7495_p4 }
 0x7c2   : > { %p5748_p9 = por %p5747_p2, %p5746_p6 }
 0x7c3   : > { %p5744_p1 = pneg %p5743_p0 }
 0x7c5   : > { %p5749_p3 = pnand %p5748_p9, %p5744_p1 }
 0x7c7   : > { %5752 = shalt.err (!%p5749_p3)
}
 0x7c8   : > { %5049 = dma.vmem_to_hbm [thread:$0]  (%p7495_p4), %s7246_s3, 2048, %s7251_s22, %s4111_s13, %s5919_s19, %s5919_s19, %s5920_s2  }
 0x7c9   : > { %s7496_s16 = sld [smem:[#allocation62_spill]]  ;;  %s4167_s1 = sshll.u32 %s6303_s17, 4  ;;  %s4168_s1 = int_to_ptr.vmem [resolvable:$true] %s4167_s1 }
 0x7ca   : > { %s5753_s30 = scalar_lea.vmem %s4168_s1, 16  ;;  %s5922_s25 = smov [#allocation17]  }
 0x7cb   : > { %p5754_p10 = scmp.ne.s32.totalorder %s4168_s1, %s5753_s30  ;;  %s5757_s26 = sshll.u32 %s5922_s25, 4  ;;  %s5758_s26 = int_to_ptr.vmem [resolvable:$false] %s5757_s26 }
 0x7cc   : > { %s5759_s29 = scalar_lea.vmem %s5758_s26, 32  ;;  %p5760_p8 = scmp.lt.s32.totalorder %s4168_s1, %s5758_s26 }
 0x7cd   : > { %p5755_p13 = pnand %p5754_p10, %p6167_p5  ;;  %p5761_p11 = scmp.lt.s32.totalorder %s5759_s29, %s5753_s30 }
 0x7cf   : > { %s4165_s9 = scalar_lea.hbm %s7496_s16, %s4708_s6  ;;  %p5756_p7 = pneg %p5755_p13 }
 0x7d0   : > { %p5762_p12 = por %p5761_p11, %p5760_p8 }
 0x7d2   : > { %p5763_p4 = pnand %p5762_p12, %p5756_p7 }
 0x7d4   : > { %5766 = shalt.err (!%p5763_p4)
}
 0x7d5   : > { %s5767_s27 = scalar_lea.hbm %s4165_s9, 16  ;;  %s5771_s2 = scalar_lea.hbm %s7496_s16, 32 }
 0x7d6   : > { %p5768_p0 = scmp.ne.s32.totalorder %s4165_s9, %s5767_s27  ;;  %p5772_p2 = scmp.lt.s32.totalorder %s4165_s9, %s7496_s16 }
 0x7d7   : > { %p5773_p9 = scmp.lt.s32.totalorder %s5771_s2, %s5767_s27 }
 0x7d8   : > { %p5769_p1 = pnand %p5768_p0, %p6167_p5 }
 0x7d9   : > { %p5774_p3 = por %p5773_p9, %p5772_p2 }
 0x7da   : > { %p5770_p6 = pneg %p5769_p1 }
 0x7dc   : > { %p5775_p10 = pnand %p5774_p3, %p5770_p6 }
 0x7de   : > { %5778 = shalt.err (!%p5775_p10)
}
 0x7df   : > { %5051 = dma.vmem_to_hbm [thread:$0]  (%p6167_p5), %s4168_s1, 16, %s4165_s9, %s7217_s28  }
 0x7e0 PF: > { %s7497_s6 = sld [smem:[#allocation31_spill]] }
 0x7e1   : > { %s7498_s13 = sld [smem:[#allocation25_spill]] }
 0x7e2   : > { %s7499_s7 = sld [smem:[#allocation37_spill]] }
 0x7e6   : > { %p5091_p13 = scmp.ge.s32.totalorder %s7497_s6, 2 }
 0x7e7   : > { %s4179_s24 = sand.u32 1, %s7498_s13  }
 0x7e8   : > { %p7500_p7 = scmp.ne.s32.totalorder %s7499_s7, 0  ;;  %s4180_s4 = scalar_lea.sflag [#allocation7], %s4179_s24 }
 0x7ea   : > { %p5072_p8 = pnand %p5091_p13, %p7500_p7 }
 0x7ec   : > { %p5073_p11 = pneg %p5072_p8 }
 0x7ee   : > { %5844 = dma.done.wait (%p5073_p11), %s4180_s4, 2048  }
 0x7ef   : > { %5846 = vsyncadd (%p5073_p11), %s4180_s4, 4294965248  ;;  %s7501_s5 = sadd.s32 4294967294, %s7497_s6   ;;  %s7502_s0 = sld [smem:[#allocation39_spill]] }
 0x7f0   : > { %s4188_s15 = sand.u32 1, %s7501_s5  }
 0x7f1   : > { %s4189_s12 = scalar_lea.sflag [#allocation16], %s4188_s15 }
 0x7f5   : > { %p7503_p12 = scmp.ne.s32.totalorder %s7502_s0, 0 }
 0x7f7   : > { %p5075_p4 = pnand %p5091_p13, %p7503_p12 }
 0x7f9   : > { %p5076_p0 = pneg %p5075_p4 }
 0x7fb   : > { %5848 = dma.done.wait (%p5076_p0), %s4189_s12, 272  }
 0x7fc   : > { %5850 = vsyncadd (%p5076_p0), %s4189_s12, 4294967024  ;;  %s43_s29 = sadd.s32 1, %s7497_s6   ;;  %s7505_s4 = sld [smem:[#allocation23_spill]] }
 0x7fd   : > { %p7307_p5 = scmp.ge.s32.totalorder %s43_s29, 6   ;;  %s7506_s30 = sld [smem:[#allocation24_spill]] }
 0x7fe   : > { %s7507_s24 = sld [smem:[#allocation38_spill]] }
 0x7ff   : > { %s7508_s25 = sld [smem:[#allocation26_spill]] }
 0x800   : > { %s7509_s5 = sld [smem:[#allocation27_spill]] }
 0x801   : > { %s7510_s1 = sld [smem:[#allocation36_spill]] }
 0x802   : > { %s7511_s26 = sld [smem:[#allocation28_spill]] }
 0x803   : > { %s7512_s2 = sld [smem:[#allocation34_spill]] }
 0x804   : > { %s7513_s6 = sld [smem:[#allocation29_spill]] }
 0x805   : > { %s7514_s27 = sld [smem:[#allocation30_spill]] }
 0x806   : > { %s7515_s7 = sld [smem:[#allocation32_spill]] }
 0x807   : > { %s7516_s9 = sld [smem:[#allocation33_spill]] }
 0x809   :  { %42 = sbr.rel (!%p7307_p5) target bundleno = 37 (0x25), region = 255 }
 0x80d   : > { %s7518_s28 = smov %s7516_s9 }
 0x80e   :  { %4202 = vsyncpa [#allocation6], 1 }
 0x80f   :  { %4204 = vsyncpa [#allocation6 + $0x1], 1 }
 0x810   :  { %4205 = vsyncpa [#allocation9], 1 }
 0x811   :  { %4206 = vsyncpa [#allocation12], 1 }
 0x812   :  { %4207 = vsyncpa [#allocation7], 1 }
 0x813   :  { %4209 = vsyncpa [#allocation7 + $0x1], 1 }
 0x814   :  { %4210 = vsyncpa [#allocation16], 1 }
 0x815   :  { %4212 = vsyncpa [#allocation16 + $0x1], 1 }

</bundles_post_ra>
